<compile_context>
chip_gen: v6e
topology: v6e:2x2x1
jax: 0.10.0
libtpu: 0.0.40
codegen_flags: <defaults>
</compile_context>

<pallas_src>
import functools

import jax
import jax.numpy as jnp
from jax.experimental import pallas as pl
from jax.experimental.pallas import tpu as pltpu


DISCRETE_SPLITS = (3, 3, 2, 9)
ACTION_DIM_D = sum(DISCRETE_SPLITS)      # 17
ACTION_DIM_C = 4
STATS_DIM = 8
HEAD_PAD = 128                           # merged actor/critic head output lanes
FC1_CHUNK = 768                          # fc1 weight streamed in (768, 1024) K-chunks


def _round_up(x, m):
    return ((x + m - 1) // m) * m


# ----------------------------------------------------------------------------
# Kernel 1: conv layer as im2col matmul (bf16 x bf16 -> f32 acc) + bias + LeakyReLU
# ----------------------------------------------------------------------------
def _conv_mm_kernel(x_ref, w_ref, b_ref, o_ref):
    y = jnp.dot(x_ref[...], w_ref[...], preferred_element_type=jnp.float32)
    y = y + b_ref[...]
    o_ref[...] = jnp.maximum(y, 0.1 * y).astype(o_ref.dtype)   # LeakyReLU(0.1)


def _im2col(x, k, stride):
    B, H, W, C = x.shape
    OH = (H - k) // stride + 1
    OW = (W - k) // stride + 1
    cols = []
    for ky in range(k):
        for kx in range(k):
            cols.append(
                x[:, ky:ky + stride * (OH - 1) + 1:stride,
                     kx:kx + stride * (OW - 1) + 1:stride, :])
    return jnp.concatenate(cols, axis=-1), OH, OW     # (B, OH, OW, k*k*C)


def _pick_tm(m, cap=1024):
    """Largest tile <= cap that divides M exactly and is a multiple of 8."""
    for n in range(1, m + 1):
        tm = m // n
        if m % n == 0 and tm <= cap and tm % 8 == 0:
            return tm
    return min(cap, _round_up(m, 8))


def conv2d_leaky(x, w, b, k, stride):
    """x: (B,H,W,Cin) bf16.  w: (k*k*Cin, Cout) bf16.  b: (1, Cout) f32.
    Returns (B, OH, OW, Cout) bf16 (real channel count)."""
    B = x.shape[0]
    patches, OH, OW = _im2col(x, k, stride)
    M = B * OH * OW
    K = patches.shape[-1]
    Cout = w.shape[1]
    p = patches.reshape(M, K)
    tm = _pick_tm(M)
    Mp = _round_up(M, tm)
    if Mp != M:                                   # only hit for odd image sizes
        p = jnp.pad(p, ((0, Mp - M), (0, 0)))
    y = pl.pallas_call(
        _conv_mm_kernel,
        out_shape=jax.ShapeDtypeStruct((Mp, Cout), jnp.bfloat16),
        grid=(Mp // tm,),
        in_specs=[
            pl.BlockSpec((tm, K), lambda i: (i, 0)),       # M-tiled patches
            pl.BlockSpec((K, Cout), lambda i: (0, 0)),     # weight resident
            pl.BlockSpec((1, Cout), lambda i: (0, 0)),     # bias resident
        ],
        out_specs=pl.BlockSpec((tm, Cout), lambda i: (i, 0)),
        compiler_params=pltpu.CompilerParams(
            dimension_semantics=("parallel",)),
    )(p, w, b)
    return y[:M].reshape(B, OH, OW, Cout)


# ----------------------------------------------------------------------------
# Kernel 2: fused tail = conv3 + LeakyReLU + 2x2 maxpool + fc1/fc2 +
#           merged actor|critic trunks + merged heads.
# Grid streams fc1's weight in K-chunks so its HBM DMA overlaps compute.
# ----------------------------------------------------------------------------
def _tail_kernel(p0_ref, p1_ref, p2_ref, p3_ref, c3w_ref, c3b_ref,
                 w1c_ref, b1_ref, w2_ref, b2_ref, stats_ref,
                 t1wi_ref, t1ws_ref, t1b_ref, t2w_ref, t2b_ref,
                 hw_ref, hb_ref, o_ref,
                 pool_ref, m_ref, h_ref, *, nd, nc, chunk):
    f32, bf16 = jnp.float32, jnp.bfloat16
    k = pl.program_id(0)
    B = h_ref.shape[0]
    cch = pool_ref.shape[1]                      # conv3 output channels (64)
    n_sp = pool_ref.shape[0] // B                # pooled spatial positions (36)

    @pl.when(k == 0)
    def _():
        # conv3 on the four maxpool quadrants + LeakyReLU(0.1), then the max.
        w3, b3 = c3w_ref[...], c3b_ref[...]

        def conv_q(pref):
            y = jnp.dot(pref[...], w3, preferred_element_type=f32) + b3
            return jnp.maximum(y, 0.1 * y)

        pooled = jnp.maximum(jnp.maximum(conv_q(p0_ref), conv_q(p1_ref)),
                             jnp.maximum(conv_q(p2_ref), conv_q(p3_ref)))
        pool_ref[...] = pooled.astype(bf16)      # rows ordered (py, px, b)
        # Flatten to (B, 36*64) NHWC order; fc1's folded weight rows match.
        for s in range(n_sp):
            m_ref[:, s * cch:(s + 1) * cch] = pool_ref[s * B:(s + 1) * B, :]
        h_ref[...] = jnp.zeros_like(h_ref)

    # fc1 partial product for this K-chunk (next chunk's DMA overlaps this dot).
    off = pl.multiple_of(k * chunk, 128)
    h_ref[...] += jnp.dot(m_ref[:, pl.ds(off, chunk)], w1c_ref[...],
                          preferred_element_type=f32)

    @pl.when(k == pl.num_programs(0) - 1)
    def _():
        h = jnp.maximum(h_ref[...] + b1_ref[...], 0.0)                      # (B,1024)
        img = jnp.dot(h.astype(bf16), w2_ref[...],
                      preferred_element_type=f32) + b2_ref[...]
        img = jnp.maximum(img, 0.0)                                          # (B,512)
        # merged actor|critic trunk layer 1 (stats kept in f32)
        t1 = (jnp.dot(img.astype(bf16), t1wi_ref[...], preferred_element_type=f32)
              + jnp.dot(stats_ref[...], t1ws_ref[...], preferred_element_type=f32)
              + t1b_ref[...])
        t1 = jnp.maximum(t1, 0.0)                                            # (B,512)
        # merged trunk layer 2 (block-diagonal weight)
        t2 = jnp.dot(t1.astype(bf16), t2w_ref[...],
                     preferred_element_type=f32) + t2b_ref[...]
        t2 = jnp.maximum(t2, 0.0)                                            # (B,256)
        # merged lane-dense heads: [discrete logits | tanh(cont mean) | value | 0...]
        out = jnp.dot(t2.astype(bf16), hw_ref[...],
                      preferred_element_type=f32) + hb_ref[...]
        col = jax.lax.broadcasted_iota(jnp.int32, out.shape, 1)
        o_ref[...] = jnp.where((col >= nd) & (col < nd + nc), jnp.tanh(out), out)


def tail_fused(quads, stats_f32, p):
    B, sdim = stats_f32.shape
    rows, k3 = quads[0].shape
    kf, nf = p["fc1_w"].shape                    # (2304, 1024)
    assert kf % FC1_CHUNK == 0 and FC1_CHUNK % 128 == 0
    n_chunks = kf // FC1_CHUNK
    const = lambda k: (0, 0)
    kernel = functools.partial(_tail_kernel, nd=ACTION_DIM_D, nc=ACTION_DIM_C,
                               chunk=FC1_CHUNK)
    return pl.pallas_call(
        kernel,
        out_shape=jax.ShapeDtypeStruct((B, HEAD_PAD), jnp.float32),
        grid=(n_chunks,),
        in_specs=[pl.BlockSpec((rows, k3), const)] * 4 + [
            pl.BlockSpec(p["c3_w"].shape, const),
            pl.BlockSpec(p["c3_b"].shape, const),
            pl.BlockSpec((FC1_CHUNK, nf), lambda k: (k, 0)),   # fc1 weight K-chunks
            pl.BlockSpec(p["fc1_b"].shape, const),
            pl.BlockSpec(p["fc2_w"].shape, const),
            pl.BlockSpec(p["fc2_b"].shape, const),
            pl.BlockSpec((B, sdim), const),
            pl.BlockSpec(p["t1_wi"].shape, const),
            pl.BlockSpec(p["t1_ws"].shape, const),
            pl.BlockSpec(p["t1_b"].shape, const),
            pl.BlockSpec(p["t2_w"].shape, const),
            pl.BlockSpec(p["t2_b"].shape, const),
            pl.BlockSpec(p["head_w"].shape, const),
            pl.BlockSpec(p["head_b"].shape, const),
        ],
        out_specs=pl.BlockSpec((B, HEAD_PAD), const),
        scratch_shapes=[
            pltpu.VMEM((rows, p["c3_w"].shape[1]), jnp.bfloat16),  # pooled map
            pltpu.VMEM((B, kf), jnp.bfloat16),                     # flattened fc1 input
            pltpu.VMEM((B, nf), jnp.float32),                      # fc1 accumulator
        ],
        compiler_params=pltpu.CompilerParams(
            dimension_semantics=("arbitrary",),
            vmem_limit_bytes=32 * 1024 * 1024),
    )(*quads, p["c3_w"], p["c3_b"], p["fc1_w"], p["fc1_b"],
      p["fc2_w"], p["fc2_b"], stats_f32, p["t1_wi"], p["t1_ws"], p["t1_b"],
      p["t2_w"], p["t2_b"], p["head_w"], p["head_b"])


# ----------------------------------------------------------------------------
# Parameters (PyTorch-style uniform(-1/sqrt(fan_in), +) init, pre-packed for TPU)
# ----------------------------------------------------------------------------
def _uniform(key, shape, fan_in):
    bound = 1.0 / (fan_in ** 0.5)
    return jax.random.uniform(key, shape, jnp.float32, -bound, bound)


def init_params(key, image_shape, stats_dim, action_dim_d, action_dim_c):
    H, W, C = image_shape

    def conv_out(s, k, st):
        return (s - k) // st + 1

    h3 = conv_out(conv_out(conv_out(H, 5, 2), 3, 2), 3, 1)
    w3 = conv_out(conv_out(conv_out(W, 5, 2), 3, 2), 3, 1)
    P = h3 // 2
    assert P == 6 and w3 // 2 == 6, (
        "fc1 pooling fold assumes the CNN trunk ends at a 6x6 map "
        "(so AdaptiveAvgPool2d(6) is the identity); use a 64x64-ish image.")

    ks = jax.random.split(key, 24)

    def conv_params(kw, kb, k, cin, cout):
        fan = k * k * cin
        w = _uniform(kw, (fan, cout), fan)
        b = _uniform(kb, (1, cout), fan)
        return w.astype(jnp.bfloat16), b

    c1_w, c1_b = conv_params(ks[0], ks[1], 5, C, 16)
    c2_w, c2_b = conv_params(ks[2], ks[3], 3, 16, 32)
    c3_w, c3_b = conv_params(ks[4], ks[5], 3, 32, 64)

    # fc1: torch layout is (2560, 1024) with input rows [global 2x2 NCHW-flat ;
    # local 6x6 NCHW-flat].  Both adaptive avg-pools are linear maps of the 6x6x64
    # maxpool output, so fold them into fc1 (exact) and reorder rows so the kernel
    # consumes the NHWC-flattened maxpool map directly.
    cnn_out = 64 * 4 + 64 * (P * P)              # 2560
    w1t = _uniform(ks[6], (cnn_out, 1024), cnn_out)
    fc1_b = _uniform(ks[7], (1, 1024), cnn_out)
    hh, ww, cc = jnp.meshgrid(jnp.arange(P), jnp.arange(P), jnp.arange(64),
                              indexing="ij")
    g_rows = (cc * 4 + (hh // 3) * 2 + (ww // 3)).reshape(-1)        # global pool rows
    l_rows = (64 * 4 + cc * (P * P) + hh * P + ww).reshape(-1)       # local (identity)
    fc1_w = (w1t[l_rows] + w1t[g_rows] / 9.0).astype(jnp.bfloat16)   # (2304, 1024)

    fc2_w = _uniform(ks[8], (1024, 512), 1024).astype(jnp.bfloat16)
    fc2_b = _uniform(ks[9], (1, 512), 1024)

    feat = 512 + stats_dim
    a1_w = _uniform(ks[10], (feat, 256), feat)
    a1_b = _uniform(ks[11], (256,), feat)
    a2_w = _uniform(ks[12], (256, 128), 256)
    a2_b = _uniform(ks[13], (128,), 256)
    v1_w = _uniform(ks[14], (feat, 256), feat)
    v1_b = _uniform(ks[15], (256,), feat)
    v2_w = _uniform(ks[16], (256, 128), 256)
    v2_b = _uniform(ks[17], (128,), 256)

    # merged actor|critic trunks: cols [0,256) actor, [256,512) critic (layer 1);
    # cols [0,128) actor, [128,256) critic (layer 2, block-diagonal weight).
    t1_wi = jnp.concatenate([a1_w[:512], v1_w[:512]], axis=1).astype(jnp.bfloat16)
    t1_ws = jnp.concatenate([a1_w[512:], v1_w[512:]], axis=1)        # f32 (stats, 512)
    t1_b = jnp.concatenate([a1_b, v1_b]).reshape(1, 512)
    t2_w = (jnp.zeros((512, 256), jnp.float32)
            .at[:256, :128].set(a2_w)
            .at[256:, 128:].set(v2_w)).astype(jnp.bfloat16)
    t2_b = jnp.concatenate([a2_b, v2_b]).reshape(1, 256)

    dh_w = _uniform(ks[18], (128, action_dim_d), 128)
    dh_b = _uniform(ks[19], (action_dim_d,), 128)
    ch_w = _uniform(ks[20], (128, action_dim_c), 128)
    ch_b = _uniform(ks[21], (action_dim_c,), 128)
    v3_w = _uniform(ks[22], (128, 1), 128)
    v3_b = _uniform(ks[23], (1,), 128)

    nd, nc = action_dim_d, action_dim_c
    assert nd + nc + 1 <= HEAD_PAD
    head_w = (jnp.zeros((256, HEAD_PAD), jnp.float32)
              .at[:128, :nd].set(dh_w)
              .at[:128, nd:nd + nc].set(ch_w)
              .at[128:, nd + nc:nd + nc + 1].set(v3_w)).astype(jnp.bfloat16)
    head_b = (jnp.zeros((1, HEAD_PAD), jnp.float32)
              .at[0, :nd].set(dh_b)
              .at[0, nd:nd + nc].set(ch_b)
              .at[0, nd + nc].set(v3_b[0]))

    return {
        "c1_w": c1_w, "c1_b": c1_b, "c2_w": c2_w, "c2_b": c2_b,
        "c3_w": c3_w, "c3_b": c3_b,
        "fc1_w": fc1_w, "fc1_b": fc1_b, "fc2_w": fc2_w, "fc2_b": fc2_b,
        "t1_wi": t1_wi, "t1_ws": t1_ws, "t1_b": t1_b,
        "t2_w": t2_w, "t2_b": t2_b,
        "head_w": head_w, "head_b": head_b,
        "log_std": jnp.full((action_dim_c,), jnp.log(0.1), jnp.float32),
    }


# ----------------------------------------------------------------------------
# PPOPolicy.forward
# ----------------------------------------------------------------------------
def ppo_forward(params, image, stats):
    B = image.shape[0]

    # ---- CNN trunk ----
    x = image.astype(jnp.bfloat16)
    x = conv2d_leaky(x, params["c1_w"], params["c1_b"], k=5, stride=2)  # (B,30,30,16)
    x = conv2d_leaky(x, params["c2_w"], params["c2_b"], k=3, stride=2)  # (B,14,14,32)

    # conv3 im2col, grouped by 2x2-maxpool quadrant; rows ordered (py, px, b)
    patches, OH, OW = _im2col(x, 3, 1)                                  # (B,12,12,288)
    assert OH % 2 == 0 and OW % 2 == 0
    PH, PW = OH // 2, OW // 2
    quads = []
    for dy in range(2):
        for dx in range(2):
            q = patches[:, dy::2, dx::2, :]                             # (B,6,6,288)
            quads.append(jnp.transpose(q, (1, 2, 0, 3)).reshape(PH * PW * B, -1))

    stats_f = stats.reshape(B, -1).astype(jnp.float32)

    # ---- fused conv3 + maxpool + fc1/fc2 + actor/critic trunks + heads ----
    out = tail_fused(quads, stats_f, params)                            # (B,128) f32

    nd, nc = ACTION_DIM_D, ACTION_DIM_C
    discrete_logits = out[:, :nd]
    continuous_mean = out[:, nd:nd + nc]             # tanh applied in-kernel
    value = out[:, nd + nc:nd + nc + 1]

    # TODO(synk): torch.distributions Categorical/Normal objects have no tensor
    # equivalent; return their parameters (split logits, mean, std) instead.
    split_points, off = [], 0
    for s in DISCRETE_SPLITS[:-1]:
        off += s
        split_points.append(off)
    split_logits = jnp.split(discrete_logits, split_points, axis=-1)
    std = jnp.clip(jnp.exp(params["log_std"]), 1e-6, 50.0)
    return split_logits, (continuous_mean, std), value


# ----------------------------------------------------------------------------
if __name__ == "__main__":
    B = 2
    image_shape = (64, 64, 3)   # (H, W, C): CNN trunk ends at a 6x6 map

    key = jax.random.PRNGKey(0)
    kp, ki, kst = jax.random.split(key, 3)
    params = init_params(kp, image_shape, STATS_DIM, ACTION_DIM_D, ACTION_DIM_C)
    image = jax.random.uniform(ki, (B,) + image_shape, jnp.float32)
    stats = jax.random.normal(kst, (B, STATS_DIM), jnp.float32)

    fwd = jax.jit(ppo_forward)
    split_logits, (cont_mean, std), value = fwd(params, image, stats)
    jax.block_until_ready((split_logits, cont_mean, std, value))

    assert [t.shape for t in split_logits] == [(B, 3), (B, 3), (B, 2), (B, 9)]
    assert cont_mean.shape == (B, ACTION_DIM_C)
    assert std.shape == (ACTION_DIM_C,)
    assert value.shape == (B, 1)
    assert bool(jnp.all(jnp.isfinite(value)))
    assert bool(jnp.all(jnp.abs(cont_mean) <= 1.0 + 1e-3))   # tanh head in range
    print("KERNEL_OK")
</pallas_src>

<mosaic_0001>
module attributes {stable_mosaic.version = 11 : i64} {
  func.func @_conv_mm_kernel(%arg0: i32, %arg1: memref<600x75xbf16, #tpu.memory_space<vmem>>, %arg2: memref<75x16xbf16, #tpu.memory_space<vmem>>, %arg3: memref<1x16xf32, #tpu.memory_space<vmem>>, %arg4: memref<600x16xbf16, #tpu.memory_space<vmem>>) attributes {dimension_semantics = [#tpu.dimension_semantics<parallel>], iteration_bounds = array<i64: 3>, scalar_prefetch = 0 : i64, scratch_operands = 0 : i64, tpu.core_type = #tpu.core_type<tc>, window_params = [{transform_indices = @transform_0, window_bounds = array<i64: 600, 75>}, {pipeline_mode = #tpu.pipeline_mode<synchronous>, transform_indices = @transform_1, window_bounds = array<i64: 75, 16>}, {pipeline_mode = #tpu.pipeline_mode<synchronous>, transform_indices = @transform_2, window_bounds = array<i64: 1, 16>}, {transform_indices = @transform_3, window_bounds = array<i64: 600, 16>}]} {
    %c0 = arith.constant 0 : index
    %c0_0 = arith.constant 0 : index
    %0 = vector.load %arg1[%c0, %c0_0] : memref<600x75xbf16, #tpu.memory_space<vmem>>, vector<600x75xbf16>
    %c0_1 = arith.constant 0 : index
    %c0_2 = arith.constant 0 : index
    %1 = vector.load %arg2[%c0_1, %c0_2] : memref<75x16xbf16, #tpu.memory_space<vmem>>, vector<75x16xbf16>
    %cst = arith.constant dense<0.000000e+00> : vector<600x16xf32>
    %2 = tpu.matmul %0, %1, %cst {dimension_numbers = #tpu.dot_dimension_numbers<[1], [0], [0], [1], [0, 0, 1, 1], [], []>} : vector<600x75xbf16>, vector<75x16xbf16>, vector<600x16xf32> -> vector<600x16xf32>
    %c0_3 = arith.constant 0 : index
    %c0_4 = arith.constant 0 : index
    %3 = vector.load %arg3[%c0_3, %c0_4] : memref<1x16xf32, #tpu.memory_space<vmem>>, vector<1x16xf32>
    %4 = vector.broadcast %3 : vector<1x16xf32> to vector<600x16xf32>
    %5 = arith.addf %2, %4 : vector<600x16xf32>
    %cst_5 = arith.constant 1.000000e-01 : f32
    %6 = vector.broadcast %cst_5 : f32 to vector<600x16xf32>
    %7 = arith.mulf %6, %5 : vector<600x16xf32>
    %8 = arith.maximumf %5, %7 : vector<600x16xf32>
    %9 = arith.truncf %8 : vector<600x16xf32> to vector<600x16xbf16>
    %c0_6 = arith.constant 0 : index
    %c0_7 = arith.constant 0 : index
    %10 = vector.load %arg4[%c0_6, %c0_7] : memref<600x16xbf16, #tpu.memory_space<vmem>>, vector<600x16xbf16>
    tpu.vector_store %arg4[%c0_6, %c0_7], %9 {strides = array<i32>} : memref<600x16xbf16, #tpu.memory_space<vmem>>, vector<600x16xbf16>,
    return
  }
  func.func @transform_0(%arg0: i32) -> (i32, i32) {
    %c0_i32 = arith.constant 0 : i32
    %c0_i32_0 = arith.constant 0 : i32
    return %arg0, %c0_i32 : i32, i32
  }
  func.func @transform_1(%arg0: i32) -> (i32, i32) {
    %c0_i32 = arith.constant 0 : i32
    %c0_i32_0 = arith.constant 0 : i32
    %c0_i32_1 = arith.constant 0 : i32
    return %c0_i32, %c0_i32_0 : i32, i32
  }
  func.func @transform_2(%arg0: i32) -> (i32, i32) {
    %c0_i32 = arith.constant 0 : i32
    %c0_i32_0 = arith.constant 0 : i32
    %c0_i32_1 = arith.constant 0 : i32
    return %c0_i32, %c0_i32_0 : i32, i32
  }
  func.func @transform_3(%arg0: i32) -> (i32, i32) {
    %c0_i32 = arith.constant 0 : i32
    %c0_i32_0 = arith.constant 0 : i32
    return %arg0, %c0_i32 : i32, i32
  }
}

module attributes {stable_mosaic.version = 11 : i64} {
  func.func @_conv_mm_kernel(%arg0: i32, %arg1: memref<392x144xbf16, #tpu.memory_space<vmem>>, %arg2: memref<144x32xbf16, #tpu.memory_space<vmem>>, %arg3: memref<1x32xf32, #tpu.memory_space<vmem>>, %arg4: memref<392x32xbf16, #tpu.memory_space<vmem>>) attributes {dimension_semantics = [#tpu.dimension_semantics<parallel>], iteration_bounds = array<i64: 1>, scalar_prefetch = 0 : i64, scratch_operands = 0 : i64, tpu.core_type = #tpu.core_type<tc>, window_params = [{transform_indices = @transform_0, window_bounds = array<i64: 392, 144>}, {pipeline_mode = #tpu.pipeline_mode<synchronous>, transform_indices = @transform_1, window_bounds = array<i64: 144, 32>}, {pipeline_mode = #tpu.pipeline_mode<synchronous>, transform_indices = @transform_2, window_bounds = array<i64: 1, 32>}, {transform_indices = @transform_3, window_bounds = array<i64: 392, 32>}]} {
    %c0 = arith.constant 0 : index
    %c0_0 = arith.constant 0 : index
    %0 = vector.load %arg1[%c0, %c0_0] : memref<392x144xbf16, #tpu.memory_space<vmem>>, vector<392x144xbf16>
    %c0_1 = arith.constant 0 : index
    %c0_2 = arith.constant 0 : index
    %1 = vector.load %arg2[%c0_1, %c0_2] : memref<144x32xbf16, #tpu.memory_space<vmem>>, vector<144x32xbf16>
    %cst = arith.constant dense<0.000000e+00> : vector<392x32xf32>
    %2 = tpu.matmul %0, %1, %cst {dimension_numbers = #tpu.dot_dimension_numbers<[1], [0], [0], [1], [0, 0, 1, 1], [], []>} : vector<392x144xbf16>, vector<144x32xbf16>, vector<392x32xf32> -> vector<392x32xf32>
    %c0_3 = arith.constant 0 : index
    %c0_4 = arith.constant 0 : index
    %3 = vector.load %arg3[%c0_3, %c0_4] : memref<1x32xf32, #tpu.memory_space<vmem>>, vector<1x32xf32>
    %4 = vector.broadcast %3 : vector<1x32xf32> to vector<392x32xf32>
    %5 = arith.addf %2, %4 : vector<392x32xf32>
    %cst_5 = arith.constant 1.000000e-01 : f32
    %6 = vector.broadcast %cst_5 : f32 to vector<392x32xf32>
    %7 = arith.mulf %6, %5 : vector<392x32xf32>
    %8 = arith.maximumf %5, %7 : vector<392x32xf32>
    %9 = arith.truncf %8 : vector<392x32xf32> to vector<392x32xbf16>
    %c0_6 = arith.constant 0 : index
    %c0_7 = arith.constant 0 : index
    %10 = vector.load %arg4[%c0_6, %c0_7] : memref<392x32xbf16, #tpu.memory_space<vmem>>, vector<392x32xbf16>
    tpu.vector_store %arg4[%c0_6, %c0_7], %9 {strides = array<i32>} : memref<392x32xbf16, #tpu.memory_space<vmem>>, vector<392x32xbf16>,
    return
  }
  func.func @transform_0(%arg0: i32) -> (i32, i32) {
    %c0_i32 = arith.constant 0 : i32
    %c0_i32_0 = arith.constant 0 : i32
    return %arg0, %c0_i32 : i32, i32
  }
  func.func @transform_1(%arg0: i32) -> (i32, i32) {
    %c0_i32 = arith.constant 0 : i32
    %c0_i32_0 = arith.constant 0 : i32
    %c0_i32_1 = arith.constant 0 : i32
    return %c0_i32, %c0_i32_0 : i32, i32
  }
  func.func @transform_2(%arg0: i32) -> (i32, i32) {
    %c0_i32 = arith.constant 0 : i32
    %c0_i32_0 = arith.constant 0 : i32
    %c0_i32_1 = arith.constant 0 : i32
    return %c0_i32, %c0_i32_0 : i32, i32
  }
  func.func @transform_3(%arg0: i32) -> (i32, i32) {
    %c0_i32 = arith.constant 0 : i32
    %c0_i32_0 = arith.constant 0 : i32
    return %arg0, %c0_i32 : i32, i32
  }
}

module attributes {stable_mosaic.version = 11 : i64} {
  func.func @_tail_kernel(%arg0: i32, %arg1: memref<72x288xbf16, #tpu.memory_space<vmem>>, %arg2: memref<72x288xbf16, #tpu.memory_space<vmem>>, %arg3: memref<72x288xbf16, #tpu.memory_space<vmem>>, %arg4: memref<72x288xbf16, #tpu.memory_space<vmem>>, %arg5: memref<288x64xbf16, #tpu.memory_space<vmem>>, %arg6: memref<1x64xf32, #tpu.memory_space<vmem>>, %arg7: memref<768x1024xbf16, #tpu.memory_space<vmem>>, %arg8: memref<1x1024xf32, #tpu.memory_space<vmem>>, %arg9: memref<1024x512xbf16, #tpu.memory_space<vmem>>, %arg10: memref<1x512xf32, #tpu.memory_space<vmem>>, %arg11: memref<2x8xf32, #tpu.memory_space<vmem>>, %arg12: memref<512x512xbf16, #tpu.memory_space<vmem>>, %arg13: memref<8x512xf32, #tpu.memory_space<vmem>>, %arg14: memref<1x512xf32, #tpu.memory_space<vmem>>, %arg15: memref<512x256xbf16, #tpu.memory_space<vmem>>, %arg16: memref<1x256xf32, #tpu.memory_space<vmem>>, %arg17: memref<256x128xbf16, #tpu.memory_space<vmem>>, %arg18: memref<1x128xf32, #tpu.memory_space<vmem>>, %arg19: memref<2x128xf32, #tpu.memory_space<vmem>>, %arg20: memref<72x64xbf16, #tpu.memory_space<vmem>>, %arg21: memref<2x2304xbf16, #tpu.memory_space<vmem>>, %arg22: memref<2x1024xf32, #tpu.memory_space<vmem>>) attributes {dimension_semantics = [#tpu.dimension_semantics<arbitrary>], iteration_bounds = array<i64: 3>, scalar_prefetch = 0 : i64, scratch_operands = 3 : i64, tpu.core_type = #tpu.core_type<tc>, window_params = [{pipeline_mode = #tpu.pipeline_mode<synchronous>, transform_indices = @transform_0, window_bounds = array<i64: 72, 288>}, {pipeline_mode = #tpu.pipeline_mode<synchronous>, transform_indices = @transform_1, window_bounds = array<i64: 72, 288>}, {pipeline_mode = #tpu.pipeline_mode<synchronous>, transform_indices = @transform_2, window_bounds = array<i64: 72, 288>}, {pipeline_mode = #tpu.pipeline_mode<synchronous>, transform_indices = @transform_3, window_bounds = array<i64: 72, 288>}, {pipeline_mode = #tpu.pipeline_mode<synchronous>, transform_indices = @transform_4, window_bounds = array<i64: 288, 64>}, {pipeline_mode = #tpu.pipeline_mode<synchronous>, transform_indices = @transform_5, window_bounds = array<i64: 1, 64>}, {transform_indices = @transform_6, window_bounds = array<i64: 768, 1024>}, {pipeline_mode = #tpu.pipeline_mode<synchronous>, transform_indices = @transform_7, window_bounds = array<i64: 1, 1024>}, {pipeline_mode = #tpu.pipeline_mode<synchronous>, transform_indices = @transform_8, window_bounds = array<i64: 1024, 512>}, {pipeline_mode = #tpu.pipeline_mode<synchronous>, transform_indices = @transform_9, window_bounds = array<i64: 1, 512>}, {pipeline_mode = #tpu.pipeline_mode<synchronous>, transform_indices = @transform_10, window_bounds = array<i64: 2, 8>}, {pipeline_mode = #tpu.pipeline_mode<synchronous>, transform_indices = @transform_11, window_bounds = array<i64: 512, 512>}, {pipeline_mode = #tpu.pipeline_mode<synchronous>, transform_indices = @transform_12, window_bounds = array<i64: 8, 512>}, {pipeline_mode = #tpu.pipeline_mode<synchronous>, transform_indices = @transform_13, window_bounds = array<i64: 1, 512>}, {pipeline_mode = #tpu.pipeline_mode<synchronous>, transform_indices = @transform_14, window_bounds = array<i64: 512, 256>}, {pipeline_mode = #tpu.pipeline_mode<synchronous>, transform_indices = @transform_15, window_bounds = array<i64: 1, 256>}, {pipeline_mode = #tpu.pipeline_mode<synchronous>, transform_indices = @transform_16, window_bounds = array<i64: 256, 128>}, {pipeline_mode = #tpu.pipeline_mode<synchronous>, transform_indices = @transform_17, window_bounds = array<i64: 1, 128>}, {pipeline_mode = #tpu.pipeline_mode<synchronous>, transform_indices = @transform_18, window_bounds = array<i64: 2, 128>}]} {
    %c0_i32 = arith.constant 0 : i32
    %0 = arith.cmpi eq, %arg0, %c0_i32 : i32
    %1 = arith.extui %0 : i1 to i32
    %c0_i32_0 = arith.constant 0 : i32
    %2 = arith.cmpi ne, %1, %c0_i32_0 : i32
    scf.if %2 {
      %c0_8 = arith.constant 0 : index
      %c0_9 = arith.constant 0 : index
      %15 = vector.load %arg5[%c0_8, %c0_9] : memref<288x64xbf16, #tpu.memory_space<vmem>>, vector<288x64xbf16>
      %c0_10 = arith.constant 0 : index
      %c0_11 = arith.constant 0 : index
      %16 = vector.load %arg6[%c0_10, %c0_11] : memref<1x64xf32, #tpu.memory_space<vmem>>, vector<1x64xf32>
      %c0_12 = arith.constant 0 : index
      %c0_13 = arith.constant 0 : index
      %17 = vector.load %arg1[%c0_12, %c0_13] : memref<72x288xbf16, #tpu.memory_space<vmem>>, vector<72x288xbf16>
      %cst_14 = arith.constant dense<0.000000e+00> : vector<72x64xf32>
      %18 = tpu.matmul %17, %15, %cst_14 {dimension_numbers = #tpu.dot_dimension_numbers<[1], [0], [0], [1], [0, 0, 1, 1], [], []>} : vector<72x288xbf16>, vector<288x64xbf16>, vector<72x64xf32> -> vector<72x64xf32>
      %19 = vector.broadcast %16 : vector<1x64xf32> to vector<72x64xf32>
      %20 = arith.addf %18, %19 : vector<72x64xf32>
      %cst_15 = arith.constant 1.000000e-01 : f32
      %21 = vector.broadcast %cst_15 : f32 to vector<72x64xf32>
      %22 = arith.mulf %21, %20 : vector<72x64xf32>
      %23 = arith.maximumf %20, %22 : vector<72x64xf32>
      %c0_16 = arith.constant 0 : index
      %c0_17 = arith.constant 0 : index
      %24 = vector.load %arg2[%c0_16, %c0_17] : memref<72x288xbf16, #tpu.memory_space<vmem>>, vector<72x288xbf16>
      %cst_18 = arith.constant dense<0.000000e+00> : vector<72x64xf32>
      %25 = tpu.matmul %24, %15, %cst_18 {dimension_numbers = #tpu.dot_dimension_numbers<[1], [0], [0], [1], [0, 0, 1, 1], [], []>} : vector<72x288xbf16>, vector<288x64xbf16>, vector<72x64xf32> -> vector<72x64xf32>
      %26 = vector.broadcast %16 : vector<1x64xf32> to vector<72x64xf32>
      %27 = arith.addf %25, %26 : vector<72x64xf32>
      %cst_19 = arith.constant 1.000000e-01 : f32
      %28 = vector.broadcast %cst_19 : f32 to vector<72x64xf32>
      %29 = arith.mulf %28, %27 : vector<72x64xf32>
      %30 = arith.maximumf %27, %29 : vector<72x64xf32>
      %31 = arith.maximumf %23, %30 : vector<72x64xf32>
      %c0_20 = arith.constant 0 : index
      %c0_21 = arith.constant 0 : index
      %32 = vector.load %arg3[%c0_20, %c0_21] : memref<72x288xbf16, #tpu.memory_space<vmem>>, vector<72x288xbf16>
      %cst_22 = arith.constant dense<0.000000e+00> : vector<72x64xf32>
      %33 = tpu.matmul %32, %15, %cst_22 {dimension_numbers = #tpu.dot_dimension_numbers<[1], [0], [0], [1], [0, 0, 1, 1], [], []>} : vector<72x288xbf16>, vector<288x64xbf16>, vector<72x64xf32> -> vector<72x64xf32>
      %34 = vector.broadcast %16 : vector<1x64xf32> to vector<72x64xf32>
      %35 = arith.addf %33, %34 : vector<72x64xf32>
      %cst_23 = arith.constant 1.000000e-01 : f32
      %36 = vector.broadcast %cst_23 : f32 to vector<72x64xf32>
      %37 = arith.mulf %36, %35 : vector<72x64xf32>
      %38 = arith.maximumf %35, %37 : vector<72x64xf32>
      %c0_24 = arith.constant 0 : index
      %c0_25 = arith.constant 0 : index
      %39 = vector.load %arg4[%c0_24, %c0_25] : memref<72x288xbf16, #tpu.memory_space<vmem>>, vector<72x288xbf16>
      %cst_26 = arith.constant dense<0.000000e+00> : vector<72x64xf32>
      %40 = tpu.matmul %39, %15, %cst_26 {dimension_numbers = #tpu.dot_dimension_numbers<[1], [0], [0], [1], [0, 0, 1, 1], [], []>} : vector<72x288xbf16>, vector<288x64xbf16>, vector<72x64xf32> -> vector<72x64xf32>
      %41 = vector.broadcast %16 : vector<1x64xf32> to vector<72x64xf32>
      %42 = arith.addf %40, %41 : vector<72x64xf32>
      %cst_27 = arith.constant 1.000000e-01 : f32
      %43 = vector.broadcast %cst_27 : f32 to vector<72x64xf32>
      %44 = arith.mulf %43, %42 : vector<72x64xf32>
      %45 = arith.maximumf %42, %44 : vector<72x64xf32>
      %46 = arith.maximumf %38, %45 : vector<72x64xf32>
      %47 = arith.maximumf %31, %46 : vector<72x64xf32>
      %48 = arith.truncf %47 : vector<72x64xf32> to vector<72x64xbf16>
      %c0_28 = arith.constant 0 : index
      %c0_29 = arith.constant 0 : index
      %49 = vector.load %arg20[%c0_28, %c0_29] : memref<72x64xbf16, #tpu.memory_space<vmem>>, vector<72x64xbf16>
      tpu.vector_store %arg20[%c0_28, %c0_29], %48 {strides = array<i32>} : memref<72x64xbf16, #tpu.memory_space<vmem>>, vector<72x64xbf16>,
      %c0_30 = arith.constant 0 : index
      %c0_31 = arith.constant 0 : index
      %50 = vector.load %arg20[%c0_30, %c0_31] : memref<72x64xbf16, #tpu.memory_space<vmem>>, vector<2x64xbf16>
      %c0_32 = arith.constant 0 : index
      %c0_33 = arith.constant 0 : index
      %51 = vector.load %arg21[%c0_32, %c0_33] : memref<2x2304xbf16, #tpu.memory_space<vmem>>, vector<2x64xbf16>
      tpu.vector_store %arg21[%c0_32, %c0_33], %50 {strides = array<i32>} : memref<2x2304xbf16, #tpu.memory_space<vmem>>, vector<2x64xbf16>,
      %c2 = arith.constant 2 : index
      %c0_34 = arith.constant 0 : index
      %52 = vector.load %arg20[%c2, %c0_34] : memref<72x64xbf16, #tpu.memory_space<vmem>>, vector<2x64xbf16>
      %c0_35 = arith.constant 0 : index
      %c64 = arith.constant 64 : index
      %53 = vector.load %arg21[%c0_35, %c64] : memref<2x2304xbf16, #tpu.memory_space<vmem>>, vector<2x64xbf16>
      tpu.vector_store %arg21[%c0_35, %c64], %52 {strides = array<i32>} : memref<2x2304xbf16, #tpu.memory_space<vmem>>, vector<2x64xbf16>,
      %c4 = arith.constant 4 : index
      %c0_36 = arith.constant 0 : index
      %54 = vector.load %arg20[%c4, %c0_36] : memref<72x64xbf16, #tpu.memory_space<vmem>>, vector<2x64xbf16>
      %c0_37 = arith.constant 0 : index
      %c128 = arith.constant 128 : index
      %55 = vector.load %arg21[%c0_37, %c128] : memref<2x2304xbf16, #tpu.memory_space<vmem>>, vector<2x64xbf16>
      tpu.vector_store %arg21[%c0_37, %c128], %54 {strides = array<i32>} : memref<2x2304xbf16, #tpu.memory_space<vmem>>, vector<2x64xbf16>,
      %c6 = arith.constant 6 : index
      %c0_38 = arith.constant 0 : index
      %56 = vector.load %arg20[%c6, %c0_38] : memref<72x64xbf16, #tpu.memory_space<vmem>>, vector<2x64xbf16>
      %c0_39 = arith.constant 0 : index
      %c192 = arith.constant 192 : index
      %57 = vector.load %arg21[%c0_39, %c192] : memref<2x2304xbf16, #tpu.memory_space<vmem>>, vector<2x64xbf16>
      tpu.vector_store %arg21[%c0_39, %c192], %56 {strides = array<i32>} : memref<2x2304xbf16, #tpu.memory_space<vmem>>, vector<2x64xbf16>,
      %c8 = arith.constant 8 : index
      %c0_40 = arith.constant 0 : index
      %58 = vector.load %arg20[%c8, %c0_40] : memref<72x64xbf16, #tpu.memory_space<vmem>>, vector<2x64xbf16>
      %c0_41 = arith.constant 0 : index
      %c256 = arith.constant 256 : index
      %59 = vector.load %arg21[%c0_41, %c256] : memref<2x2304xbf16, #tpu.memory_space<vmem>>, vector<2x64xbf16>
      tpu.vector_store %arg21[%c0_41, %c256], %58 {strides = array<i32>} : memref<2x2304xbf16, #tpu.memory_space<vmem>>, vector<2x64xbf16>,
      %c10 = arith.constant 10 : index
      %c0_42 = arith.constant 0 : index
      %60 = vector.load %arg20[%c10, %c0_42] : memref<72x64xbf16, #tpu.memory_space<vmem>>, vector<2x64xbf16>
      %c0_43 = arith.constant 0 : index
      %c320 = arith.constant 320 : index
      %61 = vector.load %arg21[%c0_43, %c320] : memref<2x2304xbf16, #tpu.memory_space<vmem>>, vector<2x64xbf16>
      tpu.vector_store %arg21[%c0_43, %c320], %60 {strides = array<i32>} : memref<2x2304xbf16, #tpu.memory_space<vmem>>, vector<2x64xbf16>,
      %c12 = arith.constant 12 : index
      %c0_44 = arith.constant 0 : index
      %62 = vector.load %arg20[%c12, %c0_44] : memref<72x64xbf16, #tpu.memory_space<vmem>>, vector<2x64xbf16>
      %c0_45 = arith.constant 0 : index
      %c384 = arith.constant 384 : index
      %63 = vector.load %arg21[%c0_45, %c384] : memref<2x2304xbf16, #tpu.memory_space<vmem>>, vector<2x64xbf16>
      tpu.vector_store %arg21[%c0_45, %c384], %62 {strides = array<i32>} : memref<2x2304xbf16, #tpu.memory_space<vmem>>, vector<2x64xbf16>,
      %c14 = arith.constant 14 : index
      %c0_46 = arith.constant 0 : index
      %64 = vector.load %arg20[%c14, %c0_46] : memref<72x64xbf16, #tpu.memory_space<vmem>>, vector<2x64xbf16>
      %c0_47 = arith.constant 0 : index
      %c448 = arith.constant 448 : index
      %65 = vector.load %arg21[%c0_47, %c448] : memref<2x2304xbf16, #tpu.memory_space<vmem>>, vector<2x64xbf16>
      tpu.vector_store %arg21[%c0_47, %c448], %64 {strides = array<i32>} : memref<2x2304xbf16, #tpu.memory_space<vmem>>, vector<2x64xbf16>,
      %c16 = arith.constant 16 : index
      %c0_48 = arith.constant 0 : index
      %66 = vector.load %arg20[%c16, %c0_48] : memref<72x64xbf16, #tpu.memory_space<vmem>>, vector<2x64xbf16>
      %c0_49 = arith.constant 0 : index
      %c512 = arith.constant 512 : index
      %67 = vector.load %arg21[%c0_49, %c512] : memref<2x2304xbf16, #tpu.memory_space<vmem>>, vector<2x64xbf16>
      tpu.vector_store %arg21[%c0_49, %c512], %66 {strides = array<i32>} : memref<2x2304xbf16, #tpu.memory_space<vmem>>, vector<2x64xbf16>,
      %c18 = arith.constant 18 : index
      %c0_50 = arith.constant 0 : index
      %68 = vector.load %arg20[%c18, %c0_50] : memref<72x64xbf16, #tpu.memory_space<vmem>>, vector<2x64xbf16>
      %c0_51 = arith.constant 0 : index
      %c576 = arith.constant 576 : index
      %69 = vector.load %arg21[%c0_51, %c576] : memref<2x2304xbf16, #tpu.memory_space<vmem>>, vector<2x64xbf16>
      tpu.vector_store %arg21[%c0_51, %c576], %68 {strides = array<i32>} : memref<2x2304xbf16, #tpu.memory_space<vmem>>, vector<2x64xbf16>,
      %c20 = arith.constant 20 : index
      %c0_52 = arith.constant 0 : index
      %70 = vector.load %arg20[%c20, %c0_52] : memref<72x64xbf16, #tpu.memory_space<vmem>>, vector<2x64xbf16>
      %c0_53 = arith.constant 0 : index
      %c640 = arith.constant 640 : index
      %71 = vector.load %arg21[%c0_53, %c640] : memref<2x2304xbf16, #tpu.memory_space<vmem>>, vector<2x64xbf16>
      tpu.vector_store %arg21[%c0_53, %c640], %70 {strides = array<i32>} : memref<2x2304xbf16, #tpu.memory_space<vmem>>, vector<2x64xbf16>,
      %c22 = arith.constant 22 : index
      %c0_54 = arith.constant 0 : index
      %72 = vector.load %arg20[%c22, %c0_54] : memref<72x64xbf16, #tpu.memory_space<vmem>>, vector<2x64xbf16>
      %c0_55 = arith.constant 0 : index
      %c704 = arith.constant 704 : index
      %73 = vector.load %arg21[%c0_55, %c704] : memref<2x2304xbf16, #tpu.memory_space<vmem>>, vector<2x64xbf16>
      tpu.vector_store %arg21[%c0_55, %c704], %72 {strides = array<i32>} : memref<2x2304xbf16, #tpu.memory_space<vmem>>, vector<2x64xbf16>,
      %c24 = arith.constant 24 : index
      %c0_56 = arith.constant 0 : index
      %74 = vector.load %arg20[%c24, %c0_56] : memref<72x64xbf16, #tpu.memory_space<vmem>>, vector<2x64xbf16>
      %c0_57 = arith.constant 0 : index
      %c768 = arith.constant 768 : index
      %75 = vector.load %arg21[%c0_57, %c768] : memref<2x2304xbf16, #tpu.memory_space<vmem>>, vector<2x64xbf16>
      tpu.vector_store %arg21[%c0_57, %c768], %74 {strides = array<i32>} : memref<2x2304xbf16, #tpu.memory_space<vmem>>, vector<2x64xbf16>,
      %c26 = arith.constant 26 : index
      %c0_58 = arith.constant 0 : index
      %76 = vector.load %arg20[%c26, %c0_58] : memref<72x64xbf16, #tpu.memory_space<vmem>>, vector<2x64xbf16>
      %c0_59 = arith.constant 0 : index
      %c832 = arith.constant 832 : index
      %77 = vector.load %arg21[%c0_59, %c832] : memref<2x2304xbf16, #tpu.memory_space<vmem>>, vector<2x64xbf16>
      tpu.vector_store %arg21[%c0_59, %c832], %76 {strides = array<i32>} : memref<2x2304xbf16, #tpu.memory_space<vmem>>, vector<2x64xbf16>,
      %c28 = arith.constant 28 : index
      %c0_60 = arith.constant 0 : index
      %78 = vector.load %arg20[%c28, %c0_60] : memref<72x64xbf16, #tpu.memory_space<vmem>>, vector<2x64xbf16>
      %c0_61 = arith.constant 0 : index
      %c896 = arith.constant 896 : index
      %79 = vector.load %arg21[%c0_61, %c896] : memref<2x2304xbf16, #tpu.memory_space<vmem>>, vector<2x64xbf16>
      tpu.vector_store %arg21[%c0_61, %c896], %78 {strides = array<i32>} : memref<2x2304xbf16, #tpu.memory_space<vmem>>, vector<2x64xbf16>,
      %c30 = arith.constant 30 : index
      %c0_62 = arith.constant 0 : index
      %80 = vector.load %arg20[%c30, %c0_62] : memref<72x64xbf16, #tpu.memory_space<vmem>>, vector<2x64xbf16>
      %c0_63 = arith.constant 0 : index
      %c960 = arith.constant 960 : index
      %81 = vector.load %arg21[%c0_63, %c960] : memref<2x2304xbf16, #tpu.memory_space<vmem>>, vector<2x64xbf16>
      tpu.vector_store %arg21[%c0_63, %c960], %80 {strides = array<i32>} : memref<2x2304xbf16, #tpu.memory_space<vmem>>, vector<2x64xbf16>,
      %c32 = arith.constant 32 : index
      %c0_64 = arith.constant 0 : index
      %82 = vector.load %arg20[%c32, %c0_64] : memref<72x64xbf16, #tpu.memory_space<vmem>>, vector<2x64xbf16>
      %c0_65 = arith.constant 0 : index
      %c1024 = arith.constant 1024 : index
      %83 = vector.load %arg21[%c0_65, %c1024] : memref<2x2304xbf16, #tpu.memory_space<vmem>>, vector<2x64xbf16>
      tpu.vector_store %arg21[%c0_65, %c1024], %82 {strides = array<i32>} : memref<2x2304xbf16, #tpu.memory_space<vmem>>, vector<2x64xbf16>,
      %c34 = arith.constant 34 : index
      %c0_66 = arith.constant 0 : index
      %84 = vector.load %arg20[%c34, %c0_66] : memref<72x64xbf16, #tpu.memory_space<vmem>>, vector<2x64xbf16>
      %c0_67 = arith.constant 0 : index
      %c1088 = arith.constant 1088 : index
      %85 = vector.load %arg21[%c0_67, %c1088] : memref<2x2304xbf16, #tpu.memory_space<vmem>>, vector<2x64xbf16>
      tpu.vector_store %arg21[%c0_67, %c1088], %84 {strides = array<i32>} : memref<2x2304xbf16, #tpu.memory_space<vmem>>, vector<2x64xbf16>,
      %c36 = arith.constant 36 : index
      %c0_68 = arith.constant 0 : index
      %86 = vector.load %arg20[%c36, %c0_68] : memref<72x64xbf16, #tpu.memory_space<vmem>>, vector<2x64xbf16>
      %c0_69 = arith.constant 0 : index
      %c1152 = arith.constant 1152 : index
      %87 = vector.load %arg21[%c0_69, %c1152] : memref<2x2304xbf16, #tpu.memory_space<vmem>>, vector<2x64xbf16>
      tpu.vector_store %arg21[%c0_69, %c1152], %86 {strides = array<i32>} : memref<2x2304xbf16, #tpu.memory_space<vmem>>, vector<2x64xbf16>,
      %c38 = arith.constant 38 : index
      %c0_70 = arith.constant 0 : index
      %88 = vector.load %arg20[%c38, %c0_70] : memref<72x64xbf16, #tpu.memory_space<vmem>>, vector<2x64xbf16>
      %c0_71 = arith.constant 0 : index
      %c1216 = arith.constant 1216 : index
      %89 = vector.load %arg21[%c0_71, %c1216] : memref<2x2304xbf16, #tpu.memory_space<vmem>>, vector<2x64xbf16>
      tpu.vector_store %arg21[%c0_71, %c1216], %88 {strides = array<i32>} : memref<2x2304xbf16, #tpu.memory_space<vmem>>, vector<2x64xbf16>,
      %c40 = arith.constant 40 : index
      %c0_72 = arith.constant 0 : index
      %90 = vector.load %arg20[%c40, %c0_72] : memref<72x64xbf16, #tpu.memory_space<vmem>>, vector<2x64xbf16>
      %c0_73 = arith.constant 0 : index
      %c1280 = arith.constant 1280 : index
      %91 = vector.load %arg21[%c0_73, %c1280] : memref<2x2304xbf16, #tpu.memory_space<vmem>>, vector<2x64xbf16>
      tpu.vector_store %arg21[%c0_73, %c1280], %90 {strides = array<i32>} : memref<2x2304xbf16, #tpu.memory_space<vmem>>, vector<2x64xbf16>,
      %c42 = arith.constant 42 : index
      %c0_74 = arith.constant 0 : index
      %92 = vector.load %arg20[%c42, %c0_74] : memref<72x64xbf16, #tpu.memory_space<vmem>>, vector<2x64xbf16>
      %c0_75 = arith.constant 0 : index
      %c1344 = arith.constant 1344 : index
      %93 = vector.load %arg21[%c0_75, %c1344] : memref<2x2304xbf16, #tpu.memory_space<vmem>>, vector<2x64xbf16>
      tpu.vector_store %arg21[%c0_75, %c1344], %92 {strides = array<i32>} : memref<2x2304xbf16, #tpu.memory_space<vmem>>, vector<2x64xbf16>,
      %c44 = arith.constant 44 : index
      %c0_76 = arith.constant 0 : index
      %94 = vector.load %arg20[%c44, %c0_76] : memref<72x64xbf16, #tpu.memory_space<vmem>>, vector<2x64xbf16>
      %c0_77 = arith.constant 0 : index
      %c1408 = arith.constant 1408 : index
      %95 = vector.load %arg21[%c0_77, %c1408] : memref<2x2304xbf16, #tpu.memory_space<vmem>>, vector<2x64xbf16>
      tpu.vector_store %arg21[%c0_77, %c1408], %94 {strides = array<i32>} : memref<2x2304xbf16, #tpu.memory_space<vmem>>, vector<2x64xbf16>,
      %c46 = arith.constant 46 : index
      %c0_78 = arith.constant 0 : index
      %96 = vector.load %arg20[%c46, %c0_78] : memref<72x64xbf16, #tpu.memory_space<vmem>>, vector<2x64xbf16>
      %c0_79 = arith.constant 0 : index
      %c1472 = arith.constant 1472 : index
      %97 = vector.load %arg21[%c0_79, %c1472] : memref<2x2304xbf16, #tpu.memory_space<vmem>>, vector<2x64xbf16>
      tpu.vector_store %arg21[%c0_79, %c1472], %96 {strides = array<i32>} : memref<2x2304xbf16, #tpu.memory_space<vmem>>, vector<2x64xbf16>,
      %c48 = arith.constant 48 : index
      %c0_80 = arith.constant 0 : index
      %98 = vector.load %arg20[%c48, %c0_80] : memref<72x64xbf16, #tpu.memory_space<vmem>>, vector<2x64xbf16>
      %c0_81 = arith.constant 0 : index
      %c1536 = arith.constant 1536 : index
      %99 = vector.load %arg21[%c0_81, %c1536] : memref<2x2304xbf16, #tpu.memory_space<vmem>>, vector<2x64xbf16>
      tpu.vector_store %arg21[%c0_81, %c1536], %98 {strides = array<i32>} : memref<2x2304xbf16, #tpu.memory_space<vmem>>, vector<2x64xbf16>,
      %c50 = arith.constant 50 : index
      %c0_82 = arith.constant 0 : index
      %100 = vector.load %arg20[%c50, %c0_82] : memref<72x64xbf16, #tpu.memory_space<vmem>>, vector<2x64xbf16>
      %c0_83 = arith.constant 0 : index
      %c1600 = arith.constant 1600 : index
      %101 = vector.load %arg21[%c0_83, %c1600] : memref<2x2304xbf16, #tpu.memory_space<vmem>>, vector<2x64xbf16>
      tpu.vector_store %arg21[%c0_83, %c1600], %100 {strides = array<i32>} : memref<2x2304xbf16, #tpu.memory_space<vmem>>, vector<2x64xbf16>,
      %c52 = arith.constant 52 : index
      %c0_84 = arith.constant 0 : index
      %102 = vector.load %arg20[%c52, %c0_84] : memref<72x64xbf16, #tpu.memory_space<vmem>>, vector<2x64xbf16>
      %c0_85 = arith.constant 0 : index
      %c1664 = arith.constant 1664 : index
      %103 = vector.load %arg21[%c0_85, %c1664] : memref<2x2304xbf16, #tpu.memory_space<vmem>>, vector<2x64xbf16>
      tpu.vector_store %arg21[%c0_85, %c1664], %102 {strides = array<i32>} : memref<2x2304xbf16, #tpu.memory_space<vmem>>, vector<2x64xbf16>,
      %c54 = arith.constant 54 : index
      %c0_86 = arith.constant 0 : index
      %104 = vector.load %arg20[%c54, %c0_86] : memref<72x64xbf16, #tpu.memory_space<vmem>>, vector<2x64xbf16>
      %c0_87 = arith.constant 0 : index
      %c1728 = arith.constant 1728 : index
      %105 = vector.load %arg21[%c0_87, %c1728] : memref<2x2304xbf16, #tpu.memory_space<vmem>>, vector<2x64xbf16>
      tpu.vector_store %arg21[%c0_87, %c1728], %104 {strides = array<i32>} : memref<2x2304xbf16, #tpu.memory_space<vmem>>, vector<2x64xbf16>,
      %c56 = arith.constant 56 : index
      %c0_88 = arith.constant 0 : index
      %106 = vector.load %arg20[%c56, %c0_88] : memref<72x64xbf16, #tpu.memory_space<vmem>>, vector<2x64xbf16>
      %c0_89 = arith.constant 0 : index
      %c1792 = arith.constant 1792 : index
      %107 = vector.load %arg21[%c0_89, %c1792] : memref<2x2304xbf16, #tpu.memory_space<vmem>>, vector<2x64xbf16>
      tpu.vector_store %arg21[%c0_89, %c1792], %106 {strides = array<i32>} : memref<2x2304xbf16, #tpu.memory_space<vmem>>, vector<2x64xbf16>,
      %c58 = arith.constant 58 : index
      %c0_90 = arith.constant 0 : index
      %108 = vector.load %arg20[%c58, %c0_90] : memref<72x64xbf16, #tpu.memory_space<vmem>>, vector<2x64xbf16>
      %c0_91 = arith.constant 0 : index
      %c1856 = arith.constant 1856 : index
      %109 = vector.load %arg21[%c0_91, %c1856] : memref<2x2304xbf16, #tpu.memory_space<vmem>>, vector<2x64xbf16>
      tpu.vector_store %arg21[%c0_91, %c1856], %108 {strides = array<i32>} : memref<2x2304xbf16, #tpu.memory_space<vmem>>, vector<2x64xbf16>,
      %c60 = arith.constant 60 : index
      %c0_92 = arith.constant 0 : index
      %110 = vector.load %arg20[%c60, %c0_92] : memref<72x64xbf16, #tpu.memory_space<vmem>>, vector<2x64xbf16>
      %c0_93 = arith.constant 0 : index
      %c1920 = arith.constant 1920 : index
      %111 = vector.load %arg21[%c0_93, %c1920] : memref<2x2304xbf16, #tpu.memory_space<vmem>>, vector<2x64xbf16>
      tpu.vector_store %arg21[%c0_93, %c1920], %110 {strides = array<i32>} : memref<2x2304xbf16, #tpu.memory_space<vmem>>, vector<2x64xbf16>,
      %c62 = arith.constant 62 : index
      %c0_94 = arith.constant 0 : index
      %112 = vector.load %arg20[%c62, %c0_94] : memref<72x64xbf16, #tpu.memory_space<vmem>>, vector<2x64xbf16>
      %c0_95 = arith.constant 0 : index
      %c1984 = arith.constant 1984 : index
      %113 = vector.load %arg21[%c0_95, %c1984] : memref<2x2304xbf16, #tpu.memory_space<vmem>>, vector<2x64xbf16>
      tpu.vector_store %arg21[%c0_95, %c1984], %112 {strides = array<i32>} : memref<2x2304xbf16, #tpu.memory_space<vmem>>, vector<2x64xbf16>,
      %c64_96 = arith.constant 64 : index
      %c0_97 = arith.constant 0 : index
      %114 = vector.load %arg20[%c64_96, %c0_97] : memref<72x64xbf16, #tpu.memory_space<vmem>>, vector<2x64xbf16>
      %c0_98 = arith.constant 0 : index
      %c2048 = arith.constant 2048 : index
      %115 = vector.load %arg21[%c0_98, %c2048] : memref<2x2304xbf16, #tpu.memory_space<vmem>>, vector<2x64xbf16>
      tpu.vector_store %arg21[%c0_98, %c2048], %114 {strides = array<i32>} : memref<2x2304xbf16, #tpu.memory_space<vmem>>, vector<2x64xbf16>,
      %c66 = arith.constant 66 : index
      %c0_99 = arith.constant 0 : index
      %116 = vector.load %arg20[%c66, %c0_99] : memref<72x64xbf16, #tpu.memory_space<vmem>>, vector<2x64xbf16>
      %c0_100 = arith.constant 0 : index
      %c2112 = arith.constant 2112 : index
      %117 = vector.load %arg21[%c0_100, %c2112] : memref<2x2304xbf16, #tpu.memory_space<vmem>>, vector<2x64xbf16>
      tpu.vector_store %arg21[%c0_100, %c2112], %116 {strides = array<i32>} : memref<2x2304xbf16, #tpu.memory_space<vmem>>, vector<2x64xbf16>,
      %c68 = arith.constant 68 : index
      %c0_101 = arith.constant 0 : index
      %118 = vector.load %arg20[%c68, %c0_101] : memref<72x64xbf16, #tpu.memory_space<vmem>>, vector<2x64xbf16>
      %c0_102 = arith.constant 0 : index
      %c2176 = arith.constant 2176 : index
      %119 = vector.load %arg21[%c0_102, %c2176] : memref<2x2304xbf16, #tpu.memory_space<vmem>>, vector<2x64xbf16>
      tpu.vector_store %arg21[%c0_102, %c2176], %118 {strides = array<i32>} : memref<2x2304xbf16, #tpu.memory_space<vmem>>, vector<2x64xbf16>,
      %c70 = arith.constant 70 : index
      %c0_103 = arith.constant 0 : index
      %120 = vector.load %arg20[%c70, %c0_103] : memref<72x64xbf16, #tpu.memory_space<vmem>>, vector<2x64xbf16>
      %c0_104 = arith.constant 0 : index
      %c2240 = arith.constant 2240 : index
      %121 = vector.load %arg21[%c0_104, %c2240] : memref<2x2304xbf16, #tpu.memory_space<vmem>>, vector<2x64xbf16>
      tpu.vector_store %arg21[%c0_104, %c2240], %120 {strides = array<i32>} : memref<2x2304xbf16, #tpu.memory_space<vmem>>, vector<2x64xbf16>,
      %cst_105 = arith.constant 0.000000e+00 : f32
      %122 = vector.broadcast %cst_105 : f32 to vector<2x1024xf32>
      %c0_106 = arith.constant 0 : index
      %c0_107 = arith.constant 0 : index
      %123 = vector.load %arg22[%c0_106, %c0_107] : memref<2x1024xf32, #tpu.memory_space<vmem>>, vector<2x1024xf32>
      tpu.vector_store %arg22[%c0_106, %c0_107], %122 {strides = array<i32>} : memref<2x1024xf32, #tpu.memory_space<vmem>>, vector<2x1024xf32>,
    } else {
    }
    %c768_i32 = arith.constant 768 : i32
    %3 = arith.muli %arg0, %c768_i32 : i32
    %4 = tpu.assume_multiple %3, 128 : i32
    %c0 = arith.constant 0 : index
    %c0_1 = arith.constant 0 : index
    %5 = vector.load %arg22[%c0, %c0_1] : memref<2x1024xf32, #tpu.memory_space<vmem>>, vector<2x1024xf32>
    %c0_2 = arith.constant 0 : index
    %6 = arith.index_cast %4 : i32 to index
    %7 = vector.load %arg21[%c0_2, %6] : memref<2x2304xbf16, #tpu.memory_space<vmem>>, vector<2x768xbf16>
    %c0_3 = arith.constant 0 : index
    %c0_4 = arith.constant 0 : index
    %8 = vector.load %arg7[%c0_3, %c0_4] : memref<768x1024xbf16, #tpu.memory_space<vmem>>, vector<768x1024xbf16>
    %cst = arith.constant dense<0.000000e+00> : vector<2x1024xf32>
    %9 = tpu.matmul %7, %8, %cst {dimension_numbers = #tpu.dot_dimension_numbers<[1], [0], [0], [1], [0, 0, 1, 1], [], []>} : vector<2x768xbf16>, vector<768x1024xbf16>, vector<2x1024xf32> -> vector<2x1024xf32>
    %10 = arith.addf %5, %9 : vector<2x1024xf32>
    %c0_5 = arith.constant 0 : index
    %c0_6 = arith.constant 0 : index
    %11 = vector.load %arg22[%c0_5, %c0_6] : memref<2x1024xf32, #tpu.memory_space<vmem>>, vector<2x1024xf32>
    tpu.vector_store %arg22[%c0_5, %c0_6], %10 {strides = array<i32>} : memref<2x1024xf32, #tpu.memory_space<vmem>>, vector<2x1024xf32>,
    %c2_i32 = arith.constant 2 : i32
    %12 = arith.cmpi eq, %arg0, %c2_i32 : i32
    %13 = arith.extui %12 : i1 to i32
    %c0_i32_7 = arith.constant 0 : i32
    %14 = arith.cmpi ne, %13, %c0_i32_7 : i32
    scf.if %14 {
      %c0_8 = arith.constant 0 : index
      %c0_9 = arith.constant 0 : index
      %15 = vector.load %arg22[%c0_8, %c0_9] : memref<2x1024xf32, #tpu.memory_space<vmem>>, vector<2x1024xf32>
      %c0_10 = arith.constant 0 : index
      %c0_11 = arith.constant 0 : index
      %16 = vector.load %arg8[%c0_10, %c0_11] : memref<1x1024xf32, #tpu.memory_space<vmem>>, vector<1x1024xf32>
      %17 = vector.broadcast %16 : vector<1x1024xf32> to vector<2x1024xf32>
      %18 = arith.addf %15, %17 : vector<2x1024xf32>
      %cst_12 = arith.constant 0.000000e+00 : f32
      %19 = vector.broadcast %cst_12 : f32 to vector<2x1024xf32>
      %20 = arith.maximumf %18, %19 : vector<2x1024xf32>
      %21 = arith.truncf %20 : vector<2x1024xf32> to vector<2x1024xbf16>
      %c0_13 = arith.constant 0 : index
      %c0_14 = arith.constant 0 : index
      %22 = vector.load %arg9[%c0_13, %c0_14] : memref<1024x512xbf16, #tpu.memory_space<vmem>>, vector<1024x512xbf16>
      %cst_15 = arith.constant dense<0.000000e+00> : vector<2x512xf32>
      %23 = tpu.matmul %21, %22, %cst_15 {dimension_numbers = #tpu.dot_dimension_numbers<[1], [0], [0], [1], [0, 0, 1, 1], [], []>} : vector<2x1024xbf16>, vector<1024x512xbf16>, vector<2x512xf32> -> vector<2x512xf32>
      %c0_16 = arith.constant 0 : index
      %c0_17 = arith.constant 0 : index
      %24 = vector.load %arg10[%c0_16, %c0_17] : memref<1x512xf32, #tpu.memory_space<vmem>>, vector<1x512xf32>
      %25 = vector.broadcast %24 : vector<1x512xf32> to vector<2x512xf32>
      %26 = arith.addf %23, %25 : vector<2x512xf32>
      %cst_18 = arith.constant 0.000000e+00 : f32
      %27 = vector.broadcast %cst_18 : f32 to vector<2x512xf32>
      %28 = arith.maximumf %26, %27 : vector<2x512xf32>
      %29 = arith.truncf %28 : vector<2x512xf32> to vector<2x512xbf16>
      %c0_19 = arith.constant 0 : index
      %c0_20 = arith.constant 0 : index
      %30 = vector.load %arg12[%c0_19, %c0_20] : memref<512x512xbf16, #tpu.memory_space<vmem>>, vector<512x512xbf16>
      %cst_21 = arith.constant dense<0.000000e+00> : vector<2x512xf32>
      %31 = tpu.matmul %29, %30, %cst_21 {dimension_numbers = #tpu.dot_dimension_numbers<[1], [0], [0], [1], [0, 0, 1, 1], [], []>} : vector<2x512xbf16>, vector<512x512xbf16>, vector<2x512xf32> -> vector<2x512xf32>
      %c0_22 = arith.constant 0 : index
      %c0_23 = arith.constant 0 : index
      %32 = vector.load %arg11[%c0_22, %c0_23] : memref<2x8xf32, #tpu.memory_space<vmem>>, vector<2x8xf32>
      %c0_24 = arith.constant 0 : index
      %c0_25 = arith.constant 0 : index
      %33 = vector.load %arg13[%c0_24, %c0_25] : memref<8x512xf32, #tpu.memory_space<vmem>>, vector<8x512xf32>
      %cst_26 = arith.constant dense<0.000000e+00> : vector<2x512xf32>
      %34 = tpu.matmul %32, %33, %cst_26 {dimension_numbers = #tpu.dot_dimension_numbers<[1], [0], [0], [1], [0, 0, 1, 1], [], []>} : vector<2x8xf32>, vector<8x512xf32>, vector<2x512xf32> -> vector<2x512xf32>
      %35 = arith.addf %31, %34 : vector<2x512xf32>
      %c0_27 = arith.constant 0 : index
      %c0_28 = arith.constant 0 : index
      %36 = vector.load %arg14[%c0_27, %c0_28] : memref<1x512xf32, #tpu.memory_space<vmem>>, vector<1x512xf32>
      %37 = vector.broadcast %36 : vector<1x512xf32> to vector<2x512xf32>
      %38 = arith.addf %35, %37 : vector<2x512xf32>
      %cst_29 = arith.constant 0.000000e+00 : f32
      %39 = vector.broadcast %cst_29 : f32 to vector<2x512xf32>
      %40 = arith.maximumf %38, %39 : vector<2x512xf32>
      %41 = arith.truncf %40 : vector<2x512xf32> to vector<2x512xbf16>
      %c0_30 = arith.constant 0 : index
      %c0_31 = arith.constant 0 : index
      %42 = vector.load %arg15[%c0_30, %c0_31] : memref<512x256xbf16, #tpu.memory_space<vmem>>, vector<512x256xbf16>
      %cst_32 = arith.constant dense<0.000000e+00> : vector<2x256xf32>
      %43 = tpu.matmul %41, %42, %cst_32 {dimension_numbers = #tpu.dot_dimension_numbers<[1], [0], [0], [1], [0, 0, 1, 1], [], []>} : vector<2x512xbf16>, vector<512x256xbf16>, vector<2x256xf32> -> vector<2x256xf32>
      %c0_33 = arith.constant 0 : index
      %c0_34 = arith.constant 0 : index
      %44 = vector.load %arg16[%c0_33, %c0_34] : memref<1x256xf32, #tpu.memory_space<vmem>>, vector<1x256xf32>
      %45 = vector.broadcast %44 : vector<1x256xf32> to vector<2x256xf32>
      %46 = arith.addf %43, %45 : vector<2x256xf32>
      %cst_35 = arith.constant 0.000000e+00 : f32
      %47 = vector.broadcast %cst_35 : f32 to vector<2x256xf32>
      %48 = arith.maximumf %46, %47 : vector<2x256xf32>
      %49 = arith.truncf %48 : vector<2x256xf32> to vector<2x256xbf16>
      %c0_36 = arith.constant 0 : index
      %c0_37 = arith.constant 0 : index
      %50 = vector.load %arg17[%c0_36, %c0_37] : memref<256x128xbf16, #tpu.memory_space<vmem>>, vector<256x128xbf16>
      %cst_38 = arith.constant dense<0.000000e+00> : vector<2x128xf32>
      %51 = tpu.matmul %49, %50, %cst_38 {dimension_numbers = #tpu.dot_dimension_numbers<[1], [0], [0], [1], [0, 0, 1, 1], [], []>} : vector<2x256xbf16>, vector<256x128xbf16>, vector<2x128xf32> -> vector<2x128xf32>
      %c0_39 = arith.constant 0 : index
      %c0_40 = arith.constant 0 : index
      %52 = vector.load %arg18[%c0_39, %c0_40] : memref<1x128xf32, #tpu.memory_space<vmem>>, vector<1x128xf32>
      %53 = vector.broadcast %52 : vector<1x128xf32> to vector<2x128xf32>
      %54 = arith.addf %51, %53 : vector<2x128xf32>
      %55 = tpu.iota {dimensions = array<i32: 1>} : vector<2x128xi32>
      %c17_i32 = arith.constant 17 : i32
      %56 = vector.broadcast %c17_i32 : i32 to vector<2x128xi32>
      %57 = arith.cmpi sge, %55, %56 : vector<2x128xi32>
      %c21_i32 = arith.constant 21 : i32
      %58 = vector.broadcast %c21_i32 : i32 to vector<2x128xi32>
      %59 = arith.cmpi slt, %55, %58 : vector<2x128xi32>
      %60 = arith.andi %57, %59 : vector<2x128xi1>
      %61 = math.tanh %54 : vector<2x128xf32>
      %62 = arith.select %60, %61, %54 : vector<2x128xi1>, vector<2x128xf32>
      %c0_41 = arith.constant 0 : index
      %c0_42 = arith.constant 0 : index
      %63 = vector.load %arg19[%c0_41, %c0_42] : memref<2x128xf32, #tpu.memory_space<vmem>>, vector<2x128xf32>
      tpu.vector_store %arg19[%c0_41, %c0_42], %62 {strides = array<i32>} : memref<2x128xf32, #tpu.memory_space<vmem>>, vector<2x128xf32>,
    } else {
    }
    return
  }
  func.func @transform_0(%arg0: i32) -> (i32, i32) {
    %c0_i32 = arith.constant 0 : i32
    %c0_i32_0 = arith.constant 0 : i32
    %c0_i32_1 = arith.constant 0 : i32
    return %c0_i32, %c0_i32_0 : i32, i32
  }
  func.func @transform_1(%arg0: i32) -> (i32, i32) {
    %c0_i32 = arith.constant 0 : i32
    %c0_i32_0 = arith.constant 0 : i32
    %c0_i32_1 = arith.constant 0 : i32
    return %c0_i32, %c0_i32_0 : i32, i32
  }
  func.func @transform_2(%arg0: i32) -> (i32, i32) {
    %c0_i32 = arith.constant 0 : i32
    %c0_i32_0 = arith.constant 0 : i32
    %c0_i32_1 = arith.constant 0 : i32
    return %c0_i32, %c0_i32_0 : i32, i32
  }
  func.func @transform_3(%arg0: i32) -> (i32, i32) {
    %c0_i32 = arith.constant 0 : i32
    %c0_i32_0 = arith.constant 0 : i32
    %c0_i32_1 = arith.constant 0 : i32
    return %c0_i32, %c0_i32_0 : i32, i32
  }
  func.func @transform_4(%arg0: i32) -> (i32, i32) {
    %c0_i32 = arith.constant 0 : i32
    %c0_i32_0 = arith.constant 0 : i32
    %c0_i32_1 = arith.constant 0 : i32
    return %c0_i32, %c0_i32_0 : i32, i32
  }
  func.func @transform_5(%arg0: i32) -> (i32, i32) {
    %c0_i32 = arith.constant 0 : i32
    %c0_i32_0 = arith.constant 0 : i32
    %c0_i32_1 = arith.constant 0 : i32
    return %c0_i32, %c0_i32_0 : i32, i32
  }
  func.func @transform_6(%arg0: i32) -> (i32, i32) {
    %c0_i32 = arith.constant 0 : i32
    %c0_i32_0 = arith.constant 0 : i32
    return %arg0, %c0_i32 : i32, i32
  }
  func.func @transform_7(%arg0: i32) -> (i32, i32) {
    %c0_i32 = arith.constant 0 : i32
    %c0_i32_0 = arith.constant 0 : i32
    %c0_i32_1 = arith.constant 0 : i32
    return %c0_i32, %c0_i32_0 : i32, i32
  }
  func.func @transform_8(%arg0: i32) -> (i32, i32) {
    %c0_i32 = arith.constant 0 : i32
    %c0_i32_0 = arith.constant 0 : i32
    %c0_i32_1 = arith.constant 0 : i32
    return %c0_i32, %c0_i32_0 : i32, i32
  }
  func.func @transform_9(%arg0: i32) -> (i32, i32) {
    %c0_i32 = arith.constant 0 : i32
    %c0_i32_0 = arith.constant 0 : i32
    %c0_i32_1 = arith.constant 0 : i32
    return %c0_i32, %c0_i32_0 : i32, i32
  }
  func.func @transform_10(%arg0: i32) -> (i32, i32) {
    %c0_i32 = arith.constant 0 : i32
    %c0_i32_0 = arith.constant 0 : i32
    %c0_i32_1 = arith.constant 0 : i32
    return %c0_i32, %c0_i32_0 : i32, i32
  }
  func.func @transform_11(%arg0: i32) -> (i32, i32) {
    %c0_i32 = arith.constant 0 : i32
    %c0_i32_0 = arith.constant 0 : i32
    %c0_i32_1 = arith.constant 0 : i32
    return %c0_i32, %c0_i32_0 : i32, i32
  }
  func.func @transform_12(%arg0: i32) -> (i32, i32) {
    %c0_i32 = arith.constant 0 : i32
    %c0_i32_0 = arith.constant 0 : i32
    %c0_i32_1 = arith.constant 0 : i32
    return %c0_i32, %c0_i32_0 : i32, i32
  }
  func.func @transform_13(%arg0: i32) -> (i32, i32) {
    %c0_i32 = arith.constant 0 : i32
    %c0_i32_0 = arith.constant 0 : i32
    %c0_i32_1 = arith.constant 0 : i32
    return %c0_i32, %c0_i32_0 : i32, i32
  }
  func.func @transform_14(%arg0: i32) -> (i32, i32) {
    %c0_i32 = arith.constant 0 : i32
    %c0_i32_0 = arith.constant 0 : i32
    %c0_i32_1 = arith.constant 0 : i32
    return %c0_i32, %c0_i32_0 : i32, i32
  }
  func.func @transform_15(%arg0: i32) -> (i32, i32) {
    %c0_i32 = arith.constant 0 : i32
    %c0_i32_0 = arith.constant 0 : i32
    %c0_i32_1 = arith.constant 0 : i32
    return %c0_i32, %c0_i32_0 : i32, i32
  }
  func.func @transform_16(%arg0: i32) -> (i32, i32) {
    %c0_i32 = arith.constant 0 : i32
    %c0_i32_0 = arith.constant 0 : i32
    %c0_i32_1 = arith.constant 0 : i32
    return %c0_i32, %c0_i32_0 : i32, i32
  }
  func.func @transform_17(%arg0: i32) -> (i32, i32) {
    %c0_i32 = arith.constant 0 : i32
    %c0_i32_0 = arith.constant 0 : i32
    %c0_i32_1 = arith.constant 0 : i32
    return %c0_i32, %c0_i32_0 : i32, i32
  }
  func.func @transform_18(%arg0: i32) -> (i32, i32) {
    %c0_i32 = arith.constant 0 : i32
    %c0_i32_0 = arith.constant 0 : i32
    %c0_i32_1 = arith.constant 0 : i32
    return %c0_i32, %c0_i32_0 : i32, i32
  }
}

</mosaic_0001>

<bundles_post_ra>
// kernel: ppo_forward.3
= control target key start
LH: loop header
LB: loop body
LE: loop exit
PB: predicated region body
PF: predicated region fallthrough
CT: control target
= control target key end

     0   :  { %s1986_s12 = smov 0   ;;  %s2335_s0 = inlined_call_operand.vmem [shape: bf16[1800,75], index: 0, kind: input, shape index: {}]   ;;  %s2336_s1 = inlined_call_operand.vmem [shape: bf16[75,16], index: 1, kind: input, shape index: {}]   ;;  %s2337_s2 = inlined_call_operand.vmem [shape: f32[1,16], index: 2, kind: input, shape index: {}]   ;;  %s2338_s3 = inlined_call_operand.vmem [shape: bf16[1800,16], index: 3, kind: output, shape index: {}]  }
   0x1 LB: > { %s1525_s13 = sadd.s32 4294967295, %s1963_s12   ;;  %p1529_p0 = scmp.ge.s32.totalorder %s1963_s12, 1  ;;  %s1963_s12 = sphi %s1986_s12, %s13_s12  }
   0x2   : > { %p138_p1 = scmp.lt.s32.totalorder %s1963_s12, 4 }
   0x4   : > { %p139_p2 = pnand %p1529_p0, %p138_p1 }
   0x5   : > { %s162_s18 = smul.u32 (!%p139_p2), 75, %s1525_s13 }
   0x6   : > { %142 = sbr.rel (%p139_p2) target bundleno = 316 (0x13c), region = 32 }
   0x7   : > { %p163_p3 = scmp.lt.s32.totalorder (!%p139_p2), %s162_s18, 224 }
   0xb   : > { %v1914_v0 = vld [vmem:[%s2336_s1 + $0x20] sm:$0x3f]   ;;  %vm599_vm0 = vcmask 1044480   ;;  %vm600_vm1 = vcmask 1045504   ;;  %v1965_v1 = vmov 65535   ;;  %v1915_v4 = vld [vmem:[%s2336_s1 + $0x18] sm:$0xff]  }
   0xc   : > { %v601_v2 = vsel %vm599_vm0, 4294967295, %v1965_v1  ;;  %v1916_v6 = vld [vmem:[%s2336_s1 + $0x10] sm:$0xff]   ;;  %s2340_s18 = smov (!%p163_p3, %s162_s18), 224  ;;  %v1917_v7 = vld [vmem:[%s2336_s1 + $0x8] sm:$0xff]   ;;  %vm484_vm2 = vcmask 613376   ;;  %v1918_v10 = vld [vmem:[%s2336_s1] sm:$0xff]  }
   0xd   : > { %v602_v3 = vsel %vm600_vm1, %v601_v2, 0  ;;  %s1530_s21 = sshll.u32 %s2340_s18, 2  ;;  %v2098_v47 = vld [vmem:[%s2337_s2] ss:$0 sm:$0xff]  ;;  %vm1393_vm3 = vcmask 125952  }
   0xe   : > { %v604_v5 = vand.u32 %v1914_v0, %v602_v3  ;;  %s2014_s26 = scalar_lea.vmem %s2335_s0, %s1530_s21  ;;  %s2109_s6 = scalar_lea.vmem %s2338_s3, %s1530_s21 }
   0xf   : > { %v1919_v8 = vld [vmem:[%s2014_s26] sm:$0xff]   ;;  %v1921_v11 = vld [vmem:[%s2014_s26 + $0x8] sm:$0xff]   ;;  %v1923_v13 = vld [vmem:[%s2014_s26 + $0x10] sm:$0xff]  }
  0x10   : > { %1809 = vmatprep.subr.bf16.mxu0 %v604_v5  ;;  %1895 = vmatprep.subr.bf16.mxu1 %v604_v5  ;;  %v1920_v9 = vld [vmem:[%s2014_s26 + $0xa0] sm:$0xff]   ;;  %v1922_v12 = vld [vmem:[%s2014_s26 + $0xa8] sm:$0xff]   ;;  %v1924_v14 = vld [vmem:[%s2014_s26 + $0xb0] sm:$0xff]  }
  0x11   : > { %1810 = vmatpush3.bf16.msra.mxu0 %v604_v5  ;;  %1900 = vmatpush3.bf16.msra.mxu1 %v604_v5  ;;  %v1925_v15 = vld [vmem:[%s2014_s26 + $0x18] sm:$0xff]   ;;  %v1927_v17 = vld [vmem:[%s2014_s26 + $0x20] sm:$0xff]   ;;  %v1929_v19 = vld [vmem:[%s2014_s26 + $0x28] sm:$0xff]  }
  0x12   : > { %1811 = vmatprep.subr.bf16.mxu0 %v1915_v4  ;;  %1896 = vmatprep.subr.bf16.mxu1 %v1915_v4  ;;  %v1926_v16 = vld [vmem:[%s2014_s26 + $0xb8] sm:$0xff]   ;;  %v1928_v18 = vld [vmem:[%s2014_s26 + $0xc0] sm:$0xff]   ;;  %v1930_v20 = vld [vmem:[%s2014_s26 + $0xc8] sm:$0xff]  }
  0x13   : > { %1819 = vmatprep.mubr.msk.bf16.mxu0 %vm484_vm2, %v1919_v8  ;;  %1859 = vmatprep.mubr.msk.bf16.mxu1 %vm484_vm2, %v1920_v9  ;;  %v1931_v21 = vld [vmem:[%s2014_s26 + $0x30] sm:$0xff]   ;;  %v1933_v23 = vld [vmem:[%s2014_s26 + $0x38] sm:$0xff]   ;;  %v1935_v25 = vld [vmem:[%s2014_s26 + $0x40] sm:$0xff]  }
  0x14   : > { %v1932_v22 = vld [vmem:[%s2014_s26 + $0xd0] sm:$0xff]   ;;  %v1934_v24 = vld [vmem:[%s2014_s26 + $0xd8] sm:$0xff]   ;;  %v1936_v26 = vld [vmem:[%s2014_s26 + $0xe0] sm:$0xff]  }
  0x15   : > { %1812 = vmatpush3.bf16.msra.mxu0 %v1915_v4  ;;  %1901 = vmatpush3.bf16.msra.mxu1 %v1915_v4  ;;  %v1937_v27 = vld [vmem:[%s2014_s26 + $0x48] sm:$0xff]   ;;  %v1939_v29 = vld [vmem:[%s2014_s26 + $0x50] sm:$0xff]   ;;  %v1941_v31 = vld [vmem:[%s2014_s26 + $0x58] sm:$0xff]  }
  0x16   : > { %1813 = vmatprep.subr.bf16.mxu0 %v1916_v6  ;;  %1897 = vmatprep.subr.bf16.mxu1 %v1916_v6  ;;  %v1938_v28 = vld [vmem:[%s2014_s26 + $0xe8] sm:$0xff]   ;;  %v1940_v30 = vld [vmem:[%s2014_s26 + $0xf0] sm:$0xff]   ;;  %v1942_v32 = vld [vmem:[%s2014_s26 + $0xf8] sm:$0xff]  }
  0x17   : > { %v1943_v33 = vld [vmem:[%s2014_s26 + $0x60] sm:$0xff]   ;;  %v1945_v35 = vld [vmem:[%s2014_s26 + $0x68] sm:$0xff]   ;;  %v1947_v37 = vld [vmem:[%s2014_s26 + $0x70] sm:$0xff]  }
  0x18   : > { %v1944_v34 = vld [vmem:[%s2014_s26 + $0x100] sm:$0xff]   ;;  %v1946_v36 = vld [vmem:[%s2014_s26 + $0x108] sm:$0xff]   ;;  %v1948_v38 = vld [vmem:[%s2014_s26 + $0x110] sm:$0xff]  }
  0x19   : > { %1814 = vmatpush3.bf16.msra.mxu0 %v1916_v6  ;;  %1902 = vmatpush3.bf16.msra.mxu1 %v1916_v6  ;;  %v1949_v39 = vld [vmem:[%s2014_s26 + $0x78] sm:$0xff]   ;;  %v1951_v41 = vld [vmem:[%s2014_s26 + $0x80] sm:$0xff]   ;;  %v1953_v43 = vld [vmem:[%s2014_s26 + $0x88] sm:$0xff]  }
  0x1a   : > { %1815 = vmatprep.subr.bf16.mxu0 %v1917_v7  ;;  %1898 = vmatprep.subr.bf16.mxu1 %v1917_v7  ;;  %v1950_v40 = vld [vmem:[%s2014_s26 + $0x118] sm:$0xff]   ;;  %v1952_v42 = vld [vmem:[%s2014_s26 + $0x120] sm:$0xff]   ;;  %v1954_v44 = vld [vmem:[%s2014_s26 + $0x128] ss:$0 sps:$4 sm:$0xff]  }
  0x1b   : > { %v1955_v45 = vld [vmem:[%s2014_s26 + $0x90] sm:$0xff]   ;;  %v1956_v46 = vld [vmem:[%s2014_s26 + $0x98] sm:$0xff]  }
  0x1d   : > { %1816 = vmatpush3.bf16.msra.mxu0 %v1917_v7  ;;  %1903 = vmatpush3.bf16.msra.mxu1 %v1917_v7 }
  0x1e   : > { %1817 = vmatprep.subr.bf16.mxu0 %v1918_v10  ;;  %1899 = vmatprep.subr.bf16.mxu1 %v1918_v10 }
  0x21   : > { %1818 = vmatpush3.bf16.msra.mxu0 %v1918_v10  ;;  %1904 = vmatpush3.bf16.msra.mxu1 %v1918_v10 }
  0x24   : > { %1820 = vmatmul.mubr.msk.bf16.vlgmr.msra.gmra.mxu0 %vm484_vm2, %v1921_v11  ;;  %1860 = vmatmul.mubr.msk.bf16.vlgmr.msra.gmra.mxu1 %vm484_vm2, %v1922_v12 }
  0x25   : > { %1823 = vmatprep.mubr.msk.bf16.mxu0 %vm484_vm2, %v1923_v13  ;;  %1863 = vmatprep.mubr.msk.bf16.mxu1 %vm484_vm2, %v1924_v14 }
  0x2c   : > { %1824 = vmatmul.mubr.msk.bf16.gmra.mxu0 %vm484_vm2, %v1925_v15  ;;  %1864 = vmatmul.mubr.msk.bf16.gmra.mxu1 %vm484_vm2, %v1926_v16 }
  0x2d   : > { %1827 = vmatprep.mubr.msk.bf16.mxu0 %vm484_vm2, %v1927_v17  ;;  %1867 = vmatprep.mubr.msk.bf16.mxu1 %vm484_vm2, %v1928_v18 }
  0x34   : > { %1828 = vmatmul.mubr.msk.bf16.gmra.mxu0 %vm484_vm2, %v1929_v19  ;;  %1868 = vmatmul.mubr.msk.bf16.gmra.mxu1 %vm484_vm2, %v1930_v20 }
  0x35   : > { %1831 = vmatprep.mubr.msk.bf16.mxu0 %vm484_vm2, %v1931_v21  ;;  %1871 = vmatprep.mubr.msk.bf16.mxu1 %vm484_vm2, %v1932_v22 }
  0x3c   : > { %1832 = vmatmul.mubr.msk.bf16.gmra.mxu0 %vm484_vm2, %v1933_v23  ;;  %1872 = vmatmul.mubr.msk.bf16.gmra.mxu1 %vm484_vm2, %v1934_v24 }
  0x3d   : > { %1835 = vmatprep.mubr.msk.bf16.mxu0 %vm484_vm2, %v1935_v25  ;;  %1875 = vmatprep.mubr.msk.bf16.mxu1 %vm484_vm2, %v1936_v26 }
  0x44   : > { %1836 = vmatmul.mubr.msk.bf16.gmra.mxu0 %vm484_vm2, %v1937_v27  ;;  %1876 = vmatmul.mubr.msk.bf16.gmra.mxu1 %vm484_vm2, %v1938_v28 }
  0x45   : > { %1839 = vmatprep.mubr.msk.bf16.mxu0 %vm484_vm2, %v1939_v29  ;;  %1879 = vmatprep.mubr.msk.bf16.mxu1 %vm484_vm2, %v1940_v30 }
  0x4c   : > { %1840 = vmatmul.mubr.msk.bf16.gmra.mxu0 %vm484_vm2, %v1941_v31  ;;  %1880 = vmatmul.mubr.msk.bf16.gmra.mxu1 %vm484_vm2, %v1942_v32 }
  0x4d   : > { %1843 = vmatprep.mubr.msk.bf16.mxu0 %vm484_vm2, %v1943_v33  ;;  %1883 = vmatprep.mubr.msk.bf16.mxu1 %vm484_vm2, %v1944_v34 }
  0x54   : > { %1844 = vmatmul.mubr.msk.bf16.gmra.mxu0 %vm484_vm2, %v1945_v35  ;;  %1884 = vmatmul.mubr.msk.bf16.gmra.mxu1 %vm484_vm2, %v1946_v36 }
  0x55   : > { %1847 = vmatprep.mubr.msk.bf16.mxu0 %vm484_vm2, %v1947_v37  ;;  %1887 = vmatprep.mubr.msk.bf16.mxu1 %vm484_vm2, %v1948_v38 }
  0x5c   : > { %1848 = vmatmul.mubr.msk.bf16.gmra.mxu0 %vm484_vm2, %v1949_v39  ;;  %1888 = vmatmul.mubr.msk.bf16.gmra.mxu1 %vm484_vm2, %v1950_v40 }
  0x5d   : > { %1851 = vmatprep.mubr.msk.bf16.mxu0 %vm484_vm2, %v1951_v41  ;;  %1891 = vmatprep.mubr.msk.bf16.mxu1 %vm484_vm2, %v1952_v42 }
  0x64   : > { %1852 = vmatmul.mubr.msk.bf16.gmra.mxu0 %vm484_vm2, %v1953_v43  ;;  %1892 = vmatmul.mubr.msk.bf16.gmra.mxu1 %vm484_vm2, %v1954_v44 }
  0x65   : > { %1855 = vmatprep.mubr.msk.bf16.mxu0 %vm484_vm2, %v1955_v45 }
  0x6c   : > { %1856 = vmatmul.mubr.msk.bf16.gmra.mxu0 %vm484_vm2, %v1956_v46 }
  0xe4   : > { %v1821_v48 = vpop.f32.mrf.mxu0  ;;  %v1861_v49 = vpop.f32.mrf.mxu1 }
  0xe5   : > { %v649_v50 = vadd.f32 %v1821_v48, %v2098_v47  ;;  %v809_v51 = vadd.f32 %v1861_v49, %v2098_v47 }
  0xe6   : > { %v640_v52 = vpop.f32.mrf.mxu0  ;;  %v800_v53 = vpop.f32.mrf.mxu1 }
  0xe7   : > { %v944_v54 = vmul.f32 0.1, %v649_v50  ;;  %v984_v55 = vmul.f32 0.1, %v809_v51  ;;  %v641_v56 = vadd.f32 %v2098_v47, %v640_v52  ;;  %v801_v57 = vadd.f32 %v2098_v47, %v800_v53 }
  0xe8   : > { %v1822_v58 = vpop.f32.mrf.mxu0  ;;  %v1862_v59 = vpop.f32.mrf.mxu1 }
  0xe9   : > { %v1019_v60 = vmax.f32 %v649_v50, %v944_v54  ;;  %v1059_v61 = vmax.f32 %v809_v51, %v984_v55  ;;  %v942_v62 = vmul.f32 0.1, %v641_v56  ;;  %v982_v63 = vmul.f32 0.1, %v801_v57 }
  0xea   : > { %v652_v0 = vadd.f32 %v1822_v58, %v2098_v47  ;;  %v812_v1 = vadd.f32 %v1862_v59, %v2098_v47  ;;  %v643_v2 = vpop.f32.mrf.mxu0  ;;  %v803_v3 = vpop.f32.mrf.mxu1 }
  0xeb   : > { %v1693_v4 = vpack.c.bf16 %v1019_v60, %v1019_v60  ;;  %v1733_v5 = vpack.c.bf16 %v1059_v61, %v1059_v61  ;;  %v1017_v6 = vmax.f32 %v641_v56, %v942_v62  ;;  %v1057_v7 = vmax.f32 %v801_v57, %v982_v63 }
  0xec   : > { %v945_v8 = vmul.f32 0.1, %v652_v0  ;;  %v985_v9 = vmul.f32 0.1, %v812_v1  ;;  %v644_v10 = vadd.f32 %v2098_v47, %v643_v2  ;;  %v804_v11 = vadd.f32 %v2098_v47, %v803_v3  ;;  %v1825_v12 = vpop.f32.mrf.mxu0  ;;  %v1865_v13 = vpop.f32.mrf.mxu1 }
  0xed   : > { %1396 = vst.msk [vmem:[%s2109_s6 + $0x8] sm:$0xf] %vm1393_vm3, %v1693_v4  ;;  %1436 = vst.msk [vmem:[%s2109_s6 + $0xa8] sm:$0xf] %vm1393_vm3, %v1733_v5  ;;  %v1691_v14 = vpack.c.bf16 %v1017_v6, %v1017_v6  ;;  %v1731_v15 = vpack.c.bf16 %v1057_v7, %v1057_v7  ;;  %v665_v16 = vadd.f32 %v1825_v12, %v2098_v47 }
  0xee   : > { %v825_v17 = vadd.f32 %v1865_v13, %v2098_v47  ;;  %v1020_v18 = vmax.f32 %v652_v0, %v945_v8  ;;  %v1060_v19 = vmax.f32 %v812_v1, %v985_v9  ;;  %v943_v20 = vmul.f32 0.1, %v644_v10  ;;  %v656_v22 = vpop.f32.mrf.mxu0  ;;  %v816_v23 = vpop.f32.mrf.mxu1 }
  0xef   : > { %v983_v21 = vmul.f32 0.1, %v804_v11  ;;  %1394 = vst.msk [vmem:[%s2109_s6] sm:$0xf] %vm1393_vm3, %v1691_v14  ;;  %1434 = vst.msk [vmem:[%s2109_s6 + $0xa0] sm:$0xf] %vm1393_vm3, %v1731_v15  ;;  %v657_v26 = vadd.f32 %v2098_v47, %v656_v22  ;;  %v817_v27 = vadd.f32 %v2098_v47, %v816_v23 }
  0xf0   : > { %v948_v24 = vmul.f32 0.1, %v665_v16  ;;  %v988_v25 = vmul.f32 0.1, %v825_v17  ;;  %v1694_v28 = vpack.c.bf16 %v1020_v18, %v1020_v18  ;;  %v1734_v29 = vpack.c.bf16 %v1060_v19, %v1060_v19  ;;  %v1826_v32 = vpop.f32.mrf.mxu0  ;;  %v1866_v33 = vpop.f32.mrf.mxu1 }
  0xf1   : > { %v1018_v30 = vmax.f32 %v644_v10, %v943_v20  ;;  %v1058_v31 = vmax.f32 %v804_v11, %v983_v21  ;;  %v946_v36 = vmul.f32 0.1, %v657_v26  ;;  %v986_v37 = vmul.f32 0.1, %v817_v27 }
  0xf2   : > { %v1023_v34 = vmax.f32 %v665_v16, %v948_v24  ;;  %v1063_v35 = vmax.f32 %v825_v17, %v988_v25  ;;  %1397 = vst.msk [vmem:[%s2109_s6 + $0xc] sm:$0xf] %vm1393_vm3, %v1694_v28  ;;  %1437 = vst.msk [vmem:[%s2109_s6 + $0xac] sm:$0xf] %vm1393_vm3, %v1734_v29  ;;  %v668_v40 = vadd.f32 %v1826_v32, %v2098_v47  ;;  %v659_v42 = vpop.f32.mrf.mxu0  ;;  %v819_v43 = vpop.f32.mrf.mxu1 }
  0xf3   : > { %v1692_v38 = vpack.c.bf16 %v1018_v30, %v1018_v30  ;;  %v1732_v39 = vpack.c.bf16 %v1058_v31, %v1058_v31  ;;  %v828_v41 = vadd.f32 %v1866_v33, %v2098_v47  ;;  %v1021_v46 = vmax.f32 %v657_v26, %v946_v36 }
  0xf4   : > { %v1697_v44 = vpack.c.bf16 %v1023_v34, %v1023_v34  ;;  %v1737_v45 = vpack.c.bf16 %v1063_v35, %v1063_v35  ;;  %v1061_v48 = vmax.f32 %v817_v27, %v986_v37  ;;  %v949_v49 = vmul.f32 0.1, %v668_v40  ;;  %v1829_v53 = vpop.f32.mrf.mxu0  ;;  %v1869_v54 = vpop.f32.mrf.mxu1 }
  0xf5   : > { %1395 = vst.msk [vmem:[%s2109_s6 + $0x4] sm:$0xf] %vm1393_vm3, %v1692_v38  ;;  %1435 = vst.msk [vmem:[%s2109_s6 + $0xa4] sm:$0xf] %vm1393_vm3, %v1732_v39  ;;  %v989_v50 = vmul.f32 0.1, %v828_v41  ;;  %v660_v51 = vadd.f32 %v2098_v47, %v659_v42  ;;  %v820_v52 = vadd.f32 %v2098_v47, %v819_v43  ;;  %v1695_v55 = vpack.c.bf16 %v1021_v46, %v1021_v46 }
  0xf6   : > { %1400 = vst.msk [vmem:[%s2109_s6 + $0x18] sm:$0xf] %vm1393_vm3, %v1697_v44  ;;  %1440 = vst.msk [vmem:[%s2109_s6 + $0xb8] sm:$0xf] %vm1393_vm3, %v1737_v45  ;;  %v1735_v56 = vpack.c.bf16 %v1061_v48, %v1061_v48  ;;  %v681_v57 = vadd.f32 %v1829_v53, %v2098_v47  ;;  %v841_v58 = vadd.f32 %v1869_v54, %v2098_v47  ;;  %v672_v63 = vpop.f32.mrf.mxu0  ;;  %v832_v0 = vpop.f32.mrf.mxu1 }
  0xf7   : > { %v1024_v59 = vmax.f32 %v668_v40, %v949_v49  ;;  %v1064_v60 = vmax.f32 %v828_v41, %v989_v50  ;;  %v947_v61 = vmul.f32 0.1, %v660_v51  ;;  %v987_v62 = vmul.f32 0.1, %v820_v52  ;;  %1398 = vst.msk [vmem:[%s2109_s6 + $0x10] sm:$0xf] %vm1393_vm3, %v1695_v55 }
  0xf8   : > { %1438 = vst.msk [vmem:[%s2109_s6 + $0xb0] sm:$0xf] %vm1393_vm3, %v1735_v56  ;;  %v952_v1 = vmul.f32 0.1, %v681_v57  ;;  %v992_v2 = vmul.f32 0.1, %v841_v58  ;;  %v673_v3 = vadd.f32 %v2098_v47, %v672_v63  ;;  %v833_v4 = vadd.f32 %v2098_v47, %v832_v0  ;;  %v1830_v9 = vpop.f32.mrf.mxu0  ;;  %v1870_v10 = vpop.f32.mrf.mxu1 }
  0xf9   : > { %v1698_v5 = vpack.c.bf16 %v1024_v59, %v1024_v59  ;;  %v1738_v6 = vpack.c.bf16 %v1064_v60, %v1064_v60  ;;  %v1022_v7 = vmax.f32 %v660_v51, %v947_v61  ;;  %v1062_v8 = vmax.f32 %v820_v52, %v987_v62 }
  0xfa   : > { %v1027_v11 = vmax.f32 %v681_v57, %v952_v1  ;;  %v1067_v12 = vmax.f32 %v841_v58, %v992_v2  ;;  %v950_v13 = vmul.f32 0.1, %v673_v3  ;;  %v990_v14 = vmul.f32 0.1, %v833_v4  ;;  %v675_v19 = vpop.f32.mrf.mxu0  ;;  %v835_v20 = vpop.f32.mrf.mxu1 }
  0xfb   : > { %1401 = vst.msk [vmem:[%s2109_s6 + $0x1c] sm:$0xf] %vm1393_vm3, %v1698_v5  ;;  %1441 = vst.msk [vmem:[%s2109_s6 + $0xbc] sm:$0xf] %vm1393_vm3, %v1738_v6  ;;  %v1696_v15 = vpack.c.bf16 %v1022_v7, %v1022_v7  ;;  %v1736_v16 = vpack.c.bf16 %v1062_v8, %v1062_v8  ;;  %v684_v17 = vadd.f32 %v1830_v9, %v2098_v47 }
  0xfc   : > { %v844_v18 = vadd.f32 %v1870_v10, %v2098_v47  ;;  %v1701_v21 = vpack.c.bf16 %v1027_v11, %v1027_v11  ;;  %v1741_v22 = vpack.c.bf16 %v1067_v12, %v1067_v12  ;;  %v1025_v23 = vmax.f32 %v673_v3, %v950_v13  ;;  %v1833_v29 = vpop.f32.mrf.mxu0  ;;  %v1873_v30 = vpop.f32.mrf.mxu1 }
  0xfd   : > { %v1065_v24 = vmax.f32 %v833_v4, %v990_v14  ;;  %1399 = vst.msk [vmem:[%s2109_s6 + $0x14] sm:$0xf] %vm1393_vm3, %v1696_v15  ;;  %1439 = vst.msk [vmem:[%s2109_s6 + $0xb4] sm:$0xf] %vm1393_vm3, %v1736_v16  ;;  %v953_v25 = vmul.f32 0.1, %v684_v17  ;;  %v676_v27 = vadd.f32 %v2098_v47, %v675_v19  ;;  %v836_v28 = vadd.f32 %v2098_v47, %v835_v20 }
  0xfe   : > { %v993_v26 = vmul.f32 0.1, %v844_v18  ;;  %1404 = vst.msk [vmem:[%s2109_s6 + $0x28] sm:$0xf] %vm1393_vm3, %v1701_v21  ;;  %1444 = vst.msk [vmem:[%s2109_s6 + $0xc8] sm:$0xf] %vm1393_vm3, %v1741_v22  ;;  %v1699_v31 = vpack.c.bf16 %v1025_v23, %v1025_v23  ;;  %v697_v33 = vadd.f32 %v1833_v29, %v2098_v47  ;;  %v857_v34 = vadd.f32 %v1873_v30, %v2098_v47  ;;  %v688_v39 = vpop.f32.mrf.mxu0  ;;  %v848_v40 = vpop.f32.mrf.mxu1 }
  0xff   : > { %v1739_v32 = vpack.c.bf16 %v1065_v24, %v1065_v24  ;;  %v1028_v35 = vmax.f32 %v684_v17, %v953_v25  ;;  %v951_v37 = vmul.f32 0.1, %v676_v27  ;;  %v991_v38 = vmul.f32 0.1, %v836_v28 }
 0x100   : > { %v1068_v36 = vmax.f32 %v844_v18, %v993_v26  ;;  %1402 = vst.msk [vmem:[%s2109_s6 + $0x20] sm:$0xf] %vm1393_vm3, %v1699_v31  ;;  %v956_v41 = vmul.f32 0.1, %v697_v33  ;;  %v996_v42 = vmul.f32 0.1, %v857_v34  ;;  %v689_v43 = vadd.f32 %v2098_v47, %v688_v39  ;;  %v1834_v50 = vpop.f32.mrf.mxu0  ;;  %v1874_v51 = vpop.f32.mrf.mxu1 }
 0x101   : > { %1442 = vst.msk [vmem:[%s2109_s6 + $0xc0] sm:$0xf] %vm1393_vm3, %v1739_v32  ;;  %v849_v44 = vadd.f32 %v2098_v47, %v848_v40  ;;  %v1702_v45 = vpack.c.bf16 %v1028_v35, %v1028_v35  ;;  %v1026_v48 = vmax.f32 %v676_v27, %v951_v37  ;;  %v1066_v49 = vmax.f32 %v836_v28, %v991_v38 }
 0x102   : > { %v1742_v46 = vpack.c.bf16 %v1068_v36, %v1068_v36  ;;  %v1031_v52 = vmax.f32 %v697_v33, %v956_v41  ;;  %v1071_v53 = vmax.f32 %v857_v34, %v996_v42  ;;  %v954_v54 = vmul.f32 0.1, %v689_v43  ;;  %v691_v60 = vpop.f32.mrf.mxu0  ;;  %v851_v61 = vpop.f32.mrf.mxu1 }
 0x103   : > { %v994_v55 = vmul.f32 0.1, %v849_v44  ;;  %1405 = vst.msk [vmem:[%s2109_s6 + $0x2c] sm:$0xf] %vm1393_vm3, %v1702_v45  ;;  %v1700_v56 = vpack.c.bf16 %v1026_v48, %v1026_v48  ;;  %v1740_v57 = vpack.c.bf16 %v1066_v49, %v1066_v49  ;;  %v700_v58 = vadd.f32 %v1834_v50, %v2098_v47 }
 0x104   : > { %1445 = vst.msk [vmem:[%s2109_s6 + $0xcc] sm:$0xf] %vm1393_vm3, %v1742_v46  ;;  %v860_v59 = vadd.f32 %v1874_v51, %v2098_v47  ;;  %v1705_v62 = vpack.c.bf16 %v1031_v52, %v1031_v52  ;;  %v1745_v63 = vpack.c.bf16 %v1071_v53, %v1071_v53  ;;  %v1029_v0 = vmax.f32 %v689_v43, %v954_v54  ;;  %v1837_v6 = vpop.f32.mrf.mxu0  ;;  %v1877_v7 = vpop.f32.mrf.mxu1 }
 0x105   : > { %v1069_v1 = vmax.f32 %v849_v44, %v994_v55  ;;  %1403 = vst.msk [vmem:[%s2109_s6 + $0x24] sm:$0xf] %vm1393_vm3, %v1700_v56  ;;  %1443 = vst.msk [vmem:[%s2109_s6 + $0xc4] sm:$0xf] %vm1393_vm3, %v1740_v57  ;;  %v957_v2 = vmul.f32 0.1, %v700_v58  ;;  %v692_v4 = vadd.f32 %v2098_v47, %v691_v60  ;;  %v852_v5 = vadd.f32 %v2098_v47, %v851_v61 }
 0x106   : > { %v997_v3 = vmul.f32 0.1, %v860_v59  ;;  %1408 = vst.msk [vmem:[%s2109_s6 + $0x38] sm:$0xf] %vm1393_vm3, %v1705_v62  ;;  %1448 = vst.msk [vmem:[%s2109_s6 + $0xd8] sm:$0xf] %vm1393_vm3, %v1745_v63  ;;  %v1703_v8 = vpack.c.bf16 %v1029_v0, %v1029_v0  ;;  %v713_v10 = vadd.f32 %v1837_v6, %v2098_v47  ;;  %v873_v11 = vadd.f32 %v1877_v7, %v2098_v47  ;;  %v704_v16 = vpop.f32.mrf.mxu0  ;;  %v864_v17 = vpop.f32.mrf.mxu1 }
 0x107   : > { %v1743_v9 = vpack.c.bf16 %v1069_v1, %v1069_v1  ;;  %v1032_v12 = vmax.f32 %v700_v58, %v957_v2  ;;  %v955_v14 = vmul.f32 0.1, %v692_v4  ;;  %v995_v15 = vmul.f32 0.1, %v852_v5 }
 0x108   : > { %v1072_v13 = vmax.f32 %v860_v59, %v997_v3  ;;  %1406 = vst.msk [vmem:[%s2109_s6 + $0x30] sm:$0xf] %vm1393_vm3, %v1703_v8  ;;  %v960_v18 = vmul.f32 0.1, %v713_v10  ;;  %v1000_v19 = vmul.f32 0.1, %v873_v11  ;;  %v705_v20 = vadd.f32 %v2098_v47, %v704_v16  ;;  %v1838_v26 = vpop.f32.mrf.mxu0  ;;  %v1878_v27 = vpop.f32.mrf.mxu1 }
 0x109   : > { %1446 = vst.msk [vmem:[%s2109_s6 + $0xd0] sm:$0xf] %vm1393_vm3, %v1743_v9  ;;  %v865_v21 = vadd.f32 %v2098_v47, %v864_v17  ;;  %v1706_v22 = vpack.c.bf16 %v1032_v12, %v1032_v12  ;;  %v1030_v24 = vmax.f32 %v692_v4, %v955_v14  ;;  %v1070_v25 = vmax.f32 %v852_v5, %v995_v15 }
 0x10a   : > { %v1746_v23 = vpack.c.bf16 %v1072_v13, %v1072_v13  ;;  %v1035_v28 = vmax.f32 %v713_v10, %v960_v18  ;;  %v1075_v29 = vmax.f32 %v873_v11, %v1000_v19  ;;  %v958_v30 = vmul.f32 0.1, %v705_v20  ;;  %v707_v36 = vpop.f32.mrf.mxu0  ;;  %v867_v37 = vpop.f32.mrf.mxu1 }
 0x10b   : > { %v998_v31 = vmul.f32 0.1, %v865_v21  ;;  %1409 = vst.msk [vmem:[%s2109_s6 + $0x3c] sm:$0xf] %vm1393_vm3, %v1706_v22  ;;  %v1704_v32 = vpack.c.bf16 %v1030_v24, %v1030_v24  ;;  %v1744_v33 = vpack.c.bf16 %v1070_v25, %v1070_v25  ;;  %v716_v34 = vadd.f32 %v1838_v26, %v2098_v47 }
 0x10c   : > { %1449 = vst.msk [vmem:[%s2109_s6 + $0xdc] sm:$0xf] %vm1393_vm3, %v1746_v23  ;;  %v876_v35 = vadd.f32 %v1878_v27, %v2098_v47  ;;  %v1709_v38 = vpack.c.bf16 %v1035_v28, %v1035_v28  ;;  %v1749_v39 = vpack.c.bf16 %v1075_v29, %v1075_v29  ;;  %v1033_v40 = vmax.f32 %v705_v20, %v958_v30  ;;  %v1841_v46 = vpop.f32.mrf.mxu0  ;;  %v1881_v48 = vpop.f32.mrf.mxu1 }
 0x10d   : > { %v1073_v41 = vmax.f32 %v865_v21, %v998_v31  ;;  %1407 = vst.msk [vmem:[%s2109_s6 + $0x34] sm:$0xf] %vm1393_vm3, %v1704_v32  ;;  %1447 = vst.msk [vmem:[%s2109_s6 + $0xd4] sm:$0xf] %vm1393_vm3, %v1744_v33  ;;  %v961_v42 = vmul.f32 0.1, %v716_v34  ;;  %v708_v44 = vadd.f32 %v2098_v47, %v707_v36  ;;  %v868_v45 = vadd.f32 %v2098_v47, %v867_v37 }
 0x10e   : > { %v1001_v43 = vmul.f32 0.1, %v876_v35  ;;  %1412 = vst.msk [vmem:[%s2109_s6 + $0x48] sm:$0xf] %vm1393_vm3, %v1709_v38  ;;  %1452 = vst.msk [vmem:[%s2109_s6 + $0xe8] sm:$0xf] %vm1393_vm3, %v1749_v39  ;;  %v1707_v49 = vpack.c.bf16 %v1033_v40, %v1033_v40  ;;  %v729_v51 = vadd.f32 %v1841_v46, %v2098_v47  ;;  %v889_v52 = vadd.f32 %v1881_v48, %v2098_v47  ;;  %v720_v57 = vpop.f32.mrf.mxu0  ;;  %v880_v58 = vpop.f32.mrf.mxu1 }
 0x10f   : > { %v1747_v50 = vpack.c.bf16 %v1073_v41, %v1073_v41  ;;  %v1036_v53 = vmax.f32 %v716_v34, %v961_v42  ;;  %v959_v55 = vmul.f32 0.1, %v708_v44  ;;  %v999_v56 = vmul.f32 0.1, %v868_v45 }
 0x110   : > { %v1076_v54 = vmax.f32 %v876_v35, %v1001_v43  ;;  %1410 = vst.msk [vmem:[%s2109_s6 + $0x40] sm:$0xf] %vm1393_vm3, %v1707_v49  ;;  %v964_v59 = vmul.f32 0.1, %v729_v51  ;;  %v1004_v60 = vmul.f32 0.1, %v889_v52  ;;  %v721_v61 = vadd.f32 %v2098_v47, %v720_v57  ;;  %v1842_v3 = vpop.f32.mrf.mxu0  ;;  %v1882_v4 = vpop.f32.mrf.mxu1 }
 0x111   : > { %1450 = vst.msk [vmem:[%s2109_s6 + $0xe0] sm:$0xf] %vm1393_vm3, %v1747_v50  ;;  %v881_v62 = vadd.f32 %v2098_v47, %v880_v58  ;;  %v1710_v63 = vpack.c.bf16 %v1036_v53, %v1036_v53  ;;  %v1034_v1 = vmax.f32 %v708_v44, %v959_v55  ;;  %v1074_v2 = vmax.f32 %v868_v45, %v999_v56 }
 0x112   : > { %v1750_v0 = vpack.c.bf16 %v1076_v54, %v1076_v54  ;;  %v1039_v5 = vmax.f32 %v729_v51, %v964_v59  ;;  %v1079_v6 = vmax.f32 %v889_v52, %v1004_v60  ;;  %v962_v7 = vmul.f32 0.1, %v721_v61  ;;  %v723_v13 = vpop.f32.mrf.mxu0  ;;  %v883_v14 = vpop.f32.mrf.mxu1 }
 0x113   : > { %v1002_v8 = vmul.f32 0.1, %v881_v62  ;;  %1413 = vst.msk [vmem:[%s2109_s6 + $0x4c] sm:$0xf] %vm1393_vm3, %v1710_v63  ;;  %v1708_v9 = vpack.c.bf16 %v1034_v1, %v1034_v1  ;;  %v1748_v10 = vpack.c.bf16 %v1074_v2, %v1074_v2  ;;  %v732_v11 = vadd.f32 %v1842_v3, %v2098_v47 }
 0x114   : > { %1453 = vst.msk [vmem:[%s2109_s6 + $0xec] sm:$0xf] %vm1393_vm3, %v1750_v0  ;;  %v892_v12 = vadd.f32 %v1882_v4, %v2098_v47  ;;  %v1713_v15 = vpack.c.bf16 %v1039_v5, %v1039_v5  ;;  %v1753_v16 = vpack.c.bf16 %v1079_v6, %v1079_v6  ;;  %v1037_v17 = vmax.f32 %v721_v61, %v962_v7  ;;  %v1845_v23 = vpop.f32.mrf.mxu0  ;;  %v1885_v24 = vpop.f32.mrf.mxu1 }
 0x115   : > { %v1077_v18 = vmax.f32 %v881_v62, %v1002_v8  ;;  %1411 = vst.msk [vmem:[%s2109_s6 + $0x44] sm:$0xf] %vm1393_vm3, %v1708_v9  ;;  %1451 = vst.msk [vmem:[%s2109_s6 + $0xe4] sm:$0xf] %vm1393_vm3, %v1748_v10  ;;  %v965_v19 = vmul.f32 0.1, %v732_v11  ;;  %v724_v21 = vadd.f32 %v2098_v47, %v723_v13  ;;  %v884_v22 = vadd.f32 %v2098_v47, %v883_v14 }
 0x116   : > { %v1005_v20 = vmul.f32 0.1, %v892_v12  ;;  %1416 = vst.msk [vmem:[%s2109_s6 + $0x58] sm:$0xf] %vm1393_vm3, %v1713_v15  ;;  %1456 = vst.msk [vmem:[%s2109_s6 + $0xf8] sm:$0xf] %vm1393_vm3, %v1753_v16  ;;  %v1711_v25 = vpack.c.bf16 %v1037_v17, %v1037_v17  ;;  %v745_v27 = vadd.f32 %v1845_v23, %v2098_v47  ;;  %v905_v28 = vadd.f32 %v1885_v24, %v2098_v47  ;;  %v736_v33 = vpop.f32.mrf.mxu0  ;;  %v896_v34 = vpop.f32.mrf.mxu1 }
 0x117   : > { %v1751_v26 = vpack.c.bf16 %v1077_v18, %v1077_v18  ;;  %v1040_v29 = vmax.f32 %v732_v11, %v965_v19  ;;  %v963_v31 = vmul.f32 0.1, %v724_v21  ;;  %v1003_v32 = vmul.f32 0.1, %v884_v22 }
 0x118   : > { %v1080_v30 = vmax.f32 %v892_v12, %v1005_v20  ;;  %1414 = vst.msk [vmem:[%s2109_s6 + $0x50] sm:$0xf] %vm1393_vm3, %v1711_v25  ;;  %v968_v35 = vmul.f32 0.1, %v745_v27  ;;  %v1008_v36 = vmul.f32 0.1, %v905_v28  ;;  %v737_v37 = vadd.f32 %v2098_v47, %v736_v33  ;;  %v1846_v43 = vpop.f32.mrf.mxu0  ;;  %v1886_v44 = vpop.f32.mrf.mxu1 }
 0x119   : > { %1454 = vst.msk [vmem:[%s2109_s6 + $0xf0] sm:$0xf] %vm1393_vm3, %v1751_v26  ;;  %v897_v38 = vadd.f32 %v2098_v47, %v896_v34  ;;  %v1714_v39 = vpack.c.bf16 %v1040_v29, %v1040_v29  ;;  %v1038_v41 = vmax.f32 %v724_v21, %v963_v31  ;;  %v1078_v42 = vmax.f32 %v884_v22, %v1003_v32 }
 0x11a   : > { %v1754_v40 = vpack.c.bf16 %v1080_v30, %v1080_v30  ;;  %v1043_v45 = vmax.f32 %v745_v27, %v968_v35  ;;  %v1083_v46 = vmax.f32 %v905_v28, %v1008_v36  ;;  %v966_v48 = vmul.f32 0.1, %v737_v37  ;;  %v739_v54 = vpop.f32.mrf.mxu0  ;;  %v899_v55 = vpop.f32.mrf.mxu1 }
 0x11b   : > { %v1006_v49 = vmul.f32 0.1, %v897_v38  ;;  %1417 = vst.msk [vmem:[%s2109_s6 + $0x5c] sm:$0xf] %vm1393_vm3, %v1714_v39  ;;  %v1712_v50 = vpack.c.bf16 %v1038_v41, %v1038_v41  ;;  %v1752_v51 = vpack.c.bf16 %v1078_v42, %v1078_v42  ;;  %v748_v52 = vadd.f32 %v1846_v43, %v2098_v47 }
 0x11c   : > { %1457 = vst.msk [vmem:[%s2109_s6 + $0xfc] sm:$0xf] %vm1393_vm3, %v1754_v40  ;;  %v908_v53 = vadd.f32 %v1886_v44, %v2098_v47  ;;  %v1717_v56 = vpack.c.bf16 %v1043_v45, %v1043_v45  ;;  %v1757_v57 = vpack.c.bf16 %v1083_v46, %v1083_v46  ;;  %v1041_v58 = vmax.f32 %v737_v37, %v966_v48  ;;  %v1849_v0 = vpop.f32.mrf.mxu0  ;;  %v1889_v1 = vpop.f32.mrf.mxu1 }
 0x11d   : > { %v1081_v59 = vmax.f32 %v897_v38, %v1006_v49  ;;  %1415 = vst.msk [vmem:[%s2109_s6 + $0x54] sm:$0xf] %vm1393_vm3, %v1712_v50  ;;  %1455 = vst.msk [vmem:[%s2109_s6 + $0xf4] sm:$0xf] %vm1393_vm3, %v1752_v51  ;;  %v969_v60 = vmul.f32 0.1, %v748_v52  ;;  %v740_v62 = vadd.f32 %v2098_v47, %v739_v54  ;;  %v900_v63 = vadd.f32 %v2098_v47, %v899_v55 }
 0x11e   : > { %v1009_v61 = vmul.f32 0.1, %v908_v53  ;;  %1420 = vst.msk [vmem:[%s2109_s6 + $0x68] sm:$0xf] %vm1393_vm3, %v1717_v56  ;;  %1460 = vst.msk [vmem:[%s2109_s6 + $0x108] sm:$0xf] %vm1393_vm3, %v1757_v57  ;;  %v1715_v2 = vpack.c.bf16 %v1041_v58, %v1041_v58  ;;  %v761_v4 = vadd.f32 %v1849_v0, %v2098_v47  ;;  %v921_v5 = vadd.f32 %v1889_v1, %v2098_v47  ;;  %v752_v10 = vpop.f32.mrf.mxu0  ;;  %v912_v11 = vpop.f32.mrf.mxu1 }
 0x11f   : > { %v1755_v3 = vpack.c.bf16 %v1081_v59, %v1081_v59  ;;  %v1044_v6 = vmax.f32 %v748_v52, %v969_v60  ;;  %v967_v8 = vmul.f32 0.1, %v740_v62  ;;  %v1007_v9 = vmul.f32 0.1, %v900_v63 }
 0x120   : > { %v1084_v7 = vmax.f32 %v908_v53, %v1009_v61  ;;  %1418 = vst.msk [vmem:[%s2109_s6 + $0x60] sm:$0xf] %vm1393_vm3, %v1715_v2  ;;  %v972_v12 = vmul.f32 0.1, %v761_v4  ;;  %v1012_v13 = vmul.f32 0.1, %v921_v5  ;;  %v753_v14 = vadd.f32 %v2098_v47, %v752_v10  ;;  %v1850_v20 = vpop.f32.mrf.mxu0  ;;  %v1890_v21 = vpop.f32.mrf.mxu1 }
 0x121   : > { %1458 = vst.msk [vmem:[%s2109_s6 + $0x100] sm:$0xf] %vm1393_vm3, %v1755_v3  ;;  %v913_v15 = vadd.f32 %v2098_v47, %v912_v11  ;;  %v1718_v16 = vpack.c.bf16 %v1044_v6, %v1044_v6  ;;  %v1042_v18 = vmax.f32 %v740_v62, %v967_v8  ;;  %v1082_v19 = vmax.f32 %v900_v63, %v1007_v9 }
 0x122   : > { %v1758_v17 = vpack.c.bf16 %v1084_v7, %v1084_v7  ;;  %v1047_v22 = vmax.f32 %v761_v4, %v972_v12  ;;  %v1087_v23 = vmax.f32 %v921_v5, %v1012_v13  ;;  %v970_v24 = vmul.f32 0.1, %v753_v14  ;;  %v755_v30 = vpop.f32.mrf.mxu0  ;;  %v915_v31 = vpop.f32.mrf.mxu1 }
 0x123   : > { %v1010_v25 = vmul.f32 0.1, %v913_v15  ;;  %1421 = vst.msk [vmem:[%s2109_s6 + $0x6c] sm:$0xf] %vm1393_vm3, %v1718_v16  ;;  %v1716_v26 = vpack.c.bf16 %v1042_v18, %v1042_v18  ;;  %v1756_v27 = vpack.c.bf16 %v1082_v19, %v1082_v19  ;;  %v764_v28 = vadd.f32 %v1850_v20, %v2098_v47 }
 0x124   : > { %1461 = vst.msk [vmem:[%s2109_s6 + $0x10c] sm:$0xf] %vm1393_vm3, %v1758_v17  ;;  %v924_v29 = vadd.f32 %v1890_v21, %v2098_v47  ;;  %v1721_v32 = vpack.c.bf16 %v1047_v22, %v1047_v22  ;;  %v1761_v33 = vpack.c.bf16 %v1087_v23, %v1087_v23  ;;  %v1045_v34 = vmax.f32 %v753_v14, %v970_v24  ;;  %v1853_v40 = vpop.f32.mrf.mxu0  ;;  %v1893_v41 = vpop.f32.mrf.mxu1 }
 0x125   : > { %v1085_v35 = vmax.f32 %v913_v15, %v1010_v25  ;;  %1419 = vst.msk [vmem:[%s2109_s6 + $0x64] sm:$0xf] %vm1393_vm3, %v1716_v26  ;;  %1459 = vst.msk [vmem:[%s2109_s6 + $0x104] sm:$0xf] %vm1393_vm3, %v1756_v27  ;;  %v973_v36 = vmul.f32 0.1, %v764_v28  ;;  %v756_v38 = vadd.f32 %v2098_v47, %v755_v30  ;;  %v916_v39 = vadd.f32 %v2098_v47, %v915_v31 }
 0x126   : > { %v1013_v37 = vmul.f32 0.1, %v924_v29  ;;  %1424 = vst.msk [vmem:[%s2109_s6 + $0x78] sm:$0xf] %vm1393_vm3, %v1721_v32  ;;  %1464 = vst.msk [vmem:[%s2109_s6 + $0x118] sm:$0xf] %vm1393_vm3, %v1761_v33  ;;  %v1719_v42 = vpack.c.bf16 %v1045_v34, %v1045_v34  ;;  %v777_v44 = vadd.f32 %v1853_v40, %v2098_v47  ;;  %v937_v45 = vadd.f32 %v1893_v41, %v2098_v47  ;;  %v768_v51 = vpop.f32.mrf.mxu0  ;;  %v928_v52 = vpop.f32.mrf.mxu1 }
 0x127   : > { %v1759_v43 = vpack.c.bf16 %v1085_v35, %v1085_v35  ;;  %v1048_v46 = vmax.f32 %v764_v28, %v973_v36  ;;  %v971_v49 = vmul.f32 0.1, %v756_v38  ;;  %v1011_v50 = vmul.f32 0.1, %v916_v39 }
 0x128   : > { %v1088_v48 = vmax.f32 %v924_v29, %v1013_v37  ;;  %1422 = vst.msk [vmem:[%s2109_s6 + $0x70] sm:$0xf] %vm1393_vm3, %v1719_v42  ;;  %v976_v53 = vmul.f32 0.1, %v777_v44  ;;  %v1016_v54 = vmul.f32 0.1, %v937_v45  ;;  %v769_v55 = vadd.f32 %v2098_v47, %v768_v51  ;;  %v1854_v61 = vpop.f32.mrf.mxu0  ;;  %v1894_v62 = vpop.f32.mrf.mxu1 }
 0x129   : > { %1462 = vst.msk [vmem:[%s2109_s6 + $0x110] sm:$0xf] %vm1393_vm3, %v1759_v43  ;;  %v929_v56 = vadd.f32 %v2098_v47, %v928_v52  ;;  %v1722_v57 = vpack.c.bf16 %v1048_v46, %v1048_v46  ;;  %v1046_v59 = vmax.f32 %v756_v38, %v971_v49  ;;  %v1086_v60 = vmax.f32 %v916_v39, %v1011_v50 }
 0x12a   : > { %v1762_v58 = vpack.c.bf16 %v1088_v48, %v1088_v48  ;;  %v1051_v63 = vmax.f32 %v777_v44, %v976_v53  ;;  %v1091_v0 = vmax.f32 %v937_v45, %v1016_v54  ;;  %v974_v1 = vmul.f32 0.1, %v769_v55  ;;  %v771_v6 = vpop.f32.mrf.mxu0  ;;  %v931_v7 = vpop.f32.mrf.mxu1 }
 0x12b   : > { %v1014_v2 = vmul.f32 0.1, %v929_v56  ;;  %1425 = vst.msk [vmem:[%s2109_s6 + $0x7c] sm:$0xf] %vm1393_vm3, %v1722_v57  ;;  %v1720_v3 = vpack.c.bf16 %v1046_v59, %v1046_v59  ;;  %v1760_v4 = vpack.c.bf16 %v1086_v60, %v1086_v60  ;;  %v780_v5 = vadd.f32 %v1854_v61, %v2098_v47 }
 0x12c   : > { %1465 = vst.msk [vmem:[%s2109_s6 + $0x11c] sm:$0xf] %vm1393_vm3, %v1762_v58  ;;  %v1725_v8 = vpack.c.bf16 %v1051_v63, %v1051_v63  ;;  %v1765_v9 = vpack.c.bf16 %v1091_v0, %v1091_v0  ;;  %v1049_v10 = vmax.f32 %v769_v55, %v974_v1  ;;  %v772_v13 = vadd.f32 %v2098_v47, %v771_v6  ;;  %v1857_v15 = vpop.f32.mrf.mxu0 }
 0x12d   : > { %v1089_v11 = vmax.f32 %v929_v56, %v1014_v2  ;;  %1423 = vst.msk [vmem:[%s2109_s6 + $0x74] sm:$0xf] %vm1393_vm3, %v1720_v3  ;;  %1463 = vst.msk [vmem:[%s2109_s6 + $0x114] sm:$0xf] %vm1393_vm3, %v1760_v4  ;;  %v977_v12 = vmul.f32 0.1, %v780_v5  ;;  %v932_v14 = vadd.f32 %v2098_v47, %v931_v7  ;;  %v793_v18 = vadd.f32 %v1857_v15, %v2098_v47 }
 0x12e   : > { %1428 = vst.msk [vmem:[%s2109_s6 + $0x88] sm:$0xf] %vm1393_vm3, %v1725_v8  ;;  %1468 = vst.msk [vmem:[%s2109_s6 + $0x128] sm:$0xf] %vm1393_vm3, %v1765_v9  ;;  %v1723_v16 = vpack.c.bf16 %v1049_v10, %v1049_v10  ;;  %v975_v20 = vmul.f32 0.1, %v772_v13  ;;  %v784_v22 = vpop.f32.mrf.mxu0 }
 0x12f   : > { %v1763_v17 = vpack.c.bf16 %v1089_v11, %v1089_v11  ;;  %v1052_v19 = vmax.f32 %v780_v5, %v977_v12  ;;  %v1015_v21 = vmul.f32 0.1, %v932_v14  ;;  %v980_v23 = vmul.f32 0.1, %v793_v18 }
 0x130   : > { %1426 = vst.msk [vmem:[%s2109_s6 + $0x80] sm:$0xf] %vm1393_vm3, %v1723_v16  ;;  %v785_v24 = vadd.f32 %v2098_v47, %v784_v22  ;;  %v1050_v26 = vmax.f32 %v772_v13, %v975_v20  ;;  %v1858_v28 = vpop.f32.mrf.mxu0 }
 0x131   : > { %1466 = vst.msk [vmem:[%s2109_s6 + $0x120] sm:$0xf] %vm1393_vm3, %v1763_v17  ;;  %v1726_v25 = vpack.c.bf16 %v1052_v19, %v1052_v19  ;;  %v1090_v27 = vmax.f32 %v932_v14, %v1015_v21  ;;  %v1055_v29 = vmax.f32 %v793_v18, %v980_v23  ;;  %v796_v31 = vadd.f32 %v1858_v28, %v2098_v47 }
 0x132   : > { %v978_v30 = vmul.f32 0.1, %v785_v24  ;;  %v1724_v32 = vpack.c.bf16 %v1050_v26, %v1050_v26  ;;  %v787_v34 = vpop.f32.mrf.mxu0 }
 0x133   : > { %1429 = vst.msk [vmem:[%s2109_s6 + $0x8c] sm:$0xf] %vm1393_vm3, %v1726_v25  ;;  %v1764_v33 = vpack.c.bf16 %v1090_v27, %v1090_v27  ;;  %v1729_v35 = vpack.c.bf16 %v1055_v29, %v1055_v29  ;;  %v981_v37 = vmul.f32 0.1, %v796_v31  ;;  %v788_v38 = vadd.f32 %v2098_v47, %v787_v34 }
 0x134   : > { %v1053_v36 = vmax.f32 %v785_v24, %v978_v30  ;;  %1427 = vst.msk [vmem:[%s2109_s6 + $0x84] sm:$0xf] %vm1393_vm3, %v1724_v32 }
 0x135   : > { %1467 = vst.msk [vmem:[%s2109_s6 + $0x124] sm:$0xf] %vm1393_vm3, %v1764_v33  ;;  %1432 = vst.msk [vmem:[%s2109_s6 + $0x98] sm:$0xf] %vm1393_vm3, %v1729_v35  ;;  %v1056_v40 = vmax.f32 %v796_v31, %v981_v37  ;;  %v979_v41 = vmul.f32 0.1, %v788_v38 }
 0x136   : > { %v1727_v39 = vpack.c.bf16 %v1053_v36, %v1053_v36 }
 0x137   : > { %v1730_v42 = vpack.c.bf16 %v1056_v40, %v1056_v40  ;;  %v1054_v43 = vmax.f32 %v788_v38, %v979_v41 }
 0x138   : > { %1430 = vst.msk [vmem:[%s2109_s6 + $0x90] sm:$0xf] %vm1393_vm3, %v1727_v39 }
 0x139   : > { %1433 = vst.msk [vmem:[%s2109_s6 + $0x9c] sm:$0xf] %vm1393_vm3, %v1730_v42  ;;  %v1728_v44 = vpack.c.bf16 %v1054_v43, %v1054_v43 }
 0x13b   : > { %1431 = vst.msk [vmem:[%s2109_s6 + $0x94] sm:$0xf] %vm1393_vm3, %v1728_v44 }
 0x13c PF: > { %s13_s12 = sadd.s32 1, %s1963_s12  }
 0x13d   : > { %p10_p4 = scmp.ge.s32.totalorder %s13_s12, 5  }
 0x13f   :  { %12 = sbr.rel (!%p10_p4) target bundleno = 1 (0x1), region = 62 }

// kernel: ppo_forward.4
= control target key start
LH: loop header
LB: loop body
LE: loop exit
PB: predicated region body
PF: predicated region fallthrough
CT: control target
= control target key end

     0   :  { %v1307_v0 = vmov 0   ;;  %vm365_vm0 = vcmask 130048   ;;  %vm968_vm1 = vcmask 257024   ;;  %s1777_s1 = inlined_call_operand.vmem [shape: bf16[144,32], index: 1, kind: input, shape index: {}]   ;;  %s1778_s0 = inlined_call_operand.vmem [shape: bf16[392,144], index: 0, kind: input, shape index: {}]   ;;  %s1779_s2 = inlined_call_operand.vmem [shape: f32[1,32], index: 2, kind: input, shape index: {}]   ;;  %s1780_s3 = inlined_call_operand.vmem [shape: bf16[392,32], index: 3, kind: output, shape index: {}]  }
   0x1   :  { %441 = vmatprep.subr.bf16.mxu0 %v1307_v0  ;;  %v1224_v1 = vld [vmem:[%s1777_s1 + $0x38] sm:$0xff]   ;;  %1205 = vmatprep.subr.bf16.mxu1 %v1307_v0  ;;  %v1225_v2 = vld [vmem:[%s1777_s1 + $0x30] sm:$0xff]   ;;  %v1226_v3 = vld [vmem:[%s1777_s1 + $0x28] sm:$0xff]  }
   0x2   :  { %442 = vmatpush1.bf16.msra.mxu0 %v1224_v1  ;;  %1214 = vmatpush1.bf16.msra.mxu1 %v1224_v1  ;;  %v1227_v4 = vld [vmem:[%s1777_s1 + $0x20] sm:$0xff]   ;;  %v1238_v6 = vld [vmem:[%s1778_s0 + $0xd4] ss:$8 sps:$4 sm:$0xff]   ;;  %v1230_v9 = vld [vmem:[%s1777_s1 + $0x8] sm:$0xff]  }
   0x3   :  { %443 = vmatprep.subr.bf16.mxu0 %v1307_v0  ;;  %1206 = vmatprep.subr.bf16.mxu1 %v1307_v0  ;;  %v1235_v5 = vld [vmem:[%s1778_s0 + $0x4] ss:$8 sps:$4 sm:$0xff]   ;;  %v1228_v7 = vld [vmem:[%s1777_s1 + $0x18] sm:$0xff]   ;;  %v1229_v8 = vld [vmem:[%s1777_s1 + $0x10] sm:$0xff]  }
   0x4   :  { %1082 = vmatprep.mubr.msk.bf16.mxu0 %vm365_vm0, %v1235_v5  ;;  %1095 = vmatprep.mubr.msk.bf16.mxu1 %vm365_vm0, %v1238_v6  ;;  %v1231_v10 = vld [vmem:[%s1777_s1] sm:$0xff]   ;;  %v1236_v13 = vld [vmem:[%s1778_s0 + $0xd0] ss:$8 sps:$4 sm:$0xff]   ;;  %v1239_v14 = vld [vmem:[%s1778_s0 + $0x14] ss:$8 sps:$4 sm:$0xff]  }
   0x5   :  { %v1232_v11 = vld [vmem:[%s1777_s1 + $0x40] sm:$0xff]   ;;  %v1241_v16 = vld [vmem:[%s1778_s0 + $0x10] ss:$8 sps:$4 sm:$0xff]   ;;  %v1248_v19 = vld [vmem:[%s1778_s0 + $0xf4] ss:$8 sps:$4 sm:$0xff]  }
   0x6   :  { %444 = vmatpush1.bf16.msra.mxu0 %v1225_v2  ;;  %1215 = vmatpush1.bf16.msra.mxu1 %v1225_v2  ;;  %v1233_v12 = vld [vmem:[%s1778_s0] ss:$8 sps:$4 sm:$0xff]   ;;  %v1242_v15 = vld [vmem:[%s1778_s0 + $0xe4] ss:$8 sps:$4 sm:$0xff]   ;;  %v1250_v21 = vld [vmem:[%s1778_s0 + $0xf0] ss:$8 sps:$4 sm:$0xff]  }
   0x7   :  { %445 = vmatprep.subr.bf16.mxu0 %v1307_v0  ;;  %1207 = vmatprep.subr.bf16.mxu1 %v1307_v0  ;;  %v1244_v17 = vld [vmem:[%s1778_s0 + $0xe0] ss:$8 sps:$4 sm:$0xff]   ;;  %v1245_v18 = vld [vmem:[%s1778_s0 + $0x24] ss:$8 sps:$4 sm:$0xff]   ;;  %v1251_v22 = vld [vmem:[%s1778_s0 + $0x34] ss:$8 sps:$4 sm:$0xff]  }
   0x8   :  { %v1247_v20 = vld [vmem:[%s1778_s0 + $0x20] ss:$8 sps:$4 sm:$0xff]   ;;  %v1254_v23 = vld [vmem:[%s1778_s0 + $0x104] ss:$8 sps:$4 sm:$0xff]   ;;  %v1253_v24 = vld [vmem:[%s1778_s0 + $0x30] ss:$8 sps:$4 sm:$0xff]  }
   0x9   :  { %v1256_v25 = vld [vmem:[%s1778_s0 + $0x100] ss:$8 sps:$4 sm:$0xff]   ;;  %v1257_v26 = vld [vmem:[%s1778_s0 + $0x44] ss:$8 sps:$4 sm:$0xff]   ;;  %v1260_v27 = vld [vmem:[%s1778_s0 + $0x114] ss:$8 sps:$4 sm:$0xff]  }
   0xa   :  { %446 = vmatpush1.bf16.msra.mxu0 %v1226_v3  ;;  %1216 = vmatpush1.bf16.msra.mxu1 %v1226_v3  ;;  %v1259_v28 = vld [vmem:[%s1778_s0 + $0x40] ss:$8 sps:$4 sm:$0xff]   ;;  %v1262_v29 = vld [vmem:[%s1778_s0 + $0x110] ss:$8 sps:$4 sm:$0xff]   ;;  %v1263_v30 = vld [vmem:[%s1778_s0 + $0x54] ss:$8 sps:$4 sm:$0xff]  }
   0xb   :  { %447 = vmatprep.subr.bf16.mxu0 %v1307_v0  ;;  %1208 = vmatprep.subr.bf16.mxu1 %v1307_v0  ;;  %v1266_v31 = vld [vmem:[%s1778_s0 + $0x124] ss:$8 sps:$4 sm:$0xff]   ;;  %v1265_v32 = vld [vmem:[%s1778_s0 + $0x50] ss:$8 sps:$4 sm:$0xff]   ;;  %v1268_v33 = vld [vmem:[%s1778_s0 + $0x120] ss:$8 sps:$4 sm:$0xff]  }
   0xc   :  { %v1269_v34 = vld [vmem:[%s1778_s0 + $0x64] ss:$8 sps:$4 sm:$0xff]   ;;  %v1272_v35 = vld [vmem:[%s1778_s0 + $0x134] ss:$8 sps:$4 sm:$0xff]   ;;  %v1271_v36 = vld [vmem:[%s1778_s0 + $0x60] ss:$8 sps:$4 sm:$0xff]  }
   0xd   :  { %v1274_v37 = vld [vmem:[%s1778_s0 + $0x130] ss:$8 sps:$4 sm:$0xff]   ;;  %v1275_v38 = vld [vmem:[%s1778_s0 + $0x74] ss:$8 sps:$4 sm:$0xff]   ;;  %v1278_v39 = vld [vmem:[%s1778_s0 + $0x144] ss:$8 sps:$4 sm:$0xff]  }
   0xe   :  { %448 = vmatpush1.bf16.msra.mxu0 %v1227_v4  ;;  %1217 = vmatpush1.bf16.msra.mxu1 %v1227_v4  ;;  %v1277_v40 = vld [vmem:[%s1778_s0 + $0x70] ss:$8 sps:$4 sm:$0xff]   ;;  %v1280_v41 = vld [vmem:[%s1778_s0 + $0x140] ss:$8 sps:$4 sm:$0xff]   ;;  %v1281_v42 = vld [vmem:[%s1778_s0 + $0x84] ss:$8 sps:$4 sm:$0xff]  }
   0xf   :  { %449 = vmatprep.subr.bf16.mxu0 %v1307_v0  ;;  %1209 = vmatprep.subr.bf16.mxu1 %v1307_v0  ;;  %v1284_v43 = vld [vmem:[%s1778_s0 + $0x154] ss:$8 sps:$4 sm:$0xff]   ;;  %v1283_v44 = vld [vmem:[%s1778_s0 + $0x80] ss:$8 sps:$4 sm:$0xff]   ;;  %v1286_v45 = vld [vmem:[%s1778_s0 + $0x150] ss:$8 sps:$4 sm:$0xff]  }
  0x10   :  { %v1287_v46 = vld [vmem:[%s1778_s0 + $0x94] ss:$8 sps:$4 sm:$0xff]   ;;  %v1290_v47 = vld [vmem:[%s1778_s0 + $0x164] ss:$8 sps:$4 sm:$0xff]   ;;  %v1289_v48 = vld [vmem:[%s1778_s0 + $0x90] ss:$8 sps:$4 sm:$0xff]  }
  0x11   :  { %v1292_v49 = vld [vmem:[%s1778_s0 + $0x160] ss:$8 sps:$4 sm:$0xff]   ;;  %v1293_v50 = vld [vmem:[%s1778_s0 + $0xa4] ss:$8 sps:$4 sm:$0xff]   ;;  %v1296_v51 = vld [vmem:[%s1778_s0 + $0x174] ss:$8 sps:$4 sm:$0xff]  }
  0x12   :  { %450 = vmatpush1.bf16.msra.mxu0 %v1228_v7  ;;  %1218 = vmatpush1.bf16.msra.mxu1 %v1228_v7  ;;  %v63_v52 = vld [vmem:[%s1778_s0 + $0x180] sm:$0xff]  ;;  %v1298_v54 = vld [vmem:[%s1778_s0 + $0x170] ss:$8 sps:$4 sm:$0xff]   ;;  %v1299_v55 = vld [vmem:[%s1778_s0 + $0xb4] ss:$8 sps:$4 sm:$0xff]  }
  0x13   :  { %451 = vmatprep.subr.bf16.mxu0 %v1307_v0  ;;  %1210 = vmatprep.subr.bf16.mxu1 %v1307_v0  ;;  %v1295_v53 = vld [vmem:[%s1778_s0 + $0xa0] ss:$8 sps:$4 sm:$0xff]   ;;  %v1072_v56 = vcombine.high %v63_v52, %v63_v52  ;;  %v1301_v57 = vld [vmem:[%s1778_s0 + $0xb0] ss:$8 sps:$4 sm:$0xff]   ;;  %v1071_v58 = vcombine.low %v63_v52, %v63_v52  ;;  %v1304_v59 = vld [vmem:[%s1778_s0 + $0xc4] ss:$8 sps:$4 sm:$0xff]  }
  0x14   :  { %v1306_v60 = vld [vmem:[%s1778_s0 + $0xc0] ss:$8 sps:$4 sm:$0xff]  }
  0x15   :  { %v1530_v61 = vld [vmem:[%s1779_s2] ss:$0 sm:$0xff] }
  0x16   :  { %452 = vmatpush1.bf16.msra.mxu0 %v1229_v8  ;;  %1219 = vmatpush1.bf16.msra.mxu1 %v1229_v8 }
  0x17   :  { %453 = vmatprep.subr.bf16.mxu0 %v1307_v0  ;;  %1211 = vmatprep.subr.bf16.mxu1 %v1307_v0 }
  0x1a   :  { %454 = vmatpush1.bf16.msra.mxu0 %v1230_v9  ;;  %1220 = vmatpush1.bf16.msra.mxu1 %v1230_v9 }
  0x1b   :  { %455 = vmatprep.subr.bf16.mxu0 %v1307_v0  ;;  %1212 = vmatprep.subr.bf16.mxu1 %v1307_v0 }
  0x1e   :  { %456 = vmatpush1.bf16.msra.mxu0 %v1231_v10  ;;  %1221 = vmatpush1.bf16.msra.mxu1 %v1231_v10 }
  0x1f   :  { %471 = vmatprep.subr.bf16.mxu0 %v1307_v0  ;;  %1213 = vmatprep.subr.bf16.mxu1 %v1307_v0 }
  0x22   :  { %472 = vmatpush2.bf16.msra.mxu0 %v1232_v11  ;;  %1222 = vmatpush2.bf16.msra.mxu1 %v1232_v11 }
  0x25   :  { %474 = vmatmul.mubr.bf16.vlgmr.msra.gmra.mxu0 %v1233_v12  ;;  %578 = vmatmul.mubr.bf16.vlgmr.msra.gmra.mxu1 %v1236_v13 }
  0x26   :  { %1083 = vmatprep.mubr.msk.bf16.mxu0 %vm365_vm0, %v1239_v14  ;;  %1096 = vmatprep.mubr.msk.bf16.mxu1 %vm365_vm0, %v1242_v15 }
  0x2d   :  { %482 = vmatmul.mubr.bf16.gmra.mxu0 %v1241_v16  ;;  %586 = vmatmul.mubr.bf16.gmra.mxu1 %v1244_v17 }
  0x2e   :  { %1084 = vmatprep.mubr.msk.bf16.mxu0 %vm365_vm0, %v1245_v18  ;;  %1097 = vmatprep.mubr.msk.bf16.mxu1 %vm365_vm0, %v1248_v19 }
  0x35   :  { %490 = vmatmul.mubr.bf16.gmra.mxu0 %v1247_v20  ;;  %594 = vmatmul.mubr.bf16.gmra.mxu1 %v1250_v21 }
  0x36   :  { %1085 = vmatprep.mubr.msk.bf16.mxu0 %vm365_vm0, %v1251_v22  ;;  %1098 = vmatprep.mubr.msk.bf16.mxu1 %vm365_vm0, %v1254_v23 }
  0x3d   :  { %498 = vmatmul.mubr.bf16.gmra.mxu0 %v1253_v24  ;;  %602 = vmatmul.mubr.bf16.gmra.mxu1 %v1256_v25 }
  0x3e   :  { %1086 = vmatprep.mubr.msk.bf16.mxu0 %vm365_vm0, %v1257_v26  ;;  %1099 = vmatprep.mubr.msk.bf16.mxu1 %vm365_vm0, %v1260_v27 }
  0x45   :  { %506 = vmatmul.mubr.bf16.gmra.mxu0 %v1259_v28  ;;  %610 = vmatmul.mubr.bf16.gmra.mxu1 %v1262_v29 }
  0x46   :  { %1087 = vmatprep.mubr.msk.bf16.mxu0 %vm365_vm0, %v1263_v30  ;;  %1100 = vmatprep.mubr.msk.bf16.mxu1 %vm365_vm0, %v1266_v31 }
  0x4d   :  { %514 = vmatmul.mubr.bf16.gmra.mxu0 %v1265_v32  ;;  %618 = vmatmul.mubr.bf16.gmra.mxu1 %v1268_v33 }
  0x4e   :  { %1088 = vmatprep.mubr.msk.bf16.mxu0 %vm365_vm0, %v1269_v34  ;;  %1101 = vmatprep.mubr.msk.bf16.mxu1 %vm365_vm0, %v1272_v35 }
  0x55   :  { %522 = vmatmul.mubr.bf16.gmra.mxu0 %v1271_v36  ;;  %626 = vmatmul.mubr.bf16.gmra.mxu1 %v1274_v37 }
  0x56   :  { %1089 = vmatprep.mubr.msk.bf16.mxu0 %vm365_vm0, %v1275_v38  ;;  %1102 = vmatprep.mubr.msk.bf16.mxu1 %vm365_vm0, %v1278_v39 }
  0x5d   :  { %530 = vmatmul.mubr.bf16.gmra.mxu0 %v1277_v40  ;;  %634 = vmatmul.mubr.bf16.gmra.mxu1 %v1280_v41 }
  0x5e   :  { %1090 = vmatprep.mubr.msk.bf16.mxu0 %vm365_vm0, %v1281_v42  ;;  %1103 = vmatprep.mubr.msk.bf16.mxu1 %vm365_vm0, %v1284_v43 }
  0x65   :  { %538 = vmatmul.mubr.bf16.gmra.mxu0 %v1283_v44  ;;  %642 = vmatmul.mubr.bf16.gmra.mxu1 %v1286_v45 }
  0x66   :  { %1091 = vmatprep.mubr.msk.bf16.mxu0 %vm365_vm0, %v1287_v46  ;;  %1104 = vmatprep.mubr.msk.bf16.mxu1 %vm365_vm0, %v1290_v47 }
  0x6d   :  { %546 = vmatmul.mubr.bf16.gmra.mxu0 %v1289_v48  ;;  %650 = vmatmul.mubr.bf16.gmra.mxu1 %v1292_v49 }
  0x6e   :  { %1092 = vmatprep.mubr.msk.bf16.mxu0 %vm365_vm0, %v1293_v50  ;;  %1105 = vmatprep.mubr.msk.bf16.mxu1 %vm365_vm0, %v1296_v51 }
  0x75   :  { %554 = vmatmul.mubr.bf16.gmra.mxu0 %v1295_v53  ;;  %658 = vmatmul.mubr.bf16.gmra.mxu1 %v1298_v54 }
  0x76   :  { %1093 = vmatprep.mubr.msk.bf16.mxu0 %vm365_vm0, %v1299_v55  ;;  %1106 = vmatprep.mubr.msk.bf16.mxu1 %vm365_vm0, %v1072_v56 }
  0x7d   :  { %562 = vmatmul.mubr.bf16.gmra.mxu0 %v1301_v57  ;;  %666 = vmatmul.mubr.bf16.gmra.mxu1 %v1071_v58 }
  0x7e   :  { %1094 = vmatprep.mubr.msk.bf16.mxu0 %vm365_vm0, %v1304_v59 }
  0x85   :  { %570 = vmatmul.mubr.bf16.gmra.mxu0 %v1306_v60 }
  0xe5   :  { %v475_v62 = vpop.f32.mrf.mxu0  ;;  %v579_v63 = vpop.f32.mrf.mxu1 }
  0xe6   :  { %v476_v0 = vadd.f32 %v1530_v61, %v475_v62  ;;  %v580_v1 = vadd.f32 %v1530_v61, %v579_v63 }
  0xe7   :  { %v477_v2 = vpop.f32.mrf.mxu0  ;;  %v581_v3 = vpop.f32.mrf.mxu1 }
  0xe8   :  { %v673_v4 = vmul.f32 0.1, %v476_v0  ;;  %v699_v5 = vmul.f32 0.1, %v580_v1 }
  0xe9   :  { %v478_v6 = vpop.f32.mrf.mxu0  ;;  %v582_v7 = vpop.f32.mrf.mxu1 }
  0xea   :  { %v722_v8 = vmax.f32 %v476_v0, %v673_v4  ;;  %v479_v9 = vadd.f32 %v1530_v61, %v478_v6  ;;  %v748_v10 = vmax.f32 %v580_v1, %v699_v5  ;;  %v583_v11 = vadd.f32 %v1530_v61, %v582_v7 }
  0xeb   :  { %v480_v12 = vpop.f32.mrf.mxu0  ;;  %v584_v13 = vpop.f32.mrf.mxu1 }
  0xec   :  { %v1156_v14 = vpack.c.bf16 %v722_v8, %v722_v8  ;;  %v674_v15 = vmul.f32 0.1, %v479_v9  ;;  %v1182_v16 = vpack.c.bf16 %v748_v10, %v748_v10  ;;  %v700_v17 = vmul.f32 0.1, %v583_v11 }
  0xed   :  { %v483_v18 = vpop.f32.mrf.mxu0  ;;  %v587_v19 = vpop.f32.mrf.mxu1 }
  0xee   :  { %969 = vst.msk [vmem:[%s1780_s3] sm:$0xf] %vm968_vm1, %v1156_v14  ;;  %v723_v20 = vmax.f32 %v479_v9, %v674_v15  ;;  %995 = vst.msk [vmem:[%s1780_s3 + $0x68] sm:$0xf] %vm968_vm1, %v1182_v16  ;;  %v484_v21 = vadd.f32 %v1530_v61, %v483_v18  ;;  %v749_v22 = vmax.f32 %v583_v11, %v700_v17 }
  0xef   :  { %v588_v23 = vadd.f32 %v1530_v61, %v587_v19  ;;  %v485_v24 = vpop.f32.mrf.mxu0  ;;  %v589_v25 = vpop.f32.mrf.mxu1 }
  0xf0   :  { %v1157_v26 = vpack.c.bf16 %v723_v20, %v723_v20  ;;  %v675_v27 = vmul.f32 0.1, %v484_v21  ;;  %v1183_v28 = vpack.c.bf16 %v749_v22, %v749_v22 }
  0xf1   :  { %v701_v29 = vmul.f32 0.1, %v588_v23  ;;  %v486_v30 = vpop.f32.mrf.mxu0  ;;  %v590_v31 = vpop.f32.mrf.mxu1 }
  0xf2   :  { %970 = vst.msk [vmem:[%s1780_s3 + $0x4] sm:$0xf] %vm968_vm1, %v1157_v26  ;;  %v724_v32 = vmax.f32 %v484_v21, %v675_v27  ;;  %996 = vst.msk [vmem:[%s1780_s3 + $0x6c] sm:$0xf] %vm968_vm1, %v1183_v28  ;;  %v487_v33 = vadd.f32 %v1530_v61, %v486_v30  ;;  %v591_v35 = vadd.f32 %v1530_v61, %v590_v31 }
  0xf3   :  { %v750_v34 = vmax.f32 %v588_v23, %v701_v29  ;;  %v488_v36 = vpop.f32.mrf.mxu0  ;;  %v592_v37 = vpop.f32.mrf.mxu1 }
  0xf4   :  { %v1158_v38 = vpack.c.bf16 %v724_v32, %v724_v32  ;;  %v676_v39 = vmul.f32 0.1, %v487_v33  ;;  %v702_v41 = vmul.f32 0.1, %v591_v35 }
  0xf5   :  { %v1184_v40 = vpack.c.bf16 %v750_v34, %v750_v34  ;;  %v491_v42 = vpop.f32.mrf.mxu0  ;;  %v595_v43 = vpop.f32.mrf.mxu1 }
  0xf6   :  { %971 = vst.msk [vmem:[%s1780_s3 + $0x8] sm:$0xf] %vm968_vm1, %v1158_v38  ;;  %v725_v44 = vmax.f32 %v487_v33, %v676_v39  ;;  %v492_v45 = vadd.f32 %v1530_v61, %v491_v42  ;;  %v751_v46 = vmax.f32 %v591_v35, %v702_v41  ;;  %v596_v47 = vadd.f32 %v1530_v61, %v595_v43 }
  0xf7   :  { %997 = vst.msk [vmem:[%s1780_s3 + $0x70] sm:$0xf] %vm968_vm1, %v1184_v40  ;;  %v493_v48 = vpop.f32.mrf.mxu0  ;;  %v597_v49 = vpop.f32.mrf.mxu1 }
  0xf8   :  { %v1159_v50 = vpack.c.bf16 %v725_v44, %v725_v44  ;;  %v677_v51 = vmul.f32 0.1, %v492_v45  ;;  %v1185_v52 = vpack.c.bf16 %v751_v46, %v751_v46  ;;  %v703_v53 = vmul.f32 0.1, %v596_v47 }
  0xf9   :  { %v494_v54 = vpop.f32.mrf.mxu0  ;;  %v598_v55 = vpop.f32.mrf.mxu1 }
  0xfa   :  { %972 = vst.msk [vmem:[%s1780_s3 + $0xc] sm:$0xf] %vm968_vm1, %v1159_v50  ;;  %v726_v56 = vmax.f32 %v492_v45, %v677_v51  ;;  %998 = vst.msk [vmem:[%s1780_s3 + $0x74] sm:$0xf] %vm968_vm1, %v1185_v52  ;;  %v495_v57 = vadd.f32 %v1530_v61, %v494_v54  ;;  %v752_v58 = vmax.f32 %v596_v47, %v703_v53 }
  0xfb   :  { %v599_v59 = vadd.f32 %v1530_v61, %v598_v55  ;;  %v496_v60 = vpop.f32.mrf.mxu0  ;;  %v600_v62 = vpop.f32.mrf.mxu1 }
  0xfc   :  { %v1160_v63 = vpack.c.bf16 %v726_v56, %v726_v56  ;;  %v678_v0 = vmul.f32 0.1, %v495_v57  ;;  %v1186_v1 = vpack.c.bf16 %v752_v58, %v752_v58 }
  0xfd   :  { %v704_v2 = vmul.f32 0.1, %v599_v59  ;;  %v499_v3 = vpop.f32.mrf.mxu0  ;;  %v603_v4 = vpop.f32.mrf.mxu1 }
  0xfe   :  { %973 = vst.msk [vmem:[%s1780_s3 + $0x10] sm:$0xf] %vm968_vm1, %v1160_v63  ;;  %v727_v5 = vmax.f32 %v495_v57, %v678_v0  ;;  %999 = vst.msk [vmem:[%s1780_s3 + $0x78] sm:$0xf] %vm968_vm1, %v1186_v1  ;;  %v500_v6 = vadd.f32 %v1530_v61, %v499_v3  ;;  %v604_v8 = vadd.f32 %v1530_v61, %v603_v4 }
  0xff   :  { %v753_v7 = vmax.f32 %v599_v59, %v704_v2  ;;  %v501_v9 = vpop.f32.mrf.mxu0  ;;  %v605_v10 = vpop.f32.mrf.mxu1 }
 0x100   :  { %v1161_v11 = vpack.c.bf16 %v727_v5, %v727_v5  ;;  %v679_v12 = vmul.f32 0.1, %v500_v6  ;;  %v705_v14 = vmul.f32 0.1, %v604_v8 }
 0x101   :  { %v1187_v13 = vpack.c.bf16 %v753_v7, %v753_v7  ;;  %v502_v15 = vpop.f32.mrf.mxu0  ;;  %v606_v16 = vpop.f32.mrf.mxu1 }
 0x102   :  { %974 = vst.msk [vmem:[%s1780_s3 + $0x14] sm:$0xf] %vm968_vm1, %v1161_v11  ;;  %v728_v17 = vmax.f32 %v500_v6, %v679_v12  ;;  %v503_v18 = vadd.f32 %v1530_v61, %v502_v15  ;;  %v754_v19 = vmax.f32 %v604_v8, %v705_v14  ;;  %v607_v20 = vadd.f32 %v1530_v61, %v606_v16 }
 0x103   :  { %1000 = vst.msk [vmem:[%s1780_s3 + $0x7c] sm:$0xf] %vm968_vm1, %v1187_v13  ;;  %v504_v21 = vpop.f32.mrf.mxu0  ;;  %v608_v22 = vpop.f32.mrf.mxu1 }
 0x104   :  { %v1162_v23 = vpack.c.bf16 %v728_v17, %v728_v17  ;;  %v680_v24 = vmul.f32 0.1, %v503_v18  ;;  %v1188_v25 = vpack.c.bf16 %v754_v19, %v754_v19  ;;  %v706_v26 = vmul.f32 0.1, %v607_v20 }
 0x105   :  { %v507_v27 = vpop.f32.mrf.mxu0  ;;  %v611_v28 = vpop.f32.mrf.mxu1 }
 0x106   :  { %975 = vst.msk [vmem:[%s1780_s3 + $0x18] sm:$0xf] %vm968_vm1, %v1162_v23  ;;  %v729_v29 = vmax.f32 %v503_v18, %v680_v24  ;;  %1001 = vst.msk [vmem:[%s1780_s3 + $0x80] sm:$0xf] %vm968_vm1, %v1188_v25  ;;  %v508_v30 = vadd.f32 %v1530_v61, %v507_v27  ;;  %v755_v31 = vmax.f32 %v607_v20, %v706_v26 }
 0x107   :  { %v612_v32 = vadd.f32 %v1530_v61, %v611_v28  ;;  %v509_v33 = vpop.f32.mrf.mxu0  ;;  %v613_v34 = vpop.f32.mrf.mxu1 }
 0x108   :  { %v1163_v35 = vpack.c.bf16 %v729_v29, %v729_v29  ;;  %v681_v36 = vmul.f32 0.1, %v508_v30  ;;  %v1189_v37 = vpack.c.bf16 %v755_v31, %v755_v31 }
 0x109   :  { %v707_v38 = vmul.f32 0.1, %v612_v32  ;;  %v510_v39 = vpop.f32.mrf.mxu0  ;;  %v614_v40 = vpop.f32.mrf.mxu1 }
 0x10a   :  { %976 = vst.msk [vmem:[%s1780_s3 + $0x1c] sm:$0xf] %vm968_vm1, %v1163_v35  ;;  %v730_v41 = vmax.f32 %v508_v30, %v681_v36  ;;  %1002 = vst.msk [vmem:[%s1780_s3 + $0x84] sm:$0xf] %vm968_vm1, %v1189_v37  ;;  %v511_v42 = vadd.f32 %v1530_v61, %v510_v39  ;;  %v615_v44 = vadd.f32 %v1530_v61, %v614_v40 }
 0x10b   :  { %v756_v43 = vmax.f32 %v612_v32, %v707_v38  ;;  %v512_v45 = vpop.f32.mrf.mxu0  ;;  %v616_v46 = vpop.f32.mrf.mxu1 }
 0x10c   :  { %v1164_v47 = vpack.c.bf16 %v730_v41, %v730_v41  ;;  %v682_v48 = vmul.f32 0.1, %v511_v42  ;;  %v708_v50 = vmul.f32 0.1, %v615_v44 }
 0x10d   :  { %v1190_v49 = vpack.c.bf16 %v756_v43, %v756_v43  ;;  %v515_v51 = vpop.f32.mrf.mxu0  ;;  %v619_v52 = vpop.f32.mrf.mxu1 }
 0x10e   :  { %977 = vst.msk [vmem:[%s1780_s3 + $0x20] sm:$0xf] %vm968_vm1, %v1164_v47  ;;  %v731_v53 = vmax.f32 %v511_v42, %v682_v48  ;;  %v516_v54 = vadd.f32 %v1530_v61, %v515_v51  ;;  %v757_v55 = vmax.f32 %v615_v44, %v708_v50  ;;  %v620_v56 = vadd.f32 %v1530_v61, %v619_v52 }
 0x10f   :  { %1003 = vst.msk [vmem:[%s1780_s3 + $0x88] sm:$0xf] %vm968_vm1, %v1190_v49  ;;  %v517_v57 = vpop.f32.mrf.mxu0  ;;  %v621_v58 = vpop.f32.mrf.mxu1 }
 0x110   :  { %v1165_v59 = vpack.c.bf16 %v731_v53, %v731_v53  ;;  %v683_v60 = vmul.f32 0.1, %v516_v54  ;;  %v1191_v62 = vpack.c.bf16 %v757_v55, %v757_v55  ;;  %v709_v63 = vmul.f32 0.1, %v620_v56 }
 0x111   :  { %v518_v0 = vpop.f32.mrf.mxu0  ;;  %v622_v1 = vpop.f32.mrf.mxu1 }
 0x112   :  { %978 = vst.msk [vmem:[%s1780_s3 + $0x24] sm:$0xf] %vm968_vm1, %v1165_v59  ;;  %v732_v2 = vmax.f32 %v516_v54, %v683_v60  ;;  %1004 = vst.msk [vmem:[%s1780_s3 + $0x8c] sm:$0xf] %vm968_vm1, %v1191_v62  ;;  %v519_v3 = vadd.f32 %v1530_v61, %v518_v0  ;;  %v758_v4 = vmax.f32 %v620_v56, %v709_v63 }
 0x113   :  { %v623_v5 = vadd.f32 %v1530_v61, %v622_v1  ;;  %v520_v6 = vpop.f32.mrf.mxu0  ;;  %v624_v7 = vpop.f32.mrf.mxu1 }
 0x114   :  { %v1166_v8 = vpack.c.bf16 %v732_v2, %v732_v2  ;;  %v684_v9 = vmul.f32 0.1, %v519_v3  ;;  %v1192_v10 = vpack.c.bf16 %v758_v4, %v758_v4 }
 0x115   :  { %v710_v11 = vmul.f32 0.1, %v623_v5  ;;  %v523_v12 = vpop.f32.mrf.mxu0  ;;  %v627_v13 = vpop.f32.mrf.mxu1 }
 0x116   :  { %979 = vst.msk [vmem:[%s1780_s3 + $0x28] sm:$0xf] %vm968_vm1, %v1166_v8  ;;  %v733_v14 = vmax.f32 %v519_v3, %v684_v9  ;;  %1005 = vst.msk [vmem:[%s1780_s3 + $0x90] sm:$0xf] %vm968_vm1, %v1192_v10  ;;  %v524_v15 = vadd.f32 %v1530_v61, %v523_v12  ;;  %v628_v17 = vadd.f32 %v1530_v61, %v627_v13 }
 0x117   :  { %v759_v16 = vmax.f32 %v623_v5, %v710_v11  ;;  %v525_v18 = vpop.f32.mrf.mxu0  ;;  %v629_v19 = vpop.f32.mrf.mxu1 }
 0x118   :  { %v1167_v20 = vpack.c.bf16 %v733_v14, %v733_v14  ;;  %v685_v21 = vmul.f32 0.1, %v524_v15  ;;  %v711_v23 = vmul.f32 0.1, %v628_v17 }
 0x119   :  { %v1193_v22 = vpack.c.bf16 %v759_v16, %v759_v16  ;;  %v526_v24 = vpop.f32.mrf.mxu0  ;;  %v630_v25 = vpop.f32.mrf.mxu1 }
 0x11a   :  { %980 = vst.msk [vmem:[%s1780_s3 + $0x2c] sm:$0xf] %vm968_vm1, %v1167_v20  ;;  %v734_v26 = vmax.f32 %v524_v15, %v685_v21  ;;  %v527_v27 = vadd.f32 %v1530_v61, %v526_v24  ;;  %v760_v28 = vmax.f32 %v628_v17, %v711_v23  ;;  %v631_v29 = vadd.f32 %v1530_v61, %v630_v25 }
 0x11b   :  { %1006 = vst.msk [vmem:[%s1780_s3 + $0x94] sm:$0xf] %vm968_vm1, %v1193_v22  ;;  %v528_v30 = vpop.f32.mrf.mxu0  ;;  %v632_v31 = vpop.f32.mrf.mxu1 }
 0x11c   :  { %v1168_v32 = vpack.c.bf16 %v734_v26, %v734_v26  ;;  %v686_v33 = vmul.f32 0.1, %v527_v27  ;;  %v1194_v34 = vpack.c.bf16 %v760_v28, %v760_v28  ;;  %v712_v35 = vmul.f32 0.1, %v631_v29 }
 0x11d   :  { %v531_v36 = vpop.f32.mrf.mxu0  ;;  %v635_v37 = vpop.f32.mrf.mxu1 }
 0x11e   :  { %981 = vst.msk [vmem:[%s1780_s3 + $0x30] sm:$0xf] %vm968_vm1, %v1168_v32  ;;  %v735_v38 = vmax.f32 %v527_v27, %v686_v33  ;;  %1007 = vst.msk [vmem:[%s1780_s3 + $0x98] sm:$0xf] %vm968_vm1, %v1194_v34  ;;  %v532_v39 = vadd.f32 %v1530_v61, %v531_v36  ;;  %v761_v40 = vmax.f32 %v631_v29, %v712_v35 }
 0x11f   :  { %v636_v41 = vadd.f32 %v1530_v61, %v635_v37  ;;  %v533_v42 = vpop.f32.mrf.mxu0  ;;  %v637_v43 = vpop.f32.mrf.mxu1 }
 0x120   :  { %v1169_v44 = vpack.c.bf16 %v735_v38, %v735_v38  ;;  %v687_v45 = vmul.f32 0.1, %v532_v39  ;;  %v1195_v46 = vpack.c.bf16 %v761_v40, %v761_v40 }
 0x121   :  { %v713_v47 = vmul.f32 0.1, %v636_v41  ;;  %v534_v48 = vpop.f32.mrf.mxu0  ;;  %v638_v49 = vpop.f32.mrf.mxu1 }
 0x122   :  { %982 = vst.msk [vmem:[%s1780_s3 + $0x34] sm:$0xf] %vm968_vm1, %v1169_v44  ;;  %v736_v50 = vmax.f32 %v532_v39, %v687_v45  ;;  %1008 = vst.msk [vmem:[%s1780_s3 + $0x9c] sm:$0xf] %vm968_vm1, %v1195_v46  ;;  %v535_v51 = vadd.f32 %v1530_v61, %v534_v48  ;;  %v639_v53 = vadd.f32 %v1530_v61, %v638_v49 }
 0x123   :  { %v762_v52 = vmax.f32 %v636_v41, %v713_v47  ;;  %v536_v54 = vpop.f32.mrf.mxu0  ;;  %v640_v55 = vpop.f32.mrf.mxu1 }
 0x124   :  { %v1170_v56 = vpack.c.bf16 %v736_v50, %v736_v50  ;;  %v688_v57 = vmul.f32 0.1, %v535_v51  ;;  %v714_v59 = vmul.f32 0.1, %v639_v53 }
 0x125   :  { %v1196_v58 = vpack.c.bf16 %v762_v52, %v762_v52  ;;  %v539_v60 = vpop.f32.mrf.mxu0  ;;  %v643_v62 = vpop.f32.mrf.mxu1 }
 0x126   :  { %983 = vst.msk [vmem:[%s1780_s3 + $0x38] sm:$0xf] %vm968_vm1, %v1170_v56  ;;  %v737_v63 = vmax.f32 %v535_v51, %v688_v57  ;;  %v540_v0 = vadd.f32 %v1530_v61, %v539_v60  ;;  %v763_v1 = vmax.f32 %v639_v53, %v714_v59  ;;  %v644_v2 = vadd.f32 %v1530_v61, %v643_v62 }
 0x127   :  { %1009 = vst.msk [vmem:[%s1780_s3 + $0xa0] sm:$0xf] %vm968_vm1, %v1196_v58  ;;  %v541_v3 = vpop.f32.mrf.mxu0  ;;  %v645_v4 = vpop.f32.mrf.mxu1 }
 0x128   :  { %v1171_v5 = vpack.c.bf16 %v737_v63, %v737_v63  ;;  %v689_v6 = vmul.f32 0.1, %v540_v0  ;;  %v1197_v7 = vpack.c.bf16 %v763_v1, %v763_v1  ;;  %v715_v8 = vmul.f32 0.1, %v644_v2 }
 0x129   :  { %v542_v9 = vpop.f32.mrf.mxu0  ;;  %v646_v10 = vpop.f32.mrf.mxu1 }
 0x12a   :  { %984 = vst.msk [vmem:[%s1780_s3 + $0x3c] sm:$0xf] %vm968_vm1, %v1171_v5  ;;  %v738_v11 = vmax.f32 %v540_v0, %v689_v6  ;;  %1010 = vst.msk [vmem:[%s1780_s3 + $0xa4] sm:$0xf] %vm968_vm1, %v1197_v7  ;;  %v543_v12 = vadd.f32 %v1530_v61, %v542_v9  ;;  %v764_v13 = vmax.f32 %v644_v2, %v715_v8 }
 0x12b   :  { %v647_v14 = vadd.f32 %v1530_v61, %v646_v10  ;;  %v544_v15 = vpop.f32.mrf.mxu0  ;;  %v648_v16 = vpop.f32.mrf.mxu1 }
 0x12c   :  { %v1172_v17 = vpack.c.bf16 %v738_v11, %v738_v11  ;;  %v690_v18 = vmul.f32 0.1, %v543_v12  ;;  %v1198_v19 = vpack.c.bf16 %v764_v13, %v764_v13 }
 0x12d   :  { %v716_v20 = vmul.f32 0.1, %v647_v14  ;;  %v547_v21 = vpop.f32.mrf.mxu0  ;;  %v651_v22 = vpop.f32.mrf.mxu1 }
 0x12e   :  { %985 = vst.msk [vmem:[%s1780_s3 + $0x40] sm:$0xf] %vm968_vm1, %v1172_v17  ;;  %v739_v23 = vmax.f32 %v543_v12, %v690_v18  ;;  %1011 = vst.msk [vmem:[%s1780_s3 + $0xa8] sm:$0xf] %vm968_vm1, %v1198_v19  ;;  %v548_v24 = vadd.f32 %v1530_v61, %v547_v21  ;;  %v652_v26 = vadd.f32 %v1530_v61, %v651_v22 }
 0x12f   :  { %v765_v25 = vmax.f32 %v647_v14, %v716_v20  ;;  %v549_v27 = vpop.f32.mrf.mxu0  ;;  %v653_v28 = vpop.f32.mrf.mxu1 }
 0x130   :  { %v1173_v29 = vpack.c.bf16 %v739_v23, %v739_v23  ;;  %v691_v30 = vmul.f32 0.1, %v548_v24  ;;  %v717_v32 = vmul.f32 0.1, %v652_v26 }
 0x131   :  { %v1199_v31 = vpack.c.bf16 %v765_v25, %v765_v25  ;;  %v550_v33 = vpop.f32.mrf.mxu0  ;;  %v654_v34 = vpop.f32.mrf.mxu1 }
 0x132   :  { %986 = vst.msk [vmem:[%s1780_s3 + $0x44] sm:$0xf] %vm968_vm1, %v1173_v29  ;;  %v740_v35 = vmax.f32 %v548_v24, %v691_v30  ;;  %v551_v36 = vadd.f32 %v1530_v61, %v550_v33  ;;  %v766_v37 = vmax.f32 %v652_v26, %v717_v32  ;;  %v655_v38 = vadd.f32 %v1530_v61, %v654_v34 }
 0x133   :  { %1012 = vst.msk [vmem:[%s1780_s3 + $0xac] sm:$0xf] %vm968_vm1, %v1199_v31  ;;  %v552_v39 = vpop.f32.mrf.mxu0  ;;  %v656_v40 = vpop.f32.mrf.mxu1 }
 0x134   :  { %v1174_v41 = vpack.c.bf16 %v740_v35, %v740_v35  ;;  %v692_v42 = vmul.f32 0.1, %v551_v36  ;;  %v1200_v43 = vpack.c.bf16 %v766_v37, %v766_v37  ;;  %v718_v44 = vmul.f32 0.1, %v655_v38 }
 0x135   :  { %v555_v45 = vpop.f32.mrf.mxu0  ;;  %v659_v46 = vpop.f32.mrf.mxu1 }
 0x136   :  { %987 = vst.msk [vmem:[%s1780_s3 + $0x48] sm:$0xf] %vm968_vm1, %v1174_v41  ;;  %v741_v47 = vmax.f32 %v551_v36, %v692_v42  ;;  %1013 = vst.msk [vmem:[%s1780_s3 + $0xb0] sm:$0xf] %vm968_vm1, %v1200_v43  ;;  %v556_v48 = vadd.f32 %v1530_v61, %v555_v45  ;;  %v767_v49 = vmax.f32 %v655_v38, %v718_v44 }
 0x137   :  { %v660_v50 = vadd.f32 %v1530_v61, %v659_v46  ;;  %v557_v51 = vpop.f32.mrf.mxu0  ;;  %v661_v52 = vpop.f32.mrf.mxu1 }
 0x138   :  { %v1175_v53 = vpack.c.bf16 %v741_v47, %v741_v47  ;;  %v693_v54 = vmul.f32 0.1, %v556_v48  ;;  %v1201_v55 = vpack.c.bf16 %v767_v49, %v767_v49 }
 0x139   :  { %v719_v56 = vmul.f32 0.1, %v660_v50  ;;  %v558_v57 = vpop.f32.mrf.mxu0  ;;  %v662_v58 = vpop.f32.mrf.mxu1 }
 0x13a   :  { %988 = vst.msk [vmem:[%s1780_s3 + $0x4c] sm:$0xf] %vm968_vm1, %v1175_v53  ;;  %v742_v59 = vmax.f32 %v556_v48, %v693_v54  ;;  %1014 = vst.msk [vmem:[%s1780_s3 + $0xb4] sm:$0xf] %vm968_vm1, %v1201_v55  ;;  %v559_v60 = vadd.f32 %v1530_v61, %v558_v57  ;;  %v663_v63 = vadd.f32 %v1530_v61, %v662_v58 }
 0x13b   :  { %v768_v62 = vmax.f32 %v660_v50, %v719_v56  ;;  %v560_v0 = vpop.f32.mrf.mxu0  ;;  %v664_v1 = vpop.f32.mrf.mxu1 }
 0x13c   :  { %v1176_v2 = vpack.c.bf16 %v742_v59, %v742_v59  ;;  %v694_v3 = vmul.f32 0.1, %v559_v60  ;;  %v720_v5 = vmul.f32 0.1, %v663_v63 }
 0x13d   :  { %v1202_v4 = vpack.c.bf16 %v768_v62, %v768_v62  ;;  %v563_v6 = vpop.f32.mrf.mxu0  ;;  %v667_v7 = vpop.f32.mrf.mxu1 }
 0x13e   :  { %989 = vst.msk [vmem:[%s1780_s3 + $0x50] sm:$0xf] %vm968_vm1, %v1176_v2  ;;  %v743_v8 = vmax.f32 %v559_v60, %v694_v3  ;;  %v564_v9 = vadd.f32 %v1530_v61, %v563_v6  ;;  %v769_v10 = vmax.f32 %v663_v63, %v720_v5  ;;  %v668_v11 = vadd.f32 %v1530_v61, %v667_v7 }
 0x13f   :  { %1015 = vst.msk [vmem:[%s1780_s3 + $0xb8] sm:$0xf] %vm968_vm1, %v1202_v4  ;;  %v565_v12 = vpop.f32.mrf.mxu0  ;;  %v669_v13 = vpop.f32.mrf.mxu1 }
 0x140   :  { %v1177_v14 = vpack.c.bf16 %v743_v8, %v743_v8  ;;  %v695_v15 = vmul.f32 0.1, %v564_v9  ;;  %v1203_v16 = vpack.c.bf16 %v769_v10, %v769_v10  ;;  %v721_v17 = vmul.f32 0.1, %v668_v11 }
 0x141   :  { %v566_v18 = vpop.f32.mrf.mxu0  ;;  %v670_v19 = vpop.f32.mrf.mxu1 }
 0x142   :  { %990 = vst.msk [vmem:[%s1780_s3 + $0x54] sm:$0xf] %vm968_vm1, %v1177_v14  ;;  %v744_v20 = vmax.f32 %v564_v9, %v695_v15  ;;  %1016 = vst.msk [vmem:[%s1780_s3 + $0xbc] sm:$0xf] %vm968_vm1, %v1203_v16  ;;  %v567_v21 = vadd.f32 %v1530_v61, %v566_v18  ;;  %v770_v22 = vmax.f32 %v668_v11, %v721_v17 }
 0x143   :  { %v568_v23 = vpop.f32.mrf.mxu0  ;;  %v671_v24 = vpop.f32.mrf.mxu1 }
 0x144   :  { %v1178_v25 = vpack.c.bf16 %v744_v20, %v744_v20  ;;  %v696_v26 = vmul.f32 0.1, %v567_v21  ;;  %v1204_v27 = vpack.c.bf16 %v770_v22, %v770_v22 }
 0x145   :  { %v571_v28 = vpop.f32.mrf.mxu0 }
 0x146   :  { %991 = vst.msk [vmem:[%s1780_s3 + $0x58] sm:$0xf] %vm968_vm1, %v1178_v25  ;;  %v745_v29 = vmax.f32 %v567_v21, %v696_v26  ;;  %1017 = vst.msk [vmem:[%s1780_s3 + $0xc0] sm:$0xf] %vm968_vm1, %v1204_v27  ;;  %v572_v30 = vadd.f32 %v1530_v61, %v571_v28 }
 0x147   :  { %v573_v31 = vpop.f32.mrf.mxu0 }
 0x148   :  { %v1179_v32 = vpack.c.bf16 %v745_v29, %v745_v29  ;;  %v697_v33 = vmul.f32 0.1, %v572_v30 }
 0x149   :  { %v574_v34 = vpop.f32.mrf.mxu0 }
 0x14a   :  { %992 = vst.msk [vmem:[%s1780_s3 + $0x5c] sm:$0xf] %vm968_vm1, %v1179_v32  ;;  %v746_v35 = vmax.f32 %v572_v30, %v697_v33  ;;  %v575_v36 = vadd.f32 %v1530_v61, %v574_v34 }
 0x14b   :  { %v576_v37 = vpop.f32.mrf.mxu0 }
 0x14c   :  { %v1180_v38 = vpack.c.bf16 %v746_v35, %v746_v35  ;;  %v698_v39 = vmul.f32 0.1, %v575_v36 }
 0x14e   :  { %993 = vst.msk [vmem:[%s1780_s3 + $0x60] sm:$0xf] %vm968_vm1, %v1180_v38  ;;  %v747_v40 = vmax.f32 %v575_v36, %v698_v39 }
 0x150   :  { %v1181_v41 = vpack.c.bf16 %v747_v40, %v747_v40 }
 0x152   :  { %994 = vst.msk [vmem:[%s1780_s3 + $0x64] sm:$0xf] %vm968_vm1, %v1181_v41 }

// kernel: split.6
= control target key start
LH: loop header
LB: loop body
LE: loop exit
PB: predicated region body
PF: predicated region fallthrough
CT: control target
= control target key end

     0   :  { %v4_v0 = vlaneseq  ;;  %s63_s0 = inlined_call_operand.vmem [shape: f32[2,128], index: 0, kind: input, shape index: {}]   ;;  %s64_s1 = inlined_call_operand.hbm [shape: f32[2,2], index: 1, kind: output, shape index: {}]  }
   0x1   :  { %2 = vsyncpa [#allocation6], 0  ;;  %v3_v1 = vld [vmem:[%s63_s0] sm:$0x3]  ;;  %s45_s0 = smov 122   ;;  %s46_s8 = smov [#allocation5]  }
   0x2   :  { %v5_v2 = vand.u32 127, %v4_v0  ;;  %s15_s9 = sshll.u32 %s46_s8, 4  ;;  %s16_s9 = int_to_ptr.vmem [resolvable:$true] %s15_s9 }
   0x3   :  { %s23_s10 = scalar_lea.vmem %s16_s9, 32  ;;  %p28_p1 = scmp.lt.s32.totalorder %s16_s9, %s16_s9 }
   0x4   :  { %vm6_vm0 = vcmp.lt.s32.totalorder %v5_v2, 6  ;;  %p24_p0 = scmp.ne.s32.totalorder %s16_s9, %s23_s10  ;;  %p29_p2 = scmp.lt.s32.totalorder %s23_s10, %s23_s10 }
   0x5   :  { %v7_v3 = vsel %vm6_vm0, 0, %v3_v1 }
   0x6   :  { %8 = vrot.lane.b32.xlu0 %v7_v3, %s45_s0  ;;  %p30_p3 = por %p29_p2, %p28_p1 }
   0x8   :  { %p31_p4 = pnand %p30_p3, %p24_p0 }
  0x78   :  { %v9_v4 = vpop.permute.xlu0 %8 }
  0x79   :  { %10 = vst [vmem:[#allocation5] sm:$0x3] %v9_v4 }
  0x7a   :  { %34 = shalt.err (!%p31_p4)
}
  0x7b   :  { %18 = dma.vmem_to_hbm [thread:$0]  %s16_s9, 32, %s64_s1, [#allocation6]  }
  0x7c   :  { %43 = dma.done.wait [#allocation6], 32  }
  0x7d   :  { %44 = vsyncadd [#allocation6], 4294967264 }
  0x7e   :  { %20 = vsyncpa [#allocation6], 1 }

// kernel: split.7
= control target key start
LH: loop header
LB: loop body
LE: loop exit
PB: predicated region body
PF: predicated region fallthrough
CT: control target
= control target key end

     0   :  { %v4_v0 = vlaneseq  ;;  %s63_s0 = inlined_call_operand.vmem [shape: f32[2,128], index: 0, kind: input, shape index: {}]   ;;  %s64_s1 = inlined_call_operand.hbm [shape: f32[2,9], index: 1, kind: output, shape index: {}]  }
   0x1   :  { %2 = vsyncpa [#allocation6], 0  ;;  %v3_v1 = vld [vmem:[%s63_s0] sm:$0x3]  ;;  %s45_s0 = smov 120   ;;  %s46_s8 = smov [#allocation5]  }
   0x2   :  { %v5_v2 = vand.u32 127, %v4_v0  ;;  %s15_s9 = sshll.u32 %s46_s8, 4  ;;  %s16_s9 = int_to_ptr.vmem [resolvable:$true] %s15_s9 }
   0x3   :  { %s23_s10 = scalar_lea.vmem %s16_s9, 32  ;;  %p28_p1 = scmp.lt.s32.totalorder %s16_s9, %s16_s9 }
   0x4   :  { %vm6_vm0 = vcmp.lt.s32.totalorder %v5_v2, 8  ;;  %p24_p0 = scmp.ne.s32.totalorder %s16_s9, %s23_s10  ;;  %p29_p2 = scmp.lt.s32.totalorder %s23_s10, %s23_s10 }
   0x5   :  { %v7_v3 = vsel %vm6_vm0, 0, %v3_v1 }
   0x6   :  { %8 = vrot.lane.b32.xlu0 %v7_v3, %s45_s0  ;;  %p30_p3 = por %p29_p2, %p28_p1 }
   0x8   :  { %p31_p4 = pnand %p30_p3, %p24_p0 }
  0x78   :  { %v9_v4 = vpop.permute.xlu0 %8 }
  0x79   :  { %10 = vst [vmem:[#allocation5] sm:$0x3] %v9_v4 }
  0x7a   :  { %34 = shalt.err (!%p31_p4)
}
  0x7b   :  { %18 = dma.vmem_to_hbm [thread:$0]  %s16_s9, 32, %s64_s1, [#allocation6]  }
  0x7c   :  { %43 = dma.done.wait [#allocation6], 32  }
  0x7d   :  { %44 = vsyncadd [#allocation6], 4294967264 }
  0x7e   :  { %20 = vsyncpa [#allocation6], 1 }

// kernel: ppo_forward.5
= control target key start
LH: loop header
LB: loop body
LE: loop exit
PB: predicated region body
PF: predicated region fallthrough
CT: control target
= control target key end

     0   :  { %s11429_s27 = smov 0   ;;  %s14202_s0 = inlined_call_operand.vmem [shape: bf16[72,288], index: 0, kind: input, shape index: {}]   ;;  %s14203_s1 = inlined_call_operand.vmem [shape: bf16[72,288], index: 1, kind: input, shape index: {}]   ;;  %s14204_s2 = inlined_call_operand.vmem [shape: bf16[72,288], index: 2, kind: input, shape index: {}]   ;;  %s14205_s3 = inlined_call_operand.vmem [shape: bf16[72,288], index: 3, kind: input, shape index: {}]   ;;  %s14206_s4 = inlined_call_operand.vmem [shape: bf16[288,64], index: 4, kind: input, shape index: {}]   ;;  %s14207_s5 = inlined_call_operand.vmem [shape: f32[1,64], index: 5, kind: input, shape index: {}]   ;;  %s14208_s6 = inlined_call_operand.vmem [shape: bf16[2304,1024], index: 6, kind: input, shape index: {}]   ;;  %s14209_s7 = inlined_call_operand.vmem [shape: f32[1,1024], index: 7, kind: input, shape index: {}]   ;;  %s14210_s8 = inlined_call_operand.vmem [shape: bf16[1024,512], index: 8, kind: input, shape index: {}]   ;;  %s14211_s9 = inlined_call_operand.vmem [shape: f32[1,512], index: 9, kind: input, shape index: {}]   ;;  %s14212_s10 = inlined_call_operand.vmem [shape: f32[2,8], index: 10, kind: input, shape index: {}]   ;;  %s14213_s11 = inlined_call_operand.vmem [shape: bf16[512,512], index: 11, kind: input, shape index: {}]   ;;  %s14214_s12 = inlined_call_operand.vmem [shape: f32[8,512], index: 12, kind: input, shape index: {}]   ;;  %s14215_s13 = inlined_call_operand.vmem [shape: f32[1,512], index: 13, kind: input, shape index: {}]   ;;  %s14216_s14 = inlined_call_operand.vmem [shape: bf16[512,256], index: 14, kind: input, shape index: {}]   ;;  %s14217_s15 = inlined_call_operand.vmem [shape: f32[1,256], index: 15, kind: input, shape index: {}]   ;;  %s14218_s16 = inlined_call_operand.vmem [shape: bf16[256,128], index: 16, kind: input, shape index: {}]   ;;  %s14219_s17 = inlined_call_operand.vmem [shape: f32[1,128], index: 17, kind: input, shape index: {}]   ;;  %s14220_s18 = inlined_call_operand.vmem [shape: f32[2,128], index: 18, kind: output, shape index: {}]  }
   0x1   :  { %14224 = sst [smem:[#allocation5_spill]] %s14202_s0 }
   0x2   :  { %14225 = sst [smem:[#allocation6_spill]] %s14203_s1 }
   0x3   :  { %14226 = sst [smem:[#allocation7_spill]] %s14204_s2 }
   0x4 LB: > { %s11435_s28 = sadd.s32 4294967295, %s11325_s27   ;;  %p9182_p0 = scmp.ge.s32.totalorder %s11325_s27, 1  ;;  %s11325_s27 = sphi %s11429_s27, %s28_s27  }
   0x5   : > { %p509_p1 = scmp.lt.s32.totalorder %s11325_s27, 4 }
   0x7   : > { %p510_p2 = pnand %p9182_p0, %p509_p1 }
   0x8   : > { %s559_s29 = smul.u32 (!%p510_p2), 96, %s11435_s28  ;;  %p9185_p4 = scmp.ne.s32.totalorder (!%p510_p2), %s11435_s28, 0 }
   0x9   : > { %513 = sbr.rel (%p510_p2) target bundleno = 2287 (0x8ef), region = 92 }
   0xa   : > { %p560_p3 = scmp.lt.s32.totalorder (!%p510_p2), %s559_s29, 287 }
   0xe   : > { %s14231_s29 = smov (!%p560_p3, %s559_s29), 287  ;;  %570 = sbr.rel (%p9185_p4) target bundleno = 543 (0x21f), region = 96 }
   0xf   : > { %s10175_s30 = sshll.u32 %s14231_s29, 5  ;;  %s14227_s22 = sld [smem:[#allocation5_spill]] (!%p9185_p4) }
  0x10   : > { %s11443_s1 = scalar_lea.vmem %s14208_s6, %s10175_s30  ;;  %s14228_s20 = sld [smem:[#allocation6_spill]] (!%p9185_p4) }
  0x11   : > { %s14229_s23 = sld [smem:[#allocation7_spill]] (!%p9185_p4)  ;;  %s11330_s2 = smov (!%p9185_p4), 64  }
  0x13   : > { %v11449_v0 = vld [vmem:[%s14206_s4 + $0x78] sm:$0xff]   ;;  %v11327_v1 = vmov 0.0   ;;  %v11457_v2 = vld [vmem:[%s14206_s4 + $0x88] sm:$0xff]   ;;  %vm11328_vm0 = vmmov 0   ;;  %v11471_v4 = vld [vmem:[%s14206_s4 + $0x70] sm:$0xff]   ;;  %vm810_vm1 = vcmask 261120  }
  0x14   : > { %10419 = vmatprep.subr.bf16.mxu1 %v11327_v1  ;;  %2435 = vst [vmem:[#allocation4] sm:$0xff] %v11327_v1  ;;  %2436 = vst [vmem:[#allocation4 + $0x8] sm:$0xff] %v11327_v1  ;;  %10185 = vmatprep.subr.bf16.mxu0 %v11449_v0  ;;  %v11463_v3 = vld [vmem:[%s14206_s4 + $0x38] sm:$0xff]   ;;  %v11478_v5 = vld [vmem:[%s14206_s4 + $0x80] sm:$0xff]   ;;  %vm1847_vm2 = vcmask 519168   ;;  %vm1858_vm3 = vcmask 516096  }
  0x15   : > { %10423 = vmatprep.mubr.msk.bf16.mxu1 %vm11328_vm0, %v11327_v1  ;;  %10420 = vmatpush3.bf16.msra.mxu1 %v11457_v2  ;;  %v11484_v6 = vld [vmem:[%s14206_s4 + $0x30] sm:$0xff]   ;;  %v11493_v8 = vld [vmem:[%s14206_s4 + $0x68] sm:$0xff]   ;;  %v11506_v10 = vld [vmem:[%s14206_s4 + $0x60] sm:$0xff]   ;;  %vm1880_vm4 = vcmask 1040896  }
  0x16   : > { %10186 = vmatpush3.bf16.msra.mxu0 %v11463_v3  ;;  %10421 = vmatprep.subr.bf16.mxu1 %v11327_v1  ;;  %v10540_v7 = vld [vmem:[%s14227_s22 + $0x8] ss:$12 sps:$4 sm:$0xff]   ;;  %v11516_v11 = vld [vmem:[%s14206_s4 + $0x20] sm:$0xff]   ;;  %v11523_v12 = vld [vmem:[%s14206_s4 + $0x58] sm:$0xff]  }
  0x17   : > { %10187 = vmatprep.subr.bf16.mxu0 %v11471_v4  ;;  %v11499_v9 = vld [vmem:[%s14206_s4 + $0x28] sm:$0xff]   ;;  %v11533_v14 = vld [vmem:[%s14206_s4 + $0x18] sm:$0xff]   ;;  %v11540_v15 = vld [vmem:[%s14206_s4 + $0x50] sm:$0xff]  }
  0x18   : > { %v10545_v13 = vld [vmem:[%s14227_s22 + $0x20] ss:$12 sps:$4 sm:$0xff]   ;;  %v11546_v16 = vld [vmem:[%s14206_s4 + $0x10] sm:$0xff]   ;;  %v10550_v17 = vld [vmem:[%s14227_s22 + $0x38] ss:$12 sps:$4 sm:$0xff]  }
  0x19   : > { %10422 = vmatpush3.bf16.msra.mxu1 %v11478_v5  ;;  %v11560_v18 = vld [vmem:[%s14206_s4 + $0x48] sm:$0xff]   ;;  %v10557_v19 = vld [vmem:[%s14227_s22 + $0x4] ss:$12 sps:$4 sm:$0xff]   ;;  %v10566_v29 = vld [vmem:[%s14227_s22 + $0x34] ss:$12 sps:$4 sm:$0xff]  }
  0x1a   : > { %10188 = vmatpush3.bf16.msra.mxu0 %v11484_v6  ;;  %10238 = vmatprep.subr.bf16.mxu1 %v11449_v0  ;;  %v11570_v20 = vld [vmem:[%s14206_s4 + $0x8] sm:$0xff]   ;;  %v11576_v21 = vld [vmem:[%s14206_s4 + $0x40] sm:$0xff]   ;;  %v10558_v23 = vld [vmem:[%s14227_s22 + $0x50] ss:$12 sps:$4 sm:$0xff]  }
  0x1b   : > { %10189 = vmatprep.subr.bf16.mxu0 %v11493_v8  ;;  %858 = vmatprep.mubr.bf16.mxu0 %v10557_v19  ;;  %v11587_v22 = vld [vmem:[%s14206_s4] sm:$0xff]   ;;  %v10559_v25 = vld [vmem:[%s14227_s22 + $0x1c] ss:$12 sps:$4 sm:$0xff]   ;;  %v10571_v33 = vld [vmem:[%s14227_s22 + $0x4c] ss:$12 sps:$4 sm:$0xff]  }
  0x1c   : > { %10424 = vmatmul.mubr.msk.bf16.vlgmr.msra.gmra.mxu1 %vm810_vm1, %v10540_v7  ;;  %v10555_v24 = vld [vmem:[%s14227_s22] ss:$12 sps:$4 sm:$0xff]   ;;  %v10561_v26 = vld [vmem:[%s14227_s22 + $0x68] ss:$0 sps:$4 sm:$0xff]   ;;  %v10562_v27 = vld [vmem:[%s14227_s22 + $0x18] ss:$12 sps:$4 sm:$0xff]  }
  0x1d   : > { %10427 = vmatprep.mubr.msk.bf16.mxu1 %vm11328_vm0, %v11327_v1  ;;  %10239 = vmatpush3.bf16.msra.mxu1 %v11463_v3  ;;  %v10565_v28 = vld [vmem:[%s14228_s20 + $0x4] ss:$12 sps:$4 sm:$0xff]   ;;  %v10563_v30 = vld [vmem:[%s14228_s20] ss:$12 sps:$4 sm:$0xff]   ;;  %v10569_v32 = vld [vmem:[%s14228_s20 + $0x1c] ss:$12 sps:$4 sm:$0xff]  }
  0x1e   : > { %10190 = vmatpush3.bf16.msra.mxu0 %v11499_v9  ;;  %10240 = vmatprep.subr.bf16.mxu1 %v11471_v4  ;;  %v10568_v31 = vld [vmem:[%s14227_s22 + $0x30] ss:$12 sps:$4 sm:$0xff]   ;;  %v624_v34 = vld [vmem:[%s14227_s22 + $0x60] sm:$0xff]  ;;  %v10574_v36 = vld [vmem:[%s14227_s22 + $0x48] ss:$12 sps:$4 sm:$0xff]  }
  0x1f   : > { %10191 = vmatprep.subr.bf16.mxu0 %v11506_v10  ;;  %v10573_v35 = vld [vmem:[%s14228_s20 + $0x18] ss:$12 sps:$4 sm:$0xff]   ;;  %v10575_v37 = vld [vmem:[%s14228_s20 + $0x34] ss:$12 sps:$4 sm:$0xff]   ;;  %v9200_v38 = vcombine.high %v624_v34, %v624_v34  ;;  %v10578_v39 = vld [vmem:[%s14228_s20 + $0x30] ss:$12 sps:$4 sm:$0xff]   ;;  %v9199_v40 = vcombine.low %v624_v34, %v624_v34 }
  0x20   : > { %v10580_v41 = vld [vmem:[%s14228_s20 + $0x4c] ss:$12 sps:$4 sm:$0xff]   ;;  %v1004_v42 = vld [vmem:[%s14228_s20 + $0x60] sm:$0xff]  ;;  %v10582_v43 = vld [vmem:[%s14228_s20 + $0x48] ss:$12 sps:$4 sm:$0xff]  }
  0x21   : > { %10241 = vmatpush3.bf16.msra.mxu1 %v11484_v6  ;;  %v10583_v44 = vld [vmem:[%s14228_s20 + $0x8] ss:$12 sps:$4 sm:$0xff]   ;;  %v9238_v45 = vcombine.high %v1004_v42, %v1004_v42  ;;  %v9237_v46 = vcombine.low %v1004_v42, %v1004_v42  ;;  %v10586_v47 = vld [vmem:[%s14228_s20 + $0x20] ss:$12 sps:$4 sm:$0xff]   ;;  %v10589_v48 = vld [vmem:[%s14229_s23 + $0x4] ss:$12 sps:$4 sm:$0xff]  }
  0x22   : > { %10192 = vmatpush3.bf16.msra.mxu0 %v11516_v11  ;;  %10242 = vmatprep.subr.bf16.mxu1 %v11493_v8  ;;  %v10587_v49 = vld [vmem:[%s14229_s23] ss:$12 sps:$4 sm:$0xff]   ;;  %v10590_v50 = vld [vmem:[%s14228_s20 + $0x38] ss:$12 sps:$4 sm:$0xff]   ;;  %v10591_v51 = vld [vmem:[%s14229_s23 + $0x1c] ss:$12 sps:$4 sm:$0xff]  }
  0x23   : > { %10193 = vmatprep.subr.bf16.mxu0 %v11523_v12  ;;  %v10593_v52 = vld [vmem:[%s14229_s23 + $0x18] ss:$12 sps:$4 sm:$0xff]   ;;  %v10594_v53 = vld [vmem:[%s14228_s20 + $0x50] ss:$12 sps:$4 sm:$0xff]   ;;  %v10595_v54 = vld [vmem:[%s14229_s23 + $0x34] ss:$12 sps:$4 sm:$0xff]  }
  0x24   : > { %10428 = vmatmul.mubr.msk.bf16.gmra.mxu1 %vm810_vm1, %v10545_v13  ;;  %v10597_v55 = vld [vmem:[%s14229_s23 + $0x30] ss:$12 sps:$4 sm:$0xff]   ;;  %v10598_v56 = vld [vmem:[%s14228_s20 + $0x68] ss:$0 sps:$4 sm:$0xff]   ;;  %v10599_v57 = vld [vmem:[%s14229_s23 + $0x4c] ss:$12 sps:$4 sm:$0xff]  }
  0x25   : > { %10431 = vmatprep.mubr.msk.bf16.mxu1 %vm11328_vm0, %v11327_v1  ;;  %10243 = vmatpush3.bf16.msra.mxu1 %v11499_v9  ;;  %v1278_v58 = vld [vmem:[%s14229_s23 + $0x60] sm:$0xff]  ;;  %v10601_v59 = vld [vmem:[%s14229_s23 + $0x48] ss:$12 sps:$4 sm:$0xff]   ;;  %v10627_v19 = vld [vmem:[%s14205_s3 + $0x50] ss:$12 sps:$4 sm:$0xff]  }
  0x26   : > { %10194 = vmatpush3.bf16.msra.mxu0 %v11533_v14  ;;  %10244 = vmatprep.subr.bf16.mxu1 %v11506_v10  ;;  %v10602_v60 = vld [vmem:[%s14229_s23 + $0x8] ss:$12 sps:$4 sm:$0xff]   ;;  %v9258_v61 = vcombine.high %v1278_v58, %v1278_v58  ;;  %v9257_v62 = vcombine.low %v1278_v58, %v1278_v58  ;;  %v10605_v63 = vld [vmem:[%s14229_s23 + $0x20] ss:$12 sps:$4 sm:$0xff]   ;;  %v10612_v7 = vld [vmem:[%s14205_s3 + $0x18] ss:$12 sps:$4 sm:$0xff]  }
  0x27   : > { %10195 = vmatprep.subr.bf16.mxu0 %v11540_v15  ;;  %v10621_v13 = vld [vmem:[%s14205_s3 + $0x8] ss:$12 sps:$4 sm:$0xff]   ;;  %v11853_v34 = vld [vmem:[%s14207_s5] ss:$0 sm:$0xff] }
  0x29   : > { %10245 = vmatpush3.bf16.msra.mxu1 %v11516_v11 }
  0x2a   : > { %10196 = vmatpush3.bf16.msra.mxu0 %v11546_v16  ;;  %10246 = vmatprep.subr.bf16.mxu1 %v11523_v12 }
  0x2b   : > { %10197 = vmatprep.subr.bf16.mxu0 %v11560_v18 }
  0x2c   : > { %10432 = vmatmul.mubr.msk.bf16.gmra.mxu1 %vm810_vm1, %v10550_v17  ;;  %v10625_v17 = vld [vmem:[%s14205_s3 + $0x68] ss:$0 sps:$4 sm:$0xff]  }
  0x2d   : > { %10435 = vmatprep.mubr.msk.bf16.mxu1 %vm11328_vm0, %v11327_v1  ;;  %10247 = vmatpush3.bf16.msra.mxu1 %v11533_v14 }
  0x2e   : > { %10198 = vmatpush3.bf16.msra.mxu0 %v11570_v20  ;;  %10248 = vmatprep.subr.bf16.mxu1 %v11540_v15 }
  0x2f   : > { %10199 = vmatprep.subr.bf16.mxu0 %v11576_v21 }
  0x31   : > { %10249 = vmatpush3.bf16.msra.mxu1 %v11546_v16 }
  0x32   : > { %10200 = vmatpush3.bf16.msra.mxu0 %v11587_v22  ;;  %10250 = vmatprep.subr.bf16.mxu1 %v11560_v18 }
  0x33   : > { %10443 = vmatprep.subr.bf16.mxu0 %v11327_v1 }
  0x34   : > { %10436 = vmatmul.mubr.msk.bf16.gmra.mxu1 %vm810_vm1, %v10558_v23 }
  0x35   : > { %859 = vmatmul.mubr.bf16.vlgmr.msra.gmra.mxu0 %v10555_v24  ;;  %10439 = vmatprep.mubr.msk.bf16.mxu1 %vm11328_vm0, %v11327_v1 }
  0x36   : > { %10444 = vmatpush3.bf16.msra.mxu0 %v11457_v2  ;;  %866 = vmatprep.mubr.bf16.mxu0 %v10559_v25 }
  0x37   : > { %10251 = vmatpush3.bf16.msra.mxu1 %v11570_v20  ;;  %10445 = vmatprep.subr.bf16.mxu0 %v11327_v1 }
  0x38   : > { %10252 = vmatprep.subr.bf16.mxu1 %v11576_v21 }
  0x3a   : > { %10446 = vmatpush3.bf16.msra.mxu0 %v11478_v5 }
  0x3b   : > { %10253 = vmatpush3.bf16.msra.mxu1 %v11587_v22  ;;  %10467 = vmatprep.subr.bf16.mxu0 %v11327_v1 }
  0x3c   : > { %10440 = vmatmul.mubr.msk.bf16.gmra.mxu1 %vm810_vm1, %v10561_v26  ;;  %10291 = vmatprep.subr.bf16.mxu1 %v11449_v0 }
  0x3d   : > { %867 = vmatmul.mubr.bf16.gmra.mxu0 %v10562_v27  ;;  %1123 = vmatprep.mubr.bf16.mxu1 %v10565_v28 }
  0x3e   : > { %874 = vmatprep.mubr.bf16.mxu0 %v10566_v29 }
  0x44   : > { %1124 = vmatmul.mubr.bf16.vlgmr.msra.gmra.mxu1 %v10563_v30 }
  0x45   : > { %875 = vmatmul.mubr.bf16.gmra.mxu0 %v10568_v31  ;;  %1131 = vmatprep.mubr.bf16.mxu1 %v10569_v32 }
  0x46   : > { %882 = vmatprep.mubr.bf16.mxu0 %v10571_v33  ;;  %10292 = vmatpush3.bf16.msra.mxu1 %v11463_v3 }
  0x47   : > { %10293 = vmatprep.subr.bf16.mxu1 %v11471_v4 }
  0x4a   : > { %10294 = vmatpush3.bf16.msra.mxu1 %v11484_v6 }
  0x4b   : > { %10295 = vmatprep.subr.bf16.mxu1 %v11493_v8 }
  0x4c   : > { %1132 = vmatmul.mubr.bf16.gmra.mxu1 %v10573_v35 }
  0x4d   : > { %883 = vmatmul.mubr.bf16.gmra.mxu0 %v10574_v36  ;;  %1139 = vmatprep.mubr.bf16.mxu1 %v10575_v37 }
  0x4e   : > { %890 = vmatprep.mubr.bf16.mxu0 %v9200_v38  ;;  %10296 = vmatpush3.bf16.msra.mxu1 %v11499_v9 }
  0x4f   : > { %10297 = vmatprep.subr.bf16.mxu1 %v11506_v10 }
  0x52   : > { %10298 = vmatpush3.bf16.msra.mxu1 %v11516_v11 }
  0x53   : > { %10299 = vmatprep.subr.bf16.mxu1 %v11523_v12 }
  0x54   : > { %1140 = vmatmul.mubr.bf16.gmra.mxu1 %v10578_v39 }
  0x55   : > { %891 = vmatmul.mubr.bf16.gmra.mxu0 %v9199_v40  ;;  %1147 = vmatprep.mubr.bf16.mxu1 %v10580_v41 }
  0x56   : > { %10447 = vmatprep.mubr.msk.bf16.mxu0 %vm11328_vm0, %v11327_v1  ;;  %10300 = vmatpush3.bf16.msra.mxu1 %v11533_v14 }
  0x57   : > { %10301 = vmatprep.subr.bf16.mxu1 %v11540_v15 }
  0x5a   : > { %10302 = vmatpush3.bf16.msra.mxu1 %v11546_v16 }
  0x5b   : > { %10303 = vmatprep.subr.bf16.mxu1 %v11560_v18 }
  0x5c   : > { %1148 = vmatmul.mubr.bf16.gmra.mxu1 %v10582_v43 }
  0x5d   : > { %10448 = vmatmul.mubr.msk.bf16.vlgmr.msra.gmra.mxu0 %vm810_vm1, %v10583_v44  ;;  %1155 = vmatprep.mubr.bf16.mxu1 %v9238_v45 }
  0x5e   : > { %10468 = vmatpush3.bf16.msra.mxu0 %v11457_v2  ;;  %10451 = vmatprep.mubr.msk.bf16.mxu0 %vm11328_vm0, %v11327_v1 }
  0x5f   : > { %10304 = vmatpush3.bf16.msra.mxu1 %v11570_v20  ;;  %10469 = vmatprep.subr.bf16.mxu0 %v11327_v1 }
  0x60   : > { %10305 = vmatprep.subr.bf16.mxu1 %v11576_v21 }
  0x62   : > { %10470 = vmatpush3.bf16.msra.mxu0 %v11478_v5 }
  0x63   : > { %10306 = vmatpush3.bf16.msra.mxu1 %v11587_v22  ;;  %10491 = vmatprep.subr.bf16.mxu0 %v11327_v1 }
  0x64   : > { %1156 = vmatmul.mubr.bf16.gmra.mxu1 %v9237_v46  ;;  %10344 = vmatprep.subr.bf16.mxu1 %v11449_v0  ;;  %v10608_v0 = vld [vmem:[%s14205_s3 + $0x4] ss:$12 sps:$4 sm:$0xff]  }
  0x65   : > { %10452 = vmatmul.mubr.msk.bf16.gmra.mxu0 %vm810_vm1, %v10586_v47  ;;  %1397 = vmatprep.mubr.bf16.mxu1 %v10589_v48 }
  0x66   : > { %10455 = vmatprep.mubr.msk.bf16.mxu0 %vm11328_vm0, %v11327_v1 }
  0x6c   : > { %1398 = vmatmul.mubr.bf16.vlgmr.msra.gmra.mxu1 %v10587_v49 }
  0x6d   : > { %10456 = vmatmul.mubr.msk.bf16.gmra.mxu0 %vm810_vm1, %v10590_v50  ;;  %1405 = vmatprep.mubr.bf16.mxu1 %v10591_v51 }
  0x6e   : > { %10459 = vmatprep.mubr.msk.bf16.mxu0 %vm11328_vm0, %v11327_v1  ;;  %10345 = vmatpush3.bf16.msra.mxu1 %v11463_v3  ;;  %v10606_v3 = vld [vmem:[%s14205_s3] ss:$12 sps:$4 sm:$0xff]  }
  0x6f   : > { %10346 = vmatprep.subr.bf16.mxu1 %v11471_v4  ;;  %v10609_v4 = vld [vmem:[%s14229_s23 + $0x38] ss:$12 sps:$4 sm:$0xff]  }
  0x72   : > { %10347 = vmatpush3.bf16.msra.mxu1 %v11484_v6  ;;  %v10610_v6 = vld [vmem:[%s14205_s3 + $0x1c] ss:$12 sps:$4 sm:$0xff]  }
  0x73   : > { %10348 = vmatprep.subr.bf16.mxu1 %v11493_v8  ;;  %v10613_v8 = vld [vmem:[%s14229_s23 + $0x50] ss:$12 sps:$4 sm:$0xff]  }
  0x74   : > { %1406 = vmatmul.mubr.bf16.gmra.mxu1 %v10593_v52 }
  0x75   : > { %10460 = vmatmul.mubr.msk.bf16.gmra.mxu0 %vm810_vm1, %v10594_v53  ;;  %1413 = vmatprep.mubr.bf16.mxu1 %v10595_v54 }
  0x76   : > { %10463 = vmatprep.mubr.msk.bf16.mxu0 %vm11328_vm0, %v11327_v1  ;;  %10349 = vmatpush3.bf16.msra.mxu1 %v11499_v9  ;;  %v10614_v9 = vld [vmem:[%s14205_s3 + $0x34] ss:$12 sps:$4 sm:$0xff]  }
  0x77   : > { %10350 = vmatprep.subr.bf16.mxu1 %v11506_v10  ;;  %v10617_v10 = vld [vmem:[%s14229_s23 + $0x68] ss:$0 sps:$4 sm:$0xff]  }
  0x7a   : > { %10351 = vmatpush3.bf16.msra.mxu1 %v11516_v11  ;;  %v10618_v11 = vld [vmem:[%s14205_s3 + $0x4c] ss:$12 sps:$4 sm:$0xff]  }
  0x7b   : > { %10352 = vmatprep.subr.bf16.mxu1 %v11523_v12  ;;  %v10620_v12 = vld [vmem:[%s14205_s3 + $0x48] ss:$12 sps:$4 sm:$0xff]  }
  0x7c   : > { %1414 = vmatmul.mubr.bf16.gmra.mxu1 %v10597_v55 }
  0x7d   : > { %10464 = vmatmul.mubr.msk.bf16.gmra.mxu0 %vm810_vm1, %v10598_v56  ;;  %1421 = vmatprep.mubr.bf16.mxu1 %v10599_v57 }
  0x7e   : > { %10471 = vmatprep.mubr.msk.bf16.mxu0 %vm11328_vm0, %v11327_v1  ;;  %10353 = vmatpush3.bf16.msra.mxu1 %v11533_v14 }
  0x7f   : > { %10354 = vmatprep.subr.bf16.mxu1 %v11540_v15 }
  0x82   : > { %10355 = vmatpush3.bf16.msra.mxu1 %v11546_v16  ;;  %v10624_v16 = vld [vmem:[%s14205_s3 + $0x20] ss:$12 sps:$4 sm:$0xff]  }
  0x83   : > { %10356 = vmatprep.subr.bf16.mxu1 %v11560_v18  ;;  %v10626_v18 = vld [vmem:[%s14205_s3 + $0x38] ss:$12 sps:$4 sm:$0xff]  }
  0x84   : > { %1422 = vmatmul.mubr.bf16.gmra.mxu1 %v10601_v59 }
  0x85   : > { %10472 = vmatmul.mubr.msk.bf16.vlgmr.msra.gmra.mxu0 %vm810_vm1, %v10602_v60  ;;  %1429 = vmatprep.mubr.bf16.mxu1 %v9258_v61 }
  0x86   : > { %10492 = vmatpush3.bf16.msra.mxu0 %v11457_v2  ;;  %10475 = vmatprep.mubr.msk.bf16.mxu0 %vm11328_vm0, %v11327_v1 }
  0x87   : > { %10357 = vmatpush3.bf16.msra.mxu1 %v11570_v20  ;;  %10493 = vmatprep.subr.bf16.mxu0 %v11327_v1 }
  0x88   : > { %10358 = vmatprep.subr.bf16.mxu1 %v11576_v21 }
  0x8a   : > { %10494 = vmatpush3.bf16.msra.mxu0 %v11478_v5 }
  0x8b   : > { %10359 = vmatpush3.bf16.msra.mxu1 %v11587_v22 }
  0x8c   : > { %1430 = vmatmul.mubr.bf16.gmra.mxu1 %v9257_v62  ;;  %10515 = vmatprep.subr.bf16.mxu1 %v11327_v1 }
  0x8d   : > { %10476 = vmatmul.mubr.msk.bf16.gmra.mxu0 %vm810_vm1, %v10605_v63  ;;  %1662 = vmatprep.mubr.bf16.mxu1 %v10608_v0 }
  0x8e   : > { %10479 = vmatprep.mubr.msk.bf16.mxu0 %vm11328_vm0, %v11327_v1 }
  0x94   : > { %1663 = vmatmul.mubr.bf16.vlgmr.msra.gmra.mxu1 %v10606_v3 }
  0x95   : > { %10480 = vmatmul.mubr.msk.bf16.gmra.mxu0 %vm810_vm1, %v10609_v4  ;;  %1670 = vmatprep.mubr.bf16.mxu1 %v10610_v6 }
  0x96   : > { %10483 = vmatprep.mubr.msk.bf16.mxu0 %vm11328_vm0, %v11327_v1  ;;  %10517 = vmatpush3.bf16.msra.mxu1 %v11457_v2  ;;  %v10616_v2 = vld [vmem:[%s14205_s3 + $0x30] ss:$12 sps:$4 sm:$0xff]  }
  0x97   : > { %10516 = vmatprep.subr.bf16.mxu1 %v11327_v1 }
  0x9a   : > { %10518 = vmatpush3.bf16.msra.mxu1 %v11478_v5  ;;  %v1543_v5 = vld [vmem:[%s14205_s3 + $0x60] sm:$0xff] }
  0x9b   : > { %v9278_v14 = vcombine.high %v1543_v5, %v1543_v5  ;;  %v9277_v15 = vcombine.low %v1543_v5, %v1543_v5 }
  0x9c   : > { %1671 = vmatmul.mubr.bf16.gmra.mxu1 %v10612_v7 }
  0x9d   : > { %10484 = vmatmul.mubr.msk.bf16.gmra.mxu0 %vm810_vm1, %v10613_v8  ;;  %1678 = vmatprep.mubr.bf16.mxu1 %v10614_v9 }
  0x9e   : > { %10487 = vmatprep.mubr.msk.bf16.mxu0 %vm11328_vm0, %v11327_v1 }
  0xa4   : > { %1679 = vmatmul.mubr.bf16.gmra.mxu1 %v10616_v2 }
  0xa5   : > { %10488 = vmatmul.mubr.msk.bf16.gmra.mxu0 %vm810_vm1, %v10617_v10  ;;  %1686 = vmatprep.mubr.bf16.mxu1 %v10618_v11 }
  0xa6   : > { %10495 = vmatprep.mubr.msk.bf16.mxu0 %vm11328_vm0, %v11327_v1 }
  0xac   : > { %1687 = vmatmul.mubr.bf16.gmra.mxu1 %v10620_v12 }
  0xad   : > { %10496 = vmatmul.mubr.msk.bf16.vlgmr.msra.gmra.mxu0 %vm810_vm1, %v10621_v13  ;;  %1694 = vmatprep.mubr.bf16.mxu1 %v9278_v14 }
  0xae   : > { %10499 = vmatprep.mubr.msk.bf16.mxu0 %vm11328_vm0, %v11327_v1 }
  0xb4   : > { %1695 = vmatmul.mubr.bf16.gmra.mxu1 %v9277_v15 }
  0xb5   : > { %10500 = vmatmul.mubr.msk.bf16.gmra.mxu0 %vm810_vm1, %v10624_v16  ;;  %10511 = vmatprep.mubr.msk.bf16.mxu1 %vm11328_vm0, %v11327_v1 }
  0xb6   : > { %10503 = vmatprep.mubr.msk.bf16.mxu0 %vm11328_vm0, %v11327_v1 }
  0xbc   : > { %10512 = vmatmul.mubr.msk.bf16.vlgmr.msra.gmra.mxu1 %vm810_vm1, %v10625_v17 }
  0xbd   : > { %10504 = vmatmul.mubr.msk.bf16.gmra.mxu0 %vm810_vm1, %v10626_v18 }
  0xbe   : > { %10507 = vmatprep.mubr.msk.bf16.mxu0 %vm11328_vm0, %v11327_v1 }
  0xc5   : > { %10508 = vmatmul.mubr.msk.bf16.gmra.mxu0 %vm810_vm1, %v10627_v19 }
  0xdc   : > { %v932_v20 = vpop.f32.mrf.mxu1 }
  0xde   : > { %v10425_v21 = vpop.f32.mrf.mxu1 }
  0xe0   : > { %v935_v22 = vpop.f32.mrf.mxu1 }
  0xe2   : > { %v10426_v23 = vpop.f32.mrf.mxu1 }
  0xe4   : > { %v940_v24 = vpop.f32.mrf.mxu1 }
  0xe6   : > { %v10429_v25 = vpop.f32.mrf.mxu1 }
  0xe8   : > { %v943_v26 = vpop.f32.mrf.mxu1 }
  0xea   : > { %v10430_v27 = vpop.f32.mrf.mxu1 }
  0xec   : > { %v948_v28 = vpop.f32.mrf.mxu1 }
  0xee   : > { %v10433_v29 = vpop.f32.mrf.mxu1 }
  0xf0   : > { %v951_v30 = vpop.f32.mrf.mxu1 }
  0xf2   : > { %v10434_v31 = vpop.f32.mrf.mxu1 }
  0xf4   : > { %v956_v32 = vpop.f32.mrf.mxu1 }
  0xf5   : > { %v10201_v1 = vpop.f32.mrf.mxu0 }
  0xf6   : > { %v10437_v33 = vpop.f32.mrf.mxu1 }
  0xf7   : > { %v10202_v35 = vpop.f32.mrf.mxu0 }
  0xf8   : > { %v10203_v36 = vadd.f32 %v10202_v35, %v10201_v1  ;;  %v959_v37 = vpop.f32.mrf.mxu1 }
  0xf9   : > { %v10204_v38 = vpop.f32.mrf.mxu0 }
  0xfa   : > { %v861_v39 = vadd.f32 %v10203_v36, %v11853_v34  ;;  %v10438_v40 = vpop.f32.mrf.mxu1 }
  0xfb   : > { %v10205_v41 = vpop.f32.mrf.mxu0 }
  0xfc   : > { %v11856_v42 = vadd.f32 %v932_v20, %v861_v39  ;;  %v10206_v43 = vadd.f32 %v10205_v41, %v10204_v38  ;;  %v964_v44 = vpop.f32.mrf.mxu1 }
  0xfd   : > { %v10207_v45 = vpop.f32.mrf.mxu0 }
  0xfe   : > { %v864_v46 = vadd.f32 %v10206_v43, %v11853_v34  ;;  %v10441_v47 = vpop.f32.mrf.mxu1 }
  0xff   : > { %v10208_v48 = vpop.f32.mrf.mxu0 }
 0x100   : > { %v11859_v49 = vadd.f32 %v935_v22, %v864_v46  ;;  %v10209_v50 = vadd.f32 %v10208_v48, %v10207_v45  ;;  %v967_v51 = vpop.f32.mrf.mxu1  ;;  %v970_v48 = vmul.f32 0.1, %v11856_v42 }
 0x101   : > { %v10210_v52 = vpop.f32.mrf.mxu0 }
 0x102   : > { %v869_v53 = vadd.f32 %v10209_v50, %v11853_v34  ;;  %v10442_v54 = vpop.f32.mrf.mxu1 }
 0x103   : > { %v10211_v55 = vpop.f32.mrf.mxu0 }
 0x104   : > { %v11862_v56 = vadd.f32 %v940_v24, %v869_v53  ;;  %v10212_v57 = vadd.f32 %v10211_v55, %v10210_v52  ;;  %v10254_v58 = vpop.f32.mrf.mxu1 }
 0x105   : > { %v10213_v59 = vpop.f32.mrf.mxu0 }
 0x106   : > { %v872_v60 = vadd.f32 %v10212_v57, %v11853_v34  ;;  %v10255_v61 = vpop.f32.mrf.mxu1 }
 0x107   : > { %v10256_v62 = vadd.f32 %v10255_v61, %v10254_v58  ;;  %v10214_v63 = vpop.f32.mrf.mxu0  ;;  %v971_v58 = vmul.f32 0.1, %v11859_v49 }
 0x108   : > { %v11865_v0 = vadd.f32 %v943_v26, %v872_v60  ;;  %v10215_v3 = vadd.f32 %v10214_v63, %v10213_v59  ;;  %v10257_v4 = vpop.f32.mrf.mxu1 }
 0x109   : > { %v10216_v6 = vpop.f32.mrf.mxu0  ;;  %v1126_v46 = vadd.f32 %v10256_v62, %v11853_v34 }
 0x10a   : > { %v877_v7 = vadd.f32 %v10215_v3, %v11853_v34  ;;  %v10258_v8 = vpop.f32.mrf.mxu1 }
 0x10b   : > { %v10259_v9 = vadd.f32 %v10258_v8, %v10257_v4  ;;  %v10217_v2 = vpop.f32.mrf.mxu0 }
 0x10c   : > { %v11868_v10 = vadd.f32 %v948_v28, %v877_v7  ;;  %v10218_v11 = vadd.f32 %v10217_v2, %v10216_v6  ;;  %v10260_v5 = vpop.f32.mrf.mxu1  ;;  %v972_v2 = vmul.f32 0.1, %v11862_v56 }
 0x10d   : > { %v10219_v12 = vpop.f32.mrf.mxu0  ;;  %v1129_v55 = vadd.f32 %v10259_v9, %v11853_v34  ;;  %v980_v9 = vmax.f32 %v11859_v49, %v971_v58 }
 0x10e   : > { %v880_v13 = vadd.f32 %v10218_v11, %v11853_v34  ;;  %v10261_v14 = vpop.f32.mrf.mxu1 }
 0x10f   : > { %v10262_v15 = vadd.f32 %v10261_v14, %v10260_v5  ;;  %v10220_v16 = vpop.f32.mrf.mxu0 }
 0x110   : > { %v11871_v17 = vadd.f32 %v951_v30, %v880_v13  ;;  %v10221_v18 = vadd.f32 %v10220_v16, %v10219_v12  ;;  %v10263_v19 = vpop.f32.mrf.mxu1 }
 0x111   : > { %v10222_v20 = vpop.f32.mrf.mxu0  ;;  %v1134_v7 = vadd.f32 %v10262_v15, %v11853_v34  ;;  %v981_v15 = vmax.f32 %v11862_v56, %v972_v2 }
 0x112   : > { %v885_v21 = vadd.f32 %v10221_v18, %v11853_v34  ;;  %v10264_v22 = vpop.f32.mrf.mxu1 }
 0x113   : > { %v10265_v23 = vadd.f32 %v10264_v22, %v10263_v19  ;;  %v10223_v24 = vpop.f32.mrf.mxu0 }
 0x114   : > { %v11874_v25 = vadd.f32 %v956_v32, %v885_v21  ;;  %v10224_v26 = vadd.f32 %v10223_v24, %v10222_v20  ;;  %v10266_v27 = vpop.f32.mrf.mxu1  ;;  %v973_v21 = vmul.f32 0.1, %v11865_v0 }
 0x115   : > { %v10225_v28 = vpop.f32.mrf.mxu0  ;;  %v1137_v19 = vadd.f32 %v10265_v23, %v11853_v34 }
 0x116   : > { %v888_v29 = vadd.f32 %v10224_v26, %v11853_v34  ;;  %v10267_v31 = vpop.f32.mrf.mxu1  ;;  %v982_v23 = vmax.f32 %v11865_v0, %v973_v21 }
 0x117   : > { %v10268_v1 = vadd.f32 %v10267_v31, %v10266_v27  ;;  %v10226_v33 = vpop.f32.mrf.mxu0 }
 0x118   : > { %v11877_v30 = vadd.f32 %v959_v37, %v888_v29  ;;  %v10227_v35 = vadd.f32 %v10226_v33, %v10225_v28  ;;  %v10269_v36 = vpop.f32.mrf.mxu1 }
 0x119   : > { %v10228_v38 = vpop.f32.mrf.mxu0  ;;  %v1142_v31 = vadd.f32 %v10268_v1, %v11853_v34  ;;  %v975_v1 = vmul.f32 0.1, %v11871_v17 }
 0x11a   : > { %v893_v39 = vadd.f32 %v10227_v35, %v11853_v34  ;;  %v10270_v40 = vpop.f32.mrf.mxu1  ;;  %v974_v35 = vmul.f32 0.1, %v11868_v10 }
 0x11b   : > { %v10271_v41 = vadd.f32 %v10270_v40, %v10269_v36  ;;  %v10229_v43 = vpop.f32.mrf.mxu0 }
 0x11c   : > { %v11880_v32 = vadd.f32 %v964_v44, %v893_v39  ;;  %v10272_v45 = vpop.f32.mrf.mxu1  ;;  %v979_v44 = vmax.f32 %v11856_v42, %v970_v48  ;;  %v983_v48 = vmax.f32 %v11868_v10, %v974_v35 }
 0x11d   : > { %v1197_v47 = vpop.f32.mrf.mxu0 }
 0x11e   : > { %v1198_v50 = vadd.f32 %v1197_v47, %v1126_v46  ;;  %v10273_v51 = vpop.f32.mrf.mxu1  ;;  %v1145_v46 = vadd.f32 %v10271_v41, %v11853_v34  ;;  %v976_v41 = vmul.f32 0.1, %v11874_v25 }
 0x11f   : > { %v10274_v37 = vadd.f32 %v10273_v51, %v10272_v45  ;;  %v10449_v52 = vpop.f32.mrf.mxu0 }
 0x120   : > { %v1235_v53 = vmul.f32 0.1, %v1198_v50  ;;  %v10275_v54 = vpop.f32.mrf.mxu1  ;;  %v985_v2 = vmax.f32 %v11874_v25, %v976_v41 }
 0x121   : > { %v1200_v57 = vpop.f32.mrf.mxu0 }
 0x122   : > { %v1244_v59 = vmax.f32 %v1198_v50, %v1235_v53  ;;  %v1201_v60 = vadd.f32 %v1200_v57, %v1129_v55  ;;  %v10276_v61 = vpop.f32.mrf.mxu1  ;;  %v1150_v57 = vadd.f32 %v10274_v37, %v11853_v34  ;;  %v977_v37 = vmul.f32 0.1, %v11877_v30 }
 0x123   : > { %v10277_v62 = vadd.f32 %v10276_v61, %v10275_v54  ;;  %v10450_v63 = vpop.f32.mrf.mxu0 }
 0x124   : > { %v11887_v3 = vmax.f32 %v979_v44, %v1244_v59  ;;  %v1236_v4 = vmul.f32 0.1, %v1201_v60  ;;  %v10278_v6 = vpop.f32.mrf.mxu1  ;;  %v984_v44 = vmax.f32 %v11871_v17, %v975_v1 }
 0x125   : > { %v1205_v8 = vpop.f32.mrf.mxu0 }
 0x126   : > { %v1245_v11 = vmax.f32 %v1201_v60, %v1236_v4  ;;  %v1206_v5 = vadd.f32 %v1205_v8, %v1134_v7  ;;  %v10279_v12 = vpop.f32.mrf.mxu1  ;;  %v1153_v7 = vadd.f32 %v10277_v62, %v11853_v34  ;;  %v978_v62 = vmul.f32 0.1, %v11880_v32 }
 0x127   : > { %v10280_v42 = vadd.f32 %v10279_v12, %v10278_v6  ;;  %v10453_v13 = vpop.f32.mrf.mxu0 }
 0x128   : > { %v11892_v14 = vmax.f32 %v980_v9, %v1245_v11  ;;  %v1237_v16 = vmul.f32 0.1, %v1206_v5  ;;  %v10281_v18 = vpop.f32.mrf.mxu1 }
 0x129   : > { %v1208_v20 = vpop.f32.mrf.mxu0  ;;  %v1158_v18 = vadd.f32 %v10280_v42, %v11853_v34 }
 0x12a   : > { %v1246_v22 = vmax.f32 %v1206_v5, %v1237_v16  ;;  %v1209_v24 = vadd.f32 %v1208_v20, %v1137_v19  ;;  %v10282_v26 = vpop.f32.mrf.mxu1  ;;  %v986_v20 = vmax.f32 %v11877_v30, %v977_v37 }
 0x12b   : > { %v10454_v49 = vpop.f32.mrf.mxu0 }
 0x12c   : > { %v11897_v27 = vmax.f32 %v981_v15, %v1246_v22  ;;  %v1238_v28 = vmul.f32 0.1, %v1209_v24  ;;  %v11899_v29 = vpop.f32.mrf.mxu1 }
 0x12d   : > { %v1213_v33 = vpop.f32.mrf.mxu0 }
 0x12e   : > { %v1247_v36 = vmax.f32 %v1209_v24, %v1238_v28  ;;  %v1214_v38 = vadd.f32 %v1213_v33, %v1142_v31  ;;  %v11904_v39 = vpop.f32.mrf.mxu1  ;;  %v987_v31 = vmax.f32 %v11880_v32, %v978_v62 }
 0x12f   : > { %v10457_v56 = vpop.f32.mrf.mxu0  ;;  %v10309_v62 = vadd.f32 %v11904_v39, %v11899_v29  ;;  %v11329_v29 = vmov 1966171168  }
 0x130   : > { %v11906_v40 = vmax.f32 %v982_v23, %v1247_v36  ;;  %v1239_v43 = vmul.f32 0.1, %v1214_v38  ;;  %v11908_v45 = vpop.f32.mrf.mxu1  ;;  %v1871_v39 = vunpack.c.l.s4 %v11329_v29 }
 0x131   : > { %v1216_v47 = vpop.f32.mrf.mxu0 }
 0x132   : > { %v1248_v50 = vmax.f32 %v1214_v38, %v1239_v43  ;;  %v1217_v51 = vadd.f32 %v1216_v47, %v1145_v46  ;;  %v11913_v0 = vpop.f32.mrf.mxu1 }
 0x133   : > { %v10458_v52 = vpop.f32.mrf.mxu0 }
 0x134   : > { %v11915_v53 = vmax.f32 %v983_v48, %v1248_v50  ;;  %v1240_v54 = vmul.f32 0.1, %v1217_v51  ;;  %v11917_v55 = vpop.f32.mrf.mxu1 }
 0x135   : > { %v1221_v58 = vpop.f32.mrf.mxu0 }
 0x136   : > { %v1249_v59 = vmax.f32 %v1217_v51, %v1240_v54  ;;  %v1222_v60 = vadd.f32 %v1221_v58, %v1150_v57  ;;  %v11922_v10 = vpop.f32.mrf.mxu1 }
 0x137   : > { %v10461_v61 = vpop.f32.mrf.mxu0 }
 0x138   : > { %v11924_v63 = vmax.f32 %v984_v44, %v1249_v59  ;;  %v1241_v4 = vmul.f32 0.1, %v1222_v60  ;;  %v11926_v6 = vpop.f32.mrf.mxu1 }
 0x139   : > { %v1224_v8 = vpop.f32.mrf.mxu0 }
 0x13a   : > { %v1250_v9 = vmax.f32 %v1222_v60, %v1241_v4  ;;  %v1225_v11 = vadd.f32 %v1224_v8, %v1153_v7  ;;  %v11931_v17 = vpop.f32.mrf.mxu1 }
 0x13b   : > { %v10462_v5 = vpop.f32.mrf.mxu0 }
 0x13c   : > { %v11933_v12 = vmax.f32 %v985_v2, %v1250_v9  ;;  %v1242_v13 = vmul.f32 0.1, %v1225_v11  ;;  %v11935_v16 = vpop.f32.mrf.mxu1 }
 0x13d   : > { %v1229_v19 = vpop.f32.mrf.mxu0 }
 0x13e   : > { %v1251_v21 = vmax.f32 %v1225_v11, %v1242_v13  ;;  %v1230_v15 = vadd.f32 %v1229_v19, %v1158_v18  ;;  %v11940_v25 = vpop.f32.mrf.mxu1 }
 0x13f   : > { %v10465_v22 = vpop.f32.mrf.mxu0 }
 0x140   : > { %v11942_v24 = vmax.f32 %v986_v20, %v1251_v21  ;;  %v1243_v26 = vmul.f32 0.1, %v1230_v15  ;;  %v11944_v49 = vpop.f32.mrf.mxu1  ;;  %v10312_v22 = vadd.f32 %v11913_v0, %v11908_v45 }
 0x141   : > { %v1232_v28 = vpop.f32.mrf.mxu0 }
 0x142   : > { %v1252_v33 = vmax.f32 %v1230_v15, %v1243_v26  ;;  %v11947_v42 = vpop.f32.mrf.mxu1  ;;  %v1400_v28 = vadd.f32 %v10309_v62, %v11853_v34 }
 0x143   : > { %v10466_v35 = vpop.f32.mrf.mxu0 }
 0x144   : > { %v11949_v23 = vmax.f32 %v987_v31, %v1252_v33  ;;  %v11951_v30 = vpop.f32.mrf.mxu1  ;;  %v10315_v35 = vadd.f32 %v11922_v10, %v11917_v55  ;;  %v1872_v55 = vunpack.c.0.s8 %v1871_v39 }
 0x145   : > { %v1471_v36 = vpop.f32.mrf.mxu0 }
 0x146   : > { %v11953_v38 = vpop.f32.mrf.mxu1 }
 0x147   : > { %v10473_v56 = vpop.f32.mrf.mxu0 }
 0x148   : > { %v11955_v43 = vpop.f32.mrf.mxu1 }
 0x149   : > { %v1474_v46 = vpop.f32.mrf.mxu0 }
 0x14a   : > { %v11957_v47 = vpop.f32.mrf.mxu1 }
 0x14b   : > { %v10474_v1 = vpop.f32.mrf.mxu0 }
 0x14c   : > { %v11959_v48 = vpop.f32.mrf.mxu1  ;;  %v1873_v1 = vlaneseq }
 0x14d   : > { %v1479_v32 = vpop.f32.mrf.mxu0 }
 0x14e   : > { %v11961_v50 = vpop.f32.mrf.mxu1  ;;  %v1874_v10 = vshrl.u32 %v1873_v1, 7 }
 0x14f   : > { %v10477_v51 = vpop.f32.mrf.mxu0 }
 0x150   : > { %v10334_v52 = vpop.f32.mrf.mxu1  ;;  %v1472_v51 = vadd.f32 %v1471_v36, %v1400_v28  ;;  %v12010_v29 = vsub.s32 %v1872_v55, %v1874_v10 }
 0x151   : > { %v11963_v54 = vpop.f32.mrf.mxu0 }
 0x152   : > { %v10335_v57 = vpop.f32.mrf.mxu1  ;;  %v1509_v36 = vmul.f32 0.1, %v1472_v51 }
 0x153   : > { %v10478_v58 = vpop.f32.mrf.mxu0  ;;  %v1403_v57 = vadd.f32 %v10312_v22, %v11853_v34 }
 0x154   : > { %v10360_v41 = vpop.f32.mrf.mxu1 }
 0x155   : > { %v11965_v44 = vpop.f32.mrf.mxu0 }
 0x156   : > { %v10361_v59 = vpop.f32.mrf.mxu1 }
 0x157   : > { %v10481_v60 = vpop.f32.mrf.mxu0  ;;  %v10362_v31 = vadd.f32 %v10361_v59, %v10360_v41  ;;  %v1475_v59 = vadd.f32 %v1474_v46, %v1403_v57 }
 0x158   : > { %v10363_v61 = vpop.f32.mrf.mxu1  ;;  %v1408_v60 = vadd.f32 %v10315_v35, %v11853_v34 }
 0x159   : > { %v11967_v4 = vpop.f32.mrf.mxu0  ;;  %v1665_v41 = vadd.f32 %v10362_v31, %v11853_v34 }
 0x15a   : > { %v10364_v7 = vpop.f32.mrf.mxu1  ;;  %v12003_v22 = vadd.f32 %v1479_v32, %v1408_v60  ;;  %v10330_v60 = vadd.f32 %v11957_v47, %v11955_v43 }
 0x15b   : > { %v10482_v8 = vpop.f32.mrf.mxu0  ;;  %v10365_v45 = vadd.f32 %v10364_v7, %v10363_v61  ;;  %v10321_v61 = vadd.f32 %v11940_v25, %v11935_v16  ;;  %v10324_v7 = vadd.f32 %v11947_v42, %v11944_v49  ;;  %v1518_v16 = vmax.f32 %v1472_v51, %v1509_v36 }
 0x15c   : > { %v10366_v37 = vpop.f32.mrf.mxu1 }
 0x15d   : > { %v11969_v2 = vpop.f32.mrf.mxu0  ;;  %v1668_v35 = vadd.f32 %v10365_v45, %v11853_v34  ;;  %v1416_v39 = vadd.f32 %v10321_v61, %v11853_v34 }
 0x15e   : > { %v10367_v9 = vpop.f32.mrf.mxu1 }
 0x15f   : > { %v10485_v11 = vpop.f32.mrf.mxu0 }
 0x160   : > { %v10369_v5 = vpop.f32.mrf.mxu1  ;;  %v10318_v11 = vadd.f32 %v11931_v17, %v11926_v6  ;;  %v10327_v6 = vadd.f32 %v11953_v38, %v11951_v30  ;;  %v1510_v17 = vmul.f32 0.1, %v1475_v59  ;;  %v1419_v30 = vadd.f32 %v10324_v7, %v11853_v34 }
 0x161   : > { %v11971_v13 = vpop.f32.mrf.mxu0 }
 0x162   : > { %v10370_v18 = vpop.f32.mrf.mxu1  ;;  %v1411_v25 = vadd.f32 %v10318_v11, %v11853_v34  ;;  %v1424_v55 = vadd.f32 %v10327_v6, %v11853_v34 }
 0x163   : > { %v10486_v19 = vpop.f32.mrf.mxu0  ;;  %v10371_v1 = vadd.f32 %v10370_v18, %v10369_v5 }
 0x164   : > { %v11975_v20 = vpop.f32.mrf.mxu1 }
 0x165   : > { %v11977_v21 = vpop.f32.mrf.mxu0 }
 0x166   : > { %v11979_v15 = vpop.f32.mrf.mxu1 }
 0x167   : > { %v10489_v26 = vpop.f32.mrf.mxu0  ;;  %v10374_v43 = vadd.f32 %v11979_v15, %v11975_v20 }
 0x168   : > { %v11984_v33 = vpop.f32.mrf.mxu1  ;;  %v10368_v26 = vadd.f32 %v10367_v9, %v10366_v37  ;;  %v1511_v37 = vmul.f32 0.1, %v12003_v22  ;;  %v10333_v9 = vadd.f32 %v11961_v50, %v11959_v48  ;;  %v12026_v50 = vadd.f32 %v11965_v44, %v1416_v39 }
 0x169   : > { %v1506_v56 = vpop.f32.mrf.mxu0  ;;  %v1676_v44 = vadd.f32 %v10371_v1, %v11853_v34 }
 0x16a   : > { %v11988_v52 = vpop.f32.mrf.mxu1  ;;  %v1673_v45 = vadd.f32 %v10368_v26, %v11853_v34  ;;  %v1520_v36 = vmax.f32 %v12003_v22, %v1511_v37  ;;  %v1513_v6 = vmul.f32 0.1, %v12026_v50 }
 0x16b   : > { %v10490_v58 = vpop.f32.mrf.mxu0 }
 0x16c   : > { %v11991_v0 = vpop.f32.mrf.mxu1 }
 0x16d   : > { %v1736_v8 = vpop.f32.mrf.mxu0 }
 0x16e   : > { %v1737_v19 = vadd.f32 %v1736_v8, %v1665_v41  ;;  %v11997_v62 = vpop.f32.mrf.mxu1  ;;  %v1519_v41 = vmax.f32 %v1475_v59, %v1510_v17  ;;  %v1483_v8 = vadd.f32 %v11963_v54, %v1411_v25  ;;  %v1432_v59 = vadd.f32 %v10333_v9, %v11853_v34 }
 0x16f   : > { %v10497_v46 = vpop.f32.mrf.mxu0 }
 0x170   : > { %v1774_v28 = vmul.f32 0.1, %v1737_v19  ;;  %v12005_v31 = vpop.f32.mrf.mxu1  ;;  %v1512_v26 = vmul.f32 0.1, %v1483_v8 }
 0x171   : > { %v1739_v56 = vpop.f32.mrf.mxu0 }
 0x172   : > { %v1783_v49 = vmax.f32 %v1737_v19, %v1774_v28  ;;  %v1740_v42 = vadd.f32 %v1739_v56, %v1668_v35  ;;  %v12013_v32 = vpop.f32.mrf.mxu1  ;;  %v1504_v28 = vadd.f32 %v11977_v21, %v1432_v59  ;;  %v1681_v21 = vadd.f32 %v10374_v43, %v11853_v34 }
 0x173   : > { %v10498_v38 = vpop.f32.mrf.mxu0 }
 0x174   : > { %v1792_v57 = vmax.f32 %v1518_v16, %v1783_v49  ;;  %v1775_v58 = vmul.f32 0.1, %v1740_v42  ;;  %v10384_v51 = vpop.f32.mrf.mxu1  ;;  %v12043_v16 = vadd.f32 %v11969_v2, %v1424_v55  ;;  %v10377_v49 = vadd.f32 %v11988_v52, %v11984_v33 }
 0x175   : > { %v1744_v48 = vpop.f32.mrf.mxu0  ;;  %v1517_v38 = vmul.f32 0.1, %v1504_v28 }
 0x176   : > { %v1801_v10 = vmax.f32 %v11887_v3, %v1792_v57  ;;  %v1784_v5 = vmax.f32 %v1740_v42, %v1775_v58  ;;  %v1745_v18 = vadd.f32 %v1744_v48, %v1673_v45  ;;  %v10385_v11 = vpop.f32.mrf.mxu1  ;;  %v12035_v3 = vadd.f32 %v11967_v4, %v1419_v30 }
 0x177   : > { %v10386_v47 = vadd.f32 %v10385_v11, %v10384_v51  ;;  %v10501_v54 = vpop.f32.mrf.mxu0  ;;  %v1427_v4 = vadd.f32 %v10330_v60, %v11853_v34  ;;  %v1522_v57 = vmax.f32 %v12026_v50, %v1513_v6  ;;  %v12056_v52 = vmul.f32 0.1, %v12043_v16 }
 0x178   : > { %v10176_v19 = vpack.c.bf16 %v1801_v10, %v1801_v10  ;;  %v1793_v61 = vmax.f32 %v1519_v41, %v1784_v5  ;;  %v1776_v7 = vmul.f32 0.1, %v1745_v18  ;;  %v10387_v46 = vpop.f32.mrf.mxu1  ;;  %v12050_v30 = vmul.f32 0.1, %v12035_v3 }
 0x179   : > { %v1747_v22 = vpop.f32.mrf.mxu0  ;;  %v1697_v35 = vadd.f32 %v10386_v47, %v11853_v34  ;;  %v12059_v41 = vadd.f32 %v11971_v13, %v1427_v4  ;;  %v10380_v60 = vadd.f32 %v11997_v62, %v11991_v0  ;;  %v1684_v5 = vadd.f32 %v10377_v49, %v11853_v34 }
 0x17a   : > { %1848 = vst.msk [vmem:[#allocation2] sm:$0xf] %vm1847_vm2, %v10176_v19  ;;  %v1802_v20 = vmax.f32 %v11892_v14, %v1793_v61  ;;  %v1785_v15 = vmax.f32 %v1745_v18, %v1776_v7  ;;  %v1748_v17 = vadd.f32 %v1747_v22, %v1676_v44  ;;  %v10388_v56 = vpop.f32.mrf.mxu1  ;;  %v1521_v14 = vmax.f32 %v1483_v8, %v1512_v26 }
 0x17b   : > { %v10502_v25 = vpop.f32.mrf.mxu0  ;;  %v1523_v18 = vmax.f32 %v12035_v3, %v12050_v30  ;;  %v1526_v11 = vmax.f32 %v1504_v28, %v1517_v38  ;;  %v12072_v46 = vmul.f32 0.1, %v12059_v41 }
 0x17c   : > { %v10177_v42 = vpack.c.bf16 %v1802_v20, %v1802_v20  ;;  %v1794_v37 = vmax.f32 %v1520_v36, %v1785_v15  ;;  %v1777_v9 = vmul.f32 0.1, %v1748_v17  ;;  %v1768_v39 = vpop.f32.mrf.mxu1  ;;  %v10383_v36 = vadd.f32 %v12013_v32, %v12005_v31 }
 0x17d   : > { %v1769_v2 = vadd.f32 %v1768_v39, %v1697_v35  ;;  %v1752_v1 = vpop.f32.mrf.mxu0  ;;  %v1689_v32 = vadd.f32 %v10380_v60, %v11853_v34 }
 0x17e   : > { %1849 = vst.msk [vmem:[#allocation2 + $0x4] sm:$0xf] %vm1847_vm2, %v10177_v42  ;;  %v1803_v58 = vmax.f32 %v11897_v27, %v1794_v37  ;;  %v1786_v51 = vmax.f32 %v1748_v17, %v1777_v9  ;;  %v1753_v45 = vadd.f32 %v1752_v1, %v1681_v21  ;;  %v10513_v33 = vpop.f32.mrf.mxu1  ;;  %v1692_v15 = vadd.f32 %v10383_v36, %v11853_v34 }
 0x17f   : > { %v1782_v8 = vmul.f32 0.1, %v1769_v2  ;;  %v10505_v55 = vpop.f32.mrf.mxu0 }
 0x180   : > { %v10178_v48 = vpack.c.bf16 %v1803_v58, %v1803_v58  ;;  %v1795_v50 = vmax.f32 %v1521_v14, %v1786_v51  ;;  %v1778_v10 = vmul.f32 0.1, %v1753_v45  ;;  %v1771_v27 = vpop.f32.mrf.mxu1  ;;  %v1524_v58 = vmax.f32 %v12043_v16, %v12056_v52 }
 0x181   : > { %v1791_v13 = vmax.f32 %v1769_v2, %v1782_v8  ;;  %v1755_v59 = vpop.f32.mrf.mxu0  ;;  %v9294_v43 = vld.sshfl [vmem:[#allocation2] sm:$0x10 pattern:$0x75316420]  ;;  %v1857_v47 = vld [vmem:[#allocation2] sm:$0x1] }
 0x182   : > { %1850 = vst.msk [vmem:[#allocation2 + $0x8] sm:$0xf] %vm1847_vm2, %v10178_v48  ;;  %v1804_v0 = vmax.f32 %v11906_v40, %v1795_v50  ;;  %v1787_v62 = vmax.f32 %v1753_v45, %v1778_v10  ;;  %v1756_v54 = vadd.f32 %v1755_v59, %v1684_v5  ;;  %v1869_v19 = vcombine.high %v9294_v43, %v9294_v43  ;;  %v9296_v61 = vld.sshfl [vmem:[#allocation2] sm:$0x20 pattern:$0x75316420]  ;;  %v10514_v7 = vpop.f32.mrf.mxu1 }
 0x183   : > { %1859 = vst.msk [vmem:[#allocation3] sm:$0x1] %vm1858_vm3, %v1857_v47  ;;  %v1800_v44 = vmax.f32 %v1526_v11, %v1791_v13  ;;  %v10506_v31 = vpop.f32.mrf.mxu0  ;;  %v1910_v26 = vcombine.high %v9296_v61, %v9296_v61  ;;  %v9295_v3 = vld.sshfl [vmem:[#allocation2] sm:$0x2 pattern:$0x75316420]  ;;  %v1525_v43 = vmax.f32 %v12059_v41, %v12072_v46 }
 0x184   : > { %v10179_v28 = vpack.c.bf16 %v1804_v0, %v1804_v0  ;;  %v1796_v22 = vmax.f32 %v1522_v57, %v1787_v62  ;;  %v1779_v35 = vmul.f32 0.1, %v1756_v54  ;;  %v1876_v40 = vrot.slane %v1869_v19, %v12010_v29 }
 0x185   : > { %v1809_v6 = vmax.f32 %v11949_v23, %v1800_v44  ;;  %v1760_v20 = vpop.f32.mrf.mxu0  ;;  %v9297_v17 = vld.sshfl [vmem:[#allocation2 + $0x4] sm:$0x10 pattern:$0x75316420]  ;;  %v1917_v56 = vrot.slane %v1910_v26, %v12010_v29  ;;  %v1923_v4 = vld [vmem:[#allocation2 + $0x4] sm:$0x1]  ;;  %v1897_v25 = vrot.slane %v9295_v3, %v12010_v29 }
 0x186   : > { %1851 = vst.msk [vmem:[#allocation2 + $0xc] sm:$0xf] %vm1847_vm2, %v10179_v28  ;;  %v1805_v21 = vmax.f32 %v11915_v53, %v1796_v22  ;;  %v1788_v49 = vmax.f32 %v1756_v54, %v1779_v35  ;;  %v1761_v42 = vadd.f32 %v1760_v20, %v1689_v32  ;;  %1877 = vrot.lane.b32.xlu0 %v1876_v40, %s11330_s2  ;;  %v9299_v23 = vld.sshfl [vmem:[#allocation2 + $0x4] sm:$0x20 pattern:$0x75316420] }
 0x187   : > { %v1934_v37 = vcombine.high %v9297_v17, %v9297_v17  ;;  %1924 = vst.msk [vmem:[#allocation3 + $0x2] sm:$0x1] %vm1858_vm3, %v1923_v4  ;;  %v10184_v34 = vpack.c.bf16 %v1809_v6, %v1809_v6  ;;  %v10509_v9 = vpop.f32.mrf.mxu0  ;;  %v1918_v39 = vcombine.high %v1917_v56, %v1917_v56  ;;  %v1974_v14 = vcombine.high %v9299_v23, %v9299_v23  ;;  %v9298_v38 = vld.sshfl [vmem:[#allocation2 + $0x4] sm:$0x2 pattern:$0x75316420] }
 0x188   : > { %v1898_v30 = vcombine.high %v1897_v25, %v1897_v25  ;;  %v10180_v2 = vpack.c.bf16 %v1805_v21, %v1805_v21  ;;  %v1797_v1 = vmax.f32 %v1523_v18, %v1788_v49  ;;  %v1780_v57 = vmul.f32 0.1, %v1761_v42 }
 0x189   : > { %v1941_v53 = vrot.slane %v1934_v37, %v12010_v29  ;;  %1856 = vst.msk [vmem:[#allocation2 + $0x20] sm:$0xf] %vm1847_vm2, %v10184_v34  ;;  %v1763_v51 = vpop.f32.mrf.mxu0  ;;  %v1981_v45 = vrot.slane %v1974_v14, %v12010_v29  ;;  %v9300_v33 = vld.sshfl [vmem:[#allocation2 + $0x8] sm:$0x10 pattern:$0x75316420]  ;;  %v1961_v60 = vrot.slane %v9298_v38, %v12010_v29 }
 0x18a   : > { %1900 = vst.msk [vmem:[#allocation3 + $0x1] sm:$0x1] %vm1858_vm3, %v1898_v30  ;;  %v1987_v8 = vld [vmem:[#allocation2 + $0x8] sm:$0x1]  ;;  %v1806_v55 = vmax.f32 %v11924_v63, %v1797_v1  ;;  %v1789_v48 = vmax.f32 %v1761_v42, %v1780_v57  ;;  %v1764_v50 = vadd.f32 %v1763_v51, %v1692_v15  ;;  %1919 = vrot.lane.b32.xlu0 %v1918_v39, %s11330_s2 }
 0x18b   : > { %1852 = vst.msk [vmem:[#allocation2 + $0x10] sm:$0xf] %vm1847_vm2, %v10180_v2  ;;  %1942 = vrot.lane.b32.xlu1 %v1941_v53, %s11330_s2  ;;  %v9302_v16 = vld.sshfl [vmem:[#allocation2 + $0x8] sm:$0x20 pattern:$0x75316420]  ;;  %v10510_v52 = vpop.f32.mrf.mxu0  ;;  %v1982_v10 = vcombine.high %v1981_v45, %v1981_v45  ;;  %v1998_v5 = vcombine.high %v9300_v33, %v9300_v33  ;;  %v1962_v18 = vcombine.high %v1961_v60, %v1961_v60 }
 0x18c   : > { %1988 = vst.msk [vmem:[#allocation3 + $0x4] sm:$0x1] %vm1858_vm3, %v1987_v8  ;;  %v2038_v27 = vcombine.high %v9302_v16, %v9302_v16  ;;  %v9301_v11 = vld.sshfl [vmem:[#allocation2 + $0x8] sm:$0x2 pattern:$0x75316420]  ;;  %v10181_v36 = vpack.c.bf16 %v1806_v55, %v1806_v55  ;;  %v1798_v13 = vmax.f32 %v1524_v58, %v1789_v48 }
 0x18d   : > { %v1781_v59 = vmul.f32 0.1, %v1764_v50  ;;  %v2025_v63 = vrot.slane %v9301_v11, %v12010_v29  ;;  %v2005_v47 = vrot.slane %v1998_v5, %v12010_v29  ;;  %v9303_v62 = vld.sshfl [vmem:[#allocation2 + $0xc] sm:$0x10 pattern:$0x75316420] }
 0x18e   : > { %v2045_v0 = vrot.slane %v2038_v27, %v12010_v29  ;;  %1964 = vst.msk [vmem:[#allocation3 + $0x3] sm:$0x1] %vm1858_vm3, %v1962_v18  ;;  %v2051_v54 = vld [vmem:[#allocation2 + $0xc] sm:$0x1]  ;;  %v1807_v19 = vmax.f32 %v11933_v12, %v1798_v13  ;;  %v2062_v7 = vcombine.high %v9303_v62, %v9303_v62 }
 0x18f   : > { %1853 = vst.msk [vmem:[#allocation2 + $0x14] sm:$0xf] %vm1847_vm2, %v10181_v36  ;;  %v1790_v61 = vmax.f32 %v1764_v50, %v1781_v59  ;;  %1983 = vrot.lane.b32.xlu1 %v1982_v10, %s11330_s2  ;;  %v9305_v44 = vld.sshfl [vmem:[#allocation2 + $0xc] sm:$0x20 pattern:$0x75316420]  ;;  %v2026_v31 = vcombine.high %v2025_v63, %v2025_v63  ;;  %2006 = vrot.lane.b32.xlu0 %v2005_v47, %s11330_s2 }
 0x190   : > { %2052 = vst.msk [vmem:[#allocation3 + $0x6] sm:$0x1] %vm1858_vm3, %v2051_v54  ;;  %v2046_v41 = vcombine.high %v2045_v0, %v2045_v0  ;;  %v2102_v46 = vcombine.high %v9305_v44, %v9305_v44  ;;  %v9304_v32 = vld.sshfl [vmem:[#allocation2 + $0xc] sm:$0x2 pattern:$0x75316420]  ;;  %v10182_v26 = vpack.c.bf16 %v1807_v19, %v1807_v19  ;;  %v2069_v28 = vrot.slane %v2062_v7, %v12010_v29 }
 0x191   : > { %v1799_v3 = vmax.f32 %v1525_v43, %v1790_v61  ;;  %2028 = vst.msk [vmem:[#allocation3 + $0x5] sm:$0x1] %vm1858_vm3, %v2026_v31  ;;  %v2089_v12 = vrot.slane %v9304_v32, %v12010_v29  ;;  %v2371_v22 = vld [vmem:[#allocation2 + $0x20] sm:$0x1] }
 0x192   : > { %v2109_v35 = vrot.slane %v2102_v46, %v12010_v29  ;;  %v9306_v40 = vld.sshfl [vmem:[#allocation2 + $0x10] sm:$0x10 pattern:$0x75316420]  ;;  %v2115_v6 = vld [vmem:[#allocation2 + $0x10] sm:$0x1] }
 0x193   : > { %2372 = vst.msk [vmem:[#allocation3 + $0x10] sm:$0x1] %vm1858_vm3, %v2371_v22  ;;  %v1808_v20 = vmax.f32 %v11942_v24, %v1799_v3  ;;  %2047 = vrot.lane.b32.xlu1 %v2046_v41, %s11330_s2  ;;  %v2126_v15 = vcombine.high %v9306_v40, %v9306_v40  ;;  %v9308_v17 = vld.sshfl [vmem:[#allocation2 + $0x10] sm:$0x20 pattern:$0x75316420]  ;;  %v2090_v56 = vcombine.high %v2089_v12, %v2089_v12 }
 0x194   : > { %1854 = vst.msk [vmem:[#allocation2 + $0x18] sm:$0xf] %vm1847_vm2, %v10182_v26  ;;  %2070 = vrot.lane.b32.xlu0 %v2069_v28, %s11330_s2  ;;  %v2166_v4 = vcombine.high %v9308_v17, %v9308_v17  ;;  %v2110_v21 = vcombine.high %v2109_v35, %v2109_v35  ;;  %v9307_v42 = vld.sshfl [vmem:[#allocation2 + $0x10] sm:$0x2 pattern:$0x75316420] }
 0x195   : > { %2116 = vst.msk [vmem:[#allocation3 + $0x8] sm:$0x1] %vm1858_vm3, %v2115_v6  ;;  %v10183_v25 = vpack.c.bf16 %v1808_v20, %v1808_v20  ;;  %v2133_v49 = vrot.slane %v2126_v15, %v12010_v29  ;;  %2092 = vst.msk [vmem:[#allocation3 + $0x7] sm:$0x1] %vm1858_vm3, %v2090_v56  ;;  %v2153_v23 = vrot.slane %v9307_v42, %v12010_v29 }
 0x196   : > { %v2173_v37 = vrot.slane %v2166_v4, %v12010_v29  ;;  %v9309_v24 = vld.sshfl [vmem:[#allocation2 + $0x14] sm:$0x10 pattern:$0x75316420]  ;;  %v2179_v34 = vld [vmem:[#allocation2 + $0x14] sm:$0x1] }
 0x197   : > { %1855 = vst.msk [vmem:[#allocation2 + $0x1c] sm:$0xf] %vm1847_vm2, %v10183_v25  ;;  %2111 = vrot.lane.b32.xlu1 %v2110_v21, %s11330_s2  ;;  %v2190_v9 = vcombine.high %v9309_v24, %v9309_v24  ;;  %v9311_v39 = vld.sshfl [vmem:[#allocation2 + $0x14] sm:$0x20 pattern:$0x75316420]  ;;  %v2154_v30 = vcombine.high %v2153_v23, %v2153_v23 }
 0x198   : > { %2180 = vst.msk [vmem:[#allocation3 + $0xa] sm:$0x1] %vm1858_vm3, %v2179_v34  ;;  %2134 = vrot.lane.b32.xlu0 %v2133_v49, %s11330_s2  ;;  %v2230_v14 = vcombine.high %v9311_v39, %v9311_v39  ;;  %v9310_v38 = vld.sshfl [vmem:[#allocation2 + $0x14] sm:$0x2 pattern:$0x75316420]  ;;  %v2174_v2 = vcombine.high %v2173_v37, %v2173_v37 }
 0x199   : > { %v2197_v1 = vrot.slane %v2190_v9, %v12010_v29  ;;  %v2217_v57 = vrot.slane %v9310_v38, %v12010_v29  ;;  %v9319_v53 = vld.sshfl [vmem:[#allocation2 + $0x20] sm:$0x2 pattern:$0x75316420]  ;;  %2156 = vst.msk [vmem:[#allocation3 + $0x9] sm:$0x1] %vm1858_vm3, %v2154_v30 }
 0x19a   : > { %v2237_v58 = vrot.slane %v2230_v14, %v12010_v29  ;;  %v2409_v33 = vrot.slane %v9319_v53, %v12010_v29  ;;  %v9318_v5 = vld.sshfl [vmem:[#allocation2 + $0x20] sm:$0x10 pattern:$0x75316420] }
 0x19b   : > { %v9312_v51 = vld.sshfl [vmem:[#allocation2 + $0x18] sm:$0x10 pattern:$0x75316420]  ;;  %v2243_v45 = vld [vmem:[#allocation2 + $0x18] sm:$0x1]  ;;  %2175 = vrot.lane.b32.xlu1 %v2174_v2, %s11330_s2  ;;  %v2218_v55 = vcombine.high %v2217_v57, %v2217_v57  ;;  %v2382_v44 = vcombine.high %v9318_v5, %v9318_v5 }
 0x19c   : > { %v2254_v60 = vcombine.high %v9312_v51, %v9312_v51  ;;  %v9314_v8 = vld.sshfl [vmem:[#allocation2 + $0x18] sm:$0x20 pattern:$0x75316420]  ;;  %2244 = vst.msk [vmem:[#allocation3 + $0xc] sm:$0x1] %vm1858_vm3, %v2243_v45  ;;  %2198 = vrot.lane.b32.xlu0 %v2197_v1, %s11330_s2  ;;  %v2410_v16 = vcombine.high %v2409_v33, %v2409_v33  ;;  %v2238_v52 = vcombine.high %v2237_v58, %v2237_v58 }
 0x19d   : > { %v2294_v48 = vcombine.high %v9314_v8, %v9314_v8  ;;  %v9313_v50 = vld.sshfl [vmem:[#allocation2 + $0x18] sm:$0x2 pattern:$0x75316420]  ;;  %2220 = vst.msk [vmem:[#allocation3 + $0xb] sm:$0x1] %vm1858_vm3, %v2218_v55  ;;  %v2389_v32 = vrot.slane %v2382_v44, %v12010_v29 }
 0x19e   : > { %v2261_v10 = vrot.slane %v2254_v60, %v12010_v29  ;;  %v9320_v27 = vld.sshfl [vmem:[#allocation2 + $0x20] sm:$0x20 pattern:$0x75316420]  ;;  %v2281_v18 = vrot.slane %v9313_v50, %v12010_v29  ;;  %v2307_v13 = vld [vmem:[#allocation2 + $0x1c] sm:$0x1] }
 0x19f   : > { %v2301_v11 = vrot.slane %v2294_v48, %v12010_v29  ;;  %v9315_v36 = vld.sshfl [vmem:[#allocation2 + $0x1c] sm:$0x10 pattern:$0x75316420]  ;;  %2412 = vst.msk [vmem:[#allocation3 + $0x11] sm:$0x1] %vm1858_vm3, %v2410_v16  ;;  %2239 = vrot.lane.b32.xlu1 %v2238_v52, %s11330_s2  ;;  %v2422_v19 = vcombine.high %v9320_v27, %v9320_v27 }
 0x1a0   : > { %v2318_v59 = vcombine.high %v9315_v36, %v9315_v36  ;;  %v9317_v63 = vld.sshfl [vmem:[#allocation2 + $0x1c] sm:$0x20 pattern:$0x75316420]  ;;  %v2282_v43 = vcombine.high %v2281_v18, %v2281_v18  ;;  %2308 = vst.msk [vmem:[#allocation3 + $0xe] sm:$0x1] %vm1858_vm3, %v2307_v13  ;;  %2262 = vrot.lane.b32.xlu0 %v2261_v10, %s11330_s2 }
 0x1a1   : > { %v2358_v47 = vcombine.high %v9317_v63, %v9317_v63  ;;  %v9316_v0 = vld.sshfl [vmem:[#allocation2 + $0x1c] sm:$0x2 pattern:$0x75316420]  ;;  %v2302_v62 = vcombine.high %v2301_v11, %v2301_v11  ;;  %v2429_v46 = vrot.slane %v2422_v19, %v12010_v29 }
 0x1a2   : > { %v2325_v54 = vrot.slane %v2318_v59, %v12010_v29  ;;  %2284 = vst.msk [vmem:[#allocation3 + $0xd] sm:$0x1] %vm1858_vm3, %v2282_v43  ;;  %v2345_v61 = vrot.slane %v9316_v0, %v12010_v29 }
 0x1a3   : > { %v2365_v7 = vrot.slane %v2358_v47, %v12010_v29  ;;  %2303 = vrot.lane.b32.xlu1 %v2302_v62, %s11330_s2  ;;  %v2430_v26 = vcombine.high %v2429_v46, %v2429_v46 }
 0x1a4   : > { %v2346_v31 = vcombine.high %v2345_v61, %v2345_v61  ;;  %2326 = vrot.lane.b32.xlu0 %v2325_v54, %s11330_s2 }
 0x1a5   : > { %v2366_v41 = vcombine.high %v2365_v7, %v2365_v7 }
 0x1a6   : > { %2348 = vst.msk [vmem:[#allocation3 + $0xf] sm:$0x1] %vm1858_vm3, %v2346_v31 }
 0x1a7   : > { %2367 = vrot.lane.b32.xlu1 %v2366_v41, %s11330_s2 }
 0x1a8   : > { %2390 = vrot.lane.b32.xlu0 %v2389_v32, %s11330_s2 }
 0x1ab   : > { %2431 = vrot.lane.b32.xlu1 %v2430_v26, %s11330_s2 }
 0x1f8   : > { %v1878_v3 = vpop.permute.xlu0 %1877 }
 0x1f9   : > { %1881 = vst.msk [vmem:[#allocation3] sm:$0x1] %vm1880_vm4, %v1878_v3 }
 0x1fc   : > { %v1920_v12 = vpop.permute.xlu0 %1919 }
 0x1fd   : > { %v1943_v28 = vpop.permute.xlu1 %1942  ;;  %1922 = vst.msk [vmem:[#allocation3 + $0x1] sm:$0x1] %vm1880_vm4, %v1920_v12 }
 0x1fe   : > { %1945 = vst.msk [vmem:[#allocation3 + $0x2] sm:$0x1] %vm1880_vm4, %v1943_v28 }
 0x201   : > { %v1984_v22 = vpop.permute.xlu1 %1983  ;;  %v2007_v29 = vpop.permute.xlu0 %2006 }
 0x202   : > { %1986 = vst.msk [vmem:[#allocation3 + $0x3] sm:$0x1] %vm1880_vm4, %v1984_v22  ;;  %2009 = vst.msk [vmem:[#allocation3 + $0x4] sm:$0x1] %vm1880_vm4, %v2007_v29 }
 0x205   : > { %v2048_v35 = vpop.permute.xlu1 %2047 }
 0x206   : > { %2050 = vst.msk [vmem:[#allocation3 + $0x5] sm:$0x1] %vm1880_vm4, %v2048_v35  ;;  %v2071_v40 = vpop.permute.xlu0 %2070 }
 0x207   : > { %2073 = vst.msk [vmem:[#allocation3 + $0x6] sm:$0x1] %vm1880_vm4, %v2071_v40 }
 0x209   : > { %v2112_v6 = vpop.permute.xlu1 %2111 }
 0x20a   : > { %2114 = vst.msk [vmem:[#allocation3 + $0x7] sm:$0x1] %vm1880_vm4, %v2112_v6  ;;  %v2135_v20 = vpop.permute.xlu0 %2134 }
 0x20b   : > { %2137 = vst.msk [vmem:[#allocation3 + $0x8] sm:$0x1] %vm1880_vm4, %v2135_v20 }
 0x20d   : > { %v2176_v15 = vpop.permute.xlu1 %2175 }
 0x20e   : > { %2178 = vst.msk [vmem:[#allocation3 + $0x9] sm:$0x1] %vm1880_vm4, %v2176_v15  ;;  %v2199_v17 = vpop.permute.xlu0 %2198 }
 0x20f   : > { %2201 = vst.msk [vmem:[#allocation3 + $0xa] sm:$0x1] %vm1880_vm4, %v2199_v17 }
 0x211   : > { %v2240_v56 = vpop.permute.xlu1 %2239 }
 0x212   : > { %2242 = vst.msk [vmem:[#allocation3 + $0xb] sm:$0x1] %vm1880_vm4, %v2240_v56  ;;  %v2263_v4 = vpop.permute.xlu0 %2262 }
 0x213   : > { %2265 = vst.msk [vmem:[#allocation3 + $0xc] sm:$0x1] %vm1880_vm4, %v2263_v4 }
 0x215   : > { %v2304_v25 = vpop.permute.xlu1 %2303 }
 0x216   : > { %2306 = vst.msk [vmem:[#allocation3 + $0xd] sm:$0x1] %vm1880_vm4, %v2304_v25  ;;  %v2327_v21 = vpop.permute.xlu0 %2326 }
 0x217   : > { %2329 = vst.msk [vmem:[#allocation3 + $0xe] sm:$0x1] %vm1880_vm4, %v2327_v21 }
 0x219   : > { %v2368_v49 = vpop.permute.xlu1 %2367 }
 0x21a   : > { %2370 = vst.msk [vmem:[#allocation3 + $0xf] sm:$0x1] %vm1880_vm4, %v2368_v49  ;;  %v2391_v42 = vpop.permute.xlu0 %2390 }
 0x21b   : > { %2393 = vst.msk [vmem:[#allocation3 + $0x10] sm:$0x1] %vm1880_vm4, %v2391_v42 }
 0x21d   : > { %v2432_v37 = vpop.permute.xlu1 %2431 }
 0x21e   : > { %2434 = vst.msk [vmem:[#allocation3 + $0x11] sm:$0x1] %vm1880_vm4, %v2432_v37 }
 0x21f PF: > { %v2500_v24 = vld [vmem:[%s11443_s1 + $0x1c0] sm:$0xff]  ;;  %v11331_v43 = vmov 1966171168   ;;  %v2833_v0 = vlaneseq  ;;  %s2437_s24 = smul.u32 768, %s11435_s28  ;;  %p9705_p5 = scmp.ne.s32.totalorder %s11435_s28, 2 }
 0x220   : > { %v2504_v23 = vld [vmem:[%s11443_s1 + $0x1e0] sm:$0xff]  ;;  %v2831_v47 = vunpack.c.l.s4 %v11331_v43 }
 0x221   : > { %v2628_v34 = vld [vmem:[%s11443_s1 + $0x5c0] sm:$0xff]  ;;  %v9378_v9 = vcombine.high %v2500_v24, %v2504_v23  ;;  %v9377_v14 = vcombine.low %v2500_v24, %v2504_v23  ;;  %v12195_v32 = vshrl.u32 %v2833_v0, 7  ;;  %s2440_s25 = sshra.s32 %s2437_s24, 7 }
 0x222   : > { %v2632_v39 = vld [vmem:[%s11443_s1 + $0x5e0] sm:$0xff]  ;;  %v2832_v46 = vunpack.c.0.s8 %v2831_v47  ;;  %s2442_s26 = scalar_lea.vmem [#allocation3], %s2440_s25 }
 0x223   : > { %v2492_v30 = vld [vmem:[%s11443_s1 + $0x180] sm:$0xff]  ;;  %v9506_v2 = vcombine.high %v2628_v34, %v2632_v39  ;;  %v9505_v1 = vcombine.low %v2628_v34, %v2632_v39  ;;  %4802 = vmatprep.subr.bf16.mxu0 %v9378_v9 }
 0x224   : > { %v2496_v38 = vld [vmem:[%s11443_s1 + $0x1a0] sm:$0xff]  ;;  %4803 = vmatpush1.bf16.msra.mxu0 %v9377_v14  ;;  %v12202_v6 = vsub.s32 %v2832_v46, %v12195_v32 }
 0x225   : > { %v9370_v57 = vcombine.high %v2492_v30, %v2496_v38  ;;  %v2620_v53 = vld [vmem:[%s11443_s1 + $0x580] sm:$0xff]  ;;  %4843 = vmatprep.subr.bf16.mxu1 %v9506_v2  ;;  %v9369_v55 = vcombine.low %v2492_v30, %v2496_v38 }
 0x226   : > { %v2624_v58 = vld [vmem:[%s11443_s1 + $0x5a0] sm:$0xff]  ;;  %4844 = vmatpush1.bf16.msra.mxu1 %v9505_v1 }
 0x227   : > { %v2484_v51 = vld [vmem:[%s11443_s1 + $0x140] sm:$0xff]  ;;  %v9498_v45 = vcombine.high %v2620_v53, %v2624_v58  ;;  %4804 = vmatprep.subr.bf16.mxu0 %v9370_v57  ;;  %v9497_v48 = vcombine.low %v2620_v53, %v2624_v58 }
 0x228   : > { %v2488_v33 = vld [vmem:[%s11443_s1 + $0x160] sm:$0xff]  ;;  %4805 = vmatpush1.bf16.msra.mxu0 %v9369_v55 }
 0x229   : > { %v2612_v60 = vld [vmem:[%s11443_s1 + $0x540] sm:$0xff]  ;;  %v9362_v50 = vcombine.high %v2484_v51, %v2488_v33  ;;  %4845 = vmatprep.subr.bf16.mxu1 %v9498_v45  ;;  %v9361_v18 = vcombine.low %v2484_v51, %v2488_v33 }
 0x22a   : > { %v2616_v8 = vld [vmem:[%s11443_s1 + $0x560] sm:$0xff]  ;;  %4846 = vmatpush1.bf16.msra.mxu1 %v9497_v48 }
 0x22b   : > { %v9490_v16 = vcombine.high %v2612_v60, %v2616_v8  ;;  %v2476_v52 = vld [vmem:[%s11443_s1 + $0x100] sm:$0xff]  ;;  %4806 = vmatprep.subr.bf16.mxu0 %v9362_v50  ;;  %v9489_v11 = vcombine.low %v2612_v60, %v2616_v8 }
 0x22c   : > { %v2480_v10 = vld [vmem:[%s11443_s1 + $0x120] sm:$0xff]  ;;  %4807 = vmatpush1.bf16.msra.mxu0 %v9361_v18 }
 0x22d   : > { %v2604_v5 = vld [vmem:[%s11443_s1 + $0x500] sm:$0xff]  ;;  %v9354_v36 = vcombine.high %v2476_v52, %v2480_v10  ;;  %4847 = vmatprep.subr.bf16.mxu1 %v9490_v16  ;;  %v9353_v19 = vcombine.low %v2476_v52, %v2480_v10 }
 0x22e   : > { %v2608_v27 = vld [vmem:[%s11443_s1 + $0x520] sm:$0xff]  ;;  %4848 = vmatpush1.bf16.msra.mxu1 %v9489_v11 }
 0x22f   : > { %v9482_v13 = vcombine.high %v2604_v5, %v2608_v27  ;;  %v2468_v59 = vld [vmem:[%s11443_s1 + $0xc0] sm:$0xff]  ;;  %4808 = vmatprep.subr.bf16.mxu0 %v9354_v36  ;;  %v9481_v61 = vcombine.low %v2604_v5, %v2608_v27 }
 0x230   : > { %v2472_v63 = vld [vmem:[%s11443_s1 + $0xe0] sm:$0xff]  ;;  %4809 = vmatpush1.bf16.msra.mxu0 %v9353_v19 }
 0x231   : > { %v2596_v62 = vld [vmem:[%s11443_s1 + $0x4c0] sm:$0xff]  ;;  %v9346_v7 = vcombine.high %v2468_v59, %v2472_v63  ;;  %4849 = vmatprep.subr.bf16.mxu1 %v9482_v13  ;;  %v9345_v28 = vcombine.low %v2468_v59, %v2472_v63 }
 0x232   : > { %v2600_v54 = vld [vmem:[%s11443_s1 + $0x4e0] sm:$0xff]  ;;  %4850 = vmatpush1.bf16.msra.mxu1 %v9481_v61 }
 0x233   : > { %v9474_v44 = vcombine.high %v2596_v62, %v2600_v54  ;;  %v2460_v31 = vld [vmem:[%s11443_s1 + $0x80] sm:$0xff]  ;;  %4810 = vmatprep.subr.bf16.mxu0 %v9346_v7  ;;  %v9473_v12 = vcombine.low %v2596_v62, %v2600_v54 }
 0x234   : > { %v2464_v41 = vld [vmem:[%s11443_s1 + $0xa0] sm:$0xff]  ;;  %4811 = vmatpush1.bf16.msra.mxu0 %v9345_v28 }
 0x235   : > { %v2588_v26 = vld [vmem:[%s11443_s1 + $0x480] sm:$0xff]  ;;  %v9338_v22 = vcombine.high %v2460_v31, %v2464_v41  ;;  %4851 = vmatprep.subr.bf16.mxu1 %v9474_v44  ;;  %v9337_v17 = vcombine.low %v2460_v31, %v2464_v41 }
 0x236   : > { %v2592_v3 = vld [vmem:[%s11443_s1 + $0x4a0] sm:$0xff]  ;;  %4852 = vmatpush1.bf16.msra.mxu1 %v9473_v12 }
 0x237   : > { %v9466_v29 = vcombine.high %v2588_v26, %v2592_v3  ;;  %v2452_v35 = vld [vmem:[%s11443_s1 + $0x40] sm:$0xff]  ;;  %4812 = vmatprep.subr.bf16.mxu0 %v9338_v22  ;;  %v9465_v56 = vcombine.low %v2588_v26, %v2592_v3 }
 0x238   : > { %v2456_v40 = vld [vmem:[%s11443_s1 + $0x60] sm:$0xff]  ;;  %4813 = vmatpush1.bf16.msra.mxu0 %v9337_v17 }
 0x239   : > { %v2580_v20 = vld [vmem:[%s11443_s1 + $0x440] sm:$0xff]  ;;  %v9330_v4 = vcombine.high %v2452_v35, %v2456_v40  ;;  %4853 = vmatprep.subr.bf16.mxu1 %v9466_v29  ;;  %v9329_v34 = vcombine.low %v2452_v35, %v2456_v40 }
 0x23a   : > { %v2584_v15 = vld [vmem:[%s11443_s1 + $0x460] sm:$0xff]  ;;  %4854 = vmatpush1.bf16.msra.mxu1 %v9465_v56 }
 0x23b   : > { %v2443_v25 = vld [vmem:[%s2442_s26] sm:$0x3f]  ;;  %v9458_v21 = vcombine.high %v2580_v20, %v2584_v15  ;;  %4814 = vmatprep.subr.bf16.mxu0 %v9330_v4  ;;  %v9457_v39 = vcombine.low %v2580_v20, %v2584_v15 }
 0x23c   : > { %v2444_v49 = vld [vmem:[%s11443_s1] sm:$0xff]  ;;  %v12209_v37 = vrot.slane %v2443_v25, %v12202_v6  ;;  %4815 = vmatpush1.bf16.msra.mxu0 %v9329_v34  ;;  %v2829_v48 = vcombine.high %v2443_v25, %v2443_v25 }
 0x23d   : > { %v2448_v42 = vld [vmem:[%s11443_s1 + $0x20] sm:$0xff]  ;;  %4855 = vmatprep.subr.bf16.mxu1 %v9458_v21 }
 0x23e   : > { %v2572_v24 = vld [vmem:[%s11443_s1 + $0x400] sm:$0xff]  ;;  %v2844_v9 = vcombine.high %v12209_v37, %v12209_v37  ;;  %v9322_v14 = vcombine.high %v2444_v49, %v2448_v42  ;;  %v9321_v58 = vcombine.low %v2444_v49, %v2448_v42  ;;  %4856 = vmatpush1.bf16.msra.mxu1 %v9457_v39  ;;  %v12235_v36 = vrot.slane %v2829_v48, %v12202_v6 }
 0x23f   : > { %v2576_v23 = vld [vmem:[%s11443_s1 + $0x420] sm:$0xff] }
 0x240   : > { %v9450_v30 = vcombine.high %v2572_v24, %v2576_v23  ;;  %v2564_v38 = vld [vmem:[%s11443_s1 + $0x3c0] sm:$0xff]  ;;  %v12218_v1 = vrot.slane %v2844_v9, %v12202_v6  ;;  %4816 = vmatprep.subr.bf16.mxu0 %v9322_v14  ;;  %v9449_v45 = vcombine.low %v2572_v24, %v2576_v23  ;;  %v12241_v43 = vrot.slane %v12235_v36, %v12202_v6 }
 0x241   : > { %v2568_v2 = vld [vmem:[%s11443_s1 + $0x3e0] sm:$0xff]  ;;  %4817 = vmatpush1.bf16.msra.mxu0 %v9321_v58 }
 0x242   : > { %v2692_v57 = vld [vmem:[%s11443_s1 + $0x7c0] sm:$0xff]  ;;  %4834 = vmatprep.mubr.bf16.mxu0 %v12218_v1  ;;  %v12225_v51 = vcombine.high %v12218_v1, %v12218_v1  ;;  %v9442_v33 = vcombine.high %v2564_v38, %v2568_v2  ;;  %4857 = vmatprep.subr.bf16.mxu1 %v9450_v30  ;;  %v9441_v52 = vcombine.low %v2564_v38, %v2568_v2 }
 0x243   : > { %v2696_v53 = vld [vmem:[%s11443_s1 + $0x7e0] sm:$0xff]  ;;  %4858 = vmatpush1.bf16.msra.mxu1 %v9449_v45 }
 0x244   : > { %v9570_v60 = vcombine.high %v2692_v57, %v2696_v53  ;;  %v2556_v8 = vld [vmem:[%s11443_s1 + $0x380] sm:$0xff]  ;;  %4875 = vmatprep.mubr.bf16.mxu1 %v12225_v51  ;;  %4818 = vmatprep.subr.bf16.mxu0 %v9442_v33  ;;  %v9569_v10 = vcombine.low %v2692_v57, %v2696_v53 }
 0x245   : > { %v2560_v55 = vld [vmem:[%s11443_s1 + $0x3a0] sm:$0xff]  ;;  %4819 = vmatpush2.bf16.msra.mxu0 %v9441_v52 }
 0x246   : > { %v2684_v50 = vld [vmem:[%s11443_s1 + $0x780] sm:$0xff]  ;;  %v9434_v5 = vcombine.high %v2556_v8, %v2560_v55  ;;  %4859 = vmatprep.subr.bf16.mxu1 %v9570_v60  ;;  %v9433_v63 = vcombine.low %v2556_v8, %v2560_v55 }
 0x247   : > { %v2688_v16 = vld [vmem:[%s11443_s1 + $0x7a0] sm:$0xff]  ;;  %4860 = vmatpush2.bf16.msra.mxu1 %v9569_v10  ;;  %v12269_v10 = vrot.slane %v12209_v37, %v12202_v6 }
 0x248   : > { %v9562_v27 = vcombine.high %v2684_v50, %v2688_v16  ;;  %v2548_v18 = vld [vmem:[%s11443_s1 + $0x340] sm:$0xff]  ;;  %4820 = vmatprep.subr.bf16.mxu0 %v9434_v5  ;;  %v9561_v47 = vcombine.low %v2684_v50, %v2688_v16  ;;  %v2501_v50 = vld [vmem:[%s11443_s1 + $0x1c8] sm:$0xff] }
 0x249   : > { %v2552_v11 = vld [vmem:[%s11443_s1 + $0x360] sm:$0xff]  ;;  %4821 = vmatpush2.bf16.msra.mxu0 %v9433_v63  ;;  %v2505_v16 = vld [vmem:[%s11443_s1 + $0x1e8] sm:$0xff]  ;;  %v12279_v37 = vcombine.high %v12269_v10, %v12269_v10 }
 0x24a   : > { %v2676_v13 = vld [vmem:[%s11443_s1 + $0x740] sm:$0xff]  ;;  %v9426_v62 = vcombine.high %v2548_v18, %v2552_v11  ;;  %4861 = vmatprep.subr.bf16.mxu1 %v9562_v27  ;;  %v9425_v31 = vcombine.low %v2548_v18, %v2552_v11  ;;  %v9380_v18 = vcombine.high %v2501_v50, %v2505_v16  ;;  %v2493_v63 = vld [vmem:[%s11443_s1 + $0x188] sm:$0xff] }
 0x24b   : > { %v2680_v59 = vld [vmem:[%s11443_s1 + $0x760] sm:$0xff]  ;;  %4862 = vmatpush2.bf16.msra.mxu1 %v9561_v47  ;;  %v2497_v47 = vld [vmem:[%s11443_s1 + $0x1a8] sm:$0xff] }
 0x24c   : > { %v9554_v54 = vcombine.high %v2676_v13, %v2680_v59  ;;  %v2540_v19 = vld [vmem:[%s11443_s1 + $0x300] sm:$0xff]  ;;  %4822 = vmatprep.subr.bf16.mxu0 %v9426_v62  ;;  %v9553_v41 = vcombine.low %v2676_v13, %v2680_v59  ;;  %v2845_v59 = vcombine.high %v12235_v36, %v12235_v36 }
 0x24d   : > { %v2544_v61 = vld [vmem:[%s11443_s1 + $0x320] sm:$0xff]  ;;  %4823 = vmatpush2.bf16.msra.mxu0 %v9425_v31  ;;  %v2485_v31 = vld [vmem:[%s11443_s1 + $0x148] sm:$0xff] }
 0x24e   : > { %v2668_v7 = vld [vmem:[%s11443_s1 + $0x700] sm:$0xff]  ;;  %v9418_v46 = vcombine.high %v2540_v19, %v2544_v61  ;;  %4863 = vmatprep.subr.bf16.mxu1 %v9554_v54  ;;  %v9417_v29 = vcombine.low %v2540_v19, %v2544_v61  ;;  %v9379_v54 = vcombine.low %v2501_v50, %v2505_v16  ;;  %v9372_v61 = vcombine.high %v2493_v63, %v2497_v47  ;;  %v2445_v16 = vld [vmem:[%s11443_s1 + $0x8] sm:$0xff] }
 0x24f   : > { %v2672_v44 = vld [vmem:[%s11443_s1 + $0x720] sm:$0xff]  ;;  %4864 = vmatpush2.bf16.msra.mxu1 %v9553_v41  ;;  %v2489_v41 = vld [vmem:[%s11443_s1 + $0x168] sm:$0xff] }
 0x250   : > { %v9546_v26 = vcombine.high %v2668_v7, %v2672_v44  ;;  %v2532_v3 = vld [vmem:[%s11443_s1 + $0x2c0] sm:$0xff]  ;;  %4824 = vmatprep.subr.bf16.mxu0 %v9418_v46  ;;  %v9545_v35 = vcombine.low %v2668_v7, %v2672_v44  ;;  %v12284_v44 = vrot.slane %v2845_v59, %v12202_v6 }
 0x251   : > { %v2536_v28 = vld [vmem:[%s11443_s1 + $0x2e0] sm:$0xff]  ;;  %4825 = vmatpush2.bf16.msra.mxu0 %v9417_v29  ;;  %v2481_v29 = vld [vmem:[%s11443_s1 + $0x128] sm:$0xff] }
 0x252   : > { %v2660_v12 = vld [vmem:[%s11443_s1 + $0x6c0] sm:$0xff]  ;;  %v9410_v40 = vcombine.high %v2532_v3, %v2536_v28  ;;  %4865 = vmatprep.subr.bf16.mxu1 %v9546_v26  ;;  %v9409_v25 = vcombine.low %v2532_v3, %v2536_v28  ;;  %v9371_v26 = vcombine.low %v2493_v63, %v2497_v47  ;;  %v9364_v28 = vcombine.high %v2485_v31, %v2489_v41  ;;  %v2565_v63 = vld [vmem:[%s11443_s1 + $0x3c8] sm:$0xff] }
 0x253   : > { %v2664_v22 = vld [vmem:[%s11443_s1 + $0x6e0] sm:$0xff]  ;;  %4866 = vmatpush2.bf16.msra.mxu1 %v9545_v35  ;;  %v2569_v47 = vld [vmem:[%s11443_s1 + $0x3e8] sm:$0xff] }
 0x254   : > { %v9538_v20 = vcombine.high %v2660_v12, %v2664_v22  ;;  %v2524_v15 = vld [vmem:[%s11443_s1 + $0x280] sm:$0xff]  ;;  %4826 = vmatprep.subr.bf16.mxu0 %v9410_v40  ;;  %v9537_v21 = vcombine.low %v2660_v12, %v2664_v22  ;;  %v2477_v22 = vld [vmem:[%s11443_s1 + $0x108] sm:$0xff]  ;;  %v9363_v40 = vcombine.low %v2485_v31, %v2489_v41 }
 0x255   : > { %v2528_v17 = vld [vmem:[%s11443_s1 + $0x2a0] sm:$0xff]  ;;  %4827 = vmatpush2.bf16.msra.mxu0 %v9409_v25  ;;  %v2473_v25 = vld [vmem:[%s11443_s1 + $0xe8] sm:$0xff] }
 0x256   : > { %v2652_v56 = vld [vmem:[%s11443_s1 + $0x680] sm:$0xff]  ;;  %v9402_v49 = vcombine.high %v2524_v15, %v2528_v17  ;;  %4867 = vmatprep.subr.bf16.mxu1 %v9538_v20  ;;  %v9401_v39 = vcombine.low %v2524_v15, %v2528_v17  ;;  %v9356_v15 = vcombine.high %v2477_v22, %v2481_v29  ;;  %v2557_v31 = vld [vmem:[%s11443_s1 + $0x388] sm:$0xff] }
 0x257   : > { %v2656_v4 = vld [vmem:[%s11443_s1 + $0x6a0] sm:$0xff]  ;;  %4868 = vmatpush2.bf16.msra.mxu1 %v9537_v21  ;;  %v2561_v41 = vld [vmem:[%s11443_s1 + $0x3a8] sm:$0xff] }
 0x258   : > { %v9530_v42 = vcombine.high %v2652_v56, %v2656_v4  ;;  %v2516_v24 = vld [vmem:[%s11443_s1 + $0x240] sm:$0xff]  ;;  %4828 = vmatprep.subr.bf16.mxu0 %v9402_v49  ;;  %v9529_v14 = vcombine.low %v2652_v56, %v2656_v4  ;;  %v2469_v4 = vld [vmem:[%s11443_s1 + $0xc8] sm:$0xff]  ;;  %v9355_v49 = vcombine.low %v2477_v22, %v2481_v29 }
 0x259   : > { %v2520_v23 = vld [vmem:[%s11443_s1 + $0x260] sm:$0xff]  ;;  %4829 = vmatpush2.bf16.msra.mxu0 %v9401_v39  ;;  %v2465_v39 = vld [vmem:[%s11443_s1 + $0xa8] sm:$0xff] }
 0x25a   : > { %v2644_v34 = vld [vmem:[%s11443_s1 + $0x640] sm:$0xff]  ;;  %v9394_v30 = vcombine.high %v2516_v24, %v2520_v23  ;;  %4869 = vmatprep.subr.bf16.mxu1 %v9530_v42  ;;  %v9393_v45 = vcombine.low %v2516_v24, %v2520_v23  ;;  %v9348_v24 = vcombine.high %v2469_v4, %v2473_v25  ;;  %v2549_v22 = vld [vmem:[%s11443_s1 + $0x348] sm:$0xff] }
 0x25b   : > { %v2648_v9 = vld [vmem:[%s11443_s1 + $0x660] sm:$0xff]  ;;  %4870 = vmatpush2.bf16.msra.mxu1 %v9529_v14  ;;  %v2553_v29 = vld [vmem:[%s11443_s1 + $0x368] sm:$0xff] }
 0x25c   : > { %v9522_v38 = vcombine.high %v2644_v34, %v2648_v9  ;;  %v2508_v2 = vld [vmem:[%s11443_s1 + $0x200] sm:$0xff]  ;;  %4830 = vmatprep.subr.bf16.mxu0 %v9394_v30  ;;  %v9521_v33 = vcombine.low %v2644_v34, %v2648_v9  ;;  %v2461_v9 = vld [vmem:[%s11443_s1 + $0x88] sm:$0xff]  ;;  %v9347_v30 = vcombine.low %v2469_v4, %v2473_v25 }
 0x25d   : > { %v2512_v57 = vld [vmem:[%s11443_s1 + $0x220] sm:$0xff]  ;;  %4831 = vmatpush2.bf16.msra.mxu0 %v9393_v45  ;;  %v2457_v45 = vld [vmem:[%s11443_s1 + $0x68] sm:$0xff] }
 0x25e   : > { %v2636_v53 = vld [vmem:[%s11443_s1 + $0x600] sm:$0xff]  ;;  %v9386_v60 = vcombine.high %v2508_v2, %v2512_v57  ;;  %4871 = vmatprep.subr.bf16.mxu1 %v9522_v38  ;;  %v9385_v52 = vcombine.low %v2508_v2, %v2512_v57  ;;  %v9340_v2 = vcombine.high %v2461_v9, %v2465_v39  ;;  %v2541_v4 = vld [vmem:[%s11443_s1 + $0x308] sm:$0xff] }
 0x25f   : > { %v2640_v58 = vld [vmem:[%s11443_s1 + $0x620] sm:$0xff]  ;;  %4872 = vmatpush2.bf16.msra.mxu1 %v9521_v33  ;;  %v2545_v25 = vld [vmem:[%s11443_s1 + $0x328] sm:$0xff] }
 0x260   : > { %v9514_v8 = vcombine.high %v2636_v53, %v2640_v58  ;;  %v2756_v55 = vld [vmem:[%s11443_s1 + $0x9c0] sm:$0xff]  ;;  %4832 = vmatprep.subr.bf16.mxu0 %v9386_v60  ;;  %v9513_v5 = vcombine.low %v2636_v53, %v2640_v58  ;;  %v2453_v58 = vld [vmem:[%s11443_s1 + $0x48] sm:$0xff]  ;;  %v9339_v60 = vcombine.low %v2461_v9, %v2465_v39 }
 0x261   : > { %v2760_v48 = vld [vmem:[%s11443_s1 + $0x9e0] sm:$0xff]  ;;  %4833 = vmatpush2.bf16.msra.mxu0 %v9385_v52  ;;  %v2449_v52 = vld [vmem:[%s11443_s1 + $0x28] sm:$0xff] }
 0x262   : > { %v9634_v27 = vcombine.high %v2756_v55, %v2760_v48  ;;  %4873 = vmatprep.subr.bf16.mxu1 %v9514_v8  ;;  %v2748_v11 = vld [vmem:[%s11443_s1 + $0x980] sm:$0xff]  ;;  %v9633_v62 = vcombine.low %v2756_v55, %v2760_v48  ;;  %v9332_v55 = vcombine.high %v2453_v58, %v2457_v45  ;;  %v2533_v9 = vld [vmem:[%s11443_s1 + $0x2c8] sm:$0xff] }
 0x263   : > { %v2752_v13 = vld [vmem:[%s11443_s1 + $0x9a0] sm:$0xff]  ;;  %4874 = vmatpush2.bf16.msra.mxu1 %v9513_v5  ;;  %v2537_v39 = vld [vmem:[%s11443_s1 + $0x2e8] sm:$0xff] }
 0x264   : > { %4884 = vmatprep.subr.bf16.mxu0 %v9634_v27  ;;  %v9626_v19 = vcombine.high %v2748_v11, %v2752_v13  ;;  %4925 = vmatprep.subr.bf16.mxu1 %v9380_v18  ;;  %v2740_v7 = vld [vmem:[%s11443_s1 + $0x940] sm:$0xff]  ;;  %v9625_v46 = vcombine.low %v2748_v11, %v2752_v13  ;;  %v9331_v27 = vcombine.low %v2453_v58, %v2457_v45  ;;  %v2525_v58 = vld [vmem:[%s11443_s1 + $0x288] sm:$0xff] }
 0x265   : > { %v2744_v36 = vld [vmem:[%s11443_s1 + $0x960] sm:$0xff]  ;;  %4835 = vmatmul.mubr.bf16.vlgmr.msra.gmra.mxu0 %v12269_v10  ;;  %v9324_v11 = vcombine.high %v2445_v16, %v2449_v52  ;;  %v2529_v45 = vld [vmem:[%s11443_s1 + $0x2a8] sm:$0xff] }
 0x266   : > { %4876 = vmatmul.mubr.bf16.vlgmr.msra.gmra.mxu1 %v12279_v37  ;;  %4885 = vmatpush1.bf16.msra.mxu0 %v9633_v62  ;;  %v9618_v3 = vcombine.high %v2740_v7, %v2744_v36  ;;  %v2732_v6 = vld [vmem:[%s11443_s1 + $0x900] sm:$0xff]  ;;  %v9617_v35 = vcombine.low %v2740_v7, %v2744_v36 }
 0x267   : > { %4926 = vmatpush1.bf16.msra.mxu1 %v9379_v54  ;;  %4886 = vmatprep.subr.bf16.mxu0 %v9626_v19  ;;  %v2736_v12 = vld [vmem:[%s11443_s1 + $0x920] sm:$0xff]  ;;  %v9323_v54 = vcombine.low %v2445_v16, %v2449_v52  ;;  %v2517_v16 = vld [vmem:[%s11443_s1 + $0x248] sm:$0xff] }
 0x268   : > { %4927 = vmatprep.subr.bf16.mxu1 %v9372_v61  ;;  %4916 = vmatprep.mubr.bf16.mxu0 %v12284_v44  ;;  %v9610_v20 = vcombine.high %v2732_v6, %v2736_v12  ;;  %v2724_v17 = vld [vmem:[%s11443_s1 + $0x8c0] sm:$0xff]  ;;  %v9609_v21 = vcombine.low %v2732_v6, %v2736_v12  ;;  %v9444_v61 = vcombine.high %v2565_v63, %v2569_v47  ;;  %v2521_v52 = vld [vmem:[%s11443_s1 + $0x268] sm:$0xff] }
 0x269   : > { %4957 = vmatprep.mubr.bf16.mxu1 %v12218_v1  ;;  %v2728_v56 = vld [vmem:[%s11443_s1 + $0x8e0] sm:$0xff] }
 0x26a   : > { %4887 = vmatpush1.bf16.msra.mxu0 %v9625_v46  ;;  %v9602_v42 = vcombine.high %v2724_v17, %v2728_v56  ;;  %v2716_v23 = vld [vmem:[%s11443_s1 + $0x880] sm:$0xff]  ;;  %v9601_v14 = vcombine.low %v2724_v17, %v2728_v56 }
 0x26b   : > { %4928 = vmatpush1.bf16.msra.mxu1 %v9371_v26  ;;  %4888 = vmatprep.subr.bf16.mxu0 %v9618_v3  ;;  %v2720_v34 = vld [vmem:[%s11443_s1 + $0x8a0] sm:$0xff]  ;;  %v9443_v26 = vcombine.low %v2565_v63, %v2569_v47  ;;  %v2509_v63 = vld [vmem:[%s11443_s1 + $0x208] sm:$0xff] }
 0x26c   : > { %4929 = vmatprep.subr.bf16.mxu1 %v9364_v28  ;;  %v9594_v38 = vcombine.high %v2716_v23, %v2720_v34  ;;  %v2708_v57 = vld [vmem:[%s11443_s1 + $0x840] sm:$0xff]  ;;  %v9593_v33 = vcombine.low %v2716_v23, %v2720_v34  ;;  %v9436_v28 = vcombine.high %v2557_v31, %v2561_v41  ;;  %v2513_v47 = vld [vmem:[%s11443_s1 + $0x228] sm:$0xff] }
 0x26d   : > { %v2712_v53 = vld [vmem:[%s11443_s1 + $0x860] sm:$0xff] }
 0x26e   : > { %4889 = vmatpush1.bf16.msra.mxu0 %v9617_v35  ;;  %v9586_v8 = vcombine.high %v2708_v57, %v2712_v53  ;;  %v2700_v48 = vld [vmem:[%s11443_s1 + $0x800] sm:$0xff]  ;;  %v9585_v5 = vcombine.low %v2708_v57, %v2712_v53 }
 0x26f   : > { %4930 = vmatpush1.bf16.msra.mxu1 %v9363_v40  ;;  %4890 = vmatprep.subr.bf16.mxu0 %v9610_v20  ;;  %v2704_v50 = vld [vmem:[%s11443_s1 + $0x820] sm:$0xff]  ;;  %v9435_v40 = vcombine.low %v2557_v31, %v2561_v41  ;;  %v2757_v31 = vld [vmem:[%s11443_s1 + $0x9c8] sm:$0xff] }
 0x270   : > { %4931 = vmatprep.subr.bf16.mxu1 %v9356_v15  ;;  %v9578_v18 = vcombine.high %v2700_v48, %v2704_v50  ;;  %v2820_v13 = vld [vmem:[%s11443_s1 + $0xbc0] sm:$0xff]  ;;  %v9577_v62 = vcombine.low %v2700_v48, %v2704_v50  ;;  %v9428_v15 = vcombine.high %v2549_v22, %v2553_v29  ;;  %v2761_v41 = vld [vmem:[%s11443_s1 + $0x9e8] sm:$0xff] }
 0x271   : > { %v2824_v59 = vld [vmem:[%s11443_s1 + $0xbe0] sm:$0xff] }
 0x272   : > { %4891 = vmatpush1.bf16.msra.mxu0 %v9609_v21  ;;  %v9698_v19 = vcombine.high %v2820_v13, %v2824_v59  ;;  %v2812_v7 = vld [vmem:[%s11443_s1 + $0xb80] sm:$0xff]  ;;  %v9697_v46 = vcombine.low %v2820_v13, %v2824_v59 }
 0x273   : > { %4932 = vmatpush1.bf16.msra.mxu1 %v9355_v49  ;;  %4892 = vmatprep.subr.bf16.mxu0 %v9602_v42  ;;  %v2816_v36 = vld [vmem:[%s11443_s1 + $0xba0] sm:$0xff]  ;;  %v9427_v49 = vcombine.low %v2549_v22, %v2553_v29  ;;  %v2749_v22 = vld [vmem:[%s11443_s1 + $0x988] sm:$0xff] }
 0x274   : > { %4933 = vmatprep.subr.bf16.mxu1 %v9348_v24  ;;  %v9690_v3 = vcombine.high %v2812_v7, %v2816_v36  ;;  %v2804_v6 = vld [vmem:[%s11443_s1 + $0xb40] sm:$0xff]  ;;  %v9689_v35 = vcombine.low %v2812_v7, %v2816_v36  ;;  %v9420_v24 = vcombine.high %v2541_v4, %v2545_v25  ;;  %v2629_v7 = vld [vmem:[%s11443_s1 + $0x5c8] sm:$0xff] }
 0x275   : > { %v2808_v12 = vld [vmem:[%s11443_s1 + $0xb60] sm:$0xff]  ;;  %v2633_v36 = vld [vmem:[%s11443_s1 + $0x5e8] sm:$0xff] }
 0x276   : > { %4893 = vmatpush1.bf16.msra.mxu0 %v9601_v14  ;;  %v9682_v20 = vcombine.high %v2804_v6, %v2808_v12  ;;  %v2796_v17 = vld [vmem:[%s11443_s1 + $0xb00] sm:$0xff]  ;;  %v9681_v21 = vcombine.low %v2804_v6, %v2808_v12  ;;  %v2621_v6 = vld [vmem:[%s11443_s1 + $0x588] sm:$0xff] }
 0x277   : > { %4934 = vmatpush1.bf16.msra.mxu1 %v9347_v30  ;;  %4894 = vmatprep.subr.bf16.mxu0 %v9594_v38  ;;  %v2800_v56 = vld [vmem:[%s11443_s1 + $0xb20] sm:$0xff]  ;;  %v9419_v30 = vcombine.low %v2541_v4, %v2545_v25  ;;  %v2625_v12 = vld [vmem:[%s11443_s1 + $0x5a8] sm:$0xff] }
 0x278   : > { %4935 = vmatprep.subr.bf16.mxu1 %v9340_v2  ;;  %v9674_v42 = vcombine.high %v2796_v17, %v2800_v56  ;;  %v2788_v23 = vld [vmem:[%s11443_s1 + $0xac0] sm:$0xff]  ;;  %v9673_v14 = vcombine.low %v2796_v17, %v2800_v56  ;;  %v9412_v2 = vcombine.high %v2533_v9, %v2537_v39  ;;  %v2753_v29 = vld [vmem:[%s11443_s1 + $0x9a8] sm:$0xff] }
 0x279   : > { %v2792_v34 = vld [vmem:[%s11443_s1 + $0xae0] sm:$0xff]  ;;  %v2613_v17 = vld [vmem:[%s11443_s1 + $0x548] sm:$0xff] }
 0x27a   : > { %4895 = vmatpush1.bf16.msra.mxu0 %v9593_v33  ;;  %v9666_v38 = vcombine.high %v2788_v23, %v2792_v34  ;;  %v2780_v57 = vld [vmem:[%s11443_s1 + $0xa80] sm:$0xff]  ;;  %v9665_v33 = vcombine.low %v2788_v23, %v2792_v34  ;;  %v2617_v56 = vld [vmem:[%s11443_s1 + $0x568] sm:$0xff] }
 0x27b   : > { %4936 = vmatpush1.bf16.msra.mxu1 %v9339_v60  ;;  %4896 = vmatprep.subr.bf16.mxu0 %v9586_v8  ;;  %v2784_v53 = vld [vmem:[%s11443_s1 + $0xaa0] sm:$0xff]  ;;  %v9411_v60 = vcombine.low %v2533_v9, %v2537_v39  ;;  %v2741_v4 = vld [vmem:[%s11443_s1 + $0x948] sm:$0xff] }
 0x27c   : > { %4937 = vmatprep.subr.bf16.mxu1 %v9332_v55  ;;  %v9658_v8 = vcombine.high %v2780_v57, %v2784_v53  ;;  %v9404_v55 = vcombine.high %v2525_v58, %v2529_v45  ;;  %v2772_v48 = vld [vmem:[%s11443_s1 + $0xa40] sm:$0xff]  ;;  %v2745_v25 = vld [vmem:[%s11443_s1 + $0x968] sm:$0xff] }
 0x27d   : > { %v2776_v50 = vld [vmem:[%s11443_s1 + $0xa60] sm:$0xff]  ;;  %v2605_v23 = vld [vmem:[%s11443_s1 + $0x508] sm:$0xff] }
 0x27e   : > { %4897 = vmatpush1.bf16.msra.mxu0 %v9585_v5  ;;  %v9657_v5 = vcombine.low %v2780_v57, %v2784_v53  ;;  %v2764_v13 = vld [vmem:[%s11443_s1 + $0xa00] sm:$0xff]  ;;  %v2609_v34 = vld [vmem:[%s11443_s1 + $0x528] sm:$0xff] }
 0x27f   : > { %4938 = vmatpush1.bf16.msra.mxu1 %v9331_v27  ;;  %4898 = vmatprep.subr.bf16.mxu0 %v9578_v18  ;;  %v9403_v27 = vcombine.low %v2525_v58, %v2529_v45  ;;  %v9650_v18 = vcombine.high %v2772_v48, %v2776_v50  ;;  %v2768_v59 = vld [vmem:[%s11443_s1 + $0xa20] sm:$0xff]  ;;  %v2733_v9 = vld [vmem:[%s11443_s1 + $0x908] sm:$0xff] }
 0x280   : > { %4939 = vmatprep.subr.bf16.mxu1 %v9324_v11  ;;  %v9396_v11 = vcombine.high %v2517_v16, %v2521_v52  ;;  %v2737_v39 = vld [vmem:[%s11443_s1 + $0x928] sm:$0xff] }
 0x281   : > { %v2597_v57 = vld [vmem:[%s11443_s1 + $0x4c8] sm:$0xff] }
 0x282   : > { %4899 = vmatpush1.bf16.msra.mxu0 %v9577_v62  ;;  %v9649_v62 = vcombine.low %v2772_v48, %v2776_v50  ;;  %v2601_v53 = vld [vmem:[%s11443_s1 + $0x4e8] sm:$0xff] }
 0x283   : > { %4940 = vmatpush1.bf16.msra.mxu1 %v9323_v54  ;;  %4900 = vmatprep.subr.bf16.mxu0 %v9698_v19  ;;  %v9395_v54 = vcombine.low %v2517_v16, %v2521_v52  ;;  %v9642_v19 = vcombine.high %v2764_v13, %v2768_v59  ;;  %v2725_v58 = vld [vmem:[%s11443_s1 + $0x8c8] sm:$0xff] }
 0x284   : > { %4941 = vmatprep.subr.bf16.mxu1 %v9444_v61  ;;  %v9388_v61 = vcombine.high %v2509_v63, %v2513_v47  ;;  %v2729_v45 = vld [vmem:[%s11443_s1 + $0x8e8] sm:$0xff] }
 0x285   : > { %v2589_v48 = vld [vmem:[%s11443_s1 + $0x488] sm:$0xff] }
 0x286   : > { %4901 = vmatpush2.bf16.msra.mxu0 %v9697_v46  ;;  %v9641_v46 = vcombine.low %v2764_v13, %v2768_v59  ;;  %v2593_v50 = vld [vmem:[%s11443_s1 + $0x4a8] sm:$0xff] }
 0x287   : > { %4942 = vmatpush2.bf16.msra.mxu1 %v9443_v26  ;;  %4902 = vmatprep.subr.bf16.mxu0 %v9690_v3  ;;  %v9387_v26 = vcombine.low %v2509_v63, %v2513_v47  ;;  %v9508_v3 = vcombine.high %v2629_v7, %v2633_v36  ;;  %v2717_v16 = vld [vmem:[%s11443_s1 + $0x888] sm:$0xff] }
 0x288   : > { %4943 = vmatprep.subr.bf16.mxu1 %v9436_v28  ;;  %v9636_v28 = vcombine.high %v2757_v31, %v2761_v41  ;;  %v2721_v52 = vld [vmem:[%s11443_s1 + $0x8a8] sm:$0xff] }
 0x289   : > { %v2581_v13 = vld [vmem:[%s11443_s1 + $0x448] sm:$0xff] }
 0x28a   : > { %4903 = vmatpush2.bf16.msra.mxu0 %v9689_v35  ;;  %v9507_v35 = vcombine.low %v2629_v7, %v2633_v36  ;;  %v2585_v59 = vld [vmem:[%s11443_s1 + $0x468] sm:$0xff] }
 0x28b   : > { %4944 = vmatpush2.bf16.msra.mxu1 %v9435_v40  ;;  %4904 = vmatprep.subr.bf16.mxu0 %v9682_v20  ;;  %v9635_v40 = vcombine.low %v2757_v31, %v2761_v41  ;;  %v9500_v20 = vcombine.high %v2621_v6, %v2625_v12  ;;  %v2709_v63 = vld [vmem:[%s11443_s1 + $0x848] sm:$0xff] }
 0x28c   : > { %4945 = vmatprep.subr.bf16.mxu1 %v9428_v15  ;;  %v9628_v15 = vcombine.high %v2749_v22, %v2753_v29  ;;  %v2713_v47 = vld [vmem:[%s11443_s1 + $0x868] sm:$0xff] }
 0x28d   : > { %v2573_v7 = vld [vmem:[%s11443_s1 + $0x408] sm:$0xff] }
 0x28e   : > { %4905 = vmatpush2.bf16.msra.mxu0 %v9681_v21  ;;  %v9499_v21 = vcombine.low %v2621_v6, %v2625_v12  ;;  %v2577_v36 = vld [vmem:[%s11443_s1 + $0x428] sm:$0xff] }
 0x28f   : > { %4946 = vmatpush2.bf16.msra.mxu1 %v9427_v49  ;;  %4906 = vmatprep.subr.bf16.mxu0 %v9674_v42  ;;  %v9627_v49 = vcombine.low %v2749_v22, %v2753_v29  ;;  %v9492_v42 = vcombine.high %v2613_v17, %v2617_v56  ;;  %v2701_v31 = vld [vmem:[%s11443_s1 + $0x808] sm:$0xff] }
 0x290   : > { %4947 = vmatprep.subr.bf16.mxu1 %v9420_v24  ;;  %v9620_v24 = vcombine.high %v2741_v4, %v2745_v25  ;;  %v2705_v41 = vld [vmem:[%s11443_s1 + $0x828] sm:$0xff] }
 0x291   : > { %v2693_v6 = vld [vmem:[%s11443_s1 + $0x7c8] sm:$0xff] }
 0x292   : > { %4907 = vmatpush2.bf16.msra.mxu0 %v9673_v14  ;;  %v9491_v14 = vcombine.low %v2613_v17, %v2617_v56  ;;  %v2697_v12 = vld [vmem:[%s11443_s1 + $0x7e8] sm:$0xff] }
 0x293   : > { %4948 = vmatpush2.bf16.msra.mxu1 %v9419_v30  ;;  %4908 = vmatprep.subr.bf16.mxu0 %v9666_v38  ;;  %v9619_v30 = vcombine.low %v2741_v4, %v2745_v25  ;;  %v9484_v38 = vcombine.high %v2605_v23, %v2609_v34  ;;  %v2821_v22 = vld [vmem:[%s11443_s1 + $0xbc8] sm:$0xff] }
 0x294   : > { %4949 = vmatprep.subr.bf16.mxu1 %v9412_v2  ;;  %v9612_v2 = vcombine.high %v2733_v9, %v2737_v39  ;;  %v2825_v29 = vld [vmem:[%s11443_s1 + $0xbe8] sm:$0xff] }
 0x295   : > { %v2685_v17 = vld [vmem:[%s11443_s1 + $0x788] sm:$0xff] }
 0x296   : > { %4909 = vmatpush2.bf16.msra.mxu0 %v9665_v33  ;;  %v9483_v33 = vcombine.low %v2605_v23, %v2609_v34  ;;  %v2689_v56 = vld [vmem:[%s11443_s1 + $0x7a8] sm:$0xff] }
 0x297   : > { %4950 = vmatpush2.bf16.msra.mxu1 %v9411_v60  ;;  %4910 = vmatprep.subr.bf16.mxu0 %v9658_v8  ;;  %v9611_v60 = vcombine.low %v2733_v9, %v2737_v39  ;;  %v9476_v8 = vcombine.high %v2597_v57, %v2601_v53  ;;  %v2813_v4 = vld [vmem:[%s11443_s1 + $0xb88] sm:$0xff] }
 0x298   : > { %4951 = vmatprep.subr.bf16.mxu1 %v9404_v55  ;;  %v9604_v55 = vcombine.high %v2725_v58, %v2729_v45  ;;  %v2817_v25 = vld [vmem:[%s11443_s1 + $0xba8] sm:$0xff] }
 0x299   : > { %v2677_v23 = vld [vmem:[%s11443_s1 + $0x748] sm:$0xff] }
 0x29a   : > { %4911 = vmatpush2.bf16.msra.mxu0 %v9657_v5  ;;  %v9475_v5 = vcombine.low %v2597_v57, %v2601_v53  ;;  %v2681_v34 = vld [vmem:[%s11443_s1 + $0x768] sm:$0xff] }
 0x29b   : > { %4952 = vmatpush2.bf16.msra.mxu1 %v9403_v27  ;;  %4912 = vmatprep.subr.bf16.mxu0 %v9650_v18  ;;  %v9603_v27 = vcombine.low %v2725_v58, %v2729_v45  ;;  %v9468_v18 = vcombine.high %v2589_v48, %v2593_v50  ;;  %v2805_v9 = vld [vmem:[%s11443_s1 + $0xb48] sm:$0xff] }
 0x29c   : > { %4953 = vmatprep.subr.bf16.mxu1 %v9396_v11  ;;  %v9596_v11 = vcombine.high %v2717_v16, %v2721_v52  ;;  %v2809_v39 = vld [vmem:[%s11443_s1 + $0xb68] sm:$0xff] }
 0x29d   : > { %v2669_v57 = vld [vmem:[%s11443_s1 + $0x708] sm:$0xff] }
 0x29e   : > { %4913 = vmatpush2.bf16.msra.mxu0 %v9649_v62  ;;  %v9467_v62 = vcombine.low %v2589_v48, %v2593_v50  ;;  %v2673_v53 = vld [vmem:[%s11443_s1 + $0x728] sm:$0xff] }
 0x29f   : > { %4954 = vmatpush2.bf16.msra.mxu1 %v9395_v54  ;;  %4914 = vmatprep.subr.bf16.mxu0 %v9642_v19  ;;  %v9595_v54 = vcombine.low %v2717_v16, %v2721_v52  ;;  %v9460_v19 = vcombine.high %v2581_v13, %v2585_v59  ;;  %v2797_v58 = vld [vmem:[%s11443_s1 + $0xb08] sm:$0xff] }
 0x2a0   : > { %4955 = vmatprep.subr.bf16.mxu1 %v9388_v61  ;;  %v9588_v61 = vcombine.high %v2709_v63, %v2713_v47  ;;  %v2801_v45 = vld [vmem:[%s11443_s1 + $0xb28] sm:$0xff] }
 0x2a1   : > { %v2661_v48 = vld [vmem:[%s11443_s1 + $0x6c8] sm:$0xff] }
 0x2a2   : > { %4915 = vmatpush2.bf16.msra.mxu0 %v9641_v46  ;;  %v9459_v46 = vcombine.low %v2581_v13, %v2585_v59  ;;  %v2665_v50 = vld [vmem:[%s11443_s1 + $0x6e8] sm:$0xff] }
 0x2a3   : > { %4956 = vmatpush2.bf16.msra.mxu1 %v9387_v26  ;;  %4966 = vmatprep.subr.bf16.mxu0 %v9508_v3  ;;  %v9587_v26 = vcombine.low %v2709_v63, %v2713_v47  ;;  %v9452_v3 = vcombine.high %v2573_v7, %v2577_v36  ;;  %v2789_v16 = vld [vmem:[%s11443_s1 + $0xac8] sm:$0xff] }
 0x2a4   : > { %5007 = vmatprep.subr.bf16.mxu1 %v9636_v28  ;;  %v9580_v28 = vcombine.high %v2701_v31, %v2705_v41  ;;  %v2793_v52 = vld [vmem:[%s11443_s1 + $0xae8] sm:$0xff] }
 0x2a5   : > { %4917 = vmatmul.mubr.bf16.vlgmr.msra.gmra.mxu0 %v12241_v43  ;;  %v2653_v13 = vld [vmem:[%s11443_s1 + $0x688] sm:$0xff] }
 0x2a6   : > { %4958 = vmatmul.mubr.bf16.vlgmr.msra.gmra.mxu1 %v12269_v10  ;;  %4967 = vmatpush1.bf16.msra.mxu0 %v9507_v35  ;;  %v9451_v35 = vcombine.low %v2573_v7, %v2577_v36  ;;  %v2657_v59 = vld [vmem:[%s11443_s1 + $0x6a8] sm:$0xff] }
 0x2a7   : > { %5008 = vmatpush1.bf16.msra.mxu1 %v9635_v40  ;;  %4968 = vmatprep.subr.bf16.mxu0 %v9500_v20  ;;  %v9579_v40 = vcombine.low %v2701_v31, %v2705_v41  ;;  %v9572_v20 = vcombine.high %v2693_v6, %v2697_v12  ;;  %v2781_v63 = vld [vmem:[%s11443_s1 + $0xa88] sm:$0xff] }
 0x2a8   : > { %5009 = vmatprep.subr.bf16.mxu1 %v9628_v15  ;;  %4998 = vmatprep.mubr.bf16.mxu0 %v12225_v51  ;;  %v9700_v15 = vcombine.high %v2821_v22, %v2825_v29  ;;  %v2785_v47 = vld [vmem:[%s11443_s1 + $0xaa8] sm:$0xff] }
 0x2a9   : > { %5039 = vmatprep.mubr.bf16.mxu1 %v12284_v44  ;;  %v2645_v7 = vld [vmem:[%s11443_s1 + $0x648] sm:$0xff] }
 0x2aa   : > { %4969 = vmatpush1.bf16.msra.mxu0 %v9499_v21  ;;  %v9571_v21 = vcombine.low %v2693_v6, %v2697_v12  ;;  %v2649_v36 = vld [vmem:[%s11443_s1 + $0x668] sm:$0xff] }
 0x2ab   : > { %5010 = vmatpush1.bf16.msra.mxu1 %v9627_v49  ;;  %4970 = vmatprep.subr.bf16.mxu0 %v9492_v42  ;;  %v9699_v49 = vcombine.low %v2821_v22, %v2825_v29  ;;  %v9564_v42 = vcombine.high %v2685_v17, %v2689_v56  ;;  %v2773_v31 = vld [vmem:[%s11443_s1 + $0xa48] sm:$0xff] }
 0x2ac   : > { %5011 = vmatprep.subr.bf16.mxu1 %v9620_v24  ;;  %v9692_v24 = vcombine.high %v2813_v4, %v2817_v25  ;;  %v2777_v41 = vld [vmem:[%s11443_s1 + $0xa68] sm:$0xff] }
 0x2ad   : > { %v2637_v6 = vld [vmem:[%s11443_s1 + $0x608] sm:$0xff] }
 0x2ae   : > { %4971 = vmatpush1.bf16.msra.mxu0 %v9491_v14  ;;  %v9563_v14 = vcombine.low %v2685_v17, %v2689_v56  ;;  %v2641_v12 = vld [vmem:[%s11443_s1 + $0x628] sm:$0xff]  ;;  %v2502_v17 = vld [vmem:[%s11443_s1 + $0x1d0] sm:$0xff] }
 0x2af   : > { %5012 = vmatpush1.bf16.msra.mxu1 %v9619_v30  ;;  %4972 = vmatprep.subr.bf16.mxu0 %v9484_v38  ;;  %v9691_v30 = vcombine.low %v2813_v4, %v2817_v25  ;;  %v9556_v38 = vcombine.high %v2677_v23, %v2681_v34  ;;  %v2765_v22 = vld [vmem:[%s11443_s1 + $0xa08] sm:$0xff]  ;;  %v2506_v56 = vld [vmem:[%s11443_s1 + $0x1f0] sm:$0xff] }
 0x2b0   : > { %5013 = vmatprep.subr.bf16.mxu1 %v9612_v2  ;;  %v9684_v2 = vcombine.high %v2805_v9, %v2809_v39  ;;  %v2769_v29 = vld [vmem:[%s11443_s1 + $0xa28] sm:$0xff]  ;;  %v2630_v4 = vld [vmem:[%s11443_s1 + $0x5d0] sm:$0xff] }
 0x2b1   : > { %v2634_v25 = vld [vmem:[%s11443_s1 + $0x5f0] sm:$0xff] }
 0x2b2   : > { %4973 = vmatpush1.bf16.msra.mxu0 %v9483_v33  ;;  %v9555_v33 = vcombine.low %v2677_v23, %v2681_v34  ;;  %v2494_v23 = vld [vmem:[%s11443_s1 + $0x190] sm:$0xff] }
 0x2b3   : > { %5014 = vmatpush1.bf16.msra.mxu1 %v9611_v60  ;;  %4974 = vmatprep.subr.bf16.mxu0 %v9476_v8  ;;  %v9683_v60 = vcombine.low %v2805_v9, %v2809_v39  ;;  %v9548_v8 = vcombine.high %v2669_v57, %v2673_v53  ;;  %v2498_v34 = vld [vmem:[%s11443_s1 + $0x1b0] sm:$0xff] }
 0x2b4   : > { %5015 = vmatprep.subr.bf16.mxu1 %v9604_v55  ;;  %v9676_v55 = vcombine.high %v2797_v58, %v2801_v45  ;;  %v2622_v9 = vld [vmem:[%s11443_s1 + $0x590] sm:$0xff] }
 0x2b5   : > { %v2626_v39 = vld [vmem:[%s11443_s1 + $0x5b0] sm:$0xff] }
 0x2b6   : > { %4975 = vmatpush1.bf16.msra.mxu0 %v9475_v5  ;;  %v9547_v5 = vcombine.low %v2669_v57, %v2673_v53  ;;  %v2486_v57 = vld [vmem:[%s11443_s1 + $0x150] sm:$0xff] }
 0x2b7   : > { %5016 = vmatpush1.bf16.msra.mxu1 %v9603_v27  ;;  %4976 = vmatprep.subr.bf16.mxu0 %v9468_v18  ;;  %v9675_v27 = vcombine.low %v2797_v58, %v2801_v45  ;;  %v9540_v18 = vcombine.high %v2661_v48, %v2665_v50  ;;  %v2490_v53 = vld [vmem:[%s11443_s1 + $0x170] sm:$0xff] }
 0x2b8   : > { %5017 = vmatprep.subr.bf16.mxu1 %v9596_v11  ;;  %v9668_v11 = vcombine.high %v2789_v16, %v2793_v52  ;;  %v2614_v58 = vld [vmem:[%s11443_s1 + $0x550] sm:$0xff] }
 0x2b9   : > { %v2618_v45 = vld [vmem:[%s11443_s1 + $0x570] sm:$0xff] }
 0x2ba   : > { %4977 = vmatpush1.bf16.msra.mxu0 %v9467_v62  ;;  %v9539_v62 = vcombine.low %v2661_v48, %v2665_v50  ;;  %v2478_v48 = vld [vmem:[%s11443_s1 + $0x110] sm:$0xff] }
 0x2bb   : > { %5018 = vmatpush1.bf16.msra.mxu1 %v9595_v54  ;;  %4978 = vmatprep.subr.bf16.mxu0 %v9460_v19  ;;  %v9667_v54 = vcombine.low %v2789_v16, %v2793_v52  ;;  %v9532_v19 = vcombine.high %v2653_v13, %v2657_v59  ;;  %v2482_v50 = vld [vmem:[%s11443_s1 + $0x130] sm:$0xff] }
 0x2bc   : > { %5019 = vmatprep.subr.bf16.mxu1 %v9588_v61  ;;  %v9660_v61 = vcombine.high %v2781_v63, %v2785_v47  ;;  %v2606_v16 = vld [vmem:[%s11443_s1 + $0x510] sm:$0xff] }
 0x2bd   : > { %v2610_v52 = vld [vmem:[%s11443_s1 + $0x530] sm:$0xff] }
 0x2be   : > { %4979 = vmatpush1.bf16.msra.mxu0 %v9459_v46  ;;  %v9531_v46 = vcombine.low %v2653_v13, %v2657_v59  ;;  %v2470_v13 = vld [vmem:[%s11443_s1 + $0xd0] sm:$0xff] }
 0x2bf   : > { %5020 = vmatpush1.bf16.msra.mxu1 %v9587_v26  ;;  %4980 = vmatprep.subr.bf16.mxu0 %v9452_v3  ;;  %v9659_v26 = vcombine.low %v2781_v63, %v2785_v47  ;;  %v9524_v3 = vcombine.high %v2645_v7, %v2649_v36  ;;  %v2474_v59 = vld [vmem:[%s11443_s1 + $0xf0] sm:$0xff] }
 0x2c0   : > { %5021 = vmatprep.subr.bf16.mxu1 %v9580_v28  ;;  %v9652_v28 = vcombine.high %v2773_v31, %v2777_v41  ;;  %v2598_v63 = vld [vmem:[%s11443_s1 + $0x4d0] sm:$0xff] }
 0x2c1   : > { %v2602_v47 = vld [vmem:[%s11443_s1 + $0x4f0] sm:$0xff] }
 0x2c2   : > { %4981 = vmatpush1.bf16.msra.mxu0 %v9451_v35  ;;  %v9523_v35 = vcombine.low %v2645_v7, %v2649_v36  ;;  %v2462_v7 = vld [vmem:[%s11443_s1 + $0x90] sm:$0xff] }
 0x2c3   : > { %5022 = vmatpush1.bf16.msra.mxu1 %v9579_v40  ;;  %4982 = vmatprep.subr.bf16.mxu0 %v9572_v20  ;;  %v9651_v40 = vcombine.low %v2773_v31, %v2777_v41  ;;  %v9516_v20 = vcombine.high %v2637_v6, %v2641_v12  ;;  %v2466_v36 = vld [vmem:[%s11443_s1 + $0xb0] sm:$0xff] }
 0x2c4   : > { %5023 = vmatprep.subr.bf16.mxu1 %v9700_v15  ;;  %v9644_v15 = vcombine.high %v2765_v22, %v2769_v29  ;;  %v2590_v31 = vld [vmem:[%s11443_s1 + $0x490] sm:$0xff] }
 0x2c5   : > { %v2594_v41 = vld [vmem:[%s11443_s1 + $0x4b0] sm:$0xff] }
 0x2c6   : > { %4983 = vmatpush2.bf16.msra.mxu0 %v9571_v21  ;;  %v9515_v21 = vcombine.low %v2637_v6, %v2641_v12  ;;  %v2454_v6 = vld [vmem:[%s11443_s1 + $0x50] sm:$0xff] }
 0x2c7   : > { %5024 = vmatpush2.bf16.msra.mxu1 %v9699_v49  ;;  %4984 = vmatprep.subr.bf16.mxu0 %v9564_v42  ;;  %v9643_v49 = vcombine.low %v2765_v22, %v2769_v29  ;;  %v9382_v42 = vcombine.high %v2502_v17, %v2506_v56  ;;  %v2458_v12 = vld [vmem:[%s11443_s1 + $0x70] sm:$0xff] }
 0x2c8   : > { %5025 = vmatprep.subr.bf16.mxu1 %v9692_v24  ;;  %v9510_v24 = vcombine.high %v2630_v4, %v2634_v25  ;;  %v2582_v22 = vld [vmem:[%s11443_s1 + $0x450] sm:$0xff] }
 0x2c9   : > { %v2586_v29 = vld [vmem:[%s11443_s1 + $0x470] sm:$0xff] }
 0x2ca   : > { %4985 = vmatpush2.bf16.msra.mxu0 %v9563_v14  ;;  %v9381_v14 = vcombine.low %v2502_v17, %v2506_v56  ;;  %v2446_v17 = vld [vmem:[%s11443_s1 + $0x10] sm:$0xff] }
 0x2cb   : > { %5026 = vmatpush2.bf16.msra.mxu1 %v9691_v30  ;;  %4986 = vmatprep.subr.bf16.mxu0 %v9556_v38  ;;  %v9509_v30 = vcombine.low %v2630_v4, %v2634_v25  ;;  %v9374_v38 = vcombine.high %v2494_v23, %v2498_v34  ;;  %v2450_v56 = vld [vmem:[%s11443_s1 + $0x30] sm:$0xff] }
 0x2cc   : > { %5027 = vmatprep.subr.bf16.mxu1 %v9684_v2  ;;  %v9502_v2 = vcombine.high %v2622_v9, %v2626_v39  ;;  %v2574_v4 = vld [vmem:[%s11443_s1 + $0x410] sm:$0xff] }
 0x2cd   : > { %v2578_v25 = vld [vmem:[%s11443_s1 + $0x430] sm:$0xff] }
 0x2ce   : > { %4987 = vmatpush2.bf16.msra.mxu0 %v9555_v33  ;;  %v9373_v33 = vcombine.low %v2494_v23, %v2498_v34  ;;  %v2566_v23 = vld [vmem:[%s11443_s1 + $0x3d0] sm:$0xff] }
 0x2cf   : > { %5028 = vmatpush2.bf16.msra.mxu1 %v9683_v60  ;;  %4988 = vmatprep.subr.bf16.mxu0 %v9548_v8  ;;  %v9501_v60 = vcombine.low %v2622_v9, %v2626_v39  ;;  %v9366_v8 = vcombine.high %v2486_v57, %v2490_v53  ;;  %v2570_v34 = vld [vmem:[%s11443_s1 + $0x3f0] sm:$0xff] }
 0x2d0   : > { %5029 = vmatprep.subr.bf16.mxu1 %v9676_v55  ;;  %v9494_v55 = vcombine.high %v2614_v58, %v2618_v45  ;;  %v2694_v9 = vld [vmem:[%s11443_s1 + $0x7d0] sm:$0xff] }
 0x2d1   : > { %v2698_v39 = vld [vmem:[%s11443_s1 + $0x7f0] sm:$0xff] }
 0x2d2   : > { %4989 = vmatpush2.bf16.msra.mxu0 %v9547_v5  ;;  %v9365_v5 = vcombine.low %v2486_v57, %v2490_v53  ;;  %v2558_v57 = vld [vmem:[%s11443_s1 + $0x390] sm:$0xff] }
 0x2d3   : > { %5030 = vmatpush2.bf16.msra.mxu1 %v9675_v27  ;;  %4990 = vmatprep.subr.bf16.mxu0 %v9540_v18  ;;  %v9493_v27 = vcombine.low %v2614_v58, %v2618_v45  ;;  %v9358_v18 = vcombine.high %v2478_v48, %v2482_v50  ;;  %v2562_v53 = vld [vmem:[%s11443_s1 + $0x3b0] sm:$0xff] }
 0x2d4   : > { %5031 = vmatprep.subr.bf16.mxu1 %v9668_v11  ;;  %v9486_v11 = vcombine.high %v2606_v16, %v2610_v52  ;;  %v2686_v58 = vld [vmem:[%s11443_s1 + $0x790] sm:$0xff] }
 0x2d5   : > { %v2690_v45 = vld [vmem:[%s11443_s1 + $0x7b0] sm:$0xff] }
 0x2d6   : > { %4991 = vmatpush2.bf16.msra.mxu0 %v9539_v62  ;;  %v9357_v62 = vcombine.low %v2478_v48, %v2482_v50  ;;  %v2550_v48 = vld [vmem:[%s11443_s1 + $0x350] sm:$0xff] }
 0x2d7   : > { %5032 = vmatpush2.bf16.msra.mxu1 %v9667_v54  ;;  %4992 = vmatprep.subr.bf16.mxu0 %v9532_v19  ;;  %v9485_v54 = vcombine.low %v2606_v16, %v2610_v52  ;;  %v9350_v19 = vcombine.high %v2470_v13, %v2474_v59  ;;  %v2554_v50 = vld [vmem:[%s11443_s1 + $0x370] sm:$0xff] }
 0x2d8   : > { %5033 = vmatprep.subr.bf16.mxu1 %v9660_v61  ;;  %v9478_v61 = vcombine.high %v2598_v63, %v2602_v47  ;;  %v2678_v16 = vld [vmem:[%s11443_s1 + $0x750] sm:$0xff] }
 0x2d9   : > { %v2682_v52 = vld [vmem:[%s11443_s1 + $0x770] sm:$0xff] }
 0x2da   : > { %4993 = vmatpush2.bf16.msra.mxu0 %v9531_v46  ;;  %v9349_v46 = vcombine.low %v2470_v13, %v2474_v59  ;;  %v2542_v13 = vld [vmem:[%s11443_s1 + $0x310] sm:$0xff] }
 0x2db   : > { %5034 = vmatpush2.bf16.msra.mxu1 %v9659_v26  ;;  %4994 = vmatprep.subr.bf16.mxu0 %v9524_v3  ;;  %v9477_v26 = vcombine.low %v2598_v63, %v2602_v47  ;;  %v9342_v3 = vcombine.high %v2462_v7, %v2466_v36  ;;  %v2546_v59 = vld [vmem:[%s11443_s1 + $0x330] sm:$0xff] }
 0x2dc   : > { %5035 = vmatprep.subr.bf16.mxu1 %v9652_v28  ;;  %v9470_v28 = vcombine.high %v2590_v31, %v2594_v41  ;;  %v2670_v63 = vld [vmem:[%s11443_s1 + $0x710] sm:$0xff] }
 0x2dd   : > { %v2674_v47 = vld [vmem:[%s11443_s1 + $0x730] sm:$0xff] }
 0x2de   : > { %4995 = vmatpush2.bf16.msra.mxu0 %v9523_v35  ;;  %v9341_v35 = vcombine.low %v2462_v7, %v2466_v36  ;;  %v2534_v7 = vld [vmem:[%s11443_s1 + $0x2d0] sm:$0xff] }
 0x2df   : > { %5036 = vmatpush2.bf16.msra.mxu1 %v9651_v40  ;;  %4996 = vmatprep.subr.bf16.mxu0 %v9516_v20  ;;  %v9469_v40 = vcombine.low %v2590_v31, %v2594_v41  ;;  %v9334_v20 = vcombine.high %v2454_v6, %v2458_v12  ;;  %v2538_v36 = vld [vmem:[%s11443_s1 + $0x2f0] sm:$0xff] }
 0x2e0   : > { %5037 = vmatprep.subr.bf16.mxu1 %v9644_v15  ;;  %v9462_v15 = vcombine.high %v2582_v22, %v2586_v29  ;;  %v2662_v31 = vld [vmem:[%s11443_s1 + $0x6d0] sm:$0xff] }
 0x2e1   : > { %v2666_v41 = vld [vmem:[%s11443_s1 + $0x6f0] sm:$0xff] }
 0x2e2   : > { %4997 = vmatpush2.bf16.msra.mxu0 %v9515_v21  ;;  %v9333_v21 = vcombine.low %v2454_v6, %v2458_v12  ;;  %v2526_v6 = vld [vmem:[%s11443_s1 + $0x290] sm:$0xff] }
 0x2e3   : > { %5038 = vmatpush2.bf16.msra.mxu1 %v9643_v49  ;;  %5048 = vmatprep.subr.bf16.mxu0 %v9382_v42  ;;  %v9461_v49 = vcombine.low %v2582_v22, %v2586_v29  ;;  %v9326_v42 = vcombine.high %v2446_v17, %v2450_v56  ;;  %v2530_v12 = vld [vmem:[%s11443_s1 + $0x2b0] sm:$0xff] }
 0x2e4   : > { %5089 = vmatprep.subr.bf16.mxu1 %v9510_v24  ;;  %v9454_v24 = vcombine.high %v2574_v4, %v2578_v25  ;;  %v2654_v22 = vld [vmem:[%s11443_s1 + $0x690] sm:$0xff] }
 0x2e5   : > { %4999 = vmatmul.mubr.bf16.vlgmr.msra.gmra.mxu0 %v12279_v37  ;;  %v2658_v29 = vld [vmem:[%s11443_s1 + $0x6b0] sm:$0xff] }
 0x2e6   : > { %5040 = vmatmul.mubr.bf16.vlgmr.msra.gmra.mxu1 %v12241_v43  ;;  %5049 = vmatpush1.bf16.msra.mxu0 %v9381_v14  ;;  %v9325_v14 = vcombine.low %v2446_v17, %v2450_v56  ;;  %v2518_v17 = vld [vmem:[%s11443_s1 + $0x250] sm:$0xff] }
 0x2e7   : > { %5090 = vmatpush1.bf16.msra.mxu1 %v9509_v30  ;;  %5050 = vmatprep.subr.bf16.mxu0 %v9374_v38  ;;  %v9453_v30 = vcombine.low %v2574_v4, %v2578_v25  ;;  %v9446_v38 = vcombine.high %v2566_v23, %v2570_v34  ;;  %v2522_v56 = vld [vmem:[%s11443_s1 + $0x270] sm:$0xff] }
 0x2e8   : > { %5091 = vmatprep.subr.bf16.mxu1 %v9502_v2  ;;  %5080 = vmatprep.mubr.bf16.mxu0 %v12218_v1  ;;  %v9574_v2 = vcombine.high %v2694_v9, %v2698_v39  ;;  %v2646_v4 = vld [vmem:[%s11443_s1 + $0x650] sm:$0xff] }
 0x2e9   : > { %5121 = vmatprep.mubr.bf16.mxu1 %v12225_v51  ;;  %v2650_v25 = vld [vmem:[%s11443_s1 + $0x670] sm:$0xff] }
 0x2ea   : > { %5051 = vmatpush1.bf16.msra.mxu0 %v9373_v33  ;;  %v9445_v33 = vcombine.low %v2566_v23, %v2570_v34  ;;  %v2510_v23 = vld [vmem:[%s11443_s1 + $0x210] sm:$0xff] }
 0x2eb   : > { %5092 = vmatpush1.bf16.msra.mxu1 %v9501_v60  ;;  %5052 = vmatprep.subr.bf16.mxu0 %v9366_v8  ;;  %v9573_v60 = vcombine.low %v2694_v9, %v2698_v39  ;;  %v9438_v8 = vcombine.high %v2558_v57, %v2562_v53  ;;  %v2514_v34 = vld [vmem:[%s11443_s1 + $0x230] sm:$0xff] }
 0x2ec   : > { %5093 = vmatprep.subr.bf16.mxu1 %v9494_v55  ;;  %v9566_v55 = vcombine.high %v2686_v58, %v2690_v45  ;;  %v2638_v9 = vld [vmem:[%s11443_s1 + $0x610] sm:$0xff] }
 0x2ed   : > { %v2642_v39 = vld [vmem:[%s11443_s1 + $0x630] sm:$0xff] }
 0x2ee   : > { %5053 = vmatpush1.bf16.msra.mxu0 %v9365_v5  ;;  %v9437_v5 = vcombine.low %v2558_v57, %v2562_v53  ;;  %v2758_v57 = vld [vmem:[%s11443_s1 + $0x9d0] sm:$0xff] }
 0x2ef   : > { %5094 = vmatpush1.bf16.msra.mxu1 %v9493_v27  ;;  %5054 = vmatprep.subr.bf16.mxu0 %v9358_v18  ;;  %v9565_v27 = vcombine.low %v2686_v58, %v2690_v45  ;;  %v9430_v18 = vcombine.high %v2550_v48, %v2554_v50  ;;  %v2762_v53 = vld [vmem:[%s11443_s1 + $0x9f0] sm:$0xff]  ;;  %v2503_v58 = vld [vmem:[%s11443_s1 + $0x1d8] sm:$0xff] }
 0x2f0   : > { %5095 = vmatprep.subr.bf16.mxu1 %v9486_v11  ;;  %v9558_v11 = vcombine.high %v2678_v16, %v2682_v52  ;;  %v2507_v45 = vld [vmem:[%s11443_s1 + $0x1f8] sm:$0xff] }
 0x2f2   : > { %5055 = vmatpush1.bf16.msra.mxu0 %v9357_v62  ;;  %v9429_v62 = vcombine.low %v2550_v48, %v2554_v50  ;;  %v2750_v48 = vld [vmem:[%s11443_s1 + $0x990] sm:$0xff] }
 0x2f3   : > { %5096 = vmatpush1.bf16.msra.mxu1 %v9485_v54  ;;  %5056 = vmatprep.subr.bf16.mxu0 %v9350_v19  ;;  %v9557_v54 = vcombine.low %v2678_v16, %v2682_v52  ;;  %v9422_v19 = vcombine.high %v2542_v13, %v2546_v59  ;;  %v2754_v50 = vld [vmem:[%s11443_s1 + $0x9b0] sm:$0xff]  ;;  %v2495_v16 = vld [vmem:[%s11443_s1 + $0x198] sm:$0xff] }
 0x2f4   : > { %5097 = vmatprep.subr.bf16.mxu1 %v9478_v61  ;;  %v9550_v61 = vcombine.high %v2670_v63, %v2674_v47  ;;  %v2499_v52 = vld [vmem:[%s11443_s1 + $0x1b8] sm:$0xff] }
 0x2f6   : > { %5057 = vmatpush1.bf16.msra.mxu0 %v9349_v46  ;;  %v9421_v46 = vcombine.low %v2542_v13, %v2546_v59  ;;  %v2742_v13 = vld [vmem:[%s11443_s1 + $0x950] sm:$0xff] }
 0x2f7   : > { %5098 = vmatpush1.bf16.msra.mxu1 %v9477_v26  ;;  %5058 = vmatprep.subr.bf16.mxu0 %v9342_v3  ;;  %v9549_v26 = vcombine.low %v2670_v63, %v2674_v47  ;;  %v9414_v3 = vcombine.high %v2534_v7, %v2538_v36  ;;  %v2746_v59 = vld [vmem:[%s11443_s1 + $0x970] sm:$0xff]  ;;  %v2487_v47 = vld [vmem:[%s11443_s1 + $0x158] sm:$0xff] }
 0x2f8   : > { %5099 = vmatprep.subr.bf16.mxu1 %v9470_v28  ;;  %v9542_v28 = vcombine.high %v2662_v31, %v2666_v41 }
 0x2fa   : > { %5059 = vmatpush1.bf16.msra.mxu0 %v9341_v35  ;;  %v9413_v35 = vcombine.low %v2534_v7, %v2538_v36  ;;  %v9375_v36 = vcombine.low %v2495_v16, %v2499_v52 }
 0x2fb   : > { %5100 = vmatpush1.bf16.msra.mxu1 %v9469_v40  ;;  %5060 = vmatprep.subr.bf16.mxu0 %v9334_v20  ;;  %v9541_v40 = vcombine.low %v2662_v31, %v2666_v41  ;;  %v9406_v20 = vcombine.high %v2526_v6, %v2530_v12  ;;  %v9622_v31 = vcombine.high %v2742_v13, %v2746_v59 }
 0x2fc   : > { %5101 = vmatprep.subr.bf16.mxu1 %v9462_v15  ;;  %v9534_v15 = vcombine.high %v2654_v22, %v2658_v29 }
 0x2fe   : > { %5061 = vmatpush1.bf16.msra.mxu0 %v9333_v21  ;;  %v9405_v21 = vcombine.low %v2526_v6, %v2530_v12  ;;  %v2479_v12 = vld [vmem:[%s11443_s1 + $0x118] sm:$0xff] }
 0x2ff   : > { %5102 = vmatpush1.bf16.msra.mxu1 %v9461_v49  ;;  %5062 = vmatprep.subr.bf16.mxu0 %v9326_v42  ;;  %v9533_v49 = vcombine.low %v2654_v22, %v2658_v29  ;;  %v9398_v42 = vcombine.high %v2518_v17, %v2522_v56  ;;  %v2483_v22 = vld [vmem:[%s11443_s1 + $0x138] sm:$0xff] }
 0x300   : > { %5103 = vmatprep.subr.bf16.mxu1 %v9454_v24  ;;  %v9526_v24 = vcombine.high %v2646_v4, %v2650_v25 }
 0x302   : > { %5063 = vmatpush1.bf16.msra.mxu0 %v9325_v14  ;;  %v9397_v14 = vcombine.low %v2518_v17, %v2522_v56  ;;  %v9360_v56 = vcombine.high %v2479_v12, %v2483_v22 }
 0x303   : > { %5104 = vmatpush1.bf16.msra.mxu1 %v9453_v30  ;;  %5064 = vmatprep.subr.bf16.mxu0 %v9446_v38  ;;  %v9525_v30 = vcombine.low %v2646_v4, %v2650_v25  ;;  %v9390_v38 = vcombine.high %v2510_v23, %v2514_v34  ;;  %v2726_v4 = vld [vmem:[%s11443_s1 + $0x8d0] sm:$0xff] }
 0x304   : > { %5105 = vmatprep.subr.bf16.mxu1 %v9574_v2  ;;  %v9518_v2 = vcombine.high %v2638_v9, %v2642_v39  ;;  %v2730_v25 = vld [vmem:[%s11443_s1 + $0x8f0] sm:$0xff] }
 0x306   : > { %5065 = vmatpush2.bf16.msra.mxu0 %v9445_v33  ;;  %v9389_v33 = vcombine.low %v2510_v23, %v2514_v34  ;;  %v2718_v34 = vld [vmem:[%s11443_s1 + $0x890] sm:$0xff] }
 0x307   : > { %5106 = vmatpush2.bf16.msra.mxu1 %v9573_v60  ;;  %5066 = vmatprep.subr.bf16.mxu0 %v9438_v8  ;;  %v9517_v60 = vcombine.low %v2638_v9, %v2642_v39  ;;  %v9638_v8 = vcombine.high %v2758_v57, %v2762_v53  ;;  %v2722_v9 = vld [vmem:[%s11443_s1 + $0x8b0] sm:$0xff]  ;;  %v2463_v39 = vld [vmem:[%s11443_s1 + $0x98] sm:$0xff] }
 0x308   : > { %5107 = vmatprep.subr.bf16.mxu1 %v9566_v55  ;;  %v9384_v55 = vcombine.high %v2503_v58, %v2507_v45 }
 0x30a   : > { %5067 = vmatpush2.bf16.msra.mxu0 %v9437_v5  ;;  %v9637_v5 = vcombine.low %v2758_v57, %v2762_v53  ;;  %v2710_v53 = vld [vmem:[%s11443_s1 + $0x850] sm:$0xff] }
 0x30b   : > { %5108 = vmatpush2.bf16.msra.mxu1 %v9565_v27  ;;  %5068 = vmatprep.subr.bf16.mxu0 %v9430_v18  ;;  %v9383_v27 = vcombine.low %v2503_v58, %v2507_v45  ;;  %v9630_v18 = vcombine.high %v2750_v48, %v2754_v50  ;;  %v2714_v58 = vld [vmem:[%s11443_s1 + $0x870] sm:$0xff]  ;;  %v2455_v45 = vld [vmem:[%s11443_s1 + $0x58] sm:$0xff] }
 0x30c   : > { %5109 = vmatprep.subr.bf16.mxu1 %v9558_v11  ;;  %v9376_v11 = vcombine.high %v2495_v16, %v2499_v52  ;;  %v2706_v16 = vld [vmem:[%s11443_s1 + $0x830] sm:$0xff]  ;;  %v2447_v52 = vld [vmem:[%s11443_s1 + $0x18] sm:$0xff] }
 0x30e   : > { %5069 = vmatpush2.bf16.msra.mxu0 %v9429_v62  ;;  %v2491_v62 = vld [vmem:[%s11443_s1 + $0x178] sm:$0xff] }
 0x30f   : > { %5110 = vmatpush2.bf16.msra.mxu1 %v9557_v54  ;;  %5070 = vmatprep.subr.bf16.mxu0 %v9422_v19  ;;  %v9629_v19 = vcombine.low %v2750_v48, %v2754_v50  ;;  %v2702_v50 = vld [vmem:[%s11443_s1 + $0x810] sm:$0xff] }
 0x310   : > { %5111 = vmatprep.subr.bf16.mxu1 %v9550_v61 }
 0x312   : > { %5071 = vmatpush2.bf16.msra.mxu0 %v9421_v46  ;;  %v9368_v46 = vcombine.high %v2487_v47, %v2491_v62 }
 0x313   : > { %5112 = vmatpush2.bf16.msra.mxu1 %v9549_v26  ;;  %5072 = vmatprep.subr.bf16.mxu0 %v9414_v3  ;;  %v2734_v26 = vld [vmem:[%s11443_s1 + $0x910] sm:$0xff] }
 0x314   : > { %5113 = vmatprep.subr.bf16.mxu1 %v9542_v28  ;;  %v2738_v3 = vld [vmem:[%s11443_s1 + $0x930] sm:$0xff] }
 0x316   : > { %5073 = vmatpush2.bf16.msra.mxu0 %v9413_v35  ;;  %v9621_v35 = vcombine.low %v2742_v13, %v2746_v59  ;;  %v2822_v59 = vld [vmem:[%s11443_s1 + $0xbd0] sm:$0xff] }
 0x317   : > { %5114 = vmatpush2.bf16.msra.mxu1 %v9541_v40  ;;  %5074 = vmatprep.subr.bf16.mxu0 %v9406_v20  ;;  %v9367_v20 = vcombine.low %v2487_v47, %v2491_v62  ;;  %v2567_v47 = vld [vmem:[%s11443_s1 + $0x3d8] sm:$0xff] }
 0x318   : > { %5115 = vmatprep.subr.bf16.mxu1 %v9534_v15  ;;  %v9614_v15 = vcombine.high %v2734_v26, %v2738_v3  ;;  %v2571_v62 = vld [vmem:[%s11443_s1 + $0x3f8] sm:$0xff] }
 0x31a   : > { %5075 = vmatpush2.bf16.msra.mxu0 %v9405_v21  ;;  %v2471_v21 = vld [vmem:[%s11443_s1 + $0xd8] sm:$0xff] }
 0x31b   : > { %5116 = vmatpush2.bf16.msra.mxu1 %v9533_v49  ;;  %5076 = vmatprep.subr.bf16.mxu0 %v9398_v42  ;;  %v2475_v49 = vld [vmem:[%s11443_s1 + $0xf8] sm:$0xff]  ;;  %v9359_v42 = vcombine.low %v2479_v12, %v2483_v22 }
 0x31c   : > { %5117 = vmatprep.subr.bf16.mxu1 %v9526_v24  ;;  %v9606_v24 = vcombine.high %v2726_v4, %v2730_v25  ;;  %v9352_v23 = vcombine.high %v2471_v21, %v2475_v49 }
 0x31e   : > { %5077 = vmatpush2.bf16.msra.mxu0 %v9397_v14  ;;  %v2467_v14 = vld [vmem:[%s11443_s1 + $0xb8] sm:$0xff] }
 0x31f   : > { %5118 = vmatpush2.bf16.msra.mxu1 %v9525_v30  ;;  %5078 = vmatprep.subr.bf16.mxu0 %v9390_v38  ;;  %v9605_v30 = vcombine.low %v2726_v4, %v2730_v25  ;;  %v9351_v38 = vcombine.low %v2471_v21, %v2475_v49  ;;  %v9344_v57 = vcombine.high %v2463_v39, %v2467_v14  ;;  %v2798_v25 = vld [vmem:[%s11443_s1 + $0xb10] sm:$0xff]  ;;  %v2543_v49 = vld [vmem:[%s11443_s1 + $0x318] sm:$0xff] }
 0x320   : > { %5119 = vmatprep.subr.bf16.mxu1 %v9518_v2  ;;  %v9598_v2 = vcombine.high %v2718_v34, %v2722_v9  ;;  %v2802_v21 = vld [vmem:[%s11443_s1 + $0xb30] sm:$0xff] }
 0x322   : > { %5079 = vmatpush2.bf16.msra.mxu0 %v9389_v33  ;;  %v2459_v33 = vld [vmem:[%s11443_s1 + $0x78] sm:$0xff] }
 0x323   : > { %5120 = vmatpush2.bf16.msra.mxu1 %v9517_v60  ;;  %5130 = vmatprep.subr.bf16.mxu0 %v9638_v8  ;;  %v9597_v60 = vcombine.low %v2718_v34, %v2722_v9  ;;  %v9343_v8 = vcombine.low %v2463_v39, %v2467_v14  ;;  %v9336_v48 = vcombine.high %v2455_v45, %v2459_v33  ;;  %v2790_v9 = vld [vmem:[%s11443_s1 + $0xad0] sm:$0xff]  ;;  %v2535_v14 = vld [vmem:[%s11443_s1 + $0x2d8] sm:$0xff] }
 0x324   : > { %5171 = vmatprep.subr.bf16.mxu1 %v9384_v55  ;;  %v9590_v55 = vcombine.high %v2710_v53, %v2714_v58  ;;  %v2794_v39 = vld [vmem:[%s11443_s1 + $0xaf0] sm:$0xff] }
 0x325   : > { %v4836_v63 = vpop.f32.mrf.mxu0  ;;  %5081 = vmatmul.mubr.bf16.vlgmr.msra.gmra.mxu0 %v12269_v10 }
 0x326   : > { %v4877_v54 = vpop.f32.mrf.mxu1  ;;  %5122 = vmatmul.mubr.bf16.vlgmr.msra.gmra.mxu1 %v12279_v37  ;;  %5131 = vmatpush1.bf16.msra.mxu0 %v9637_v5  ;;  %v2451_v5 = vld [vmem:[%s11443_s1 + $0x38] sm:$0xff] }
 0x327   : > { %v12494_v61 = vadd.f32 %v4877_v54, %v4836_v63  ;;  %5172 = vmatpush1.bf16.msra.mxu1 %v9383_v27  ;;  %v4838_v7 = vpop.f32.mrf.mxu0  ;;  %5132 = vmatprep.subr.bf16.mxu0 %v9630_v18  ;;  %v9589_v27 = vcombine.low %v2710_v53, %v2714_v58  ;;  %v9335_v18 = vcombine.low %v2455_v45, %v2459_v33  ;;  %v2826_v63 = vld [vmem:[%s11443_s1 + $0xbf0] sm:$0xff]  ;;  %v2527_v33 = vld [vmem:[%s11443_s1 + $0x298] sm:$0xff] }
 0x328   : > { %v4879_v41 = vpop.f32.mrf.mxu1  ;;  %5173 = vmatprep.subr.bf16.mxu1 %v9376_v11  ;;  %5162 = vmatprep.mubr.bf16.mxu0 %v12284_v44  ;;  %v9582_v11 = vcombine.high %v2702_v50, %v2706_v16  ;;  %v9328_v13 = vcombine.high %v2447_v52, %v2451_v5  ;;  %v9581_v54 = vcombine.low %v2702_v50, %v2706_v16  ;;  %v2782_v58 = vld [vmem:[%s11443_s1 + $0xa90] sm:$0xff] }
 0x329   : > { %v12499_v28 = vadd.f32 %v4879_v41, %v4838_v7  ;;  %v4840_v6 = vpop.f32.mrf.mxu0  ;;  %5203 = vmatprep.mubr.bf16.mxu1 %v12218_v1  ;;  %v9613_v1 = vcombine.low %v2734_v26, %v2738_v3  ;;  %v9702_v7 = vcombine.high %v2822_v59, %v2826_v63  ;;  %v2818_v41 = vld [vmem:[%s11443_s1 + $0xbb0] sm:$0xff]  ;;  %v2563_v26 = vld [vmem:[%s11443_s1 + $0x3b8] sm:$0xff]  ;;  %v9701_v3 = vcombine.low %v2822_v59, %v2826_v63 }
 0x32a   : > { %v4881_v29 = vpop.f32.mrf.mxu1  ;;  %5133 = vmatpush1.bf16.msra.mxu0 %v9629_v19  ;;  %v9327_v19 = vcombine.low %v2447_v52, %v2451_v5  ;;  %v9447_v6 = vcombine.low %v2567_v47, %v2571_v62  ;;  %v2786_v45 = vld [vmem:[%s11443_s1 + $0xab0] sm:$0xff]  ;;  %v2519_v5 = vld [vmem:[%s11443_s1 + $0x258] sm:$0xff] }
 0x32b   : > { %5174 = vmatpush1.bf16.msra.mxu1 %v9375_v36  ;;  %v4841_v40 = vpop.f32.mrf.mxu0  ;;  %5134 = vmatprep.subr.bf16.mxu0 %v9622_v31  ;;  %v9448_v36 = vcombine.high %v2567_v47, %v2571_v62  ;;  %v2814_v31 = vld [vmem:[%s11443_s1 + $0xb90] sm:$0xff]  ;;  %v2511_v62 = vld [vmem:[%s11443_s1 + $0x218] sm:$0xff] }
 0x32c   : > { %v4882_v17 = vpop.f32.mrf.mxu1  ;;  %5175 = vmatprep.subr.bf16.mxu1 %v9368_v46  ;;  %v2559_v46 = vld [vmem:[%s11443_s1 + $0x398] sm:$0xff]  ;;  %v9694_v12 = vcombine.high %v2814_v31, %v2818_v41  ;;  %v2806_v29 = vld [vmem:[%s11443_s1 + $0xb50] sm:$0xff] }
 0x32d   : > { %v9440_v22 = vcombine.high %v2559_v46, %v2563_v26  ;;  %v2551_v40 = vld [vmem:[%s11443_s1 + $0x358] sm:$0xff]  ;;  %v9439_v17 = vcombine.low %v2559_v46, %v2563_v26  ;;  %v2774_v16 = vld [vmem:[%s11443_s1 + $0xa50] sm:$0xff] }
 0x32e   : > { %5135 = vmatpush1.bf16.msra.mxu0 %v9621_v35  ;;  %v2810_v35 = vld [vmem:[%s11443_s1 + $0xb70] sm:$0xff]  ;;  %v2635_v46 = vld [vmem:[%s11443_s1 + $0x5f8] sm:$0xff] }
 0x32f   : > { %5176 = vmatpush1.bf16.msra.mxu1 %v9367_v20  ;;  %5136 = vmatprep.subr.bf16.mxu0 %v9614_v15  ;;  %v2555_v20 = vld [vmem:[%s11443_s1 + $0x378] sm:$0xff]  ;;  %v9693_v15 = vcombine.low %v2814_v31, %v2818_v41  ;;  %v2778_v52 = vld [vmem:[%s11443_s1 + $0xa70] sm:$0xff] }
 0x330   : > { %5177 = vmatprep.subr.bf16.mxu1 %v9360_v56  ;;  %v9686_v56 = vcombine.high %v2806_v29, %v2810_v35  ;;  %v9432_v4 = vcombine.high %v2551_v40, %v2555_v20  ;;  %v2766_v63 = vld [vmem:[%s11443_s1 + $0xa10] sm:$0xff]  ;;  %v2631_v41 = vld [vmem:[%s11443_s1 + $0x5d8] sm:$0xff] }
 0x331   : > { %v2770_v47 = vld [vmem:[%s11443_s1 + $0xa30] sm:$0xff]  ;;  %v2759_v26 = vld [vmem:[%s11443_s1 + $0x9d8] sm:$0xff] }
 0x332   : > { %5137 = vmatpush1.bf16.msra.mxu0 %v9613_v1  ;;  %v2547_v1 = vld [vmem:[%s11443_s1 + $0x338] sm:$0xff] }
 0x333   : > { %5178 = vmatpush1.bf16.msra.mxu1 %v9359_v42  ;;  %5138 = vmatprep.subr.bf16.mxu0 %v9606_v24  ;;  %v9685_v42 = vcombine.low %v2806_v29, %v2810_v35  ;;  %v9431_v24 = vcombine.low %v2551_v40, %v2555_v20  ;;  %v9424_v34 = vcombine.high %v2543_v49, %v2547_v1  ;;  %v2623_v35 = vld [vmem:[%s11443_s1 + $0x598] sm:$0xff] }
 0x334   : > { %5179 = vmatprep.subr.bf16.mxu1 %v9352_v23  ;;  %v9678_v23 = vcombine.high %v2798_v25, %v2802_v21  ;;  %v2627_v40 = vld [vmem:[%s11443_s1 + $0x5b8] sm:$0xff] }
 0x335   : > { %v2751_v20 = vld [vmem:[%s11443_s1 + $0x998] sm:$0xff] }
 0x336   : > { %5139 = vmatpush1.bf16.msra.mxu0 %v9605_v30  ;;  %v2539_v30 = vld [vmem:[%s11443_s1 + $0x2f8] sm:$0xff] }
 0x337   : > { %5180 = vmatpush1.bf16.msra.mxu1 %v9351_v38  ;;  %5140 = vmatprep.subr.bf16.mxu0 %v9598_v2  ;;  %v9677_v38 = vcombine.low %v2798_v25, %v2802_v21  ;;  %v9423_v2 = vcombine.low %v2543_v49, %v2547_v1  ;;  %v9416_v53 = vcombine.high %v2535_v14, %v2539_v30  ;;  %v2615_v21 = vld [vmem:[%s11443_s1 + $0x558] sm:$0xff] }
 0x338   : > { %5181 = vmatprep.subr.bf16.mxu1 %v9344_v57  ;;  %v9670_v57 = vcombine.high %v2790_v9, %v2794_v39  ;;  %v2619_v49 = vld [vmem:[%s11443_s1 + $0x578] sm:$0xff] }
 0x33a   : > { %5141 = vmatpush1.bf16.msra.mxu0 %v9597_v60  ;;  %v2531_v60 = vld [vmem:[%s11443_s1 + $0x2b8] sm:$0xff] }
 0x33b   : > { %5182 = vmatpush1.bf16.msra.mxu1 %v9343_v8  ;;  %5142 = vmatprep.subr.bf16.mxu0 %v9590_v55  ;;  %v9669_v8 = vcombine.low %v2790_v9, %v2794_v39  ;;  %v9415_v55 = vcombine.low %v2535_v14, %v2539_v30  ;;  %v9408_v50 = vcombine.high %v2527_v33, %v2531_v60 }
 0x33c   : > { %5183 = vmatprep.subr.bf16.mxu1 %v9336_v48  ;;  %v9662_v48 = vcombine.high %v2782_v58, %v2786_v45  ;;  %v9503_v9 = vcombine.low %v2623_v35, %v2627_v40  ;;  %v9496_v30 = vcombine.high %v2615_v21, %v2619_v49 }
 0x33e   : > { %5143 = vmatpush1.bf16.msra.mxu0 %v9589_v27  ;;  %v2523_v27 = vld [vmem:[%s11443_s1 + $0x278] sm:$0xff] }
 0x33f   : > { %5184 = vmatpush1.bf16.msra.mxu1 %v9335_v18  ;;  %5144 = vmatprep.subr.bf16.mxu0 %v9582_v11  ;;  %v9661_v18 = vcombine.low %v2782_v58, %v2786_v45  ;;  %v9407_v11 = vcombine.low %v2527_v33, %v2531_v60  ;;  %v9400_v59 = vcombine.high %v2519_v5, %v2523_v27  ;;  %v2735_v58 = vld [vmem:[%s11443_s1 + $0x918] sm:$0xff] }
 0x340   : > { %5185 = vmatprep.subr.bf16.mxu1 %v9328_v13  ;;  %v9654_v13 = vcombine.high %v2774_v16, %v2778_v52  ;;  %v2739_v45 = vld [vmem:[%s11443_s1 + $0x938] sm:$0xff]  ;;  %v9495_v60 = vcombine.low %v2615_v21, %v2619_v49 }
 0x341   : > { %v2699_v21 = vld [vmem:[%s11443_s1 + $0x7f8] sm:$0xff] }
 0x342   : > { %5145 = vmatpush1.bf16.msra.mxu0 %v9581_v54  ;;  %v2515_v54 = vld [vmem:[%s11443_s1 + $0x238] sm:$0xff] }
 0x343   : > { %5186 = vmatpush1.bf16.msra.mxu1 %v9327_v19  ;;  %5146 = vmatprep.subr.bf16.mxu0 %v9702_v7  ;;  %v9653_v19 = vcombine.low %v2774_v16, %v2778_v52  ;;  %v9399_v7 = vcombine.low %v2519_v5, %v2523_v27  ;;  %v9392_v31 = vcombine.high %v2511_v62, %v2515_v54  ;;  %v2603_v16 = vld [vmem:[%s11443_s1 + $0x4f8] sm:$0xff] }
 0x344   : > { %5187 = vmatprep.subr.bf16.mxu1 %v9448_v36  ;;  %v9646_v36 = vcombine.high %v2766_v63, %v2770_v47  ;;  %v2727_v52 = vld [vmem:[%s11443_s1 + $0x8d8] sm:$0xff] }
 0x345   : > { %v2731_v5 = vld [vmem:[%s11443_s1 + $0x8f8] sm:$0xff] }
 0x346   : > { %5147 = vmatpush2.bf16.msra.mxu0 %v9701_v3  ;;  %v2763_v3 = vld [vmem:[%s11443_s1 + $0x9f8] sm:$0xff] }
 0x347   : > { %5188 = vmatpush2.bf16.msra.mxu1 %v9447_v6  ;;  %5148 = vmatprep.subr.bf16.mxu0 %v9694_v12  ;;  %v9645_v6 = vcombine.low %v2766_v63, %v2770_v47  ;;  %v9391_v12 = vcombine.low %v2511_v62, %v2515_v54  ;;  %v9640_v29 = vcombine.high %v2759_v26, %v2763_v3  ;;  %v2595_v63 = vld [vmem:[%s11443_s1 + $0x4b8] sm:$0xff] }
 0x348   : > { %5189 = vmatprep.subr.bf16.mxu1 %v9440_v22  ;;  %v9512_v22 = vcombine.high %v2631_v41, %v2635_v46  ;;  %v2719_v47 = vld [vmem:[%s11443_s1 + $0x898] sm:$0xff] }
 0x349   : > { %v2723_v62 = vld [vmem:[%s11443_s1 + $0x8b8] sm:$0xff] }
 0x34a   : > { %5149 = vmatpush2.bf16.msra.mxu0 %v9693_v15  ;;  %v2755_v15 = vld [vmem:[%s11443_s1 + $0x9b8] sm:$0xff] }
 0x34b   : > { %5190 = vmatpush2.bf16.msra.mxu1 %v9439_v17  ;;  %5150 = vmatprep.subr.bf16.mxu0 %v9686_v56  ;;  %v9511_v17 = vcombine.low %v2631_v41, %v2635_v46  ;;  %v9639_v56 = vcombine.low %v2759_v26, %v2763_v3  ;;  %v9632_v25 = vcombine.high %v2751_v20, %v2755_v15  ;;  %v2587_v41 = vld [vmem:[%s11443_s1 + $0x478] sm:$0xff] }
 0x34c   : > { %5191 = vmatprep.subr.bf16.mxu1 %v9432_v4  ;;  %v9504_v4 = vcombine.high %v2623_v35, %v2627_v40  ;;  %v9631_v14 = vcombine.low %v2751_v20, %v2755_v15  ;;  %v2711_v46 = vld [vmem:[%s11443_s1 + $0x858] sm:$0xff] }
 0x34d   : > { %v2715_v26 = vld [vmem:[%s11443_s1 + $0x878] sm:$0xff] }
 0x34e   : > { %5151 = vmatpush2.bf16.msra.mxu0 %v9685_v42  ;;  %v2743_v42 = vld [vmem:[%s11443_s1 + $0x958] sm:$0xff] }
 0x34f   : > { %5192 = vmatpush2.bf16.msra.mxu1 %v9431_v24  ;;  %5152 = vmatprep.subr.bf16.mxu0 %v9678_v23  ;;  %v2747_v24 = vld [vmem:[%s11443_s1 + $0x978] sm:$0xff] }
 0x350   : > { %5193 = vmatprep.subr.bf16.mxu1 %v9424_v34  ;;  %v2579_v35 = vld [vmem:[%s11443_s1 + $0x438] sm:$0xff] }
 0x351   : > { %v2703_v40 = vld [vmem:[%s11443_s1 + $0x818] sm:$0xff] }
 0x352   : > { %5153 = vmatpush2.bf16.msra.mxu0 %v9677_v38  ;;  %v2707_v20 = vld [vmem:[%s11443_s1 + $0x838] sm:$0xff] }
 0x353   : > { %5194 = vmatpush2.bf16.msra.mxu1 %v9423_v2  ;;  %5154 = vmatprep.subr.bf16.mxu0 %v9670_v57  ;;  %v2607_v57 = vld [vmem:[%s11443_s1 + $0x518] sm:$0xff] }
 0x354   : > { %5195 = vmatprep.subr.bf16.mxu1 %v9416_v53  ;;  %v2611_v53 = vld [vmem:[%s11443_s1 + $0x538] sm:$0xff] }
 0x355   : > { %v9487_v27 = vcombine.low %v2607_v57, %v2611_v53  ;;  %v2823_v49 = vld [vmem:[%s11443_s1 + $0xbd8] sm:$0xff] }
 0x356   : > { %5155 = vmatpush2.bf16.msra.mxu0 %v9669_v8 }
 0x357   : > { %5196 = vmatpush2.bf16.msra.mxu1 %v9415_v55  ;;  %5156 = vmatprep.subr.bf16.mxu0 %v9662_v48  ;;  %v9623_v55 = vcombine.low %v2743_v42, %v2747_v24 }
 0x358   : > { %5197 = vmatprep.subr.bf16.mxu1 %v9408_v50  ;;  %v9616_v50 = vcombine.high %v2735_v58, %v2739_v45 }
 0x35a   : > { %5157 = vmatpush2.bf16.msra.mxu0 %v9661_v18  ;;  %v9615_v18 = vcombine.low %v2735_v58, %v2739_v45 }
 0x35b   : > { %5198 = vmatpush2.bf16.msra.mxu1 %v9407_v11  ;;  %5158 = vmatprep.subr.bf16.mxu0 %v9654_v13  ;;  %v9608_v13 = vcombine.high %v2727_v52, %v2731_v5 }
 0x35c   : > { %5199 = vmatprep.subr.bf16.mxu1 %v9400_v59  ;;  %v2591_v59 = vld [vmem:[%s11443_s1 + $0x498] sm:$0xff] }
 0x35d   : > { %v9471_v3 = vcombine.low %v2591_v59, %v2595_v63 }
 0x35e   : > { %5159 = vmatpush2.bf16.msra.mxu0 %v9653_v19  ;;  %v9607_v19 = vcombine.low %v2727_v52, %v2731_v5  ;;  %v2675_v52 = vld [vmem:[%s11443_s1 + $0x738] sm:$0xff] }
 0x35f   : > { %5200 = vmatpush2.bf16.msra.mxu1 %v9399_v7  ;;  %5160 = vmatprep.subr.bf16.mxu0 %v9646_v36  ;;  %v9472_v7 = vcombine.high %v2591_v59, %v2595_v63  ;;  %v9600_v36 = vcombine.high %v2719_v47, %v2723_v62  ;;  %v2799_v5 = vld [vmem:[%s11443_s1 + $0xb18] sm:$0xff] }
 0x360   : > { %5201 = vmatprep.subr.bf16.mxu1 %v9392_v31  ;;  %v2583_v31 = vld [vmem:[%s11443_s1 + $0x458] sm:$0xff] }
 0x361   : > { %v9463_v15 = vcombine.low %v2583_v31, %v2587_v41  ;;  %v2663_v63 = vld [vmem:[%s11443_s1 + $0x6d8] sm:$0xff] }
 0x362   : > { %5161 = vmatpush2.bf16.msra.mxu0 %v9645_v6  ;;  %v9599_v6 = vcombine.low %v2719_v47, %v2723_v62  ;;  %v2667_v47 = vld [vmem:[%s11443_s1 + $0x6f8] sm:$0xff] }
 0x363   : > { %5202 = vmatpush2.bf16.msra.mxu1 %v9391_v12  ;;  %5212 = vmatprep.subr.bf16.mxu0 %v9512_v22  ;;  %v9464_v12 = vcombine.high %v2583_v31, %v2587_v41  ;;  %v9592_v22 = vcombine.high %v2711_v46, %v2715_v26  ;;  %v2791_v62 = vld [vmem:[%s11443_s1 + $0xad8] sm:$0xff] }
 0x364   : > { %5253 = vmatprep.subr.bf16.mxu1 %v9640_v29  ;;  %v2575_v29 = vld [vmem:[%s11443_s1 + $0x418] sm:$0xff] }
 0x365   : > { %v4918_v1 = vpop.f32.mrf.mxu0  ;;  %5163 = vmatmul.mubr.bf16.vlgmr.msra.gmra.mxu0 %v12241_v43  ;;  %v2655_v41 = vld [vmem:[%s11443_s1 + $0x698] sm:$0xff] }
 0x366   : > { %v12566_v23 = vadd.f32 %v4918_v1, %v12494_v61  ;;  %v12568_v34 = vpop.f32.mrf.mxu1  ;;  %5204 = vmatmul.mubr.bf16.vlgmr.msra.gmra.mxu1 %v12269_v10  ;;  %5213 = vmatpush1.bf16.msra.mxu0 %v9511_v17  ;;  %v9624_v61 = vcombine.high %v2743_v42, %v2747_v24  ;;  %v9591_v17 = vcombine.low %v2711_v46, %v2715_v26  ;;  %v2827_v1 = vld [vmem:[%s11443_s1 + $0xbf8] sm:$0xff] }
 0x367   : > { %5254 = vmatpush1.bf16.msra.mxu1 %v9639_v56  ;;  %v4920_v39 = vpop.f32.mrf.mxu0  ;;  %5214 = vmatprep.subr.bf16.mxu0 %v9504_v4  ;;  %v9456_v56 = vcombine.high %v2575_v29, %v2579_v35  ;;  %v9584_v4 = vcombine.high %v2703_v40, %v2707_v20  ;;  %v9455_v42 = vcombine.low %v2575_v29, %v2579_v35  ;;  %v2659_v46 = vld [vmem:[%s11443_s1 + $0x6b8] sm:$0xff] }
 0x368   : > { %v12572_v38 = vadd.f32 %v4920_v39, %v12499_v28  ;;  %v12574_v2 = vpop.f32.mrf.mxu1  ;;  %5255 = vmatprep.subr.bf16.mxu1 %v9632_v25  ;;  %5244 = vmatprep.mubr.bf16.mxu0 %v12225_v51  ;;  %v9488_v51 = vcombine.high %v2607_v57, %v2611_v53  ;;  %v2695_v25 = vld [vmem:[%s11443_s1 + $0x7d8] sm:$0xff]  ;;  %v9583_v24 = vcombine.low %v2703_v40, %v2707_v20 }
 0x369   : > { %v4922_v10 = vpop.f32.mrf.mxu0  ;;  %5285 = vmatprep.mubr.bf16.mxu1 %v12284_v44  ;;  %v2599_v44 = vld [vmem:[%s11443_s1 + $0x4d8] sm:$0xff]  ;;  %v9704_v39 = vcombine.high %v2823_v49, %v2827_v1  ;;  %v9575_v53 = vcombine.low %v2695_v25, %v2699_v21 }
 0x36a   : > { %v5302_v28 = vcombine.low %v12566_v23, %v12572_v38  ;;  %v4963_v33 = vpop.f32.mrf.mxu1  ;;  %5215 = vmatpush1.bf16.msra.mxu0 %v9503_v9  ;;  %v9480_v11 = vcombine.high %v2599_v44, %v2603_v16  ;;  %v9479_v54 = vcombine.low %v2599_v44, %v2603_v16  ;;  %v9576_v9 = vcombine.high %v2695_v25, %v2699_v21  ;;  %v2819_v57 = vld [vmem:[%s11443_s1 + $0xbb8] sm:$0xff] }
 0x36b   : > { %5256 = vmatpush1.bf16.msra.mxu1 %v9631_v14  ;;  %v4923_v8 = vpop.f32.mrf.mxu0  ;;  %5216 = vmatprep.subr.bf16.mxu0 %v9496_v30  ;;  %v2687_v14 = vld [vmem:[%s11443_s1 + $0x798] sm:$0xff]  ;;  %v9703_v10 = vcombine.low %v2823_v49, %v2827_v1 }
 0x36c   : > { %v4964_v48 = vpop.f32.mrf.mxu1  ;;  %5257 = vmatprep.subr.bf16.mxu1 %v9624_v61  ;;  %v2691_v30 = vld [vmem:[%s11443_s1 + $0x7b8] sm:$0xff] }
 0x36d   : > { %v2815_v61 = vld [vmem:[%s11443_s1 + $0xb98] sm:$0xff]  ;;  %v9568_v58 = vcombine.high %v2687_v14, %v2691_v30 }
 0x36e   : > { %5217 = vmatpush1.bf16.msra.mxu0 %v9495_v60  ;;  %v9696_v45 = vcombine.high %v2815_v61, %v2819_v57  ;;  %v2679_v33 = vld [vmem:[%s11443_s1 + $0x758] sm:$0xff]  ;;  %v9695_v48 = vcombine.low %v2815_v61, %v2819_v57  ;;  %v11332_v57 = vmov 1983009808  }
 0x36f   : > { %5258 = vmatpush1.bf16.msra.mxu1 %v9623_v55  ;;  %5218 = vmatprep.subr.bf16.mxu0 %v9488_v51  ;;  %v2683_v60 = vld [vmem:[%s11443_s1 + $0x778] sm:$0xff]  ;;  %v9567_v51 = vcombine.low %v2687_v14, %v2691_v30 }
 0x370   : > { %5259 = vmatprep.subr.bf16.mxu1 %v9616_v50  ;;  %v2807_v8 = vld [vmem:[%s11443_s1 + $0xb58] sm:$0xff]  ;;  %v9560_v50 = vcombine.high %v2679_v33, %v2683_v60 }
 0x371   : > { %v2811_v55 = vld [vmem:[%s11443_s1 + $0xb78] sm:$0xff] }
 0x372   : > { %5219 = vmatpush1.bf16.msra.mxu0 %v9487_v27  ;;  %v9688_v44 = vcombine.high %v2807_v8, %v2811_v55  ;;  %v2671_v16 = vld [vmem:[%s11443_s1 + $0x718] sm:$0xff] }
 0x373   : > { %5260 = vmatpush1.bf16.msra.mxu1 %v9615_v18  ;;  %5220 = vmatprep.subr.bf16.mxu0 %v9480_v11  ;;  %v2803_v27 = vld [vmem:[%s11443_s1 + $0xb38] sm:$0xff]  ;;  %v9559_v18 = vcombine.low %v2679_v33, %v2683_v60  ;;  %v9687_v11 = vcombine.low %v2807_v8, %v2811_v55 }
 0x374   : > { %5261 = vmatprep.subr.bf16.mxu1 %v9608_v13  ;;  %v9552_v13 = vcombine.high %v2671_v16, %v2675_v52  ;;  %v9680_v59 = vcombine.high %v2799_v5, %v2803_v27  ;;  %v2783_v26 = vld [vmem:[%s11443_s1 + $0xa98] sm:$0xff] }
 0x375   : > { %v2647_v35 = vld [vmem:[%s11443_s1 + $0x658] sm:$0xff] }
 0x376   : > { %5221 = vmatpush1.bf16.msra.mxu0 %v9479_v54  ;;  %v2795_v54 = vld [vmem:[%s11443_s1 + $0xaf8] sm:$0xff] }
 0x377   : > { %5262 = vmatpush1.bf16.msra.mxu1 %v9607_v19  ;;  %5222 = vmatprep.subr.bf16.mxu0 %v9472_v7  ;;  %v9551_v19 = vcombine.low %v2671_v16, %v2675_v52  ;;  %v9679_v7 = vcombine.low %v2799_v5, %v2803_v27  ;;  %v9672_v31 = vcombine.high %v2791_v62, %v2795_v54  ;;  %v2651_v40 = vld [vmem:[%s11443_s1 + $0x678] sm:$0xff] }
 0x378   : > { %5263 = vmatprep.subr.bf16.mxu1 %v9600_v36  ;;  %v9544_v36 = vcombine.high %v2663_v63, %v2667_v47  ;;  %v2775_v20 = vld [vmem:[%s11443_s1 + $0xa58] sm:$0xff] }
 0x379   : > { %v2639_v21 = vld [vmem:[%s11443_s1 + $0x618] sm:$0xff] }
 0x37a   : > { %5223 = vmatpush1.bf16.msra.mxu0 %v9471_v3  ;;  %v2787_v3 = vld [vmem:[%s11443_s1 + $0xab8] sm:$0xff] }
 0x37b   : > { %5264 = vmatpush1.bf16.msra.mxu1 %v9599_v6  ;;  %5224 = vmatprep.subr.bf16.mxu0 %v9464_v12  ;;  %v9543_v6 = vcombine.low %v2663_v63, %v2667_v47  ;;  %v9671_v12 = vcombine.low %v2791_v62, %v2795_v54  ;;  %v9664_v29 = vcombine.high %v2783_v26, %v2787_v3  ;;  %v2643_v49 = vld [vmem:[%s11443_s1 + $0x638] sm:$0xff] }
 0x37c   : > { %5265 = vmatprep.subr.bf16.mxu1 %v9592_v22  ;;  %v9536_v22 = vcombine.high %v2655_v41, %v2659_v46  ;;  %v2767_v1 = vld [vmem:[%s11443_s1 + $0xa18] sm:$0xff]  ;;  %v9519_v30 = vcombine.low %v2639_v21, %v2643_v49 }
 0x37d   : > { %v2438_v27 = vld [vmem:[#allocation4] sm:$0xff] }
 0x37e   : > { %5225 = vmatpush1.bf16.msra.mxu0 %v9463_v15  ;;  %v2779_v15 = vld [vmem:[%s11443_s1 + $0xa78] sm:$0xff] }
 0x37f   : > { %5266 = vmatpush1.bf16.msra.mxu1 %v9591_v17  ;;  %5226 = vmatprep.subr.bf16.mxu0 %v9456_v56  ;;  %v9535_v17 = vcombine.low %v2655_v41, %v2659_v46  ;;  %v9663_v56 = vcombine.low %v2783_v26, %v2787_v3  ;;  %v9656_v25 = vcombine.high %v2775_v20, %v2779_v15 }
 0x380   : > { %5267 = vmatprep.subr.bf16.mxu1 %v9584_v4  ;;  %v9528_v4 = vcombine.high %v2647_v35, %v2651_v40 }
 0x382   : > { %5227 = vmatpush1.bf16.msra.mxu0 %v9455_v42  ;;  %v2771_v42 = vld [vmem:[%s11443_s1 + $0xa38] sm:$0xff] }
 0x383   : > { %5268 = vmatpush1.bf16.msra.mxu1 %v9583_v24  ;;  %5228 = vmatprep.subr.bf16.mxu0 %v9576_v9  ;;  %v9527_v24 = vcombine.low %v2647_v35, %v2651_v40  ;;  %v9655_v9 = vcombine.low %v2775_v20, %v2779_v15  ;;  %v9648_v14 = vcombine.high %v2767_v1, %v2771_v42 }
 0x384   : > { %5269 = vmatprep.subr.bf16.mxu1 %v9704_v39  ;;  %v9520_v39 = vcombine.high %v2639_v21, %v2643_v49  ;;  %v9647_v61 = vcombine.low %v2767_v1, %v2771_v42 }
 0x386   : > { %5229 = vmatpush2.bf16.msra.mxu0 %v9575_v53  ;;  %v5305_v53 = vunpack.c.l.s4 %v11332_v57 }
 0x387   : > { %5270 = vmatpush2.bf16.msra.mxu1 %v9703_v10  ;;  %5230 = vmatprep.subr.bf16.mxu0 %v9568_v58 }
 0x388   : > { %5271 = vmatprep.subr.bf16.mxu1 %v9696_v45  ;;  %v5306_v58 = vunpack.c.0.s8 %v5305_v53 }
 0x38a   : > { %5231 = vmatpush2.bf16.msra.mxu0 %v9567_v51 }
 0x38b   : > { %5272 = vmatpush2.bf16.msra.mxu1 %v9695_v48  ;;  %5232 = vmatprep.subr.bf16.mxu0 %v9560_v50  ;;  %v12637_v48 = vsub.s32 %v5306_v58, %v12195_v32 }
 0x38c   : > { %5273 = vmatprep.subr.bf16.mxu1 %v9688_v44 }
 0x38e   : > { %5233 = vmatpush2.bf16.msra.mxu0 %v9559_v18 }
 0x38f   : > { %5274 = vmatpush2.bf16.msra.mxu1 %v9687_v11  ;;  %5234 = vmatprep.subr.bf16.mxu0 %v9552_v13 }
 0x390   : > { %5275 = vmatprep.subr.bf16.mxu1 %v9680_v59 }
 0x392   : > { %5235 = vmatpush2.bf16.msra.mxu0 %v9551_v19 }
 0x393   : > { %5276 = vmatpush2.bf16.msra.mxu1 %v9679_v7  ;;  %5236 = vmatprep.subr.bf16.mxu0 %v9544_v36 }
 0x394   : > { %5277 = vmatprep.subr.bf16.mxu1 %v9672_v31 }
 0x396   : > { %5237 = vmatpush2.bf16.msra.mxu0 %v9543_v6 }
 0x397   : > { %5278 = vmatpush2.bf16.msra.mxu1 %v9671_v12  ;;  %5238 = vmatprep.subr.bf16.mxu0 %v9536_v22 }
 0x398   : > { %5279 = vmatprep.subr.bf16.mxu1 %v9664_v29 }
 0x39a   : > { %5239 = vmatpush2.bf16.msra.mxu0 %v9535_v17 }
 0x39b   : > { %5280 = vmatpush2.bf16.msra.mxu1 %v9663_v56  ;;  %5240 = vmatprep.subr.bf16.mxu0 %v9528_v4 }
 0x39c   : > { %5281 = vmatprep.subr.bf16.mxu1 %v9656_v25 }
 0x39e   : > { %5241 = vmatpush2.bf16.msra.mxu0 %v9527_v24 }
 0x39f   : > { %5282 = vmatpush2.bf16.msra.mxu1 %v9655_v9  ;;  %5242 = vmatprep.subr.bf16.mxu0 %v9520_v39  ;;  %v2439_v39 = vld [vmem:[#allocation4 + $0x8] sm:$0xff] }
 0x3a0   : > { %5283 = vmatprep.subr.bf16.mxu1 %v9648_v14 }
 0x3a2   : > { %5243 = vmatpush2.bf16.msra.mxu0 %v9519_v30 }
 0x3a3   : > { %5284 = vmatpush2.bf16.msra.mxu1 %v9647_v61 }
 0x3a5   : > { %v5000_v10 = vpop.f32.mrf.mxu0  ;;  %5245 = vmatmul.mubr.bf16.vlgmr.msra.gmra.mxu0 %v12279_v37 }
 0x3a6   : > { %v5001_v45 = vadd.f32 %v5000_v10, %v12568_v34  ;;  %v5041_v33 = vpop.f32.mrf.mxu1  ;;  %5286 = vmatmul.mubr.bf16.vlgmr.msra.gmra.mxu1 %v12241_v43  ;;  %v5310_v34 = vrot.slane %v5302_v28, %v12637_v48 }
 0x3a7   : > { %v5002_v60 = vpop.f32.mrf.mxu0 }
 0x3a8   : > { %v5003_v8 = vadd.f32 %v5002_v60, %v12574_v2  ;;  %v5043_v55 = vpop.f32.mrf.mxu1  ;;  %v5042_v50 = vadd.f32 %v5041_v33, %v5001_v45 }
 0x3a9   : > { %v5004_v51 = vpop.f32.mrf.mxu0 }
 0x3aa   : > { %v5044_v44 = vadd.f32 %v5043_v55, %v5003_v8  ;;  %v5045_v16 = vpop.f32.mrf.mxu1 }
 0x3ab   : > { %v5005_v52 = vpop.f32.mrf.mxu0 }
 0x3ac   : > { %v5303_v5 = vcombine.low %v5042_v50, %v5044_v44  ;;  %v5046_v37 = vpop.f32.mrf.mxu1 }
 0x3ae   : > { %v5317_v43 = vrot.slane %v5303_v5, %v12637_v48 }
 0x3b0   : > { %v5318_v2 = vcombine.low %v5310_v34, %v5317_v43 }
 0x3b2   : > { %v5338_v18 = vadd.f32 %v5318_v2, %v2438_v27 }
 0x3b4   : > { %5340 = vst [vmem:[#allocation4] sm:$0xff] %v5338_v18 }
 0x3e5   : > { %v5082_v11 = vpop.f32.mrf.mxu0 }
 0x3e6   : > { %v5123_v13 = vpop.f32.mrf.mxu1 }
 0x3e7   : > { %v5124_v59 = vadd.f32 %v5123_v13, %v5082_v11  ;;  %v5084_v63 = vpop.f32.mrf.mxu0 }
 0x3e8   : > { %v5125_v47 = vpop.f32.mrf.mxu1 }
 0x3e9   : > { %v5126_v62 = vadd.f32 %v5125_v47, %v5084_v63  ;;  %v5086_v54 = vpop.f32.mrf.mxu0 }
 0x3ea   : > { %v5127_v19 = vpop.f32.mrf.mxu1 }
 0x3eb   : > { %v5087_v7 = vpop.f32.mrf.mxu0 }
 0x3ec   : > { %v5128_v36 = vpop.f32.mrf.mxu1 }
 0x425   : > { %v5164_v31 = vpop.f32.mrf.mxu0 }
 0x426   : > { %v5165_v41 = vadd.f32 %v5164_v31, %v5124_v59  ;;  %v5205_v23 = vpop.f32.mrf.mxu1 }
 0x427   : > { %v5166_v38 = vpop.f32.mrf.mxu0 }
 0x428   : > { %v5167_v28 = vadd.f32 %v5166_v38, %v5126_v62  ;;  %v5207_v46 = vpop.f32.mrf.mxu1 }
 0x429   : > { %v5168_v26 = vpop.f32.mrf.mxu0 }
 0x42a   : > { %v5319_v3 = vcombine.low %v5165_v41, %v5167_v28  ;;  %v5209_v6 = vpop.f32.mrf.mxu1 }
 0x42b   : > { %v5169_v12 = vpop.f32.mrf.mxu0 }
 0x42c   : > { %v5210_v22 = vpop.f32.mrf.mxu1  ;;  %v5327_v24 = vrot.slane %v5319_v3, %v12637_v48 }
 0x465   : > { %v5246_v29 = vpop.f32.mrf.mxu0 }
 0x466   : > { %v5247_v35 = vadd.f32 %v5246_v29, %v5205_v23  ;;  %v5287_v40 = vpop.f32.mrf.mxu1 }
 0x467   : > { %v5248_v20 = vpop.f32.mrf.mxu0 }
 0x468   : > { %v5249_v15 = vadd.f32 %v5248_v20, %v5207_v46  ;;  %v5289_v17 = vpop.f32.mrf.mxu1  ;;  %v5288_v4 = vadd.f32 %v5287_v40, %v5247_v35 }
 0x469   : > { %v5250_v56 = vpop.f32.mrf.mxu0 }
 0x46a   : > { %v5290_v25 = vadd.f32 %v5289_v17, %v5249_v15  ;;  %v5291_v21 = vpop.f32.mrf.mxu1 }
 0x46b   : > { %v5251_v49 = vpop.f32.mrf.mxu0 }
 0x46c   : > { %v5320_v1 = vcombine.low %v5288_v4, %v5290_v25  ;;  %v5292_v42 = vpop.f32.mrf.mxu1 }
 0x46e   : > { %v5334_v9 = vrot.slane %v5320_v1, %v12637_v48 }
 0x470   : > { %v5335_v14 = vcombine.low %v5327_v24, %v5334_v9  ;;  %5345 = sbr.rel (%p9705_p5) target bundleno = 2287 (0x8ef), region = 100 }
 0x472   : > { %v5339_v30 = vadd.f32 %v5335_v14, %v2439_v39 }
 0x474   : > { %5341 = vst [vmem:[#allocation4 + $0x8] sm:$0xff] %v5339_v30 }
 0x475   : > { %v10629_v61 = vld [vmem:[%s14210_s8 + $0xe4] ss:$16 sps:$4 sm:$0xff]   ;;  %v10633_v53 = vld [vmem:[%s14210_s8 + $0xe0] ss:$16 sps:$4 sm:$0xff]   ;;  %v12780_v35 = vsub.s32 0, %v12195_v32  ;;  %v12786_v20 = vsub.s32 1, %v12195_v32 }
 0x476   : > { %v10631_v57 = vld [vmem:[%s14210_s8 + $0x2e4] ss:$16 sps:$4 sm:$0xff]   ;;  %7032 = vmatprep.subr.bf16.mxu0 %v10629_v61  ;;  %v10634_v10 = vld [vmem:[%s14210_s8 + $0x2e0] ss:$16 sps:$4 sm:$0xff]   ;;  %v12789_v15 = vsub.s32 2, %v12195_v32  ;;  %v12795_v56 = vsub.s32 3, %v12195_v32 }
 0x477   : > { %7073 = vmatprep.subr.bf16.mxu1 %v10631_v57  ;;  %v10635_v58 = vld [vmem:[%s14210_s8 + $0xc4] ss:$16 sps:$4 sm:$0xff]   ;;  %7033 = vmatpush1.bf16.msra.mxu0 %v10633_v53  ;;  %v10639_v33 = vld [vmem:[%s14210_s8 + $0xc0] ss:$16 sps:$4 sm:$0xff]   ;;  %vm7501_vm5 = vcmask 64512  }
 0x478   : > { %7074 = vmatpush1.bf16.msra.mxu1 %v10634_v10  ;;  %v10637_v45 = vld [vmem:[%s14210_s8 + $0x2c4] ss:$16 sps:$4 sm:$0xff]   ;;  %7034 = vmatprep.subr.bf16.mxu0 %v10635_v58  ;;  %v10640_v60 = vld [vmem:[%s14210_s8 + $0x2c0] ss:$16 sps:$4 sm:$0xff]  }
 0x479   : > { %7075 = vmatprep.subr.bf16.mxu1 %v10637_v45  ;;  %v10641_v8 = vld [vmem:[%s14210_s8 + $0xa4] ss:$16 sps:$4 sm:$0xff]   ;;  %v10645_v51 = vld [vmem:[%s14210_s8 + $0xa0] ss:$16 sps:$4 sm:$0xff]  }
 0x47a   : > { %v10643_v55 = vld [vmem:[%s14210_s8 + $0x2a4] ss:$16 sps:$4 sm:$0xff]   ;;  %v10646_v50 = vld [vmem:[%s14210_s8 + $0x2a0] ss:$16 sps:$4 sm:$0xff]  }
 0x47b   : > { %7035 = vmatpush1.bf16.msra.mxu0 %v10639_v33  ;;  %v10647_v44 = vld [vmem:[%s14210_s8 + $0x84] ss:$16 sps:$4 sm:$0xff]   ;;  %v10651_v52 = vld [vmem:[%s14210_s8 + $0x80] ss:$16 sps:$4 sm:$0xff]  }
 0x47c   : > { %7076 = vmatpush1.bf16.msra.mxu1 %v10640_v60  ;;  %7036 = vmatprep.subr.bf16.mxu0 %v10641_v8  ;;  %v10649_v16 = vld [vmem:[%s14210_s8 + $0x284] ss:$16 sps:$4 sm:$0xff]   ;;  %v10652_v5 = vld [vmem:[%s14210_s8 + $0x280] ss:$16 sps:$4 sm:$0xff]  }
 0x47d   : > { %7077 = vmatprep.subr.bf16.mxu1 %v10643_v55  ;;  %v10653_v37 = vld [vmem:[%s14210_s8 + $0x64] ss:$16 sps:$4 sm:$0xff]   ;;  %v10657_v43 = vld [vmem:[%s14210_s8 + $0x60] ss:$16 sps:$4 sm:$0xff]  }
 0x47e   : > { %v10655_v34 = vld [vmem:[%s14210_s8 + $0x264] ss:$16 sps:$4 sm:$0xff]   ;;  %v10658_v27 = vld [vmem:[%s14210_s8 + $0x260] ss:$16 sps:$4 sm:$0xff]  }
 0x47f   : > { %7037 = vmatpush1.bf16.msra.mxu0 %v10645_v51  ;;  %v10659_v2 = vld [vmem:[%s14210_s8 + $0x44] ss:$16 sps:$4 sm:$0xff]   ;;  %v10663_v11 = vld [vmem:[%s14210_s8 + $0x40] ss:$16 sps:$4 sm:$0xff]  }
 0x480   : > { %7078 = vmatpush1.bf16.msra.mxu1 %v10646_v50  ;;  %7038 = vmatprep.subr.bf16.mxu0 %v10647_v44  ;;  %v10661_v18 = vld [vmem:[%s14210_s8 + $0x244] ss:$16 sps:$4 sm:$0xff]   ;;  %v10664_v13 = vld [vmem:[%s14210_s8 + $0x240] ss:$16 sps:$4 sm:$0xff]  }
 0x481   : > { %7079 = vmatprep.subr.bf16.mxu1 %v10649_v16  ;;  %v10665_v59 = vld [vmem:[%s14210_s8 + $0x24] ss:$16 sps:$4 sm:$0xff]   ;;  %v10669_v47 = vld [vmem:[%s14210_s8 + $0x20] ss:$16 sps:$4 sm:$0xff]  }
 0x482   : > { %v10667_v63 = vld [vmem:[%s14210_s8 + $0x224] ss:$16 sps:$4 sm:$0xff]   ;;  %v10670_v62 = vld [vmem:[%s14210_s8 + $0x220] ss:$16 sps:$4 sm:$0xff]  }
 0x483   : > { %7039 = vmatpush1.bf16.msra.mxu0 %v10651_v52  ;;  %v10671_v54 = vld [vmem:[%s14210_s8 + $0x4] ss:$16 sps:$4 sm:$0xff]   ;;  %v10675_v7 = vld [vmem:[%s14210_s8] ss:$16 sps:$4 sm:$0xff]  }
 0x484   : > { %7080 = vmatpush1.bf16.msra.mxu1 %v10652_v5  ;;  %7040 = vmatprep.subr.bf16.mxu0 %v10653_v37  ;;  %v10673_v19 = vld [vmem:[%s14210_s8 + $0x204] ss:$16 sps:$4 sm:$0xff]   ;;  %v10676_v36 = vld [vmem:[%s14210_s8 + $0x200] ss:$16 sps:$4 sm:$0xff]  }
 0x485   : > { %7081 = vmatprep.subr.bf16.mxu1 %v10655_v34  ;;  %v10677_v31 = vld [vmem:[%s14210_s8 + $0x1e4] ss:$16 sps:$4 sm:$0xff]   ;;  %v10681_v23 = vld [vmem:[%s14210_s8 + $0x1e0] ss:$16 sps:$4 sm:$0xff]  }
 0x486   : > { %v10679_v41 = vld [vmem:[%s14210_s8 + $0x3e4] ss:$16 sps:$4 sm:$0xff]   ;;  %v10682_v38 = vld [vmem:[%s14210_s8 + $0x3e0] ss:$16 sps:$4 sm:$0xff]  }
 0x487   : > { %7041 = vmatpush1.bf16.msra.mxu0 %v10657_v43  ;;  %v10683_v28 = vld [vmem:[%s14210_s8 + $0x1c4] ss:$16 sps:$4 sm:$0xff]   ;;  %v10687_v26 = vld [vmem:[%s14210_s8 + $0x1c0] ss:$16 sps:$4 sm:$0xff]  }
 0x488   : > { %7082 = vmatpush1.bf16.msra.mxu1 %v10658_v27  ;;  %7042 = vmatprep.subr.bf16.mxu0 %v10659_v2  ;;  %v10685_v46 = vld [vmem:[%s14210_s8 + $0x3c4] ss:$16 sps:$4 sm:$0xff]   ;;  %v10688_v3 = vld [vmem:[%s14210_s8 + $0x3c0] ss:$16 sps:$4 sm:$0xff]  }
 0x489   : > { %7083 = vmatprep.subr.bf16.mxu1 %v10661_v18  ;;  %v10689_v6 = vld [vmem:[%s14210_s8 + $0x1a4] ss:$16 sps:$4 sm:$0xff]   ;;  %v10693_v22 = vld [vmem:[%s14210_s8 + $0x1a0] ss:$16 sps:$4 sm:$0xff]  }
 0x48a   : > { %v10691_v12 = vld [vmem:[%s14210_s8 + $0x3a4] ss:$16 sps:$4 sm:$0xff]   ;;  %v10694_v29 = vld [vmem:[%s14210_s8 + $0x3a0] ss:$16 sps:$4 sm:$0xff]  }
 0x48b   : > { %7043 = vmatpush1.bf16.msra.mxu0 %v10663_v11  ;;  %v10695_v40 = vld [vmem:[%s14210_s8 + $0x184] ss:$16 sps:$4 sm:$0xff]   ;;  %v10699_v25 = vld [vmem:[%s14210_s8 + $0x180] ss:$16 sps:$4 sm:$0xff]  }
 0x48c   : > { %7084 = vmatpush1.bf16.msra.mxu1 %v10664_v13  ;;  %7044 = vmatprep.subr.bf16.mxu0 %v10665_v59  ;;  %v10697_v17 = vld [vmem:[%s14210_s8 + $0x384] ss:$16 sps:$4 sm:$0xff]   ;;  %v10700_v21 = vld [vmem:[%s14210_s8 + $0x380] ss:$16 sps:$4 sm:$0xff]  }
 0x48d   : > { %7085 = vmatprep.subr.bf16.mxu1 %v10667_v63  ;;  %v12800_v4 = vld [vmem:[%s14209_s7] sm:$0xff]  ;;  %v5346_v33 = vld [vmem:[#allocation4] sm:$0xff] }
 0x48e   : > { %v5353_v49 = vrot.slane %v12800_v4, %v12780_v35  ;;  %v5357_v1 = vrot.slane %v12800_v4, %v12786_v20  ;;  %v5361_v42 = vrot.slane %v12800_v4, %v12789_v15  ;;  %v10701_v24 = vld [vmem:[%s14210_s8 + $0x164] ss:$16 sps:$4 sm:$0xff]   ;;  %v5365_v39 = vrot.slane %v12800_v4, %v12795_v56  ;;  %v10705_v61 = vld [vmem:[%s14210_s8 + $0x160] ss:$16 sps:$4 sm:$0xff]  }
 0x48f   : > { %7045 = vmatpush1.bf16.msra.mxu0 %v10669_v47  ;;  %v10703_v9 = vld [vmem:[%s14210_s8 + $0x364] ss:$16 sps:$4 sm:$0xff]   ;;  %v10706_v57 = vld [vmem:[%s14210_s8 + $0x360] ss:$16 sps:$4 sm:$0xff]  }
 0x490   : > { %7086 = vmatpush1.bf16.msra.mxu1 %v10670_v62  ;;  %7046 = vmatprep.subr.bf16.mxu0 %v10671_v54  ;;  %v5382_v14 = vcombine.low %v5353_v49, %v5357_v1  ;;  %v5383_v30 = vcombine.low %v5361_v42, %v5365_v39  ;;  %v10707_v10 = vld [vmem:[%s14210_s8 + $0x144] ss:$16 sps:$4 sm:$0xff]   ;;  %v10711_v8 = vld [vmem:[%s14210_s8 + $0x140] ss:$16 sps:$4 sm:$0xff]  }
 0x491   : > { %7087 = vmatprep.subr.bf16.mxu1 %v10673_v19  ;;  %v10709_v58 = vld [vmem:[%s14210_s8 + $0x344] ss:$16 sps:$4 sm:$0xff]   ;;  %v10712_v55 = vld [vmem:[%s14210_s8 + $0x340] ss:$16 sps:$4 sm:$0xff]  }
 0x492   : > { %v5390_v53 = vrot.slane %v5382_v14, %v12637_v48  ;;  %v5397_v45 = vrot.slane %v5383_v30, %v12637_v48  ;;  %v10713_v51 = vld [vmem:[%s14210_s8 + $0x124] ss:$16 sps:$4 sm:$0xff]   ;;  %v10717_v52 = vld [vmem:[%s14210_s8 + $0x120] ss:$16 sps:$4 sm:$0xff]  }
 0x493   : > { %7047 = vmatpush1.bf16.msra.mxu0 %v10675_v7  ;;  %v10715_v50 = vld [vmem:[%s14210_s8 + $0x324] ss:$16 sps:$4 sm:$0xff]   ;;  %v10718_v5 = vld [vmem:[%s14210_s8 + $0x320] ss:$16 sps:$4 sm:$0xff]  }
 0x494   : > { %7088 = vmatpush1.bf16.msra.mxu1 %v10676_v36  ;;  %7048 = vmatprep.subr.bf16.mxu0 %v10677_v31  ;;  %v5398_v60 = vcombine.low %v5390_v53, %v5397_v45  ;;  %v10719_v37 = vld [vmem:[%s14210_s8 + $0x104] ss:$16 sps:$4 sm:$0xff]   ;;  %v10723_v11 = vld [vmem:[%s14210_s8 + $0x100] ss:$16 sps:$4 sm:$0xff]  }
 0x495   : > { %7089 = vmatprep.subr.bf16.mxu1 %v10679_v41  ;;  %v10721_v34 = vld [vmem:[%s14210_s8 + $0x304] ss:$16 sps:$4 sm:$0xff]   ;;  %v10724_v13 = vld [vmem:[%s14210_s8 + $0x300] ss:$16 sps:$4 sm:$0xff]  }
 0x496   : > { %v5418_v44 = vadd.f32 %v5398_v60, %v5346_v33  ;;  %v10727_v47 = vld [vmem:[%s14210_s8 + $0x4e4] ss:$16 sps:$4 sm:$0xff]   ;;  %v10725_v36 = vld [vmem:[%s14210_s8 + $0x4e0] ss:$16 sps:$4 sm:$0xff]  }
 0x497   : > { %7049 = vmatpush2.bf16.msra.mxu0 %v10681_v23  ;;  %v10730_v62 = vld [vmem:[%s14210_s8 + $0x6e4] ss:$16 sps:$4 sm:$0xff]   ;;  %v10728_v31 = vld [vmem:[%s14210_s8 + $0x6e0] ss:$16 sps:$4 sm:$0xff]  }
 0x498   : > { %7090 = vmatpush2.bf16.msra.mxu1 %v10682_v38  ;;  %7050 = vmatprep.subr.bf16.mxu0 %v10683_v28  ;;  %v5420_v16 = vmax.f32 %v5418_v44, 0.0  ;;  %v10733_v41 = vld [vmem:[%s14210_s8 + $0x4c4] ss:$16 sps:$4 sm:$0xff]   ;;  %v5368_v38 = vsub.s32 4, %v12195_v32  ;;  %v5372_v28 = vsub.s32 5, %v12195_v32 }
 0x499   : > { %7091 = vmatprep.subr.bf16.mxu1 %v10685_v46  ;;  %v10736_v23 = vld [vmem:[%s14210_s8 + $0x6c4] ss:$16 sps:$4 sm:$0xff]   ;;  %v5376_v46 = vsub.s32 6, %v12195_v32  ;;  %v10752_v53 = vld [vmem:[%s14210_s8 + $0x660] ss:$16 sps:$4 sm:$0xff]  }
 0x49a   : > { %v5431_v43 = vrot.slane %v5420_v16, %v12637_v48  ;;  %v5424_v27 = vcombine.high %v5420_v16, %v5420_v16  ;;  %v10745_v49 = vld [vmem:[%s14210_s8 + $0x484] ss:$16 sps:$4 sm:$0xff]   ;;  %v10755_v33 = vld [vmem:[%s14210_s8 + $0x440] ss:$16 sps:$4 sm:$0xff]  }
 0x49b   : > { %7051 = vmatpush2.bf16.msra.mxu0 %v10687_v26  ;;  %v5380_v26 = vsub.s32 7, %v12195_v32  ;;  %v10742_v32 = vld [vmem:[%s14210_s8 + $0x6a4] ss:$16 sps:$4 sm:$0xff]   ;;  %v10758_v60 = vld [vmem:[%s14210_s8 + $0x640] ss:$16 sps:$4 sm:$0xff]  }
 0x49c   : > { %7092 = vmatpush2.bf16.msra.mxu1 %v10688_v3  ;;  %7052 = vmatprep.subr.bf16.mxu0 %v10689_v6  ;;  %v5439_v2 = vcombine.high %v5431_v43, %v5431_v43  ;;  %v5438_v18 = vrot.slane %v5424_v27, %v12637_v48  ;;  %v12879_v19 = vpack.c.bf16 %v5431_v43, %v5431_v43  ;;  %v10731_v3 = vld [vmem:[%s14210_s8 + $0x4c0] ss:$16 sps:$4 sm:$0xff]   ;;  %v10751_v39 = vld [vmem:[%s14210_s8 + $0x464] ss:$16 sps:$4 sm:$0xff]  }
 0x49d   : > { %7093 = vmatprep.subr.bf16.mxu1 %v10691_v12  ;;  %v10734_v6 = vld [vmem:[%s14210_s8 + $0x6c0] ss:$16 sps:$4 sm:$0xff]   ;;  %v10739_v12 = vld [vmem:[%s14210_s8 + $0x4a4] ss:$16 sps:$4 sm:$0xff]  }
 0x49e   : > { %v12868_v59 = vpack.c.bf16 %v5439_v2, %v5439_v2  ;;  %v5440_v63 = vcombine.high %v5438_v18, %v5438_v18  ;;  %v12881_v7 = vpack.c.bf16 %v5438_v18, %v5438_v18  ;;  %v10754_v14 = vld [vmem:[%s14210_s8 + $0x664] ss:$16 sps:$4 sm:$0xff]   ;;  %v10764_v16 = vld [vmem:[%s14210_s8 + $0x620] ss:$16 sps:$4 sm:$0xff]  }
 0x49f   : > { %7053 = vmatpush2.bf16.msra.mxu0 %v10693_v22  ;;  %v5369_v22 = vrot.slane %v12800_v4, %v5368_v38  ;;  %v10770_v2 = vld [vmem:[%s14210_s8 + $0x600] ss:$16 sps:$4 sm:$0xff]   ;;  %v10775_v18 = vld [vmem:[%s14210_s8 + $0x5e4] ss:$16 sps:$4 sm:$0xff]  }
 0x4a0   : > { %7094 = vmatpush2.bf16.msra.mxu1 %v10694_v29  ;;  %7054 = vmatprep.subr.bf16.mxu0 %v10695_v40  ;;  %v12877_v54 = vpack.c.bf16 %v5440_v63, %v5440_v63  ;;  %v5373_v29 = vrot.slane %v12800_v4, %v5372_v28  ;;  %v5377_v40 = vrot.slane %v12800_v4, %v5376_v46  ;;  %v10779_v38 = vld [vmem:[%s14210_s8 + $0x5c0] ss:$16 sps:$4 sm:$0xff]   ;;  %v10787_v46 = vld [vmem:[%s14210_s8 + $0x5a4] ss:$16 sps:$4 sm:$0xff]  }
 0x4a1   : > { %7095 = vmatprep.subr.bf16.mxu1 %v10697_v17  ;;  %7064 = vmatprep.mubr.bf16.mxu0 %v12868_v59  ;;  %v5381_v17 = vrot.slane %v12800_v4, %v5380_v26  ;;  %v10748_v4 = vld [vmem:[%s14210_s8 + $0x684] ss:$16 sps:$4 sm:$0xff]   ;;  %v10782_v28 = vld [vmem:[%s14210_s8 + $0x7c0] ss:$16 sps:$4 sm:$0xff]  }
 0x4a2   : > { %7105 = vmatprep.mubr.bf16.mxu1 %v12877_v54  ;;  %v5399_v1 = vcombine.low %v5369_v22, %v5373_v29  ;;  %v10790_v26 = vld [vmem:[%s14210_s8 + $0x7a4] ss:$16 sps:$4 sm:$0xff]   ;;  %v10791_v22 = vld [vmem:[%s14210_s8 + $0x580] ss:$16 sps:$4 sm:$0xff]  }
 0x4a3   : > { %7055 = vmatpush2.bf16.msra.mxu0 %v10699_v25  ;;  %v10737_v25 = vld [vmem:[%s14210_s8 + $0x4a0] ss:$16 sps:$4 sm:$0xff]   ;;  %v5400_v42 = vcombine.low %v5377_v40, %v5381_v17  ;;  %v10799_v40 = vld [vmem:[%s14210_s8 + $0x564] ss:$16 sps:$4 sm:$0xff]  }
 0x4a4   : > { %7096 = vmatpush2.bf16.msra.mxu1 %v10700_v21  ;;  %7056 = vmatprep.subr.bf16.mxu0 %v10701_v24  ;;  %v10740_v21 = vld [vmem:[%s14210_s8 + $0x6a0] ss:$16 sps:$4 sm:$0xff]   ;;  %v5407_v30 = vrot.slane %v5399_v1, %v12637_v48  ;;  %v10802_v17 = vld [vmem:[%s14210_s8 + $0x764] ss:$16 sps:$4 sm:$0xff]  }
 0x4a5   : > { %7097 = vmatprep.subr.bf16.mxu1 %v10703_v9  ;;  %v10743_v24 = vld [vmem:[%s14210_s8 + $0x480] ss:$16 sps:$4 sm:$0xff]  }
 0x4a6   : > { %v10746_v9 = vld [vmem:[%s14210_s8 + $0x680] ss:$16 sps:$4 sm:$0xff]  }
 0x4a7   : > { %7057 = vmatpush2.bf16.msra.mxu0 %v10705_v61  ;;  %v5414_v61 = vrot.slane %v5400_v42, %v12637_v48  ;;  %v10794_v29 = vld [vmem:[%s14210_s8 + $0x780] ss:$16 sps:$4 sm:$0xff]  }
 0x4a8   : > { %7098 = vmatpush2.bf16.msra.mxu1 %v10706_v57  ;;  %7058 = vmatprep.subr.bf16.mxu0 %v10707_v10  ;;  %v10749_v57 = vld [vmem:[%s14210_s8 + $0x460] ss:$16 sps:$4 sm:$0xff]   ;;  %v10757_v10 = vld [vmem:[%s14210_s8 + $0x444] ss:$16 sps:$4 sm:$0xff]  }
 0x4a9   : > { %7099 = vmatprep.subr.bf16.mxu1 %v10709_v58  ;;  %v10760_v58 = vld [vmem:[%s14210_s8 + $0x644] ss:$16 sps:$4 sm:$0xff]   ;;  %v5415_v45 = vcombine.low %v5407_v30, %v5414_v61  ;;  %v10803_v1 = vld [vmem:[%s14210_s8 + $0x540] ss:$16 sps:$4 sm:$0xff]  }
 0x4aa   : > { %v10806_v42 = vld [vmem:[%s14210_s8 + $0x740] ss:$16 sps:$4 sm:$0xff]   ;;  %v10817_v30 = vld [vmem:[%s14210_s8 + $0x504] ss:$16 sps:$4 sm:$0xff]  }
 0x4ab   : > { %7059 = vmatpush2.bf16.msra.mxu0 %v10711_v8  ;;  %v10763_v8 = vld [vmem:[%s14210_s8 + $0x424] ss:$16 sps:$4 sm:$0xff]  }
 0x4ac   : > { %7100 = vmatpush2.bf16.msra.mxu1 %v10712_v55  ;;  %7060 = vmatprep.subr.bf16.mxu0 %v10713_v51  ;;  %v10766_v55 = vld [vmem:[%s14210_s8 + $0x624] ss:$16 sps:$4 sm:$0xff]  }
 0x4ad   : > { %7101 = vmatprep.subr.bf16.mxu1 %v10715_v50  ;;  %v5347_v51 = vld [vmem:[#allocation4 + $0x8] sm:$0xff] }
 0x4ae   : > { %v10761_v50 = vld [vmem:[%s14210_s8 + $0x420] ss:$16 sps:$4 sm:$0xff]   ;;  %v5419_v44 = vadd.f32 %v5415_v45, %v5347_v51  ;;  %v10820_v61 = vld [vmem:[%s14210_s8 + $0x704] ss:$16 sps:$4 sm:$0xff]   ;;  %v10832_v51 = vld [vmem:[%s14210_s8 + $0x2cc] ss:$16 sps:$4 sm:$0xff]  }
 0x4af   : > { %7061 = vmatpush2.bf16.msra.mxu0 %v10717_v52  ;;  %v10769_v52 = vld [vmem:[%s14210_s8 + $0x404] ss:$16 sps:$4 sm:$0xff]  }
 0x4b0   : > { %7102 = vmatpush2.bf16.msra.mxu1 %v10718_v5  ;;  %7062 = vmatprep.subr.bf16.mxu0 %v10719_v37  ;;  %v10772_v5 = vld [vmem:[%s14210_s8 + $0x604] ss:$16 sps:$4 sm:$0xff]   ;;  %v5421_v37 = vmax.f32 %v5419_v44, 0.0  ;;  %v10830_v44 = vld [vmem:[%s14210_s8 + $0x2c8] ss:$16 sps:$4 sm:$0xff]  }
 0x4b1   : > { %7103 = vmatprep.subr.bf16.mxu1 %v10721_v34  ;;  %v10767_v34 = vld [vmem:[%s14210_s8 + $0x400] ss:$16 sps:$4 sm:$0xff]  }
 0x4b2   : > { %v12984_v43 = vrot.slane %v5421_v37, %v12637_v48  ;;  %v5441_v27 = vcombine.high %v5421_v37, %v5421_v37  ;;  %v10836_v37 = vld [vmem:[%s14210_s8 + $0x2a8] ss:$16 sps:$4 sm:$0xff]  }
 0x4b3   : > { %7063 = vmatpush2.bf16.msra.mxu0 %v10723_v11  ;;  %v10778_v11 = vld [vmem:[%s14210_s8 + $0x7e4] ss:$16 sps:$4 sm:$0xff]  }
 0x4b4   : > { %7104 = vmatpush2.bf16.msra.mxu1 %v10724_v13  ;;  %7114 = vmatprep.subr.bf16.mxu0 %v10727_v47  ;;  %v5456_v13 = vcombine.high %v12984_v43, %v12984_v43  ;;  %v12998_v63 = vrot.slane %v5441_v27, %v12637_v48  ;;  %v10773_v47 = vld [vmem:[%s14210_s8 + $0x5e0] ss:$16 sps:$4 sm:$0xff]   ;;  %v10781_v48 = vld [vmem:[%s14210_s8 + $0x5c4] ss:$16 sps:$4 sm:$0xff]   ;;  %v13106_v45 = vpack.c.bf16 %v12984_v43, %v12984_v43  ;;  %v10842_v43 = vld [vmem:[%s14210_s8 + $0x288] ss:$16 sps:$4 sm:$0xff]  }
 0x4b5   : > { %7155 = vmatprep.subr.bf16.mxu1 %v10730_v62  ;;  %v10847_v27 = vld [vmem:[%s14210_s8 + $0x6c] ss:$16 sps:$4 sm:$0xff]  }
 0x4b6   : > { %7065 = vmatmul.mubr.bf16.vlgmr.msra.gmra.mxu0 %v12879_v19  ;;  %v13003_v62 = vpack.c.bf16 %v5456_v13, %v5456_v13  ;;  %v10853_v13 = vld [vmem:[%s14210_s8 + $0x4c] ss:$16 sps:$4 sm:$0xff]  }
 0x4b7   : > { %7106 = vmatmul.mubr.bf16.vlgmr.msra.gmra.mxu1 %v12881_v7  ;;  %7115 = vmatpush1.bf16.msra.mxu0 %v10725_v36  ;;  %v5457_v36 = vcombine.high %v12998_v63, %v12998_v63 }
 0x4b8   : > { %7156 = vmatpush1.bf16.msra.mxu1 %v10728_v31  ;;  %7116 = vmatprep.subr.bf16.mxu0 %v10733_v41  ;;  %v10776_v31 = vld [vmem:[%s14210_s8 + $0x7e0] ss:$16 sps:$4 sm:$0xff]   ;;  %v10784_v41 = vld [vmem:[%s14210_s8 + $0x7c4] ss:$16 sps:$4 sm:$0xff]  }
 0x4b9   : > { %7157 = vmatprep.subr.bf16.mxu1 %v10736_v23  ;;  %v13016_v23 = vpack.c.bf16 %v5457_v36, %v5457_v36  ;;  %7146 = vmatprep.mubr.bf16.mxu0 %v13003_v62  ;;  %v10854_v36 = vld [vmem:[%s14210_s8 + $0x248] ss:$16 sps:$4 sm:$0xff]  }
 0x4bb   : > { %7117 = vmatpush1.bf16.msra.mxu0 %v10731_v3  ;;  %7187 = vmatprep.mubr.bf16.mxu1 %v13016_v23  ;;  %v10785_v3 = vld [vmem:[%s14210_s8 + $0x5a0] ss:$16 sps:$4 sm:$0xff]  }
 0x4bc   : > { %7158 = vmatpush1.bf16.msra.mxu1 %v10734_v6  ;;  %7118 = vmatprep.subr.bf16.mxu0 %v10739_v12  ;;  %v10788_v6 = vld [vmem:[%s14210_s8 + $0x7a0] ss:$16 sps:$4 sm:$0xff]   ;;  %v10793_v12 = vld [vmem:[%s14210_s8 + $0x584] ss:$16 sps:$4 sm:$0xff]  }
 0x4bd   : > { %7159 = vmatprep.subr.bf16.mxu1 %v10742_v32  ;;  %v10796_v32 = vld [vmem:[%s14210_s8 + $0x784] ss:$16 sps:$4 sm:$0xff]  }
 0x4bf   : > { %7119 = vmatpush1.bf16.msra.mxu0 %v10737_v25  ;;  %v10797_v25 = vld [vmem:[%s14210_s8 + $0x560] ss:$16 sps:$4 sm:$0xff]  }
 0x4c0   : > { %7160 = vmatpush1.bf16.msra.mxu1 %v10740_v21  ;;  %7120 = vmatprep.subr.bf16.mxu0 %v10745_v49  ;;  %v10800_v21 = vld [vmem:[%s14210_s8 + $0x760] ss:$16 sps:$4 sm:$0xff]   ;;  %v10805_v49 = vld [vmem:[%s14210_s8 + $0x544] ss:$16 sps:$4 sm:$0xff]  }
 0x4c1   : > { %7161 = vmatprep.subr.bf16.mxu1 %v10748_v4  ;;  %v10808_v4 = vld [vmem:[%s14210_s8 + $0x744] ss:$16 sps:$4 sm:$0xff]  }
 0x4c3   : > { %7121 = vmatpush1.bf16.msra.mxu0 %v10743_v24  ;;  %v10811_v24 = vld [vmem:[%s14210_s8 + $0x524] ss:$16 sps:$4 sm:$0xff]  }
 0x4c4   : > { %7162 = vmatpush1.bf16.msra.mxu1 %v10746_v9  ;;  %7122 = vmatprep.subr.bf16.mxu0 %v10751_v39  ;;  %v10814_v9 = vld [vmem:[%s14210_s8 + $0x724] ss:$16 sps:$4 sm:$0xff]   ;;  %v10809_v39 = vld [vmem:[%s14210_s8 + $0x520] ss:$16 sps:$4 sm:$0xff]  }
 0x4c5   : > { %7163 = vmatprep.subr.bf16.mxu1 %v10754_v14  ;;  %v10812_v14 = vld [vmem:[%s14210_s8 + $0x720] ss:$16 sps:$4 sm:$0xff]  }
 0x4c7   : > { %7123 = vmatpush1.bf16.msra.mxu0 %v10749_v57  ;;  %v10815_v57 = vld [vmem:[%s14210_s8 + $0x500] ss:$16 sps:$4 sm:$0xff]  }
 0x4c8   : > { %7164 = vmatpush1.bf16.msra.mxu1 %v10752_v53  ;;  %7124 = vmatprep.subr.bf16.mxu0 %v10757_v10  ;;  %v10818_v53 = vld [vmem:[%s14210_s8 + $0x700] ss:$16 sps:$4 sm:$0xff]   ;;  %v10823_v10 = vld [vmem:[%s14210_s8 + $0xec] ss:$16 sps:$4 sm:$0xff]  }
 0x4c9   : > { %7165 = vmatprep.subr.bf16.mxu1 %v10760_v58  ;;  %v10826_v58 = vld [vmem:[%s14210_s8 + $0x2ec] ss:$16 sps:$4 sm:$0xff]  }
 0x4cb   : > { %7125 = vmatpush1.bf16.msra.mxu0 %v10755_v33  ;;  %v13110_v33 = vpack.c.bf16 %v12998_v63, %v12998_v63  ;;  %v10856_v63 = vld [vmem:[%s14210_s8 + $0x24c] ss:$16 sps:$4 sm:$0xff]  }
 0x4cc   : > { %7166 = vmatpush1.bf16.msra.mxu1 %v10758_v60  ;;  %7126 = vmatprep.subr.bf16.mxu0 %v10763_v8  ;;  %v10821_v60 = vld [vmem:[%s14210_s8 + $0xe8] ss:$16 sps:$4 sm:$0xff]  }
 0x4cd   : > { %7167 = vmatprep.subr.bf16.mxu1 %v10766_v55  ;;  %v10824_v8 = vld [vmem:[%s14210_s8 + $0x2e8] ss:$16 sps:$4 sm:$0xff]   ;;  %v10829_v55 = vld [vmem:[%s14210_s8 + $0xcc] ss:$16 sps:$4 sm:$0xff]  }
 0x4cf   : > { %7127 = vmatpush1.bf16.msra.mxu0 %v10761_v50  ;;  %v10827_v50 = vld [vmem:[%s14210_s8 + $0xc8] ss:$16 sps:$4 sm:$0xff]  }
 0x4d0   : > { %7168 = vmatpush1.bf16.msra.mxu1 %v10764_v16  ;;  %7128 = vmatprep.subr.bf16.mxu0 %v10769_v52  ;;  %v10835_v16 = vld [vmem:[%s14210_s8 + $0xac] ss:$16 sps:$4 sm:$0xff]  }
 0x4d1   : > { %7169 = vmatprep.subr.bf16.mxu1 %v10772_v5  ;;  %v10838_v52 = vld [vmem:[%s14210_s8 + $0x2ac] ss:$16 sps:$4 sm:$0xff]   ;;  %v10833_v5 = vld [vmem:[%s14210_s8 + $0xa8] ss:$16 sps:$4 sm:$0xff]  }
 0x4d3   : > { %7129 = vmatpush1.bf16.msra.mxu0 %v10767_v34  ;;  %v10841_v34 = vld [vmem:[%s14210_s8 + $0x8c] ss:$16 sps:$4 sm:$0xff]  }
 0x4d4   : > { %7170 = vmatpush1.bf16.msra.mxu1 %v10770_v2  ;;  %7130 = vmatprep.subr.bf16.mxu0 %v10775_v18  ;;  %v10850_v2 = vld [vmem:[%s14210_s8 + $0x26c] ss:$16 sps:$4 sm:$0xff]   ;;  %v10845_v18 = vld [vmem:[%s14210_s8 + $0x68] ss:$16 sps:$4 sm:$0xff]  }
 0x4d5   : > { %7171 = vmatprep.subr.bf16.mxu1 %v10778_v11  ;;  %v10848_v11 = vld [vmem:[%s14210_s8 + $0x268] ss:$16 sps:$4 sm:$0xff]  }
 0x4d7   : > { %7131 = vmatpush2.bf16.msra.mxu0 %v10773_v47  ;;  %v10851_v47 = vld [vmem:[%s14210_s8 + $0x48] ss:$16 sps:$4 sm:$0xff]  }
 0x4d8   : > { %7172 = vmatpush2.bf16.msra.mxu1 %v10776_v31  ;;  %7132 = vmatprep.subr.bf16.mxu0 %v10781_v48  ;;  %v10859_v31 = vld [vmem:[%s14210_s8 + $0x2c] ss:$16 sps:$4 sm:$0xff]  }
 0x4d9   : > { %7173 = vmatprep.subr.bf16.mxu1 %v10784_v41  ;;  %v10862_v48 = vld [vmem:[%s14210_s8 + $0x22c] ss:$16 sps:$4 sm:$0xff]   ;;  %v10857_v41 = vld [vmem:[%s14210_s8 + $0x28] ss:$16 sps:$4 sm:$0xff]  }
 0x4db   : > { %7133 = vmatpush2.bf16.msra.mxu0 %v10779_v38  ;;  %v10860_v38 = vld [vmem:[%s14210_s8 + $0x228] ss:$16 sps:$4 sm:$0xff]  }
 0x4dc   : > { %7174 = vmatpush2.bf16.msra.mxu1 %v10782_v28  ;;  %7134 = vmatprep.subr.bf16.mxu0 %v10787_v46  ;;  %v10865_v28 = vld [vmem:[%s14210_s8 + $0xc] ss:$16 sps:$4 sm:$0xff]  }
 0x4dd   : > { %7175 = vmatprep.subr.bf16.mxu1 %v10790_v26  ;;  %v10868_v46 = vld [vmem:[%s14210_s8 + $0x20c] ss:$16 sps:$4 sm:$0xff]   ;;  %v10863_v26 = vld [vmem:[%s14210_s8 + $0x8] ss:$16 sps:$4 sm:$0xff]  }
 0x4df   : > { %7135 = vmatpush2.bf16.msra.mxu0 %v10785_v3  ;;  %v10866_v3 = vld [vmem:[%s14210_s8 + $0x208] ss:$16 sps:$4 sm:$0xff]  }
 0x4e0   : > { %7176 = vmatpush2.bf16.msra.mxu1 %v10788_v6  ;;  %7136 = vmatprep.subr.bf16.mxu0 %v10793_v12  ;;  %v10871_v6 = vld [vmem:[%s14210_s8 + $0x1ec] ss:$16 sps:$4 sm:$0xff]  }
 0x4e1   : > { %7177 = vmatprep.subr.bf16.mxu1 %v10796_v32  ;;  %v10874_v12 = vld [vmem:[%s14210_s8 + $0x3ec] ss:$16 sps:$4 sm:$0xff]   ;;  %v10869_v32 = vld [vmem:[%s14210_s8 + $0x1e8] ss:$16 sps:$4 sm:$0xff]  }
 0x4e3   : > { %7137 = vmatpush2.bf16.msra.mxu0 %v10791_v22  ;;  %v10872_v22 = vld [vmem:[%s14210_s8 + $0x3e8] ss:$16 sps:$4 sm:$0xff]  }
 0x4e4   : > { %7178 = vmatpush2.bf16.msra.mxu1 %v10794_v29  ;;  %7138 = vmatprep.subr.bf16.mxu0 %v10799_v40  ;;  %v10877_v29 = vld [vmem:[%s14210_s8 + $0x1cc] ss:$16 sps:$4 sm:$0xff]  }
 0x4e5   : > { %7179 = vmatprep.subr.bf16.mxu1 %v10802_v17  ;;  %v10880_v40 = vld [vmem:[%s14210_s8 + $0x3cc] ss:$16 sps:$4 sm:$0xff]   ;;  %v10875_v17 = vld [vmem:[%s14210_s8 + $0x1c8] ss:$16 sps:$4 sm:$0xff]  }
 0x4e7   : > { %7139 = vmatpush2.bf16.msra.mxu0 %v10797_v25  ;;  %v10878_v25 = vld [vmem:[%s14210_s8 + $0x3c8] ss:$16 sps:$4 sm:$0xff]  }
 0x4e8   : > { %7180 = vmatpush2.bf16.msra.mxu1 %v10800_v21  ;;  %7140 = vmatprep.subr.bf16.mxu0 %v10805_v49  ;;  %v10883_v21 = vld [vmem:[%s14210_s8 + $0x1ac] ss:$16 sps:$4 sm:$0xff]  }
 0x4e9   : > { %7181 = vmatprep.subr.bf16.mxu1 %v10808_v4  ;;  %v10886_v49 = vld [vmem:[%s14210_s8 + $0x3ac] ss:$16 sps:$4 sm:$0xff]   ;;  %v10881_v4 = vld [vmem:[%s14210_s8 + $0x1a8] ss:$16 sps:$4 sm:$0xff]  }
 0x4eb   : > { %7141 = vmatpush2.bf16.msra.mxu0 %v10803_v1  ;;  %v10884_v1 = vld [vmem:[%s14210_s8 + $0x3a8] ss:$16 sps:$4 sm:$0xff]  }
 0x4ec   : > { %7182 = vmatpush2.bf16.msra.mxu1 %v10806_v42  ;;  %7142 = vmatprep.subr.bf16.mxu0 %v10811_v24  ;;  %v10889_v42 = vld [vmem:[%s14210_s8 + $0x18c] ss:$16 sps:$4 sm:$0xff]  }
 0x4ed   : > { %7183 = vmatprep.subr.bf16.mxu1 %v10814_v9  ;;  %v10892_v24 = vld [vmem:[%s14210_s8 + $0x38c] ss:$16 sps:$4 sm:$0xff]   ;;  %v10887_v9 = vld [vmem:[%s14210_s8 + $0x188] ss:$16 sps:$4 sm:$0xff]  }
 0x4ef   : > { %7143 = vmatpush2.bf16.msra.mxu0 %v10809_v39  ;;  %v10890_v39 = vld [vmem:[%s14210_s8 + $0x388] ss:$16 sps:$4 sm:$0xff]  }
 0x4f0   : > { %7184 = vmatpush2.bf16.msra.mxu1 %v10812_v14  ;;  %7144 = vmatprep.subr.bf16.mxu0 %v10817_v30  ;;  %v10895_v14 = vld [vmem:[%s14210_s8 + $0x16c] ss:$16 sps:$4 sm:$0xff]  }
 0x4f1   : > { %7185 = vmatprep.subr.bf16.mxu1 %v10820_v61  ;;  %v10898_v30 = vld [vmem:[%s14210_s8 + $0x36c] ss:$16 sps:$4 sm:$0xff]   ;;  %v10893_v61 = vld [vmem:[%s14210_s8 + $0x168] ss:$16 sps:$4 sm:$0xff]  }
 0x4f3   : > { %7145 = vmatpush2.bf16.msra.mxu0 %v10815_v57  ;;  %v10896_v57 = vld [vmem:[%s14210_s8 + $0x368] ss:$16 sps:$4 sm:$0xff]  }
 0x4f4   : > { %7186 = vmatpush2.bf16.msra.mxu1 %v10818_v53  ;;  %7196 = vmatprep.subr.bf16.mxu0 %v10823_v10  ;;  %v10901_v53 = vld [vmem:[%s14210_s8 + $0x14c] ss:$16 sps:$4 sm:$0xff]  }
 0x4f5   : > { %7237 = vmatprep.subr.bf16.mxu1 %v10826_v58  ;;  %v10904_v10 = vld [vmem:[%s14210_s8 + $0x34c] ss:$16 sps:$4 sm:$0xff]   ;;  %v10899_v58 = vld [vmem:[%s14210_s8 + $0x148] ss:$16 sps:$4 sm:$0xff]  }
 0x4f6   : > { %7147 = vmatmul.mubr.bf16.vlgmr.msra.gmra.mxu0 %v13106_v45 }
 0x4f7   : > { %7188 = vmatmul.mubr.bf16.vlgmr.msra.gmra.mxu1 %v13110_v33  ;;  %7197 = vmatpush1.bf16.msra.mxu0 %v10821_v60  ;;  %v10902_v60 = vld [vmem:[%s14210_s8 + $0x348] ss:$16 sps:$4 sm:$0xff]  }
 0x4f8   : > { %7238 = vmatpush1.bf16.msra.mxu1 %v10824_v8  ;;  %7198 = vmatprep.subr.bf16.mxu0 %v10829_v55  ;;  %v10907_v8 = vld [vmem:[%s14210_s8 + $0x12c] ss:$16 sps:$4 sm:$0xff]  }
 0x4f9   : > { %7239 = vmatprep.subr.bf16.mxu1 %v10832_v51  ;;  %7228 = vmatprep.mubr.bf16.mxu0 %v12868_v59  ;;  %v10844_v59 = vld [vmem:[%s14210_s8 + $0x28c] ss:$16 sps:$4 sm:$0xff]   ;;  %v10905_v51 = vld [vmem:[%s14210_s8 + $0x128] ss:$16 sps:$4 sm:$0xff]  }
 0x4fa   : > { %7269 = vmatprep.mubr.bf16.mxu1 %v12877_v54  ;;  %v10839_v54 = vld [vmem:[%s14210_s8 + $0x88] ss:$16 sps:$4 sm:$0xff]   ;;  %v10910_v55 = vld [vmem:[%s14210_s8 + $0x32c] ss:$16 sps:$4 sm:$0xff]  }
 0x4fb   : > { %7199 = vmatpush1.bf16.msra.mxu0 %v10827_v50  ;;  %v10908_v50 = vld [vmem:[%s14210_s8 + $0x328] ss:$16 sps:$4 sm:$0xff]  }
 0x4fc   : > { %7240 = vmatpush1.bf16.msra.mxu1 %v10830_v44  ;;  %7200 = vmatprep.subr.bf16.mxu0 %v10835_v16  ;;  %v10913_v44 = vld [vmem:[%s14210_s8 + $0x10c] ss:$16 sps:$4 sm:$0xff]  }
 0x4fd   : > { %7241 = vmatprep.subr.bf16.mxu1 %v10838_v52  ;;  %v10916_v16 = vld [vmem:[%s14210_s8 + $0x30c] ss:$16 sps:$4 sm:$0xff]   ;;  %v10911_v52 = vld [vmem:[%s14210_s8 + $0x108] ss:$16 sps:$4 sm:$0xff]  }
 0x4ff   : > { %7201 = vmatpush1.bf16.msra.mxu0 %v10833_v5  ;;  %v10914_v5 = vld [vmem:[%s14210_s8 + $0x308] ss:$16 sps:$4 sm:$0xff]  }
 0x500   : > { %7242 = vmatpush1.bf16.msra.mxu1 %v10836_v37  ;;  %7202 = vmatprep.subr.bf16.mxu0 %v10841_v34  ;;  %v10919_v37 = vld [vmem:[%s14210_s8 + $0x4ec] ss:$16 sps:$4 sm:$0xff]  }
 0x501   : > { %7243 = vmatprep.subr.bf16.mxu1 %v10844_v59  ;;  %v10922_v34 = vld [vmem:[%s14210_s8 + $0x6ec] ss:$16 sps:$4 sm:$0xff]   ;;  %v10917_v59 = vld [vmem:[%s14210_s8 + $0x4e8] ss:$16 sps:$4 sm:$0xff]  }
 0x503   : > { %7203 = vmatpush1.bf16.msra.mxu0 %v10839_v54  ;;  %v10920_v54 = vld [vmem:[%s14210_s8 + $0x6e8] ss:$16 sps:$4 sm:$0xff]  }
 0x504   : > { %7244 = vmatpush1.bf16.msra.mxu1 %v10842_v43  ;;  %7204 = vmatprep.subr.bf16.mxu0 %v10847_v27  ;;  %v10925_v43 = vld [vmem:[%s14210_s8 + $0x4cc] ss:$16 sps:$4 sm:$0xff]  }
 0x505   : > { %7245 = vmatprep.subr.bf16.mxu1 %v10850_v2  ;;  %v10928_v27 = vld [vmem:[%s14210_s8 + $0x6cc] ss:$16 sps:$4 sm:$0xff]   ;;  %v10923_v2 = vld [vmem:[%s14210_s8 + $0x4c8] ss:$16 sps:$4 sm:$0xff]  }
 0x507   : > { %7205 = vmatpush1.bf16.msra.mxu0 %v10845_v18  ;;  %v10926_v18 = vld [vmem:[%s14210_s8 + $0x6c8] ss:$16 sps:$4 sm:$0xff]  }
 0x508   : > { %7246 = vmatpush1.bf16.msra.mxu1 %v10848_v11  ;;  %7206 = vmatprep.subr.bf16.mxu0 %v10853_v13  ;;  %v10931_v11 = vld [vmem:[%s14210_s8 + $0x4ac] ss:$16 sps:$4 sm:$0xff]  }
 0x509   : > { %7247 = vmatprep.subr.bf16.mxu1 %v10856_v63  ;;  %v10934_v13 = vld [vmem:[%s14210_s8 + $0x6ac] ss:$16 sps:$4 sm:$0xff]   ;;  %v10929_v63 = vld [vmem:[%s14210_s8 + $0x4a8] ss:$16 sps:$4 sm:$0xff]  }
 0x50b   : > { %7207 = vmatpush1.bf16.msra.mxu0 %v10851_v47  ;;  %v10940_v47 = vld [vmem:[%s14210_s8 + $0x68c] ss:$16 sps:$4 sm:$0xff]  }
 0x50c   : > { %7248 = vmatpush1.bf16.msra.mxu1 %v10854_v36  ;;  %7208 = vmatprep.subr.bf16.mxu0 %v10859_v31  ;;  %v10943_v36 = vld [vmem:[%s14210_s8 + $0x46c] ss:$16 sps:$4 sm:$0xff]  }
 0x50d   : > { %7249 = vmatprep.subr.bf16.mxu1 %v10862_v48  ;;  %v10946_v31 = vld [vmem:[%s14210_s8 + $0x66c] ss:$16 sps:$4 sm:$0xff]   ;;  %v10941_v48 = vld [vmem:[%s14210_s8 + $0x468] ss:$16 sps:$4 sm:$0xff]  }
 0x50f   : > { %7209 = vmatpush1.bf16.msra.mxu0 %v10857_v41  ;;  %v10944_v41 = vld [vmem:[%s14210_s8 + $0x668] ss:$16 sps:$4 sm:$0xff]  }
 0x510   : > { %7250 = vmatpush1.bf16.msra.mxu1 %v10860_v38  ;;  %7210 = vmatprep.subr.bf16.mxu0 %v10865_v28  ;;  %v10949_v38 = vld [vmem:[%s14210_s8 + $0x44c] ss:$16 sps:$4 sm:$0xff]  }
 0x511   : > { %7251 = vmatprep.subr.bf16.mxu1 %v10868_v46  ;;  %v10952_v28 = vld [vmem:[%s14210_s8 + $0x64c] ss:$16 sps:$4 sm:$0xff]   ;;  %v10947_v46 = vld [vmem:[%s14210_s8 + $0x448] ss:$16 sps:$4 sm:$0xff]  }
 0x513   : > { %7211 = vmatpush1.bf16.msra.mxu0 %v10863_v26  ;;  %v10950_v26 = vld [vmem:[%s14210_s8 + $0x648] ss:$16 sps:$4 sm:$0xff]  }
 0x514   : > { %7252 = vmatpush1.bf16.msra.mxu1 %v10866_v3  ;;  %7212 = vmatprep.subr.bf16.mxu0 %v10871_v6  ;;  %v10955_v3 = vld [vmem:[%s14210_s8 + $0x42c] ss:$16 sps:$4 sm:$0xff]  }
 0x515   : > { %7253 = vmatprep.subr.bf16.mxu1 %v10874_v12  ;;  %v10958_v6 = vld [vmem:[%s14210_s8 + $0x62c] ss:$16 sps:$4 sm:$0xff]   ;;  %v10953_v12 = vld [vmem:[%s14210_s8 + $0x428] ss:$16 sps:$4 sm:$0xff]  }
 0x517   : > { %7213 = vmatpush2.bf16.msra.mxu0 %v10869_v32  ;;  %v10956_v32 = vld [vmem:[%s14210_s8 + $0x628] ss:$16 sps:$4 sm:$0xff]  }
 0x518   : > { %7254 = vmatpush2.bf16.msra.mxu1 %v10872_v22  ;;  %7214 = vmatprep.subr.bf16.mxu0 %v10877_v29  ;;  %v10961_v22 = vld [vmem:[%s14210_s8 + $0x40c] ss:$16 sps:$4 sm:$0xff]  }
 0x519   : > { %7255 = vmatprep.subr.bf16.mxu1 %v10880_v40  ;;  %v10964_v29 = vld [vmem:[%s14210_s8 + $0x60c] ss:$16 sps:$4 sm:$0xff]   ;;  %v10959_v40 = vld [vmem:[%s14210_s8 + $0x408] ss:$16 sps:$4 sm:$0xff]  }
 0x51b   : > { %7215 = vmatpush2.bf16.msra.mxu0 %v10875_v17  ;;  %v10962_v17 = vld [vmem:[%s14210_s8 + $0x608] ss:$16 sps:$4 sm:$0xff]  }
 0x51c   : > { %7256 = vmatpush2.bf16.msra.mxu1 %v10878_v25  ;;  %7216 = vmatprep.subr.bf16.mxu0 %v10883_v21  ;;  %v10967_v25 = vld [vmem:[%s14210_s8 + $0x5ec] ss:$16 sps:$4 sm:$0xff]  }
 0x51d   : > { %7257 = vmatprep.subr.bf16.mxu1 %v10886_v49  ;;  %v10970_v21 = vld [vmem:[%s14210_s8 + $0x7ec] ss:$16 sps:$4 sm:$0xff]   ;;  %v10965_v49 = vld [vmem:[%s14210_s8 + $0x5e8] ss:$16 sps:$4 sm:$0xff]  }
 0x51f   : > { %7217 = vmatpush2.bf16.msra.mxu0 %v10881_v4  ;;  %v10968_v4 = vld [vmem:[%s14210_s8 + $0x7e8] ss:$16 sps:$4 sm:$0xff]  }
 0x520   : > { %7258 = vmatpush2.bf16.msra.mxu1 %v10884_v1  ;;  %7218 = vmatprep.subr.bf16.mxu0 %v10889_v42  ;;  %v10973_v1 = vld [vmem:[%s14210_s8 + $0x5cc] ss:$16 sps:$4 sm:$0xff]  }
 0x521   : > { %7259 = vmatprep.subr.bf16.mxu1 %v10892_v24  ;;  %v10976_v42 = vld [vmem:[%s14210_s8 + $0x7cc] ss:$16 sps:$4 sm:$0xff]   ;;  %v10971_v24 = vld [vmem:[%s14210_s8 + $0x5c8] ss:$16 sps:$4 sm:$0xff]  }
 0x523   : > { %7219 = vmatpush2.bf16.msra.mxu0 %v10887_v9  ;;  %v10974_v9 = vld [vmem:[%s14210_s8 + $0x7c8] ss:$16 sps:$4 sm:$0xff]  }
 0x524   : > { %7260 = vmatpush2.bf16.msra.mxu1 %v10890_v39  ;;  %7220 = vmatprep.subr.bf16.mxu0 %v10895_v14  ;;  %v10979_v39 = vld [vmem:[%s14210_s8 + $0x5ac] ss:$16 sps:$4 sm:$0xff]  }
 0x525   : > { %7261 = vmatprep.subr.bf16.mxu1 %v10898_v30  ;;  %v10982_v14 = vld [vmem:[%s14210_s8 + $0x7ac] ss:$16 sps:$4 sm:$0xff]   ;;  %v10977_v30 = vld [vmem:[%s14210_s8 + $0x5a8] ss:$16 sps:$4 sm:$0xff]  }
 0x527   : > { %7221 = vmatpush2.bf16.msra.mxu0 %v10893_v61  ;;  %v10980_v61 = vld [vmem:[%s14210_s8 + $0x7a8] ss:$16 sps:$4 sm:$0xff]  }
 0x528   : > { %7262 = vmatpush2.bf16.msra.mxu1 %v10896_v57  ;;  %7222 = vmatprep.subr.bf16.mxu0 %v10901_v53  ;;  %v10985_v57 = vld [vmem:[%s14210_s8 + $0x58c] ss:$16 sps:$4 sm:$0xff]  }
 0x529   : > { %7263 = vmatprep.subr.bf16.mxu1 %v10904_v10  ;;  %v10988_v53 = vld [vmem:[%s14210_s8 + $0x78c] ss:$16 sps:$4 sm:$0xff]   ;;  %v10983_v10 = vld [vmem:[%s14210_s8 + $0x588] ss:$16 sps:$4 sm:$0xff]  }
 0x52b   : > { %7223 = vmatpush2.bf16.msra.mxu0 %v10899_v58  ;;  %v10986_v58 = vld [vmem:[%s14210_s8 + $0x788] ss:$16 sps:$4 sm:$0xff]  }
 0x52c   : > { %7264 = vmatpush2.bf16.msra.mxu1 %v10902_v60  ;;  %7224 = vmatprep.subr.bf16.mxu0 %v10907_v8  ;;  %v10991_v60 = vld [vmem:[%s14210_s8 + $0x56c] ss:$16 sps:$4 sm:$0xff]  }
 0x52d   : > { %7265 = vmatprep.subr.bf16.mxu1 %v10910_v55  ;;  %v10994_v8 = vld [vmem:[%s14210_s8 + $0x76c] ss:$16 sps:$4 sm:$0xff]   ;;  %v10989_v55 = vld [vmem:[%s14210_s8 + $0x568] ss:$16 sps:$4 sm:$0xff]  }
 0x52f   : > { %7225 = vmatpush2.bf16.msra.mxu0 %v10905_v51  ;;  %v10992_v51 = vld [vmem:[%s14210_s8 + $0x768] ss:$16 sps:$4 sm:$0xff]  }
 0x530   : > { %7266 = vmatpush2.bf16.msra.mxu1 %v10908_v50  ;;  %7226 = vmatprep.subr.bf16.mxu0 %v10913_v44  ;;  %v10997_v50 = vld [vmem:[%s14210_s8 + $0x54c] ss:$16 sps:$4 sm:$0xff]  }
 0x531   : > { %7267 = vmatprep.subr.bf16.mxu1 %v10916_v16  ;;  %v11000_v44 = vld [vmem:[%s14210_s8 + $0x74c] ss:$16 sps:$4 sm:$0xff]   ;;  %v10995_v16 = vld [vmem:[%s14210_s8 + $0x548] ss:$16 sps:$4 sm:$0xff]  }
 0x533   : > { %7227 = vmatpush2.bf16.msra.mxu0 %v10911_v52  ;;  %v10998_v52 = vld [vmem:[%s14210_s8 + $0x748] ss:$16 sps:$4 sm:$0xff]  }
 0x534   : > { %7268 = vmatpush2.bf16.msra.mxu1 %v10914_v5  ;;  %7278 = vmatprep.subr.bf16.mxu0 %v10919_v37  ;;  %v11003_v5 = vld [vmem:[%s14210_s8 + $0x52c] ss:$16 sps:$4 sm:$0xff]  }
 0x535   : > { %7319 = vmatprep.subr.bf16.mxu1 %v10922_v34  ;;  %v11006_v37 = vld [vmem:[%s14210_s8 + $0x72c] ss:$16 sps:$4 sm:$0xff]   ;;  %v11001_v34 = vld [vmem:[%s14210_s8 + $0x528] ss:$16 sps:$4 sm:$0xff]  }
 0x536   : > { %7229 = vmatmul.mubr.bf16.vlgmr.msra.gmra.mxu0 %v12879_v19  ;;  %v10932_v19 = vld [vmem:[%s14210_s8 + $0x6a8] ss:$16 sps:$4 sm:$0xff]  }
 0x537   : > { %7270 = vmatmul.mubr.bf16.vlgmr.msra.gmra.mxu1 %v12881_v7  ;;  %7279 = vmatpush1.bf16.msra.mxu0 %v10917_v59  ;;  %v10937_v7 = vld [vmem:[%s14210_s8 + $0x48c] ss:$16 sps:$4 sm:$0xff]   ;;  %v11004_v59 = vld [vmem:[%s14210_s8 + $0x728] ss:$16 sps:$4 sm:$0xff]  }
 0x538   : > { %7320 = vmatpush1.bf16.msra.mxu1 %v10920_v54  ;;  %7280 = vmatprep.subr.bf16.mxu0 %v10925_v43  ;;  %v11009_v54 = vld [vmem:[%s14210_s8 + $0x50c] ss:$16 sps:$4 sm:$0xff]  }
 0x539   : > { %7321 = vmatprep.subr.bf16.mxu1 %v10928_v27  ;;  %7310 = vmatprep.mubr.bf16.mxu0 %v13003_v62  ;;  %v10935_v62 = vld [vmem:[%s14210_s8 + $0x488] ss:$16 sps:$4 sm:$0xff]   ;;  %v11012_v43 = vld [vmem:[%s14210_s8 + $0x70c] ss:$16 sps:$4 sm:$0xff]  }
 0x53a   : > { %7351 = vmatprep.mubr.bf16.mxu1 %v13016_v23  ;;  %v10938_v23 = vld [vmem:[%s14210_s8 + $0x688] ss:$16 sps:$4 sm:$0xff]  }
 0x53b   : > { %7281 = vmatpush1.bf16.msra.mxu0 %v10923_v2  ;;  %v11007_v27 = vld [vmem:[%s14210_s8 + $0x508] ss:$16 sps:$4 sm:$0xff]  }
 0x53c   : > { %7322 = vmatpush1.bf16.msra.mxu1 %v10926_v18  ;;  %7282 = vmatprep.subr.bf16.mxu0 %v10931_v11  ;;  %v11010_v2 = vld [vmem:[%s14210_s8 + $0x708] ss:$16 sps:$4 sm:$0xff]   ;;  %v11015_v18 = vld [vmem:[%s14213_s11 + $0xe4] ss:$16 sps:$4 sm:$0xff]  }
 0x53d   : > { %7323 = vmatprep.subr.bf16.mxu1 %v10934_v13  ;;  %v7498_v11 = vld [vmem:[%s14214_s12 + $0x8] sm:$0xff]  ;;  %v11013_v13 = vld [vmem:[%s14213_s11 + $0xe0] ss:$16 sps:$4 sm:$0xff]  }
 0x53f   : > { %7283 = vmatpush1.bf16.msra.mxu0 %v10929_v63  ;;  %v11018_v63 = vld [vmem:[%s14213_s11 + $0xc4] ss:$16 sps:$4 sm:$0xff]  }
 0x540   : > { %7324 = vmatpush1.bf16.msra.mxu1 %v10932_v19  ;;  %7284 = vmatprep.subr.bf16.mxu0 %v10937_v7  ;;  %v7497_v19 = vld [vmem:[%s14214_s12] sm:$0xff] }
 0x541   : > { %7325 = vmatprep.subr.bf16.mxu1 %v10940_v47  ;;  %v11016_v7 = vld [vmem:[%s14213_s11 + $0xc0] ss:$16 sps:$4 sm:$0xff]  }
 0x543   : > { %7285 = vmatpush1.bf16.msra.mxu0 %v10935_v62 }
 0x544   : > { %7326 = vmatpush1.bf16.msra.mxu1 %v10938_v23  ;;  %7286 = vmatprep.subr.bf16.mxu0 %v10943_v36 }
 0x545   : > { %7327 = vmatprep.subr.bf16.mxu1 %v10946_v31  ;;  %v11021_v31 = vld [vmem:[%s14213_s11 + $0xa4] ss:$16 sps:$4 sm:$0xff]  }
 0x547   : > { %7287 = vmatpush1.bf16.msra.mxu0 %v10941_v48  ;;  %v11333_v48 = vmov 0.0  }
 0x548   : > { %7328 = vmatpush1.bf16.msra.mxu1 %v10944_v41  ;;  %7288 = vmatprep.subr.bf16.mxu0 %v10949_v38  ;;  %v11019_v41 = vld [vmem:[%s14213_s11 + $0xa0] ss:$16 sps:$4 sm:$0xff]  }
 0x549   : > { %7329 = vmatprep.subr.bf16.mxu1 %v10952_v28 }
 0x54b   : > { %7289 = vmatpush1.bf16.msra.mxu0 %v10947_v46 }
 0x54c   : > { %7330 = vmatpush1.bf16.msra.mxu1 %v10950_v26  ;;  %7290 = vmatprep.subr.bf16.mxu0 %v10955_v3  ;;  %v11024_v26 = vld [vmem:[%s14213_s11 + $0x84] ss:$16 sps:$4 sm:$0xff]   ;;  %v7500_v3 = vld [vmem:[%s14214_s12 + $0x18] sm:$0xff] }
 0x54d   : > { %7331 = vmatprep.subr.bf16.mxu1 %v10958_v6  ;;  %v11022_v6 = vld [vmem:[%s14213_s11 + $0x80] ss:$16 sps:$4 sm:$0xff]  }
 0x54f   : > { %7291 = vmatpush1.bf16.msra.mxu0 %v10953_v12  ;;  %v7499_v12 = vld [vmem:[%s14214_s12 + $0x10] sm:$0xff] }
 0x550   : > { %7332 = vmatpush1.bf16.msra.mxu1 %v10956_v32  ;;  %7292 = vmatprep.subr.bf16.mxu0 %v10961_v22  ;;  %v11027_v32 = vld [vmem:[%s14213_s11 + $0x64] ss:$16 sps:$4 sm:$0xff]   ;;  %v11109_v22 = vld [vmem:[%s14213_s11 + $0x2e0] ss:$16 sps:$4 sm:$0xff]  }
 0x551   : > { %7333 = vmatprep.subr.bf16.mxu1 %v10964_v29  ;;  %v11111_v29 = vld [vmem:[%s14213_s11 + $0x2e4] ss:$16 sps:$4 sm:$0xff]  }
 0x553   : > { %7293 = vmatpush1.bf16.msra.mxu0 %v10959_v40  ;;  %v11114_v40 = vld [vmem:[%s14213_s11 + $0x2c4] ss:$16 sps:$4 sm:$0xff]  }
 0x554   : > { %7334 = vmatpush1.bf16.msra.mxu1 %v10962_v17  ;;  %7294 = vmatprep.subr.bf16.mxu0 %v10967_v25  ;;  %v11025_v17 = vld [vmem:[%s14213_s11 + $0x60] ss:$16 sps:$4 sm:$0xff]  }
 0x555   : > { %7335 = vmatprep.subr.bf16.mxu1 %v10970_v21  ;;  %v11112_v25 = vld [vmem:[%s14213_s11 + $0x2c0] ss:$16 sps:$4 sm:$0xff]   ;;  %v11030_v21 = vld [vmem:[%s14213_s11 + $0x44] ss:$16 sps:$4 sm:$0xff]  }
 0x557   : > { %7295 = vmatpush2.bf16.msra.mxu0 %v10965_v49  ;;  %v11117_v49 = vld [vmem:[%s14213_s11 + $0x2a4] ss:$16 sps:$4 sm:$0xff]  }
 0x558   : > { %7336 = vmatpush2.bf16.msra.mxu1 %v10968_v4  ;;  %7296 = vmatprep.subr.bf16.mxu0 %v10973_v1  ;;  %v11028_v4 = vld [vmem:[%s14213_s11 + $0x40] ss:$16 sps:$4 sm:$0xff]  }
 0x559   : > { %7337 = vmatprep.subr.bf16.mxu1 %v10976_v42  ;;  %v11115_v1 = vld [vmem:[%s14213_s11 + $0x2a0] ss:$16 sps:$4 sm:$0xff]   ;;  %v11033_v42 = vld [vmem:[%s14213_s11 + $0x24] ss:$16 sps:$4 sm:$0xff]  }
 0x55b   : > { %7297 = vmatpush2.bf16.msra.mxu0 %v10971_v24  ;;  %v11120_v24 = vld [vmem:[%s14213_s11 + $0x284] ss:$16 sps:$4 sm:$0xff]  }
 0x55c   : > { %7338 = vmatpush2.bf16.msra.mxu1 %v10974_v9  ;;  %7298 = vmatprep.subr.bf16.mxu0 %v10979_v39  ;;  %v11031_v9 = vld [vmem:[%s14213_s11 + $0x20] ss:$16 sps:$4 sm:$0xff]  }
 0x55d   : > { %7339 = vmatprep.subr.bf16.mxu1 %v10982_v14  ;;  %v11118_v39 = vld [vmem:[%s14213_s11 + $0x280] ss:$16 sps:$4 sm:$0xff]   ;;  %v11036_v14 = vld [vmem:[%s14213_s11 + $0x4] ss:$16 sps:$4 sm:$0xff]  }
 0x55f   : > { %7299 = vmatpush2.bf16.msra.mxu0 %v10977_v30  ;;  %v11123_v30 = vld [vmem:[%s14213_s11 + $0x264] ss:$16 sps:$4 sm:$0xff]  }
 0x560   : > { %7340 = vmatpush2.bf16.msra.mxu1 %v10980_v61  ;;  %7300 = vmatprep.subr.bf16.mxu0 %v10985_v57  ;;  %v11034_v61 = vld [vmem:[%s14213_s11] ss:$16 sps:$4 sm:$0xff]  }
 0x561   : > { %7341 = vmatprep.subr.bf16.mxu1 %v10988_v53  ;;  %v11121_v57 = vld [vmem:[%s14213_s11 + $0x260] ss:$16 sps:$4 sm:$0xff]   ;;  %v11039_v53 = vld [vmem:[%s14213_s11 + $0x1e4] ss:$16 sps:$4 sm:$0xff]  }
 0x563   : > { %7301 = vmatpush2.bf16.msra.mxu0 %v10983_v10  ;;  %v11126_v10 = vld [vmem:[%s14213_s11 + $0x244] ss:$16 sps:$4 sm:$0xff]  }
 0x564   : > { %7342 = vmatpush2.bf16.msra.mxu1 %v10986_v58  ;;  %7302 = vmatprep.subr.bf16.mxu0 %v10991_v60  ;;  %v11037_v58 = vld [vmem:[%s14213_s11 + $0x1e0] ss:$16 sps:$4 sm:$0xff]  }
 0x565   : > { %7343 = vmatprep.subr.bf16.mxu1 %v10994_v8  ;;  %v11124_v60 = vld [vmem:[%s14213_s11 + $0x240] ss:$16 sps:$4 sm:$0xff]   ;;  %v11042_v8 = vld [vmem:[%s14213_s11 + $0x1c4] ss:$16 sps:$4 sm:$0xff]  }
 0x567   : > { %7303 = vmatpush2.bf16.msra.mxu0 %v10989_v55  ;;  %v11129_v55 = vld [vmem:[%s14213_s11 + $0x224] ss:$16 sps:$4 sm:$0xff]  }
 0x568   : > { %7344 = vmatpush2.bf16.msra.mxu1 %v10992_v51  ;;  %7304 = vmatprep.subr.bf16.mxu0 %v10997_v50  ;;  %v11040_v51 = vld [vmem:[%s14213_s11 + $0x1c0] ss:$16 sps:$4 sm:$0xff]  }
 0x569   : > { %7345 = vmatprep.subr.bf16.mxu1 %v11000_v44  ;;  %v11127_v50 = vld [vmem:[%s14213_s11 + $0x220] ss:$16 sps:$4 sm:$0xff]   ;;  %v11045_v44 = vld [vmem:[%s14213_s11 + $0x1a4] ss:$16 sps:$4 sm:$0xff]  }
 0x56b   : > { %7305 = vmatpush2.bf16.msra.mxu0 %v10995_v16  ;;  %v11132_v16 = vld [vmem:[%s14213_s11 + $0x204] ss:$16 sps:$4 sm:$0xff]  }
 0x56c   : > { %7346 = vmatpush2.bf16.msra.mxu1 %v10998_v52  ;;  %7306 = vmatprep.subr.bf16.mxu0 %v11003_v5  ;;  %v11043_v52 = vld [vmem:[%s14213_s11 + $0x1a0] ss:$16 sps:$4 sm:$0xff]  }
 0x56d   : > { %7347 = vmatprep.subr.bf16.mxu1 %v11006_v37  ;;  %v11130_v5 = vld [vmem:[%s14213_s11 + $0x200] ss:$16 sps:$4 sm:$0xff]   ;;  %v11048_v37 = vld [vmem:[%s14213_s11 + $0x184] ss:$16 sps:$4 sm:$0xff]  }
 0x56f   : > { %7307 = vmatpush2.bf16.msra.mxu0 %v11001_v34  ;;  %v11135_v34 = vld [vmem:[%s14213_s11 + $0x3e4] ss:$16 sps:$4 sm:$0xff]  }
 0x570   : > { %7348 = vmatpush2.bf16.msra.mxu1 %v11004_v59  ;;  %7308 = vmatprep.subr.bf16.mxu0 %v11009_v54  ;;  %v11046_v59 = vld [vmem:[%s14213_s11 + $0x180] ss:$16 sps:$4 sm:$0xff]  }
 0x571   : > { %7349 = vmatprep.subr.bf16.mxu1 %v11012_v43  ;;  %v11133_v54 = vld [vmem:[%s14213_s11 + $0x3e0] ss:$16 sps:$4 sm:$0xff]   ;;  %v11051_v43 = vld [vmem:[%s14213_s11 + $0x164] ss:$16 sps:$4 sm:$0xff]  }
 0x573   : > { %7309 = vmatpush2.bf16.msra.mxu0 %v11007_v27  ;;  %v11138_v27 = vld [vmem:[%s14213_s11 + $0x3c4] ss:$16 sps:$4 sm:$0xff]  }
 0x574   : > { %7350 = vmatpush2.bf16.msra.mxu1 %v11010_v2  ;;  %8287 = vmatprep.subr.bf16.mxu0 %v11015_v18  ;;  %v11049_v2 = vld [vmem:[%s14213_s11 + $0x160] ss:$16 sps:$4 sm:$0xff]  }
 0x575   : > { %7535 = vmatprep.subr.mxu1 %v7498_v11  ;;  %v11136_v18 = vld [vmem:[%s14213_s11 + $0x3c0] ss:$16 sps:$4 sm:$0xff]   ;;  %v11054_v11 = vld [vmem:[%s14213_s11 + $0x144] ss:$16 sps:$4 sm:$0xff]  }
 0x576   : > { %v13516_v47 = vpop.f32.mrf.mxu0  ;;  %7311 = vmatmul.mubr.bf16.vlgmr.msra.gmra.mxu0 %v13106_v45  ;;  %v7496_v45 = vld [vmem:[%s14212_s10] sm:$0x3] }
 0x577   : > { %v13518_v62 = vpop.f32.mrf.mxu1  ;;  %7352 = vmatmul.mubr.bf16.vlgmr.msra.gmra.mxu1 %v13110_v33  ;;  %8288 = vmatpush1.bf16.msra.mxu0 %v11013_v13  ;;  %v11141_v13 = vld [vmem:[%s14213_s11 + $0x3a4] ss:$16 sps:$4 sm:$0xff]  }
 0x578   : > { %7536 = vmatpush1.msra.mxu1 %v7497_v19  ;;  %v13522_v23 = vpop.f32.mrf.mxu0  ;;  %8289 = vmatprep.subr.bf16.mxu0 %v11018_v63  ;;  %v11052_v63 = vld [vmem:[%s14213_s11 + $0x140] ss:$16 sps:$4 sm:$0xff]  }
 0x579   : > { %v13524_v36 = vpop.f32.mrf.mxu1  ;;  %7569 = vmatprep.mubr.f32.mxu1 %v11333_v48  ;;  %7606 = vmatprep.subr.mxu1 %v7500_v3  ;;  %v11139_v19 = vld [vmem:[%s14213_s11 + $0x3a0] ss:$16 sps:$4 sm:$0xff]  }
 0x57a   : > { %v7070_v33 = vpop.f32.mrf.mxu0  ;;  %v11145_v3 = vld [vmem:[%s14213_s11 + $0x360] ss:$16 sps:$4 sm:$0xff]  }
 0x57b   : > { %v7111_v38 = vpop.f32.mrf.mxu1  ;;  %8290 = vmatpush1.bf16.msra.mxu0 %v11016_v7  ;;  %v11057_v7 = vld [vmem:[%s14213_s11 + $0x124] ss:$16 sps:$4 sm:$0xff]  }
 0x57c   : > { %v7071_v28 = vpop.f32.mrf.mxu0  ;;  %8291 = vmatprep.subr.bf16.mxu0 %v11021_v31  ;;  %v11144_v31 = vld [vmem:[%s14213_s11 + $0x384] ss:$16 sps:$4 sm:$0xff]  }
 0x57d   : > { %v7112_v46 = vpop.f32.mrf.mxu1  ;;  %v11060_v33 = vld [vmem:[%s14213_s11 + $0x104] ss:$16 sps:$4 sm:$0xff]  }
 0x57e   : > { %v11147_v38 = vld [vmem:[%s14213_s11 + $0x364] ss:$16 sps:$4 sm:$0xff]  }
 0x57f   : > { %9962 = vmatmul.mubr.msk.f32.vlgmr.msra.gmra.mxu1 %vm7501_vm5, %v7496_v45  ;;  %8292 = vmatpush1.bf16.msra.mxu0 %v11019_v41  ;;  %v11055_v41 = vld [vmem:[%s14213_s11 + $0x120] ss:$16 sps:$4 sm:$0xff]  }
 0x580   : > { %7607 = vmatpush1.msra.mxu1 %v7499_v12  ;;  %8293 = vmatprep.subr.bf16.mxu0 %v11024_v26  ;;  %v11058_v26 = vld [vmem:[%s14213_s11 + $0x100] ss:$16 sps:$4 sm:$0xff]   ;;  %v11150_v12 = vld [vmem:[%s14213_s11 + $0x344] ss:$16 sps:$4 sm:$0xff]  }
 0x581   : > { %7640 = vmatprep.mubr.f32.mxu1 %v11333_v48  ;;  %8328 = vmatprep.subr.bf16.mxu1 %v11111_v29  ;;  %v13684_v48 = vld [vmem:[%s14211_s9] sm:$0xf] }
 0x582   : > { %v5735_v28 = vrot.slane %v13684_v48, %v12780_v35  ;;  %v5739_v46 = vrot.slane %v13684_v48, %v12786_v20  ;;  %v11148_v29 = vld [vmem:[%s14213_s11 + $0x340] ss:$16 sps:$4 sm:$0xff]  }
 0x583   : > { %9963 = vmatmul.mubr.msk.f32.vlgmr.msra.gmra.mxu1 %vm7501_vm5, %v7496_v45  ;;  %8294 = vmatpush1.bf16.msra.mxu0 %v11022_v6  ;;  %v11142_v45 = vld [vmem:[%s14213_s11 + $0x380] ss:$16 sps:$4 sm:$0xff]   ;;  %v11063_v6 = vld [vmem:[%s14213_s11 + $0xec] ss:$16 sps:$4 sm:$0xff]  }
 0x584   : > { %8329 = vmatpush1.bf16.msra.mxu1 %v11109_v22  ;;  %8295 = vmatprep.subr.bf16.mxu0 %v11027_v32  ;;  %v7067_v32 = vadd.f32 %v13516_v47, %v5735_v28  ;;  %v7069_v22 = vadd.f32 %v13522_v23, %v5739_v46  ;;  %v11153_v23 = vld [vmem:[%s14213_s11 + $0x324] ss:$16 sps:$4 sm:$0xff]   ;;  %v11100_v28 = vld [vmem:[%s14213_s11 + $0x148] ss:$16 sps:$4 sm:$0xff]   ;;  %v11105_v46 = vld [vmem:[%s14213_s11 + $0x12c] ss:$16 sps:$4 sm:$0xff]  }
 0x585   : > { %8330 = vmatprep.subr.bf16.mxu1 %v11114_v40 }
 0x586   : > { %v7108_v40 = vadd.f32 %v13518_v62, %v7067_v32 }
 0x587   : > { %8296 = vmatpush1.bf16.msra.mxu0 %v11025_v17 }
 0x588   : > { %8331 = vmatpush1.bf16.msra.mxu1 %v11112_v25  ;;  %8297 = vmatprep.subr.bf16.mxu0 %v11030_v21  ;;  %v7110_v21 = vadd.f32 %v13524_v36, %v7069_v22  ;;  %v11108_v22 = vld [vmem:[%s14213_s11 + $0x10c] ss:$16 sps:$4 sm:$0xff]  }
 0x589   : > { %8332 = vmatprep.subr.bf16.mxu1 %v11117_v49 }
 0x58b   : > { %8298 = vmatpush1.bf16.msra.mxu0 %v11028_v4 }
 0x58c   : > { %8333 = vmatpush1.bf16.msra.mxu1 %v11115_v1  ;;  %8299 = vmatprep.subr.bf16.mxu0 %v11033_v42 }
 0x58d   : > { %8334 = vmatprep.subr.bf16.mxu1 %v11120_v24  ;;  %v11151_v24 = vld [vmem:[%s14213_s11 + $0x320] ss:$16 sps:$4 sm:$0xff]  }
 0x58f   : > { %8300 = vmatpush1.bf16.msra.mxu0 %v11031_v9 }
 0x590   : > { %8335 = vmatpush1.bf16.msra.mxu1 %v11118_v39  ;;  %8301 = vmatprep.subr.bf16.mxu0 %v11036_v14 }
 0x591   : > { %8336 = vmatprep.subr.bf16.mxu1 %v11123_v30 }
 0x593   : > { %8302 = vmatpush1.bf16.msra.mxu0 %v11034_v61  ;;  %v11156_v61 = vld [vmem:[%s14213_s11 + $0x304] ss:$16 sps:$4 sm:$0xff]  }
 0x594   : > { %8337 = vmatpush1.bf16.msra.mxu1 %v11121_v57  ;;  %8303 = vmatprep.subr.bf16.mxu0 %v11039_v53  ;;  %v11154_v53 = vld [vmem:[%s14213_s11 + $0x300] ss:$16 sps:$4 sm:$0xff]  }
 0x595   : > { %8338 = vmatprep.subr.bf16.mxu1 %v11126_v10 }
 0x597   : > { %8304 = vmatpush2.bf16.msra.mxu0 %v11037_v58  ;;  %v11061_v58 = vld [vmem:[%s14213_s11 + $0xe8] ss:$16 sps:$4 sm:$0xff]  }
 0x598   : > { %8339 = vmatpush1.bf16.msra.mxu1 %v11124_v60  ;;  %8305 = vmatprep.subr.bf16.mxu0 %v11042_v8  ;;  %v11066_v8 = vld [vmem:[%s14213_s11 + $0xcc] ss:$16 sps:$4 sm:$0xff]  }
 0x599   : > { %8340 = vmatprep.subr.bf16.mxu1 %v11129_v55  ;;  %v11159_v55 = vld [vmem:[%s14213_s11 + $0x2ec] ss:$16 sps:$4 sm:$0xff]  }
 0x59b   : > { %8306 = vmatpush2.bf16.msra.mxu0 %v11040_v51  ;;  %v11064_v51 = vld [vmem:[%s14213_s11 + $0xc8] ss:$16 sps:$4 sm:$0xff]  }
 0x59c   : > { %8341 = vmatpush1.bf16.msra.mxu1 %v11127_v50  ;;  %8307 = vmatprep.subr.bf16.mxu0 %v11045_v44  ;;  %v11069_v50 = vld [vmem:[%s14213_s11 + $0xac] ss:$16 sps:$4 sm:$0xff]   ;;  %v11067_v44 = vld [vmem:[%s14213_s11 + $0xa8] ss:$16 sps:$4 sm:$0xff]  }
 0x59d   : > { %8342 = vmatprep.subr.bf16.mxu1 %v11132_v16  ;;  %v11072_v16 = vld [vmem:[%s14213_s11 + $0x8c] ss:$16 sps:$4 sm:$0xff]  }
 0x59f   : > { %8308 = vmatpush2.bf16.msra.mxu0 %v11043_v52  ;;  %v11070_v52 = vld [vmem:[%s14213_s11 + $0x88] ss:$16 sps:$4 sm:$0xff]  }
 0x5a0   : > { %8343 = vmatpush1.bf16.msra.mxu1 %v11130_v5  ;;  %8309 = vmatprep.subr.bf16.mxu0 %v11048_v37  ;;  %v11075_v5 = vld [vmem:[%s14213_s11 + $0x6c] ss:$16 sps:$4 sm:$0xff]   ;;  %v11073_v37 = vld [vmem:[%s14213_s11 + $0x68] ss:$16 sps:$4 sm:$0xff]  }
 0x5a1   : > { %8344 = vmatprep.subr.bf16.mxu1 %v11135_v34  ;;  %v11078_v34 = vld [vmem:[%s14213_s11 + $0x4c] ss:$16 sps:$4 sm:$0xff]  }
 0x5a3   : > { %8310 = vmatpush2.bf16.msra.mxu0 %v11046_v59  ;;  %v11076_v59 = vld [vmem:[%s14213_s11 + $0x48] ss:$16 sps:$4 sm:$0xff]  }
 0x5a4   : > { %8345 = vmatpush2.bf16.msra.mxu1 %v11133_v54  ;;  %8311 = vmatprep.subr.bf16.mxu0 %v11051_v43  ;;  %v11081_v54 = vld [vmem:[%s14213_s11 + $0x2c] ss:$16 sps:$4 sm:$0xff]   ;;  %v11079_v43 = vld [vmem:[%s14213_s11 + $0x28] ss:$16 sps:$4 sm:$0xff]  }
 0x5a5   : > { %8346 = vmatprep.subr.bf16.mxu1 %v11138_v27  ;;  %v11084_v27 = vld [vmem:[%s14213_s11 + $0xc] ss:$16 sps:$4 sm:$0xff]  }
 0x5a7   : > { %8312 = vmatpush2.bf16.msra.mxu0 %v11049_v2  ;;  %v11082_v2 = vld [vmem:[%s14213_s11 + $0x8] ss:$16 sps:$4 sm:$0xff]  }
 0x5a8   : > { %8347 = vmatpush2.bf16.msra.mxu1 %v11136_v18  ;;  %8313 = vmatprep.subr.bf16.mxu0 %v11054_v11  ;;  %v11087_v18 = vld [vmem:[%s14213_s11 + $0x1ec] ss:$16 sps:$4 sm:$0xff]   ;;  %v11085_v11 = vld [vmem:[%s14213_s11 + $0x1e8] ss:$16 sps:$4 sm:$0xff]  }
 0x5a9   : > { %8348 = vmatprep.subr.bf16.mxu1 %v11141_v13  ;;  %v11090_v13 = vld [vmem:[%s14213_s11 + $0x1cc] ss:$16 sps:$4 sm:$0xff]  }
 0x5ab   : > { %8314 = vmatpush2.bf16.msra.mxu0 %v11052_v63  ;;  %v11088_v63 = vld [vmem:[%s14213_s11 + $0x1c8] ss:$16 sps:$4 sm:$0xff]  }
 0x5ac   : > { %8349 = vmatpush2.bf16.msra.mxu1 %v11139_v19  ;;  %8315 = vmatprep.subr.bf16.mxu0 %v11057_v7  ;;  %v11093_v19 = vld [vmem:[%s14213_s11 + $0x1ac] ss:$16 sps:$4 sm:$0xff]   ;;  %v11091_v7 = vld [vmem:[%s14213_s11 + $0x1a8] ss:$16 sps:$4 sm:$0xff]  }
 0x5ad   : > { %8350 = vmatprep.subr.bf16.mxu1 %v11144_v31  ;;  %v11096_v31 = vld [vmem:[%s14213_s11 + $0x18c] ss:$16 sps:$4 sm:$0xff]  }
 0x5af   : > { %8316 = vmatpush2.bf16.msra.mxu0 %v11055_v41  ;;  %v11094_v41 = vld [vmem:[%s14213_s11 + $0x188] ss:$16 sps:$4 sm:$0xff]  }
 0x5b0   : > { %8351 = vmatpush2.bf16.msra.mxu1 %v11142_v45  ;;  %8317 = vmatprep.subr.bf16.mxu0 %v11060_v33  ;;  %v11099_v45 = vld [vmem:[%s14213_s11 + $0x16c] ss:$16 sps:$4 sm:$0xff]   ;;  %v11097_v33 = vld [vmem:[%s14213_s11 + $0x168] ss:$16 sps:$4 sm:$0xff]  }
 0x5b1   : > { %8352 = vmatprep.subr.bf16.mxu1 %v11147_v38  ;;  %v11102_v38 = vld [vmem:[%s14213_s11 + $0x14c] ss:$16 sps:$4 sm:$0xff]  }
 0x5b3   : > { %8318 = vmatpush2.bf16.msra.mxu0 %v11058_v26 }
 0x5b4   : > { %8353 = vmatpush2.bf16.msra.mxu1 %v11145_v3  ;;  %8369 = vmatprep.subr.bf16.mxu0 %v11063_v6  ;;  %v11103_v6 = vld [vmem:[%s14213_s11 + $0x128] ss:$16 sps:$4 sm:$0xff]  }
 0x5b5   : > { %8354 = vmatprep.subr.bf16.mxu1 %v11150_v12 }
 0x5b6   : > { %v7148_v17 = vpop.f32.mrf.mxu0 }
 0x5b7   : > { %v7189_v25 = vpop.f32.mrf.mxu1  ;;  %v7149_v49 = vadd.f32 %v7148_v17, %v7108_v40  ;;  %v11106_v17 = vld [vmem:[%s14213_s11 + $0x108] ss:$16 sps:$4 sm:$0xff]  }
 0x5b8   : > { %8355 = vmatpush2.bf16.msra.mxu1 %v11148_v29  ;;  %v7150_v4 = vpop.f32.mrf.mxu0 }
 0x5b9   : > { %v7191_v47 = vpop.f32.mrf.mxu1  ;;  %v7190_v1 = vadd.f32 %v7189_v25, %v7149_v49  ;;  %v7151_v42 = vadd.f32 %v7150_v4, %v7110_v21  ;;  %8356 = vmatprep.subr.bf16.mxu1 %v11153_v23  ;;  %v5743_v49 = vrot.slane %v13684_v48, %v12789_v15  ;;  %v5747_v4 = vrot.slane %v13684_v48, %v12795_v56  ;;  %v11157_v48 = vld [vmem:[%s14213_s11 + $0x2e8] ss:$16 sps:$4 sm:$0xff]  }
 0x5ba   : > { %v7152_v9 = vpop.f32.mrf.mxu0 }
 0x5bb   : > { %v7193_v62 = vpop.f32.mrf.mxu1  ;;  %v7192_v39 = vadd.f32 %v7191_v47, %v7151_v42  ;;  %v7360_v36 = vmax.f32 %v7190_v1, 0.0 }
 0x5bc   : > { %8357 = vmatpush2.bf16.msra.mxu1 %v11151_v24  ;;  %v7153_v14 = vpop.f32.mrf.mxu0 }
 0x5bd   : > { %v7194_v30 = vpop.f32.mrf.mxu1  ;;  %v7361_v57 = vmax.f32 %v7192_v39, 0.0  ;;  %8358 = vmatprep.subr.bf16.mxu1 %v11156_v61  ;;  %v13736_v60 = vpack.c.bf16 %v7360_v36, %v7360_v36 }
 0x5bf   : > { %v7365_v10 = vpack.c.bf16 %v7361_v57, %v7361_v57 }
 0x5c0   : > { %8359 = vmatpush2.bf16.msra.mxu1 %v11154_v53 }
 0x5c1   : > { %8319 = vmatprep.mubr.bf16.mxu0 %v7365_v10  ;;  %8410 = vmatprep.subr.bf16.mxu1 %v11159_v55 }
 0x5c2   : > { %8320 = vmatmul.mubr.bf16.vlgmr.msra.gmra.mxu0 %v13736_v60 }
 0x5c3   : > { %8370 = vmatpush1.bf16.msra.mxu0 %v11061_v58  ;;  %8401 = vmatprep.mubr.bf16.mxu0 %v7365_v10 }
 0x5c4   : > { %8371 = vmatprep.subr.bf16.mxu0 %v11066_v8 }
 0x5c7   : > { %8372 = vmatpush1.bf16.msra.mxu0 %v11064_v51 }
 0x5c8   : > { %8373 = vmatprep.subr.bf16.mxu0 %v11069_v50  ;;  %v11162_v50 = vld [vmem:[%s14213_s11 + $0x2cc] ss:$16 sps:$4 sm:$0xff]  }
 0x5cb   : > { %8374 = vmatpush1.bf16.msra.mxu0 %v11067_v44  ;;  %v11160_v44 = vld [vmem:[%s14213_s11 + $0x2c8] ss:$16 sps:$4 sm:$0xff]  }
 0x5cc   : > { %8375 = vmatprep.subr.bf16.mxu0 %v11072_v16  ;;  %v11165_v16 = vld [vmem:[%s14213_s11 + $0x2ac] ss:$16 sps:$4 sm:$0xff]  }
 0x5cf   : > { %8376 = vmatpush1.bf16.msra.mxu0 %v11070_v52  ;;  %v11163_v52 = vld [vmem:[%s14213_s11 + $0x2a8] ss:$16 sps:$4 sm:$0xff]  }
 0x5d0   : > { %8377 = vmatprep.subr.bf16.mxu0 %v11075_v5  ;;  %v11168_v5 = vld [vmem:[%s14213_s11 + $0x28c] ss:$16 sps:$4 sm:$0xff]  }
 0x5d3   : > { %8378 = vmatpush1.bf16.msra.mxu0 %v11073_v37  ;;  %v11205_v37 = vld [vmem:[%s14216_s14 + $0x70] ss:$8 sps:$4 sm:$0xff]  }
 0x5d4   : > { %8379 = vmatprep.subr.bf16.mxu0 %v11078_v34  ;;  %v11207_v34 = vld [vmem:[%s14216_s14 + $0x74] ss:$8 sps:$4 sm:$0xff]  }
 0x5d7   : > { %8380 = vmatpush1.bf16.msra.mxu0 %v11076_v59  ;;  %v11210_v59 = vld [vmem:[%s14216_s14 + $0x64] ss:$8 sps:$4 sm:$0xff]  }
 0x5d8   : > { %8381 = vmatprep.subr.bf16.mxu0 %v11081_v54  ;;  %v11166_v54 = vld [vmem:[%s14213_s11 + $0x288] ss:$16 sps:$4 sm:$0xff]  }
 0x5db   : > { %8382 = vmatpush1.bf16.msra.mxu0 %v11079_v43  ;;  %v11208_v43 = vld [vmem:[%s14216_s14 + $0x60] ss:$8 sps:$4 sm:$0xff]  }
 0x5dc   : > { %8383 = vmatprep.subr.bf16.mxu0 %v11084_v27  ;;  %v11171_v27 = vld [vmem:[%s14213_s11 + $0x26c] ss:$16 sps:$4 sm:$0xff]  }
 0x5df   : > { %8384 = vmatpush1.bf16.msra.mxu0 %v11082_v2  ;;  %v11213_v2 = vld [vmem:[%s14216_s14 + $0x54] ss:$8 sps:$4 sm:$0xff]  }
 0x5e0   : > { %8385 = vmatprep.subr.bf16.mxu0 %v11087_v18  ;;  %v11169_v18 = vld [vmem:[%s14213_s11 + $0x268] ss:$16 sps:$4 sm:$0xff]  }
 0x5e3   : > { %8386 = vmatpush2.bf16.msra.mxu0 %v11085_v11  ;;  %v11211_v11 = vld [vmem:[%s14216_s14 + $0x50] ss:$8 sps:$4 sm:$0xff]  }
 0x5e4   : > { %8387 = vmatprep.subr.bf16.mxu0 %v11090_v13  ;;  %v11174_v13 = vld [vmem:[%s14213_s11 + $0x24c] ss:$16 sps:$4 sm:$0xff]  }
 0x5e7   : > { %8388 = vmatpush2.bf16.msra.mxu0 %v11088_v63  ;;  %v11216_v63 = vld [vmem:[%s14216_s14 + $0x44] ss:$8 sps:$4 sm:$0xff]  }
 0x5e8   : > { %8389 = vmatprep.subr.bf16.mxu0 %v11093_v19  ;;  %v11172_v19 = vld [vmem:[%s14213_s11 + $0x248] ss:$16 sps:$4 sm:$0xff]  }
 0x5eb   : > { %8390 = vmatpush2.bf16.msra.mxu0 %v11091_v7  ;;  %v11214_v7 = vld [vmem:[%s14216_s14 + $0x40] ss:$8 sps:$4 sm:$0xff]  }
 0x5ec   : > { %8391 = vmatprep.subr.bf16.mxu0 %v11096_v31  ;;  %v11177_v31 = vld [vmem:[%s14213_s11 + $0x22c] ss:$16 sps:$4 sm:$0xff]  }
 0x5ef   : > { %8392 = vmatpush2.bf16.msra.mxu0 %v11094_v41  ;;  %v11219_v41 = vld [vmem:[%s14216_s14 + $0x34] ss:$8 sps:$4 sm:$0xff]  }
 0x5f0   : > { %8393 = vmatprep.subr.bf16.mxu0 %v11099_v45  ;;  %v11175_v45 = vld [vmem:[%s14213_s11 + $0x228] ss:$16 sps:$4 sm:$0xff]  }
 0x5f3   : > { %8394 = vmatpush2.bf16.msra.mxu0 %v11097_v33  ;;  %v11217_v33 = vld [vmem:[%s14216_s14 + $0x30] ss:$8 sps:$4 sm:$0xff]  }
 0x5f4   : > { %8395 = vmatprep.subr.bf16.mxu0 %v11102_v38  ;;  %v11180_v38 = vld [vmem:[%s14213_s11 + $0x20c] ss:$16 sps:$4 sm:$0xff]  }
 0x5f6   : > { %v7230_v26 = vpop.f32.mrf.mxu0 }
 0x5f7   : > { %v7271_v3 = vpop.f32.mrf.mxu1  ;;  %8396 = vmatpush2.bf16.msra.mxu0 %v11100_v28  ;;  %v7231_v47 = vadd.f32 %v7230_v26, %v5743_v49  ;;  %v11222_v28 = vld [vmem:[%s14216_s14 + $0x24] ss:$8 sps:$4 sm:$0xff]   ;;  %v11220_v26 = vld [vmem:[%s14216_s14 + $0x20] ss:$8 sps:$4 sm:$0xff]  }
 0x5f8   : > { %v7232_v12 = vpop.f32.mrf.mxu0  ;;  %8397 = vmatprep.subr.bf16.mxu0 %v11105_v46  ;;  %v11178_v46 = vld [vmem:[%s14213_s11 + $0x208] ss:$16 sps:$4 sm:$0xff]  }
 0x5f9   : > { %v7273_v32 = vpop.f32.mrf.mxu1  ;;  %v7233_v23 = vadd.f32 %v7232_v12, %v5747_v4  ;;  %v7272_v1 = vadd.f32 %v7271_v3, %v7231_v47  ;;  %v11183_v3 = vld [vmem:[%s14213_s11 + $0x3ec] ss:$16 sps:$4 sm:$0xff]   ;;  %v11181_v12 = vld [vmem:[%s14213_s11 + $0x3e8] ss:$16 sps:$4 sm:$0xff]  }
 0x5fa   : > { %v7234_v29 = vpop.f32.mrf.mxu0  ;;  %v11187_v49 = vld [vmem:[%s14213_s11 + $0x3a8] ss:$16 sps:$4 sm:$0xff]   ;;  %v11192_v47 = vld [vmem:[%s14213_s11 + $0x38c] ss:$16 sps:$4 sm:$0xff]  }
 0x5fb   : > { %v7275_v40 = vpop.f32.mrf.mxu1  ;;  %8398 = vmatpush2.bf16.msra.mxu0 %v11103_v6  ;;  %v7274_v9 = vadd.f32 %v7273_v32, %v7233_v23  ;;  %v11225_v6 = vld [vmem:[%s14216_s14 + $0x14] ss:$8 sps:$4 sm:$0xff]   ;;  %v11223_v32 = vld [vmem:[%s14216_s14 + $0x10] ss:$8 sps:$4 sm:$0xff]   ;;  %v11228_v29 = vld [vmem:[%s14216_s14 + $0x4] ss:$8 sps:$4 sm:$0xff]  }
 0x5fc   : > { %v7235_v25 = vpop.f32.mrf.mxu0  ;;  %8399 = vmatprep.subr.bf16.mxu0 %v11108_v22  ;;  %v11186_v22 = vld [vmem:[%s14213_s11 + $0x3cc] ss:$16 sps:$4 sm:$0xff]   ;;  %v11184_v40 = vld [vmem:[%s14213_s11 + $0x3c8] ss:$16 sps:$4 sm:$0xff]  }
 0x5fd   : > { %v7276_v21 = vpop.f32.mrf.mxu1  ;;  %v11189_v25 = vld [vmem:[%s14213_s11 + $0x3ac] ss:$16 sps:$4 sm:$0xff]   ;;  %v11229_v4 = vld [vmem:[%s14216_s14 + $0xf0] ss:$8 sps:$4 sm:$0xff]  }
 0x5fe   : > { %v11231_v21 = vld [vmem:[%s14216_s14 + $0xf4] ss:$8 sps:$4 sm:$0xff]   ;;  %v11234_v23 = vld [vmem:[%s14216_s14 + $0xe4] ss:$8 sps:$4 sm:$0xff]  }
 0x5ff   : > { %8400 = vmatpush2.bf16.msra.mxu0 %v11106_v17  ;;  %v11226_v17 = vld [vmem:[%s14216_s14] ss:$8 sps:$4 sm:$0xff]  }
 0x600   : > { %8881 = vmatprep.subr.bf16.mxu0 %v11207_v34  ;;  %v11250_v34 = vld [vmem:[%s14216_s14 + $0x80] ss:$8 sps:$4 sm:$0xff]  }
 0x602   : > { %8402 = vmatmul.mubr.bf16.vlgmr.msra.gmra.mxu0 %v13736_v60 }
 0x603   : > { %8882 = vmatpush1.bf16.msra.mxu0 %v11205_v37  ;;  %v11252_v37 = vld [vmem:[%s14216_s14 + $0x84] ss:$8 sps:$4 sm:$0xff]  }
 0x604   : > { %8883 = vmatprep.subr.bf16.mxu0 %v11210_v59  ;;  %v11255_v59 = vld [vmem:[%s14216_s14 + $0x174] ss:$8 sps:$4 sm:$0xff]  }
 0x607   : > { %8884 = vmatpush1.bf16.msra.mxu0 %v11208_v43  ;;  %v11258_v43 = vld [vmem:[%s14216_s14 + $0x164] ss:$8 sps:$4 sm:$0xff]  }
 0x608   : > { %8885 = vmatprep.subr.bf16.mxu0 %v11213_v2  ;;  %v11261_v2 = vld [vmem:[%s14216_s14 + $0x154] ss:$8 sps:$4 sm:$0xff]  }
 0x60b   : > { %8886 = vmatpush1.bf16.msra.mxu0 %v11211_v11  ;;  %v11264_v11 = vld [vmem:[%s14216_s14 + $0x144] ss:$8 sps:$4 sm:$0xff]  }
 0x60c   : > { %8887 = vmatprep.subr.bf16.mxu0 %v11216_v63  ;;  %v11267_v63 = vld [vmem:[%s14216_s14 + $0x134] ss:$8 sps:$4 sm:$0xff]  }
 0x60f   : > { %8888 = vmatpush1.bf16.msra.mxu0 %v11214_v7  ;;  %v11270_v7 = vld [vmem:[%s14216_s14 + $0x124] ss:$8 sps:$4 sm:$0xff]  }
 0x610   : > { %8889 = vmatprep.subr.bf16.mxu0 %v11219_v41  ;;  %v11273_v41 = vld [vmem:[%s14216_s14 + $0x114] ss:$8 sps:$4 sm:$0xff]  }
 0x613   : > { %8890 = vmatpush1.bf16.msra.mxu0 %v11217_v33  ;;  %v11276_v33 = vld [vmem:[%s14216_s14 + $0x104] ss:$8 sps:$4 sm:$0xff]  }
 0x614   : > { %8891 = vmatprep.subr.bf16.mxu0 %v11222_v28  ;;  %v11279_v28 = vld [vmem:[%s14216_s14 + $0x1f4] ss:$8 sps:$4 sm:$0xff]  }
 0x617   : > { %8892 = vmatpush1.bf16.msra.mxu0 %v11220_v26  ;;  %v11282_v26 = vld [vmem:[%s14216_s14 + $0x1e4] ss:$8 sps:$4 sm:$0xff]  }
 0x618   : > { %8893 = vmatprep.subr.bf16.mxu0 %v11225_v6  ;;  %v11285_v6 = vld [vmem:[%s14216_s14 + $0x1d4] ss:$8 sps:$4 sm:$0xff]  }
 0x61b   : > { %8894 = vmatpush1.bf16.msra.mxu0 %v11223_v32  ;;  %v11288_v32 = vld [vmem:[%s14216_s14 + $0x1c4] ss:$8 sps:$4 sm:$0xff]  }
 0x61c   : > { %8895 = vmatprep.subr.bf16.mxu0 %v11228_v29 }
 0x61f   : > { %8896 = vmatpush1.bf16.msra.mxu0 %v11226_v17  ;;  %v11289_v17 = vld [vmem:[%s14216_s14 + $0x1b0] ss:$8 sps:$4 sm:$0xff]  }
 0x620   : > { %8897 = vmatprep.subr.bf16.mxu0 %v11231_v21 }
 0x623   : > { %8898 = vmatpush2.bf16.msra.mxu0 %v11229_v4  ;;  %v11292_v4 = vld [vmem:[%s14216_s14 + $0x1a0] ss:$8 sps:$4 sm:$0xff]  }
 0x624   : > { %8899 = vmatprep.subr.bf16.mxu0 %v11234_v23 }
 0x636   : > { %v7312_v42 = vpop.f32.mrf.mxu0 }
 0x637   : > { %v7353_v24 = vpop.f32.mrf.mxu1  ;;  %v7313_v62 = vadd.f32 %v7312_v42, %v7272_v1  ;;  %v11190_v1 = vld [vmem:[%s14213_s11 + $0x388] ss:$16 sps:$4 sm:$0xff]  }
 0x638   : > { %v7314_v39 = vpop.f32.mrf.mxu0  ;;  %v11232_v42 = vld [vmem:[%s14216_s14 + $0xe0] ss:$8 sps:$4 sm:$0xff]  }
 0x639   : > { %v7355_v36 = vpop.f32.mrf.mxu1  ;;  %v7354_v14 = vadd.f32 %v7353_v24, %v7313_v62  ;;  %v7315_v30 = vadd.f32 %v7314_v39, %v7274_v9  ;;  %v11195_v24 = vld [vmem:[%s14213_s11 + $0x36c] ss:$16 sps:$4 sm:$0xff]   ;;  %v11193_v62 = vld [vmem:[%s14213_s11 + $0x368] ss:$16 sps:$4 sm:$0xff]   ;;  %8900 = vmatpush2.bf16.msra.mxu0 %v11232_v42 }
 0x63a   : > { %v7316_v61 = vpop.f32.mrf.mxu0  ;;  %v11237_v9 = vld [vmem:[%s14216_s14 + $0xd4] ss:$8 sps:$4 sm:$0xff]   ;;  %v11235_v39 = vld [vmem:[%s14216_s14 + $0xd0] ss:$8 sps:$4 sm:$0xff]  }
 0x63b   : > { %v7357_v57 = vpop.f32.mrf.mxu1  ;;  %v7356_v53 = vadd.f32 %v7355_v36, %v7315_v30  ;;  %v7362_v10 = vmax.f32 %v7354_v14, 0.0  ;;  %v11198_v36 = vld [vmem:[%s14213_s11 + $0x34c] ss:$16 sps:$4 sm:$0xff]   ;;  %8901 = vmatprep.subr.bf16.mxu0 %v11237_v9  ;;  %v11196_v30 = vld [vmem:[%s14213_s11 + $0x348] ss:$16 sps:$4 sm:$0xff]  }
 0x63c   : > { %v7317_v58 = vpop.f32.mrf.mxu0  ;;  %v11240_v14 = vld [vmem:[%s14216_s14 + $0xc4] ss:$8 sps:$4 sm:$0xff]   ;;  %v11238_v61 = vld [vmem:[%s14216_s14 + $0xc0] ss:$8 sps:$4 sm:$0xff]   ;;  %v11297_v42 = vld [vmem:[%s14216_s14 + $0x194] ss:$8 sps:$4 sm:$0xff]  }
 0x63d   : > { %v7358_v60 = vpop.f32.mrf.mxu1  ;;  %v7363_v8 = vmax.f32 %v7356_v53, 0.0  ;;  %v13840_v51 = vpack.c.bf16 %v7362_v10, %v7362_v10  ;;  %8902 = vmatpush2.bf16.msra.mxu0 %v11235_v39  ;;  %v11201_v57 = vld [vmem:[%s14213_s11 + $0x32c] ss:$16 sps:$4 sm:$0xff]   ;;  %v11199_v10 = vld [vmem:[%s14213_s11 + $0x328] ss:$16 sps:$4 sm:$0xff]  }
 0x63e   : > { %8903 = vmatprep.subr.bf16.mxu0 %v11240_v14  ;;  %v11243_v53 = vld [vmem:[%s14216_s14 + $0xb4] ss:$8 sps:$4 sm:$0xff]   ;;  %v11241_v58 = vld [vmem:[%s14216_s14 + $0xb0] ss:$8 sps:$4 sm:$0xff]   ;;  %v11298_v14 = vld [vmem:[%s14216_s14 + $0x180] ss:$8 sps:$4 sm:$0xff]  }
 0x63f   : > { %v7367_v55 = vpack.c.bf16 %v7363_v8, %v7363_v8  ;;  %v11204_v60 = vld [vmem:[%s14213_s11 + $0x30c] ss:$16 sps:$4 sm:$0xff]   ;;  %v11202_v8 = vld [vmem:[%s14213_s11 + $0x308] ss:$16 sps:$4 sm:$0xff]   ;;  %v7571_v29 = vpop.f32.mrf.mxu1 }
 0x640   : > { %v11295_v9 = vld [vmem:[%s14216_s14 + $0x190] ss:$8 sps:$4 sm:$0xff]  }
 0x641   : > { %8360 = vmatprep.mubr.bf16.mxu1 %v7367_v55  ;;  %8904 = vmatpush2.bf16.msra.mxu0 %v11238_v61 }
 0x642   : > { %8361 = vmatmul.mubr.bf16.vlgmr.msra.gmra.mxu1 %v13840_v51  ;;  %8905 = vmatprep.subr.bf16.mxu0 %v11243_v53 }
 0x643   : > { %8411 = vmatpush1.bf16.msra.mxu1 %v11157_v48  ;;  %8442 = vmatprep.mubr.bf16.mxu1 %v7367_v55  ;;  %v11246_v55 = vld [vmem:[%s14216_s14 + $0xa4] ss:$8 sps:$4 sm:$0xff]  }
 0x644   : > { %8412 = vmatprep.subr.bf16.mxu1 %v11162_v50  ;;  %v11244_v50 = vld [vmem:[%s14216_s14 + $0xa0] ss:$8 sps:$4 sm:$0xff]  }
 0x645   : > { %8906 = vmatpush2.bf16.msra.mxu0 %v11241_v58 }
 0x646   : > { %8907 = vmatprep.subr.bf16.mxu0 %v11246_v55 }
 0x647   : > { %8413 = vmatpush1.bf16.msra.mxu1 %v11160_v44 }
 0x648   : > { %8414 = vmatprep.subr.bf16.mxu1 %v11165_v16  ;;  %v11249_v16 = vld [vmem:[%s14216_s14 + $0x94] ss:$8 sps:$4 sm:$0xff]  }
 0x649   : > { %8908 = vmatpush2.bf16.msra.mxu0 %v11244_v50 }
 0x64a   : > { %8909 = vmatprep.subr.bf16.mxu0 %v11249_v16 }
 0x64b   : > { %8415 = vmatpush1.bf16.msra.mxu1 %v11163_v52 }
 0x64c   : > { %8416 = vmatprep.subr.bf16.mxu1 %v11168_v5  ;;  %v11247_v5 = vld [vmem:[%s14216_s14 + $0x90] ss:$8 sps:$4 sm:$0xff]  }
 0x64d   : > { %8910 = vmatpush2.bf16.msra.mxu0 %v11247_v5 }
 0x64e   : > { %8911 = vmatprep.subr.bf16.mxu0 %v11252_v37 }
 0x64f   : > { %8417 = vmatpush1.bf16.msra.mxu1 %v11166_v54  ;;  %v11253_v54 = vld [vmem:[%s14216_s14 + $0x170] ss:$8 sps:$4 sm:$0xff]  }
 0x650   : > { %8418 = vmatprep.subr.bf16.mxu1 %v11171_v27  ;;  %v11256_v27 = vld [vmem:[%s14216_s14 + $0x160] ss:$8 sps:$4 sm:$0xff]  }
 0x651   : > { %8912 = vmatpush2.bf16.msra.mxu0 %v11250_v34 }
 0x653   : > { %8419 = vmatpush1.bf16.msra.mxu1 %v11169_v18  ;;  %v11259_v18 = vld [vmem:[%s14216_s14 + $0x150] ss:$8 sps:$4 sm:$0xff]  }
 0x654   : > { %8420 = vmatprep.subr.bf16.mxu1 %v11174_v13  ;;  %v11262_v13 = vld [vmem:[%s14216_s14 + $0x140] ss:$8 sps:$4 sm:$0xff]  }
 0x657   : > { %8421 = vmatpush1.bf16.msra.mxu1 %v11172_v19  ;;  %v11265_v19 = vld [vmem:[%s14216_s14 + $0x130] ss:$8 sps:$4 sm:$0xff]  }
 0x658   : > { %8422 = vmatprep.subr.bf16.mxu1 %v11177_v31  ;;  %v11268_v31 = vld [vmem:[%s14216_s14 + $0x120] ss:$8 sps:$4 sm:$0xff]  }
 0x65b   : > { %8423 = vmatpush1.bf16.msra.mxu1 %v11175_v45  ;;  %v11271_v45 = vld [vmem:[%s14216_s14 + $0x110] ss:$8 sps:$4 sm:$0xff]  }
 0x65c   : > { %8424 = vmatprep.subr.bf16.mxu1 %v11180_v38  ;;  %v11274_v38 = vld [vmem:[%s14216_s14 + $0x100] ss:$8 sps:$4 sm:$0xff]  }
 0x65f   : > { %8425 = vmatpush1.bf16.msra.mxu1 %v11178_v46  ;;  %v11277_v46 = vld [vmem:[%s14216_s14 + $0x1f0] ss:$8 sps:$4 sm:$0xff]  }
 0x660   : > { %8426 = vmatprep.subr.bf16.mxu1 %v11183_v3  ;;  %v11280_v3 = vld [vmem:[%s14216_s14 + $0x1e0] ss:$8 sps:$4 sm:$0xff]  }
 0x663   : > { %8427 = vmatpush2.bf16.msra.mxu1 %v11181_v12  ;;  %v11283_v12 = vld [vmem:[%s14216_s14 + $0x1d0] ss:$8 sps:$4 sm:$0xff]  }
 0x664   : > { %8428 = vmatprep.subr.bf16.mxu1 %v11186_v22  ;;  %v11286_v22 = vld [vmem:[%s14216_s14 + $0x1c0] ss:$8 sps:$4 sm:$0xff]  }
 0x667   : > { %8429 = vmatpush2.bf16.msra.mxu1 %v11184_v40  ;;  %v11291_v40 = vld [vmem:[%s14216_s14 + $0x1b4] ss:$8 sps:$4 sm:$0xff]  }
 0x668   : > { %8430 = vmatprep.subr.bf16.mxu1 %v11189_v25  ;;  %v7573_v25 = vpop.f32.mrf.mxu1 }
 0x66a   : > { %v7642_v21 = vpop.f32.mrf.mxu1 }
 0x66b   : > { %8431 = vmatpush2.bf16.msra.mxu1 %v11187_v49  ;;  %v11294_v49 = vld [vmem:[%s14216_s14 + $0x1a4] ss:$8 sps:$4 sm:$0xff]  }
 0x66c   : > { %8432 = vmatprep.subr.bf16.mxu1 %v11192_v47  ;;  %v7644_v23 = vpop.f32.mrf.mxu1 }
 0x66f   : > { %8433 = vmatpush2.bf16.msra.mxu1 %v11190_v1 }
 0x670   : > { %8434 = vmatprep.subr.bf16.mxu1 %v11195_v24 }
 0x673   : > { %8435 = vmatpush2.bf16.msra.mxu1 %v11193_v62 }
 0x674   : > { %8436 = vmatprep.subr.bf16.mxu1 %v11198_v36  ;;  %v11300_v36 = vld [vmem:[%s14216_s14 + $0x184] ss:$8 sps:$4 sm:$0xff]  }
 0x677   : > { %8437 = vmatpush2.bf16.msra.mxu1 %v11196_v30  ;;  %v8451_v30 = vld [vmem:[%s14215_s13] sm:$0xf] }
 0x678   : > { %8438 = vmatprep.subr.bf16.mxu1 %v11201_v57  ;;  %v8456_v57 = vrot.slane %v8451_v30, %v12780_v35 }
 0x67b   : > { %8439 = vmatpush2.bf16.msra.mxu1 %v11199_v10 }
 0x67c   : > { %8440 = vmatprep.subr.bf16.mxu1 %v11204_v60  ;;  %v8460_v60 = vrot.slane %v8451_v30, %v12786_v20 }
 0x67f   : > { %8441 = vmatpush2.bf16.msra.mxu1 %v11202_v8 }
 0x680   : > { %8922 = vmatprep.subr.bf16.mxu1 %v11255_v59 }
 0x682   : > { %8443 = vmatmul.mubr.bf16.vlgmr.msra.gmra.mxu1 %v13840_v51  ;;  %v14015_v48 = vpop.f32.mrf.mxu0 }
 0x683   : > { %8923 = vmatpush1.bf16.msra.mxu1 %v11253_v54  ;;  %v8322_v61 = vadd.f32 %v14015_v48, %v7571_v29  ;;  %v8464_v54 = vrot.slane %v8451_v30, %v12789_v15  ;;  %v11301_v15 = vld [vmem:[%s14218_s16 + $0x78] sm:$0xff]   ;;  %v11313_v29 = vld [vmem:[%s14218_s16 + $0x48] sm:$0xff]  }
 0x684   : > { %v14020_v44 = vpop.f32.mrf.mxu0  ;;  %8924 = vmatprep.subr.bf16.mxu1 %v11258_v43  ;;  %10397 = vmatprep.subr.bf16.mxu0 %v11301_v15 }
 0x685   : > { %v8324_v10 = vadd.f32 %v14020_v44, %v7573_v25  ;;  %v11316_v25 = vld [vmem:[%s14218_s16] sm:$0xff]  }
 0x686   : > { %v8325_v52 = vpop.f32.mrf.mxu0 }
 0x687   : > { %8925 = vmatpush1.bf16.msra.mxu1 %v11256_v27  ;;  %v8468_v27 = vrot.slane %v8451_v30, %v12795_v56  ;;  %v11302_v56 = vld [vmem:[%s14218_s16 + $0x38] sm:$0xff]  }
 0x688   : > { %v8326_v51 = vpop.f32.mrf.mxu0  ;;  %8926 = vmatprep.subr.bf16.mxu1 %v11261_v2 }
 0x68b   : > { %8927 = vmatpush1.bf16.msra.mxu1 %v11259_v18 }
 0x68c   : > { %8928 = vmatprep.subr.bf16.mxu1 %v11264_v11 }
 0x68f   : > { %8929 = vmatpush1.bf16.msra.mxu1 %v11262_v13 }
 0x690   : > { %8930 = vmatprep.subr.bf16.mxu1 %v11267_v63 }
 0x693   : > { %8931 = vmatpush1.bf16.msra.mxu1 %v11265_v19 }
 0x694   : > { %8932 = vmatprep.subr.bf16.mxu1 %v11270_v7 }
 0x697   : > { %8933 = vmatpush1.bf16.msra.mxu1 %v11268_v31 }
 0x698   : > { %8934 = vmatprep.subr.bf16.mxu1 %v11273_v41 }
 0x69b   : > { %8935 = vmatpush1.bf16.msra.mxu1 %v11271_v45 }
 0x69c   : > { %8936 = vmatprep.subr.bf16.mxu1 %v11276_v33  ;;  %v11303_v33 = vld [vmem:[%s14218_s16 + $0x70] sm:$0xff]  }
 0x69f   : > { %8937 = vmatpush1.bf16.msra.mxu1 %v11274_v38  ;;  %v11304_v38 = vld [vmem:[%s14218_s16 + $0x30] sm:$0xff]  }
 0x6a0   : > { %8938 = vmatprep.subr.bf16.mxu1 %v11279_v28  ;;  %v11305_v28 = vld [vmem:[%s14218_s16 + $0x68] sm:$0xff]  }
 0x6a3   : > { %8939 = vmatpush2.bf16.msra.mxu1 %v11277_v46  ;;  %v11306_v46 = vld [vmem:[%s14218_s16 + $0x28] sm:$0xff]  }
 0x6a4   : > { %8940 = vmatprep.subr.bf16.mxu1 %v11282_v26  ;;  %v11307_v26 = vld [vmem:[%s14218_s16 + $0x60] sm:$0xff]  }
 0x6a7   : > { %8941 = vmatpush2.bf16.msra.mxu1 %v11280_v3  ;;  %v11308_v3 = vld [vmem:[%s14218_s16 + $0x20] sm:$0xff]  }
 0x6a8   : > { %8942 = vmatprep.subr.bf16.mxu1 %v11285_v6  ;;  %v11309_v6 = vld [vmem:[%s14218_s16 + $0x58] sm:$0xff]  }
 0x6ab   : > { %8943 = vmatpush2.bf16.msra.mxu1 %v11283_v12  ;;  %v11310_v12 = vld [vmem:[%s14218_s16 + $0x18] sm:$0xff]  }
 0x6ac   : > { %8944 = vmatprep.subr.bf16.mxu1 %v11288_v32  ;;  %v11311_v32 = vld [vmem:[%s14218_s16 + $0x50] sm:$0xff]  }
 0x6af   : > { %8945 = vmatpush2.bf16.msra.mxu1 %v11286_v22  ;;  %v11312_v22 = vld [vmem:[%s14218_s16 + $0x10] sm:$0xff]  }
 0x6b0   : > { %8946 = vmatprep.subr.bf16.mxu1 %v11291_v40  ;;  %v11314_v40 = vld [vmem:[%s14218_s16 + $0x8] sm:$0xff]  }
 0x6b3   : > { %8947 = vmatpush2.bf16.msra.mxu1 %v11289_v17  ;;  %v11315_v17 = vld [vmem:[%s14218_s16 + $0x40] sm:$0xff]  }
 0x6b4   : > { %8948 = vmatprep.subr.bf16.mxu1 %v11294_v49 }
 0x6b7   : > { %8949 = vmatpush2.bf16.msra.mxu1 %v11292_v4 }
 0x6b8   : > { %8950 = vmatprep.subr.bf16.mxu1 %v11297_v42 }
 0x6bb   : > { %8951 = vmatpush2.bf16.msra.mxu1 %v11295_v9 }
 0x6bc   : > { %8952 = vmatprep.subr.bf16.mxu1 %v11300_v36 }
 0x6bf   : > { %8953 = vmatpush2.bf16.msra.mxu1 %v11298_v14 }
 0x6c2   : > { %v8403_v47 = vpop.f32.mrf.mxu0 }
 0x6c3   : > { %v8404_v48 = vadd.f32 %v8403_v47, %v7642_v21 }
 0x6c4   : > { %v8405_v1 = vpop.f32.mrf.mxu0 }
 0x6c5   : > { %v8406_v24 = vadd.f32 %v8405_v1, %v7644_v23  ;;  %v8549_v23 = vld [vmem:[%s14217_s15] sm:$0x3] }
 0x6c6   : > { %v8407_v62 = vpop.f32.mrf.mxu0  ;;  %v8554_v1 = vrot.slane %v8549_v23, %v12780_v35  ;;  %v8558_v42 = vrot.slane %v8549_v23, %v12786_v20  ;;  %v10156_v35 = vld [vmem:[%s14219_s17] ss:$0 sm:$0xff] }
 0x6c8   : > { %v8408_v39 = vpop.f32.mrf.mxu0 }
 0x702   : > { %v8362_v53 = vpop.f32.mrf.mxu1 }
 0x703   : > { %v8363_v58 = vadd.f32 %v8362_v53, %v8322_v61 }
 0x704   : > { %v8364_v8 = vpop.f32.mrf.mxu1 }
 0x705   : > { %v8473_v55 = vadd.f32 %v8456_v57, %v8363_v58  ;;  %v8365_v50 = vadd.f32 %v8364_v8, %v8324_v10 }
 0x706   : > { %v8366_v16 = vpop.f32.mrf.mxu1 }
 0x707   : > { %v8474_v52 = vadd.f32 %v8460_v60, %v8365_v50  ;;  %v8477_v5 = vmax.f32 %v8473_v55, 0.0 }
 0x708   : > { %v8367_v51 = vpop.f32.mrf.mxu1 }
 0x709   : > { %v8478_v37 = vmax.f32 %v8474_v52, 0.0  ;;  %v8481_v59 = vpack.c.bf16 %v8477_v5, %v8477_v5  ;;  %v9143_v52 = vand.u32 127, %v2833_v0 }
 0x70b   : > { %v8482_v34 = vpack.c.bf16 %v8478_v37, %v8478_v37  ;;  %vm9144_vm6 = vcmp.ge.s32.totalorder %v9143_v52, 17  ;;  %vm9145_vm7 = vcmp.lt.s32.totalorder %v9143_v52, 21 }
 0x70c   : > { %vm9146_vm8 = vmand %vm9144_vm6, %vm9145_vm7 }
 0x70d   : > { %8913 = vmatprep.mubr.bf16.mxu0 %v8482_v34 }
 0x70e   : > { %8914 = vmatmul.mubr.bf16.vlgmr.msra.gmra.mxu0 %v8481_v59 }
 0x70f   : > { %10398 = vmatpush3.bf16.msra.mxu0 %v11302_v56 }
 0x710   : > { %10399 = vmatprep.subr.bf16.mxu0 %v11303_v33 }
 0x713   : > { %10400 = vmatpush3.bf16.msra.mxu0 %v11304_v38 }
 0x714   : > { %10401 = vmatprep.subr.bf16.mxu0 %v11305_v28 }
 0x717   : > { %10402 = vmatpush3.bf16.msra.mxu0 %v11306_v46 }
 0x718   : > { %10403 = vmatprep.subr.bf16.mxu0 %v11307_v26 }
 0x71b   : > { %10404 = vmatpush3.bf16.msra.mxu0 %v11308_v3 }
 0x71c   : > { %10405 = vmatprep.subr.bf16.mxu0 %v11309_v6 }
 0x71f   : > { %10406 = vmatpush3.bf16.msra.mxu0 %v11310_v12 }
 0x720   : > { %10407 = vmatprep.subr.bf16.mxu0 %v11311_v32 }
 0x723   : > { %10408 = vmatpush3.bf16.msra.mxu0 %v11312_v22 }
 0x724   : > { %10409 = vmatprep.subr.bf16.mxu0 %v11313_v29 }
 0x727   : > { %10410 = vmatpush3.bf16.msra.mxu0 %v11314_v40 }
 0x728   : > { %10411 = vmatprep.subr.bf16.mxu0 %v11315_v17 }
 0x72b   : > { %10412 = vmatpush3.bf16.msra.mxu0 %v11316_v25 }
 0x742   : > { %v8444_v43 = vpop.f32.mrf.mxu1 }
 0x743   : > { %v8445_v44 = vadd.f32 %v8444_v43, %v8404_v48 }
 0x744   : > { %v8446_v2 = vpop.f32.mrf.mxu1 }
 0x745   : > { %v8475_v18 = vadd.f32 %v8464_v54, %v8445_v44  ;;  %v8447_v11 = vadd.f32 %v8446_v2, %v8406_v24 }
 0x746   : > { %v8448_v13 = vpop.f32.mrf.mxu1 }
 0x747   : > { %v8476_v63 = vadd.f32 %v8468_v27, %v8447_v11  ;;  %v8479_v19 = vmax.f32 %v8475_v18, 0.0 }
 0x748   : > { %v8449_v7 = vpop.f32.mrf.mxu1 }
 0x749   : > { %v8480_v31 = vmax.f32 %v8476_v63, 0.0  ;;  %v8483_v45 = vpack.c.bf16 %v8479_v19, %v8479_v19 }
 0x74b   : > { %v8484_v41 = vpack.c.bf16 %v8480_v31, %v8480_v31 }
 0x74d   : > { %8954 = vmatprep.mubr.bf16.mxu1 %v8484_v41 }
 0x74e   : > { %8955 = vmatmul.mubr.bf16.vlgmr.msra.gmra.mxu1 %v8483_v45 }
 0x7ce   : > { %v8915_v21 = vpop.f32.mrf.mxu0 }
 0x7cf   : > { %v8916_v24 = vadd.f32 %v8915_v21, %v8554_v1 }
 0x7d0   : > { %v8917_v49 = vpop.f32.mrf.mxu0 }
 0x7d1   : > { %v8918_v62 = vadd.f32 %v8917_v49, %v8558_v42 }
 0x7d2   : > { %v8919_v4 = vpop.f32.mrf.mxu0 }
 0x7d4   : > { %v8920_v47 = vpop.f32.mrf.mxu0 }
 0x80e   : > { %v8956_v9 = vpop.f32.mrf.mxu1 }
 0x80f   : > { %v8957_v39 = vadd.f32 %v8956_v9, %v8916_v24 }
 0x810   : > { %v8958_v36 = vpop.f32.mrf.mxu1 }
 0x811   : > { %v8959_v14 = vadd.f32 %v8958_v36, %v8918_v62  ;;  %v8963_v30 = vmax.f32 %v8957_v39, 0.0 }
 0x812   : > { %v8960_v61 = vpop.f32.mrf.mxu1 }
 0x813   : > { %v8964_v57 = vmax.f32 %v8959_v14, 0.0  ;;  %v8965_v58 = vpack.c.bf16 %v8963_v30, %v8963_v30 }
 0x814   : > { %v8961_v53 = vpop.f32.mrf.mxu1 }
 0x815   : > { %v8966_v10 = vpack.c.bf16 %v8964_v57, %v8964_v57 }
 0x817   : > { %9134 = vmatprep.mubr.bf16.mxu0 %v8966_v10 }
 0x818   : > { %9135 = vmatmul.mubr.bf16.vlgmr.msra.gmra.mxu0 %v8965_v58 }
 0x8d8   : > { %v10413_v60 = vpop.f32.mrf.mxu0 }
 0x8da   : > { %v10414_v20 = vpop.f32.mrf.mxu0 }
 0x8db   : > { %v10415_v8 = vadd.f32 %v10414_v20, %v10413_v60 }
 0x8dc   : > { %v10416_v55 = vpop.f32.mrf.mxu0 }
 0x8dd   : > { %v9137_v50 = vadd.f32 %v10415_v8, %v10156_v35 }
 0x8de   : > { %v10417_v16 = vpop.f32.mrf.mxu0 }
 0x8df   : > { %11317 = vtanh.f32 %v9137_v50 }
 0x8ec   : > { %v11318_v5 = vpop.eup %11317 }
 0x8ed   : > { %v9148_v51 = vsel %vm9146_vm8, %v11318_v5, %v9137_v50 }
 0x8ee   : > { %9149 = vst [vmem:[%s14220_s18] sm:$0x3] %v9148_v51 }
 0x8ef PF: > { %s28_s27 = sadd.s32 1, %s11325_s27  }
 0x8f0   : > { %p25_p6 = scmp.ge.s32.totalorder %s28_s27, 5  }
 0x8f2   :  { %27 = sbr.rel (!%p25_p6) target bundleno = 4 (0x4), region = 127 }

</bundles_post_ra>
